<compile_context>
chip_gen: v6e
topology: v6e:2x2x1
jax: 0.10.0
libtpu: 0.0.40
codegen_flags: <defaults>
</compile_context>

<pallas_src>
import functools

import jax
import jax.numpy as jnp
import numpy as np
from jax.experimental import pallas as pl
from jax.experimental.pallas import tpu as pltpu


def _round_up(x, m):
    return ((x + m - 1) // m) * m


# ---------------- Stage 1: serial GRU + attention recurrence --------------- #
def _recurrence_kernel(y_emb_ref, enc_ref, h0_ref,
                       w_ie_ref, w_ic_ref, w_hh_ref, b_ih_ref, b_hh_ref,
                       attn_ref, feat_ref, *, s_valid):
    T, BP, E = y_emb_ref.shape
    H = h0_ref.shape[-1]
    Sp = enc_ref.shape[1]

    # ---------- hoisted prologue (off the recurrent critical path) ----------
    # Batched embedding projection: one (T*B, E) @ (E, 3H) bf16 MXU matmul
    # instead of T tiny per-step matmuls; the b_ih broadcast happens once.
    gi_x = jnp.dot(y_emb_ref[...].reshape(T * BP, E), w_ie_ref[...],
                   preferred_element_type=jnp.float32)
    gi_x = (gi_x + b_ih_ref[...]).reshape(T, BP, 3 * H)        # (T, BP, 3H) f32

    enc = enc_ref[...]                                         # (BP, Sp, H) bf16
    w_ic = w_ic_ref[...]                                       # (H, 3H) bf16
    w_hh = w_hh_ref[...]                                       # (H, 3H) bf16
    b_hh = jnp.broadcast_to(b_hh_ref[...], (BP, 3 * H))        # hoisted broadcast

    # Mask for the lane-padded attention axis (padded key positions -> -inf).
    key_pos = jax.lax.broadcasted_iota(jnp.int32, (BP, Sp), 1)
    att_bias = jnp.where(key_pos < s_valid, 0.0, -1e30).astype(jnp.float32)

    h = h0_ref[...]                                            # (BP, H) f32 carry
    ctx_b = jnp.zeros((BP, H), jnp.bfloat16)                   # context carry

    # T is small & static -> fully unrolled serial loop carried in vregs.
    # TODO(synk): for large T switch to lax.fori_loop with h/ctx in VMEM
    # scratch (bounds vreg live ranges, enables pipelined writeback).
    for t in range(T):
        # --- GRUCell (bf16 matmul operands, f32 accumulation / elementwise) --
        gi = gi_x[t] + jnp.dot(ctx_b, w_ic, preferred_element_type=jnp.float32)
        gh = jnp.dot(h.astype(jnp.bfloat16), w_hh,
                     preferred_element_type=jnp.float32) + b_hh
        r = jax.nn.sigmoid(gi[:, 0:H] + gh[:, 0:H])
        z = jax.nn.sigmoid(gi[:, H:2 * H] + gh[:, H:2 * H])
        n = jnp.tanh(gi[:, 2 * H:3 * H] + r * gh[:, 2 * H:3 * H])
        h = (1.0 - z) * n + z * h                              # (BP, H) f32
        h_b = h.astype(jnp.bfloat16)

        # --- attention as batched matmuls (MXU); softmax math in f32 ---
        att = jnp.einsum('bqh,bsh->bqs', h_b[:, None, :], enc,
                         preferred_element_type=jnp.float32)[:, 0, :]
        att = att + att_bias                                   # (BP, Sp)
        m = jnp.max(att, axis=1, keepdims=True)
        e = jnp.exp(att - m)
        denom = jnp.sum(e, axis=1, keepdims=True)
        p = e * pl.reciprocal(denom, approx=True)              # EUP, not VALU
        ctx = jnp.einsum('bqs,bsh->bqh', p.astype(jnp.bfloat16)[:, None, :],
                         enc, preferred_element_type=jnp.float32)[:, 0, :]
        ctx_b = ctx.astype(jnp.bfloat16)

        # Lane-dense stores straight into the final (B, T, *) layouts.
        attn_ref[:, t, :] = p                                  # (BP, Sp) f32
        feat_ref[:, t, :] = jnp.concatenate([ctx_b, h_b], axis=1)   # bf16


# ------------- Stage 2: batched classifier, gridded over vocab ------------- #
def _classifier_kernel(feat_ref, w_cls_ref, b_cls_ref, scores_ref):
    BP, T, F = feat_ref.shape
    TV = scores_ref.shape[-1]
    feat = feat_ref[...].reshape(BP * T, F)                    # all steps at once
    logits = jnp.dot(feat, w_cls_ref[...],
                     preferred_element_type=jnp.float32) + b_cls_ref[...]
    scores_ref[...] = logits.reshape(BP, T, TV)


# -------------------------------- wrapper ----------------------------------- #
def nmt_decoder_forward(params, encoder_state, initial_hidden, target_sequence):
    """Teacher-forcing forward pass of NMTDecoder (sample_probability = 0.0)."""
    B, S, H = encoder_state.shape
    T = target_sequence.shape[1]
    E = params["embedding"].shape[1]
    V = params["w_cls_ctx"].shape[1]

    BP = _round_up(max(B, 8), 8)                 # sublane-aligned batch
    SP = _round_up(max(S, 128), 128)             # lane-dense attention slab
    TV = 512 if V > 512 else _round_up(V, 128)   # vocab tile for classifier grid
    VP = _round_up(V, TV)

    f32, bf16 = jnp.float32, jnp.bfloat16

    # Embedding lookup (gather) as JAX glue; padded rows are zero.
    y_emb = params["embedding"][target_sequence.T]                       # (T, B, E)
    y_emb = jnp.pad(y_emb, ((0, 0), (0, BP - B), (0, 0))).astype(bf16)
    enc_p = jnp.pad(encoder_state,
                    ((0, BP - B), (0, SP - S), (0, 0))).astype(bf16)
    h0_p = jnp.pad(initial_hidden, ((0, BP - B), (0, 0))).astype(f32)

    w_ie = params["w_ie"].astype(bf16)
    w_ic = params["w_ic"].astype(bf16)
    w_hh = params["w_hh"].astype(bf16)
    b_ih = params["b_ih"].astype(f32)
    b_hh = params["b_hh"].astype(f32)
    # Fused classifier weight for concat([ctx, h]) @ W_cls (fused once, here).
    w_cls = jnp.concatenate([params["w_cls_ctx"], params["w_cls_h"]], axis=0)
    w_cls = jnp.pad(w_cls, ((0, 0), (0, VP - V))).astype(bf16)           # (2H, VP)
    b_cls = jnp.pad(params["b_cls"], ((0, 0), (0, VP - V))).astype(f32)  # (1, VP)

    vmem = pl.BlockSpec(memory_space=pltpu.MemorySpace.VMEM)

    # Stage 1: serial recurrence (no grid; operands tiny & VMEM-resident).
    attn_p, feat = pl.pallas_call(
        functools.partial(_recurrence_kernel, s_valid=S),
        out_shape=(jax.ShapeDtypeStruct((BP, T, SP), f32),
                   jax.ShapeDtypeStruct((BP, T, 2 * H), bf16)),
        in_specs=[vmem] * 8,
        out_specs=(vmem, vmem),
        compiler_params=pltpu.CompilerParams(vmem_limit_bytes=32 * 1024 * 1024),
    )(y_emb, enc_p, h0_p, w_ie, w_ic, w_hh, b_ih, b_hh)

    # Stage 2: classifier for all T*B rows at once, pipelined over vocab tiles
    # ("parallel" -> sharded across TensorCores on v7x); scores are written
    # directly in the final (B, T, V) layout.
    scores_p = pl.pallas_call(
        _classifier_kernel,
        out_shape=jax.ShapeDtypeStruct((BP, T, VP), f32),
        grid=(VP // TV,),
        in_specs=[
            pl.BlockSpec((BP, T, 2 * H), lambda v: (0, 0, 0)),
            pl.BlockSpec((2 * H, TV), lambda v: (0, v)),
            pl.BlockSpec((1, TV), lambda v: (0, v)),
        ],
        out_specs=pl.BlockSpec((BP, T, TV), lambda v: (0, 0, v)),
        compiler_params=pltpu.CompilerParams(
            dimension_semantics=("parallel",),
            vmem_limit_bytes=48 * 1024 * 1024),  # leaves headroom on v7x (64 MiB)
    )(feat, w_cls, b_cls)

    # Drop padding; layouts already match torch.stack(...).permute(1, 0, 2).
    return scores_p[:B, :, :V], attn_p[:B, :, :S]


# --------------------------- pure-JAX reference ----------------------------- #
def nmt_decoder_reference(params, encoder_state, initial_hidden, target_sequence):
    B, S, H = encoder_state.shape
    T = target_sequence.shape[1]
    h = initial_hidden
    ctx = jnp.zeros((B, H), jnp.float32)
    out_scores, out_attn = [], []
    for t in range(T):
        x = params["embedding"][target_sequence[:, t]]
        gi = x @ params["w_ie"] + ctx @ params["w_ic"] + params["b_ih"]
        gh = h @ params["w_hh"] + params["b_hh"]
        r = jax.nn.sigmoid(gi[:, 0:H] + gh[:, 0:H])
        z = jax.nn.sigmoid(gi[:, H:2 * H] + gh[:, H:2 * H])
        n = jnp.tanh(gi[:, 2 * H:3 * H] + r * gh[:, 2 * H:3 * H])
        h = (1.0 - z) * n + z * h
        sc = jnp.sum(encoder_state * h[:, None, :], axis=2)
        p = jax.nn.softmax(sc, axis=1)
        ctx = jnp.sum(encoder_state * p[:, :, None], axis=1)
        logits = ctx @ params["w_cls_ctx"] + h @ params["w_cls_h"] + params["b_cls"]
        out_scores.append(logits)
        out_attn.append(p)
    return (jnp.stack(out_scores).transpose(1, 0, 2),
            jnp.stack(out_attn).transpose(1, 0, 2))


# --------------------------------- main ------------------------------------- #
if __name__ == "__main__":
    # Module hyperparameters (small, consistent with the forward pass)
    V = 24            # output_size (vocab)
    E = 16            # embedding_size
    H = 32            # hidden_size
    PAD = 0           # padding_idx
    SOS = 1           # sos_index
    B = 2             # batch
    S = 8             # number of encoder state vectors
    T = 6             # target sequence length

    key = jax.random.PRNGKey(0)
    ks = jax.random.split(key, 12)

    def unif(k, shape, scale):
        return jax.random.uniform(k, shape, jnp.float32, -scale, scale)

    emb = unif(ks[0], (V, E), 1.0).at[PAD].set(0.0)             # padding row = 0
    sgru = 1.0 / np.sqrt(H)
    scls = 1.0 / np.sqrt(2 * H)
    params = {
        "embedding": emb,
        "w_ie": unif(ks[1], (E, 3 * H), sgru),
        "w_ic": unif(ks[2], (H, 3 * H), sgru),
        "w_hh": unif(ks[3], (H, 3 * H), sgru),
        "b_ih": unif(ks[4], (1, 3 * H), sgru),
        "b_hh": unif(ks[5], (1, 3 * H), sgru),
        "w_cls_ctx": unif(ks[6], (H, V), scls),
        "w_cls_h": unif(ks[7], (H, V), scls),
        "b_cls": unif(ks[8], (1, V), scls),
    }

    encoder_state = jax.random.normal(ks[9], (B, S, H), jnp.float32)
    initial_hidden = jax.random.normal(ks[10], (B, H), jnp.float32)
    target_sequence = jax.random.randint(ks[11], (B, T), 0, V, jnp.int32)
    target_sequence = target_sequence.at[:, 0].set(SOS)

    scores, attn = nmt_decoder_forward(params, encoder_state, initial_hidden,
                                       target_sequence)
    jax.block_until_ready((scores, attn))

    ref_scores, ref_attn = nmt_decoder_reference(params, encoder_state,
                                                 initial_hidden, target_sequence)
    assert scores.shape == (B, T, V) and attn.shape == (B, T, S)
    # bf16 MXU operands + approx-EUP reciprocal vs. an all-f32 reference:
    # the 6-step recurrence accumulates ~1e-2-level differences, so tolerances
    # are loosened accordingly (structural bugs would be O(0.3+)).
    np.testing.assert_allclose(np.asarray(scores), np.asarray(ref_scores),
                               rtol=8e-2, atol=8e-2)
    np.testing.assert_allclose(np.asarray(attn), np.asarray(ref_attn),
                               rtol=8e-2, atol=4e-2)
    print("KERNEL_OK")
</pallas_src>

<mosaic_0001>
module attributes {stable_mosaic.version = 11 : i64} {
  func.func @_recurrence_kernel(%arg0: memref<6x8x16xbf16, #tpu.memory_space<vmem>>, %arg1: memref<8x128x32xbf16, #tpu.memory_space<vmem>>, %arg2: memref<8x32xf32, #tpu.memory_space<vmem>>, %arg3: memref<16x96xbf16, #tpu.memory_space<vmem>>, %arg4: memref<32x96xbf16, #tpu.memory_space<vmem>>, %arg5: memref<32x96xbf16, #tpu.memory_space<vmem>>, %arg6: memref<1x96xf32, #tpu.memory_space<vmem>>, %arg7: memref<1x96xf32, #tpu.memory_space<vmem>>, %arg8: memref<8x6x128xf32, #tpu.memory_space<vmem>>, %arg9: memref<8x6x64xbf16, #tpu.memory_space<vmem>>) attributes {dimension_semantics = [], scalar_prefetch = 0 : i64, scratch_operands = 0 : i64, tpu.core_type = #tpu.core_type<tc>} {
    %c0 = arith.constant 0 : index
    %c0_0 = arith.constant 0 : index
    %c0_1 = arith.constant 0 : index
    %0 = vector.load %arg0[%c0, %c0_0, %c0_1] : memref<6x8x16xbf16, #tpu.memory_space<vmem>>, vector<6x8x16xbf16>
    %1 = vector.shape_cast %0 : vector<6x8x16xbf16> to vector<48x16xbf16>
    %c0_2 = arith.constant 0 : index
    %c0_3 = arith.constant 0 : index
    %2 = vector.load %arg3[%c0_2, %c0_3] : memref<16x96xbf16, #tpu.memory_space<vmem>>, vector<16x96xbf16>
    %cst = arith.constant dense<0.000000e+00> : vector<48x96xf32>
    %3 = tpu.matmul %1, %2, %cst {dimension_numbers = #tpu.dot_dimension_numbers<[1], [0], [0], [1], [0, 0, 1, 1], [], []>} : vector<48x16xbf16>, vector<16x96xbf16>, vector<48x96xf32> -> vector<48x96xf32>
    %c0_4 = arith.constant 0 : index
    %c0_5 = arith.constant 0 : index
    %4 = vector.load %arg6[%c0_4, %c0_5] : memref<1x96xf32, #tpu.memory_space<vmem>>, vector<1x96xf32>
    %5 = vector.broadcast %4 : vector<1x96xf32> to vector<48x96xf32>
    %6 = arith.addf %3, %5 : vector<48x96xf32>
    %7 = vector.shape_cast %6 : vector<48x96xf32> to vector<6x8x96xf32>
    %c0_6 = arith.constant 0 : index
    %c0_7 = arith.constant 0 : index
    %c0_8 = arith.constant 0 : index
    %8 = vector.load %arg1[%c0_6, %c0_7, %c0_8] : memref<8x128x32xbf16, #tpu.memory_space<vmem>>, vector<8x128x32xbf16>
    %c0_9 = arith.constant 0 : index
    %c0_10 = arith.constant 0 : index
    %9 = vector.load %arg4[%c0_9, %c0_10] : memref<32x96xbf16, #tpu.memory_space<vmem>>, vector<32x96xbf16>
    %c0_11 = arith.constant 0 : index
    %c0_12 = arith.constant 0 : index
    %10 = vector.load %arg5[%c0_11, %c0_12] : memref<32x96xbf16, #tpu.memory_space<vmem>>, vector<32x96xbf16>
    %c0_13 = arith.constant 0 : index
    %c0_14 = arith.constant 0 : index
    %11 = vector.load %arg7[%c0_13, %c0_14] : memref<1x96xf32, #tpu.memory_space<vmem>>, vector<1x96xf32>
    %12 = vector.shape_cast %11 : vector<1x96xf32> to vector<1x96xf32>
    %13 = vector.broadcast %12 : vector<1x96xf32> to vector<8x96xf32>
    %14 = tpu.iota {dimensions = array<i32: 1>} : vector<8x128xi32>
    %c8_i32 = arith.constant 8 : i32
    %15 = vector.broadcast %c8_i32 : i32 to vector<8x128xi32>
    %16 = arith.cmpi slt, %14, %15 : vector<8x128xi32>
    %cst_15 = arith.constant 0.000000e+00 : f32
    %cst_16 = arith.constant -1.000000e+30 : f32
    %17 = vector.broadcast %cst_15 : f32 to vector<8x128xf32>
    %18 = vector.broadcast %cst_16 : f32 to vector<8x128xf32>
    %19 = arith.select %16, %17, %18 : vector<8x128xi1>, vector<8x128xf32>
    %c0_17 = arith.constant 0 : index
    %c0_18 = arith.constant 0 : index
    %20 = vector.load %arg2[%c0_17, %c0_18] : memref<8x32xf32, #tpu.memory_space<vmem>>, vector<8x32xf32>
    %cst_19 = arith.constant 0.000000e+00 : bf16
    %21 = vector.broadcast %cst_19 : bf16 to vector<8x32xbf16>
    %22 = vector.extract_strided_slice %7 {offsets = [0, 0, 0], sizes = [1, 8, 96], strides = [1, 1, 1]} : vector<6x8x96xf32> to vector<1x8x96xf32>
    %23 = vector.shape_cast %22 : vector<1x8x96xf32> to vector<8x96xf32>
    %cst_20 = arith.constant dense<0.000000e+00> : vector<8x96xf32>
    %24 = tpu.matmul %21, %9, %cst_20 {dimension_numbers = #tpu.dot_dimension_numbers<[1], [0], [0], [1], [0, 0, 1, 1], [], []>} : vector<8x32xbf16>, vector<32x96xbf16>, vector<8x96xf32> -> vector<8x96xf32>
    %25 = arith.addf %23, %24 : vector<8x96xf32>
    %26 = arith.truncf %20 : vector<8x32xf32> to vector<8x32xbf16>
    %cst_21 = arith.constant dense<0.000000e+00> : vector<8x96xf32>
    %27 = tpu.matmul %26, %10, %cst_21 {dimension_numbers = #tpu.dot_dimension_numbers<[1], [0], [0], [1], [0, 0, 1, 1], [], []>} : vector<8x32xbf16>, vector<32x96xbf16>, vector<8x96xf32> -> vector<8x96xf32>
    %28 = arith.addf %27, %13 : vector<8x96xf32>
    %29 = vector.extract_strided_slice %25 {offsets = [0, 0], sizes = [8, 32], strides = [1, 1]} : vector<8x96xf32> to vector<8x32xf32>
    %30 = vector.extract_strided_slice %28 {offsets = [0, 0], sizes = [8, 32], strides = [1, 1]} : vector<8x96xf32> to vector<8x32xf32>
    %31 = arith.addf %29, %30 : vector<8x32xf32>
    %32 = arith.negf %31 : vector<8x32xf32>
    %33 = math.exp %32 : vector<8x32xf32>
    %cst_22 = arith.constant 1.000000e+00 : f32
    %34 = vector.broadcast %cst_22 : f32 to vector<8x32xf32>
    %35 = arith.addf %34, %33 : vector<8x32xf32>
    %36 = arith.divf %34, %35 : vector<8x32xf32>
    %37 = vector.extract_strided_slice %25 {offsets = [0, 32], sizes = [8, 32], strides = [1, 1]} : vector<8x96xf32> to vector<8x32xf32>
    %38 = vector.extract_strided_slice %28 {offsets = [0, 32], sizes = [8, 32], strides = [1, 1]} : vector<8x96xf32> to vector<8x32xf32>
    %39 = arith.addf %37, %38 : vector<8x32xf32>
    %40 = arith.negf %39 : vector<8x32xf32>
    %41 = math.exp %40 : vector<8x32xf32>
    %cst_23 = arith.constant 1.000000e+00 : f32
    %42 = vector.broadcast %cst_23 : f32 to vector<8x32xf32>
    %43 = arith.addf %42, %41 : vector<8x32xf32>
    %44 = arith.divf %42, %43 : vector<8x32xf32>
    %45 = vector.extract_strided_slice %25 {offsets = [0, 64], sizes = [8, 32], strides = [1, 1]} : vector<8x96xf32> to vector<8x32xf32>
    %46 = vector.extract_strided_slice %28 {offsets = [0, 64], sizes = [8, 32], strides = [1, 1]} : vector<8x96xf32> to vector<8x32xf32>
    %47 = arith.mulf %36, %46 : vector<8x32xf32>
    %48 = arith.addf %45, %47 : vector<8x32xf32>
    %49 = math.tanh %48 : vector<8x32xf32>
    %cst_24 = arith.constant 1.000000e+00 : f32
    %50 = vector.broadcast %cst_24 : f32 to vector<8x32xf32>
    %51 = arith.subf %50, %44 : vector<8x32xf32>
    %52 = arith.mulf %51, %49 : vector<8x32xf32>
    %53 = arith.mulf %44, %20 : vector<8x32xf32>
    %54 = arith.addf %52, %53 : vector<8x32xf32>
    %55 = arith.truncf %54 : vector<8x32xf32> to vector<8x32xbf16>
    %56 = vector.shape_cast %55 : vector<8x32xbf16> to vector<8x1x32xbf16>
    "tpu.trace_start"() <{level = 10 : i32, message = "bqh,bsh->bqs"}> : () -> ()
    %cst_25 = arith.constant dense<0.000000e+00> : vector<8x1x128xf32>
    %57 = tpu.matmul %56, %8, %cst_25 {dimension_numbers = #tpu.dot_dimension_numbers<[2], [2], [1], [1], [0, 0, 0, 1, 1, 1], [0], [0]>} : vector<8x1x32xbf16>, vector<8x128x32xbf16>, vector<8x1x128xf32> -> vector<8x1x128xf32>
    "tpu.trace_stop"() : () -> ()
    %58 = vector.shape_cast %57 : vector<8x1x128xf32> to vector<8x128xf32>
    %59 = arith.addf %58, %19 : vector<8x128xf32>
    %cst_26 = arith.constant dense<0xFF800000> : vector<8xf32>
    %60 = vector.multi_reduction <maximumf>, %59, %cst_26 [1] : vector<8x128xf32> to vector<8xf32>
    %61 = vector.shape_cast %60 : vector<8xf32> to vector<8x1xf32>
    %62 = vector.broadcast %61 : vector<8x1xf32> to vector<8x128xf32>
    %63 = arith.subf %59, %62 : vector<8x128xf32>
    %64 = math.exp %63 : vector<8x128xf32>
    %cst_27 = arith.constant dense<0.000000e+00> : vector<8xf32>
    %65 = vector.multi_reduction <add>, %64, %cst_27 [1] : vector<8x128xf32> to vector<8xf32>
    %66 = vector.shape_cast %65 : vector<8xf32> to vector<8x1xf32>
    %67 = tpu.reciprocal %66 {approx = true} : vector<8x1xf32> -> vector<8x1xf32>
    %68 = vector.broadcast %67 : vector<8x1xf32> to vector<8x128xf32>
    %69 = arith.mulf %64, %68 : vector<8x128xf32>
    %70 = arith.truncf %69 : vector<8x128xf32> to vector<8x128xbf16>
    %71 = vector.shape_cast %70 : vector<8x128xbf16> to vector<8x1x128xbf16>
    "tpu.trace_start"() <{level = 10 : i32, message = "bqs,bsh->bqh"}> : () -> ()
    %cst_28 = arith.constant dense<0.000000e+00> : vector<8x1x32xf32>
    %72 = tpu.matmul %71, %8, %cst_28 {dimension_numbers = #tpu.dot_dimension_numbers<[2], [1], [1], [2], [0, 0, 0, 1, 1, 2], [0], [0]>} : vector<8x1x128xbf16>, vector<8x128x32xbf16>, vector<8x1x32xf32> -> vector<8x1x32xf32>
    "tpu.trace_stop"() : () -> ()
    %73 = vector.shape_cast %72 : vector<8x1x32xf32> to vector<8x32xf32>
    %74 = arith.truncf %73 : vector<8x32xf32> to vector<8x32xbf16>
    %c0_29 = arith.constant 0 : index
    %c0_30 = arith.constant 0 : index
    %c0_31 = arith.constant 0 : index
    %75 = vector.load %arg8[%c0_29, %c0_30, %c0_31] : memref<8x6x128xf32, #tpu.memory_space<vmem>>, vector<8x1x128xf32>
    %76 = vector.shape_cast %75 : vector<8x1x128xf32> to vector<8x128xf32>
    %77 = vector.shape_cast %69 : vector<8x128xf32> to vector<8x1x128xf32>
    tpu.vector_store %arg8[%c0_29, %c0_30, %c0_31], %77 {strides = array<i32>} : memref<8x6x128xf32, #tpu.memory_space<vmem>>, vector<8x1x128xf32>,
    %78 = tpu.concatenate %74, %55 in 1 : vector<8x32xbf16>, vector<8x32xbf16> -> vector<8x64xbf16>
    %c0_32 = arith.constant 0 : index
    %c0_33 = arith.constant 0 : index
    %c0_34 = arith.constant 0 : index
    %79 = vector.load %arg9[%c0_32, %c0_33, %c0_34] : memref<8x6x64xbf16, #tpu.memory_space<vmem>>, vector<8x1x64xbf16>
    %80 = vector.shape_cast %79 : vector<8x1x64xbf16> to vector<8x64xbf16>
    %81 = vector.shape_cast %78 : vector<8x64xbf16> to vector<8x1x64xbf16>
    tpu.vector_store %arg9[%c0_32, %c0_33, %c0_34], %81 {strides = array<i32>} : memref<8x6x64xbf16, #tpu.memory_space<vmem>>, vector<8x1x64xbf16>,
    %82 = vector.extract_strided_slice %7 {offsets = [1, 0, 0], sizes = [1, 8, 96], strides = [1, 1, 1]} : vector<6x8x96xf32> to vector<1x8x96xf32>
    %83 = vector.shape_cast %82 : vector<1x8x96xf32> to vector<8x96xf32>
    %cst_35 = arith.constant dense<0.000000e+00> : vector<8x96xf32>
    %84 = tpu.matmul %74, %9, %cst_35 {dimension_numbers = #tpu.dot_dimension_numbers<[1], [0], [0], [1], [0, 0, 1, 1], [], []>} : vector<8x32xbf16>, vector<32x96xbf16>, vector<8x96xf32> -> vector<8x96xf32>
    %85 = arith.addf %83, %84 : vector<8x96xf32>
    %86 = arith.truncf %54 : vector<8x32xf32> to vector<8x32xbf16>
    %cst_36 = arith.constant dense<0.000000e+00> : vector<8x96xf32>
    %87 = tpu.matmul %86, %10, %cst_36 {dimension_numbers = #tpu.dot_dimension_numbers<[1], [0], [0], [1], [0, 0, 1, 1], [], []>} : vector<8x32xbf16>, vector<32x96xbf16>, vector<8x96xf32> -> vector<8x96xf32>
    %88 = arith.addf %87, %13 : vector<8x96xf32>
    %89 = vector.extract_strided_slice %85 {offsets = [0, 0], sizes = [8, 32], strides = [1, 1]} : vector<8x96xf32> to vector<8x32xf32>
    %90 = vector.extract_strided_slice %88 {offsets = [0, 0], sizes = [8, 32], strides = [1, 1]} : vector<8x96xf32> to vector<8x32xf32>
    %91 = arith.addf %89, %90 : vector<8x32xf32>
    %92 = arith.negf %91 : vector<8x32xf32>
    %93 = math.exp %92 : vector<8x32xf32>
    %cst_37 = arith.constant 1.000000e+00 : f32
    %94 = vector.broadcast %cst_37 : f32 to vector<8x32xf32>
    %95 = arith.addf %94, %93 : vector<8x32xf32>
    %96 = arith.divf %94, %95 : vector<8x32xf32>
    %97 = vector.extract_strided_slice %85 {offsets = [0, 32], sizes = [8, 32], strides = [1, 1]} : vector<8x96xf32> to vector<8x32xf32>
    %98 = vector.extract_strided_slice %88 {offsets = [0, 32], sizes = [8, 32], strides = [1, 1]} : vector<8x96xf32> to vector<8x32xf32>
    %99 = arith.addf %97, %98 : vector<8x32xf32>
    %100 = arith.negf %99 : vector<8x32xf32>
    %101 = math.exp %100 : vector<8x32xf32>
    %cst_38 = arith.constant 1.000000e+00 : f32
    %102 = vector.broadcast %cst_38 : f32 to vector<8x32xf32>
    %103 = arith.addf %102, %101 : vector<8x32xf32>
    %104 = arith.divf %102, %103 : vector<8x32xf32>
    %105 = vector.extract_strided_slice %85 {offsets = [0, 64], sizes = [8, 32], strides = [1, 1]} : vector<8x96xf32> to vector<8x32xf32>
    %106 = vector.extract_strided_slice %88 {offsets = [0, 64], sizes = [8, 32], strides = [1, 1]} : vector<8x96xf32> to vector<8x32xf32>
    %107 = arith.mulf %96, %106 : vector<8x32xf32>
    %108 = arith.addf %105, %107 : vector<8x32xf32>
    %109 = math.tanh %108 : vector<8x32xf32>
    %cst_39 = arith.constant 1.000000e+00 : f32
    %110 = vector.broadcast %cst_39 : f32 to vector<8x32xf32>
    %111 = arith.subf %110, %104 : vector<8x32xf32>
    %112 = arith.mulf %111, %109 : vector<8x32xf32>
    %113 = arith.mulf %104, %54 : vector<8x32xf32>
    %114 = arith.addf %112, %113 : vector<8x32xf32>
    %115 = arith.truncf %114 : vector<8x32xf32> to vector<8x32xbf16>
    %116 = vector.shape_cast %115 : vector<8x32xbf16> to vector<8x1x32xbf16>
    "tpu.trace_start"() <{level = 10 : i32, message = "bqh,bsh->bqs"}> : () -> ()
    %cst_40 = arith.constant dense<0.000000e+00> : vector<8x1x128xf32>
    %117 = tpu.matmul %116, %8, %cst_40 {dimension_numbers = #tpu.dot_dimension_numbers<[2], [2], [1], [1], [0, 0, 0, 1, 1, 1], [0], [0]>} : vector<8x1x32xbf16>, vector<8x128x32xbf16>, vector<8x1x128xf32> -> vector<8x1x128xf32>
    "tpu.trace_stop"() : () -> ()
    %118 = vector.shape_cast %117 : vector<8x1x128xf32> to vector<8x128xf32>
    %119 = arith.addf %118, %19 : vector<8x128xf32>
    %cst_41 = arith.constant dense<0xFF800000> : vector<8xf32>
    %120 = vector.multi_reduction <maximumf>, %119, %cst_41 [1] : vector<8x128xf32> to vector<8xf32>
    %121 = vector.shape_cast %120 : vector<8xf32> to vector<8x1xf32>
    %122 = vector.broadcast %121 : vector<8x1xf32> to vector<8x128xf32>
    %123 = arith.subf %119, %122 : vector<8x128xf32>
    %124 = math.exp %123 : vector<8x128xf32>
    %cst_42 = arith.constant dense<0.000000e+00> : vector<8xf32>
    %125 = vector.multi_reduction <add>, %124, %cst_42 [1] : vector<8x128xf32> to vector<8xf32>
    %126 = vector.shape_cast %125 : vector<8xf32> to vector<8x1xf32>
    %127 = tpu.reciprocal %126 {approx = true} : vector<8x1xf32> -> vector<8x1xf32>
    %128 = vector.broadcast %127 : vector<8x1xf32> to vector<8x128xf32>
    %129 = arith.mulf %124, %128 : vector<8x128xf32>
    %130 = arith.truncf %129 : vector<8x128xf32> to vector<8x128xbf16>
    %131 = vector.shape_cast %130 : vector<8x128xbf16> to vector<8x1x128xbf16>
    "tpu.trace_start"() <{level = 10 : i32, message = "bqs,bsh->bqh"}> : () -> ()
    %cst_43 = arith.constant dense<0.000000e+00> : vector<8x1x32xf32>
    %132 = tpu.matmul %131, %8, %cst_43 {dimension_numbers = #tpu.dot_dimension_numbers<[2], [1], [1], [2], [0, 0, 0, 1, 1, 2], [0], [0]>} : vector<8x1x128xbf16>, vector<8x128x32xbf16>, vector<8x1x32xf32> -> vector<8x1x32xf32>
    "tpu.trace_stop"() : () -> ()
    %133 = vector.shape_cast %132 : vector<8x1x32xf32> to vector<8x32xf32>
    %134 = arith.truncf %133 : vector<8x32xf32> to vector<8x32xbf16>
    %c0_44 = arith.constant 0 : index
    %c1 = arith.constant 1 : index
    %c0_45 = arith.constant 0 : index
    %135 = vector.load %arg8[%c0_44, %c1, %c0_45] : memref<8x6x128xf32, #tpu.memory_space<vmem>>, vector<8x1x128xf32>
    %136 = vector.shape_cast %135 : vector<8x1x128xf32> to vector<8x128xf32>
    %137 = vector.shape_cast %129 : vector<8x128xf32> to vector<8x1x128xf32>
    tpu.vector_store %arg8[%c0_44, %c1, %c0_45], %137 {strides = array<i32>} : memref<8x6x128xf32, #tpu.memory_space<vmem>>, vector<8x1x128xf32>,
    %138 = tpu.concatenate %134, %115 in 1 : vector<8x32xbf16>, vector<8x32xbf16> -> vector<8x64xbf16>
    %c0_46 = arith.constant 0 : index
    %c1_47 = arith.constant 1 : index
    %c0_48 = arith.constant 0 : index
    %139 = vector.load %arg9[%c0_46, %c1_47, %c0_48] : memref<8x6x64xbf16, #tpu.memory_space<vmem>>, vector<8x1x64xbf16>
    %140 = vector.shape_cast %139 : vector<8x1x64xbf16> to vector<8x64xbf16>
    %141 = vector.shape_cast %138 : vector<8x64xbf16> to vector<8x1x64xbf16>
    tpu.vector_store %arg9[%c0_46, %c1_47, %c0_48], %141 {strides = array<i32>} : memref<8x6x64xbf16, #tpu.memory_space<vmem>>, vector<8x1x64xbf16>,
    %142 = vector.extract_strided_slice %7 {offsets = [2, 0, 0], sizes = [1, 8, 96], strides = [1, 1, 1]} : vector<6x8x96xf32> to vector<1x8x96xf32>
    %143 = vector.shape_cast %142 : vector<1x8x96xf32> to vector<8x96xf32>
    %cst_49 = arith.constant dense<0.000000e+00> : vector<8x96xf32>
    %144 = tpu.matmul %134, %9, %cst_49 {dimension_numbers = #tpu.dot_dimension_numbers<[1], [0], [0], [1], [0, 0, 1, 1], [], []>} : vector<8x32xbf16>, vector<32x96xbf16>, vector<8x96xf32> -> vector<8x96xf32>
    %145 = arith.addf %143, %144 : vector<8x96xf32>
    %146 = arith.truncf %114 : vector<8x32xf32> to vector<8x32xbf16>
    %cst_50 = arith.constant dense<0.000000e+00> : vector<8x96xf32>
    %147 = tpu.matmul %146, %10, %cst_50 {dimension_numbers = #tpu.dot_dimension_numbers<[1], [0], [0], [1], [0, 0, 1, 1], [], []>} : vector<8x32xbf16>, vector<32x96xbf16>, vector<8x96xf32> -> vector<8x96xf32>
    %148 = arith.addf %147, %13 : vector<8x96xf32>
    %149 = vector.extract_strided_slice %145 {offsets = [0, 0], sizes = [8, 32], strides = [1, 1]} : vector<8x96xf32> to vector<8x32xf32>
    %150 = vector.extract_strided_slice %148 {offsets = [0, 0], sizes = [8, 32], strides = [1, 1]} : vector<8x96xf32> to vector<8x32xf32>
    %151 = arith.addf %149, %150 : vector<8x32xf32>
    %152 = arith.negf %151 : vector<8x32xf32>
    %153 = math.exp %152 : vector<8x32xf32>
    %cst_51 = arith.constant 1.000000e+00 : f32
    %154 = vector.broadcast %cst_51 : f32 to vector<8x32xf32>
    %155 = arith.addf %154, %153 : vector<8x32xf32>
    %156 = arith.divf %154, %155 : vector<8x32xf32>
    %157 = vector.extract_strided_slice %145 {offsets = [0, 32], sizes = [8, 32], strides = [1, 1]} : vector<8x96xf32> to vector<8x32xf32>
    %158 = vector.extract_strided_slice %148 {offsets = [0, 32], sizes = [8, 32], strides = [1, 1]} : vector<8x96xf32> to vector<8x32xf32>
    %159 = arith.addf %157, %158 : vector<8x32xf32>
    %160 = arith.negf %159 : vector<8x32xf32>
    %161 = math.exp %160 : vector<8x32xf32>
    %cst_52 = arith.constant 1.000000e+00 : f32
    %162 = vector.broadcast %cst_52 : f32 to vector<8x32xf32>
    %163 = arith.addf %162, %161 : vector<8x32xf32>
    %164 = arith.divf %162, %163 : vector<8x32xf32>
    %165 = vector.extract_strided_slice %145 {offsets = [0, 64], sizes = [8, 32], strides = [1, 1]} : vector<8x96xf32> to vector<8x32xf32>
    %166 = vector.extract_strided_slice %148 {offsets = [0, 64], sizes = [8, 32], strides = [1, 1]} : vector<8x96xf32> to vector<8x32xf32>
    %167 = arith.mulf %156, %166 : vector<8x32xf32>
    %168 = arith.addf %165, %167 : vector<8x32xf32>
    %169 = math.tanh %168 : vector<8x32xf32>
    %cst_53 = arith.constant 1.000000e+00 : f32
    %170 = vector.broadcast %cst_53 : f32 to vector<8x32xf32>
    %171 = arith.subf %170, %164 : vector<8x32xf32>
    %172 = arith.mulf %171, %169 : vector<8x32xf32>
    %173 = arith.mulf %164, %114 : vector<8x32xf32>
    %174 = arith.addf %172, %173 : vector<8x32xf32>
    %175 = arith.truncf %174 : vector<8x32xf32> to vector<8x32xbf16>
    %176 = vector.shape_cast %175 : vector<8x32xbf16> to vector<8x1x32xbf16>
    "tpu.trace_start"() <{level = 10 : i32, message = "bqh,bsh->bqs"}> : () -> ()
    %cst_54 = arith.constant dense<0.000000e+00> : vector<8x1x128xf32>
    %177 = tpu.matmul %176, %8, %cst_54 {dimension_numbers = #tpu.dot_dimension_numbers<[2], [2], [1], [1], [0, 0, 0, 1, 1, 1], [0], [0]>} : vector<8x1x32xbf16>, vector<8x128x32xbf16>, vector<8x1x128xf32> -> vector<8x1x128xf32>
    "tpu.trace_stop"() : () -> ()
    %178 = vector.shape_cast %177 : vector<8x1x128xf32> to vector<8x128xf32>
    %179 = arith.addf %178, %19 : vector<8x128xf32>
    %cst_55 = arith.constant dense<0xFF800000> : vector<8xf32>
    %180 = vector.multi_reduction <maximumf>, %179, %cst_55 [1] : vector<8x128xf32> to vector<8xf32>
    %181 = vector.shape_cast %180 : vector<8xf32> to vector<8x1xf32>
    %182 = vector.broadcast %181 : vector<8x1xf32> to vector<8x128xf32>
    %183 = arith.subf %179, %182 : vector<8x128xf32>
    %184 = math.exp %183 : vector<8x128xf32>
    %cst_56 = arith.constant dense<0.000000e+00> : vector<8xf32>
    %185 = vector.multi_reduction <add>, %184, %cst_56 [1] : vector<8x128xf32> to vector<8xf32>
    %186 = vector.shape_cast %185 : vector<8xf32> to vector<8x1xf32>
    %187 = tpu.reciprocal %186 {approx = true} : vector<8x1xf32> -> vector<8x1xf32>
    %188 = vector.broadcast %187 : vector<8x1xf32> to vector<8x128xf32>
    %189 = arith.mulf %184, %188 : vector<8x128xf32>
    %190 = arith.truncf %189 : vector<8x128xf32> to vector<8x128xbf16>
    %191 = vector.shape_cast %190 : vector<8x128xbf16> to vector<8x1x128xbf16>
    "tpu.trace_start"() <{level = 10 : i32, message = "bqs,bsh->bqh"}> : () -> ()
    %cst_57 = arith.constant dense<0.000000e+00> : vector<8x1x32xf32>
    %192 = tpu.matmul %191, %8, %cst_57 {dimension_numbers = #tpu.dot_dimension_numbers<[2], [1], [1], [2], [0, 0, 0, 1, 1, 2], [0], [0]>} : vector<8x1x128xbf16>, vector<8x128x32xbf16>, vector<8x1x32xf32> -> vector<8x1x32xf32>
    "tpu.trace_stop"() : () -> ()
    %193 = vector.shape_cast %192 : vector<8x1x32xf32> to vector<8x32xf32>
    %194 = arith.truncf %193 : vector<8x32xf32> to vector<8x32xbf16>
    %c0_58 = arith.constant 0 : index
    %c2 = arith.constant 2 : index
    %c0_59 = arith.constant 0 : index
    %195 = vector.load %arg8[%c0_58, %c2, %c0_59] : memref<8x6x128xf32, #tpu.memory_space<vmem>>, vector<8x1x128xf32>
    %196 = vector.shape_cast %195 : vector<8x1x128xf32> to vector<8x128xf32>
    %197 = vector.shape_cast %189 : vector<8x128xf32> to vector<8x1x128xf32>
    tpu.vector_store %arg8[%c0_58, %c2, %c0_59], %197 {strides = array<i32>} : memref<8x6x128xf32, #tpu.memory_space<vmem>>, vector<8x1x128xf32>,
    %198 = tpu.concatenate %194, %175 in 1 : vector<8x32xbf16>, vector<8x32xbf16> -> vector<8x64xbf16>
    %c0_60 = arith.constant 0 : index
    %c2_61 = arith.constant 2 : index
    %c0_62 = arith.constant 0 : index
    %199 = vector.load %arg9[%c0_60, %c2_61, %c0_62] : memref<8x6x64xbf16, #tpu.memory_space<vmem>>, vector<8x1x64xbf16>
    %200 = vector.shape_cast %199 : vector<8x1x64xbf16> to vector<8x64xbf16>
    %201 = vector.shape_cast %198 : vector<8x64xbf16> to vector<8x1x64xbf16>
    tpu.vector_store %arg9[%c0_60, %c2_61, %c0_62], %201 {strides = array<i32>} : memref<8x6x64xbf16, #tpu.memory_space<vmem>>, vector<8x1x64xbf16>,
    %202 = vector.extract_strided_slice %7 {offsets = [3, 0, 0], sizes = [1, 8, 96], strides = [1, 1, 1]} : vector<6x8x96xf32> to vector<1x8x96xf32>
    %203 = vector.shape_cast %202 : vector<1x8x96xf32> to vector<8x96xf32>
    %cst_63 = arith.constant dense<0.000000e+00> : vector<8x96xf32>
    %204 = tpu.matmul %194, %9, %cst_63 {dimension_numbers = #tpu.dot_dimension_numbers<[1], [0], [0], [1], [0, 0, 1, 1], [], []>} : vector<8x32xbf16>, vector<32x96xbf16>, vector<8x96xf32> -> vector<8x96xf32>
    %205 = arith.addf %203, %204 : vector<8x96xf32>
    %206 = arith.truncf %174 : vector<8x32xf32> to vector<8x32xbf16>
    %cst_64 = arith.constant dense<0.000000e+00> : vector<8x96xf32>
    %207 = tpu.matmul %206, %10, %cst_64 {dimension_numbers = #tpu.dot_dimension_numbers<[1], [0], [0], [1], [0, 0, 1, 1], [], []>} : vector<8x32xbf16>, vector<32x96xbf16>, vector<8x96xf32> -> vector<8x96xf32>
    %208 = arith.addf %207, %13 : vector<8x96xf32>
    %209 = vector.extract_strided_slice %205 {offsets = [0, 0], sizes = [8, 32], strides = [1, 1]} : vector<8x96xf32> to vector<8x32xf32>
    %210 = vector.extract_strided_slice %208 {offsets = [0, 0], sizes = [8, 32], strides = [1, 1]} : vector<8x96xf32> to vector<8x32xf32>
    %211 = arith.addf %209, %210 : vector<8x32xf32>
    %212 = arith.negf %211 : vector<8x32xf32>
    %213 = math.exp %212 : vector<8x32xf32>
    %cst_65 = arith.constant 1.000000e+00 : f32
    %214 = vector.broadcast %cst_65 : f32 to vector<8x32xf32>
    %215 = arith.addf %214, %213 : vector<8x32xf32>
    %216 = arith.divf %214, %215 : vector<8x32xf32>
    %217 = vector.extract_strided_slice %205 {offsets = [0, 32], sizes = [8, 32], strides = [1, 1]} : vector<8x96xf32> to vector<8x32xf32>
    %218 = vector.extract_strided_slice %208 {offsets = [0, 32], sizes = [8, 32], strides = [1, 1]} : vector<8x96xf32> to vector<8x32xf32>
    %219 = arith.addf %217, %218 : vector<8x32xf32>
    %220 = arith.negf %219 : vector<8x32xf32>
    %221 = math.exp %220 : vector<8x32xf32>
    %cst_66 = arith.constant 1.000000e+00 : f32
    %222 = vector.broadcast %cst_66 : f32 to vector<8x32xf32>
    %223 = arith.addf %222, %221 : vector<8x32xf32>
    %224 = arith.divf %222, %223 : vector<8x32xf32>
    %225 = vector.extract_strided_slice %205 {offsets = [0, 64], sizes = [8, 32], strides = [1, 1]} : vector<8x96xf32> to vector<8x32xf32>
    %226 = vector.extract_strided_slice %208 {offsets = [0, 64], sizes = [8, 32], strides = [1, 1]} : vector<8x96xf32> to vector<8x32xf32>
    %227 = arith.mulf %216, %226 : vector<8x32xf32>
    %228 = arith.addf %225, %227 : vector<8x32xf32>
    %229 = math.tanh %228 : vector<8x32xf32>
    %cst_67 = arith.constant 1.000000e+00 : f32
    %230 = vector.broadcast %cst_67 : f32 to vector<8x32xf32>
    %231 = arith.subf %230, %224 : vector<8x32xf32>
    %232 = arith.mulf %231, %229 : vector<8x32xf32>
    %233 = arith.mulf %224, %174 : vector<8x32xf32>
    %234 = arith.addf %232, %233 : vector<8x32xf32>
    %235 = arith.truncf %234 : vector<8x32xf32> to vector<8x32xbf16>
    %236 = vector.shape_cast %235 : vector<8x32xbf16> to vector<8x1x32xbf16>
    "tpu.trace_start"() <{level = 10 : i32, message = "bqh,bsh->bqs"}> : () -> ()
    %cst_68 = arith.constant dense<0.000000e+00> : vector<8x1x128xf32>
    %237 = tpu.matmul %236, %8, %cst_68 {dimension_numbers = #tpu.dot_dimension_numbers<[2], [2], [1], [1], [0, 0, 0, 1, 1, 1], [0], [0]>} : vector<8x1x32xbf16>, vector<8x128x32xbf16>, vector<8x1x128xf32> -> vector<8x1x128xf32>
    "tpu.trace_stop"() : () -> ()
    %238 = vector.shape_cast %237 : vector<8x1x128xf32> to vector<8x128xf32>
    %239 = arith.addf %238, %19 : vector<8x128xf32>
    %cst_69 = arith.constant dense<0xFF800000> : vector<8xf32>
    %240 = vector.multi_reduction <maximumf>, %239, %cst_69 [1] : vector<8x128xf32> to vector<8xf32>
    %241 = vector.shape_cast %240 : vector<8xf32> to vector<8x1xf32>
    %242 = vector.broadcast %241 : vector<8x1xf32> to vector<8x128xf32>
    %243 = arith.subf %239, %242 : vector<8x128xf32>
    %244 = math.exp %243 : vector<8x128xf32>
    %cst_70 = arith.constant dense<0.000000e+00> : vector<8xf32>
    %245 = vector.multi_reduction <add>, %244, %cst_70 [1] : vector<8x128xf32> to vector<8xf32>
    %246 = vector.shape_cast %245 : vector<8xf32> to vector<8x1xf32>
    %247 = tpu.reciprocal %246 {approx = true} : vector<8x1xf32> -> vector<8x1xf32>
    %248 = vector.broadcast %247 : vector<8x1xf32> to vector<8x128xf32>
    %249 = arith.mulf %244, %248 : vector<8x128xf32>
    %250 = arith.truncf %249 : vector<8x128xf32> to vector<8x128xbf16>
    %251 = vector.shape_cast %250 : vector<8x128xbf16> to vector<8x1x128xbf16>
    "tpu.trace_start"() <{level = 10 : i32, message = "bqs,bsh->bqh"}> : () -> ()
    %cst_71 = arith.constant dense<0.000000e+00> : vector<8x1x32xf32>
    %252 = tpu.matmul %251, %8, %cst_71 {dimension_numbers = #tpu.dot_dimension_numbers<[2], [1], [1], [2], [0, 0, 0, 1, 1, 2], [0], [0]>} : vector<8x1x128xbf16>, vector<8x128x32xbf16>, vector<8x1x32xf32> -> vector<8x1x32xf32>
    "tpu.trace_stop"() : () -> ()
    %253 = vector.shape_cast %252 : vector<8x1x32xf32> to vector<8x32xf32>
    %254 = arith.truncf %253 : vector<8x32xf32> to vector<8x32xbf16>
    %c0_72 = arith.constant 0 : index
    %c3 = arith.constant 3 : index
    %c0_73 = arith.constant 0 : index
    %255 = vector.load %arg8[%c0_72, %c3, %c0_73] : memref<8x6x128xf32, #tpu.memory_space<vmem>>, vector<8x1x128xf32>
    %256 = vector.shape_cast %255 : vector<8x1x128xf32> to vector<8x128xf32>
    %257 = vector.shape_cast %249 : vector<8x128xf32> to vector<8x1x128xf32>
    tpu.vector_store %arg8[%c0_72, %c3, %c0_73], %257 {strides = array<i32>} : memref<8x6x128xf32, #tpu.memory_space<vmem>>, vector<8x1x128xf32>,
    %258 = tpu.concatenate %254, %235 in 1 : vector<8x32xbf16>, vector<8x32xbf16> -> vector<8x64xbf16>
    %c0_74 = arith.constant 0 : index
    %c3_75 = arith.constant 3 : index
    %c0_76 = arith.constant 0 : index
    %259 = vector.load %arg9[%c0_74, %c3_75, %c0_76] : memref<8x6x64xbf16, #tpu.memory_space<vmem>>, vector<8x1x64xbf16>
    %260 = vector.shape_cast %259 : vector<8x1x64xbf16> to vector<8x64xbf16>
    %261 = vector.shape_cast %258 : vector<8x64xbf16> to vector<8x1x64xbf16>
    tpu.vector_store %arg9[%c0_74, %c3_75, %c0_76], %261 {strides = array<i32>} : memref<8x6x64xbf16, #tpu.memory_space<vmem>>, vector<8x1x64xbf16>,
    %262 = vector.extract_strided_slice %7 {offsets = [4, 0, 0], sizes = [1, 8, 96], strides = [1, 1, 1]} : vector<6x8x96xf32> to vector<1x8x96xf32>
    %263 = vector.shape_cast %262 : vector<1x8x96xf32> to vector<8x96xf32>
    %cst_77 = arith.constant dense<0.000000e+00> : vector<8x96xf32>
    %264 = tpu.matmul %254, %9, %cst_77 {dimension_numbers = #tpu.dot_dimension_numbers<[1], [0], [0], [1], [0, 0, 1, 1], [], []>} : vector<8x32xbf16>, vector<32x96xbf16>, vector<8x96xf32> -> vector<8x96xf32>
    %265 = arith.addf %263, %264 : vector<8x96xf32>
    %266 = arith.truncf %234 : vector<8x32xf32> to vector<8x32xbf16>
    %cst_78 = arith.constant dense<0.000000e+00> : vector<8x96xf32>
    %267 = tpu.matmul %266, %10, %cst_78 {dimension_numbers = #tpu.dot_dimension_numbers<[1], [0], [0], [1], [0, 0, 1, 1], [], []>} : vector<8x32xbf16>, vector<32x96xbf16>, vector<8x96xf32> -> vector<8x96xf32>
    %268 = arith.addf %267, %13 : vector<8x96xf32>
    %269 = vector.extract_strided_slice %265 {offsets = [0, 0], sizes = [8, 32], strides = [1, 1]} : vector<8x96xf32> to vector<8x32xf32>
    %270 = vector.extract_strided_slice %268 {offsets = [0, 0], sizes = [8, 32], strides = [1, 1]} : vector<8x96xf32> to vector<8x32xf32>
    %271 = arith.addf %269, %270 : vector<8x32xf32>
    %272 = arith.negf %271 : vector<8x32xf32>
    %273 = math.exp %272 : vector<8x32xf32>
    %cst_79 = arith.constant 1.000000e+00 : f32
    %274 = vector.broadcast %cst_79 : f32 to vector<8x32xf32>
    %275 = arith.addf %274, %273 : vector<8x32xf32>
    %276 = arith.divf %274, %275 : vector<8x32xf32>
    %277 = vector.extract_strided_slice %265 {offsets = [0, 32], sizes = [8, 32], strides = [1, 1]} : vector<8x96xf32> to vector<8x32xf32>
    %278 = vector.extract_strided_slice %268 {offsets = [0, 32], sizes = [8, 32], strides = [1, 1]} : vector<8x96xf32> to vector<8x32xf32>
    %279 = arith.addf %277, %278 : vector<8x32xf32>
    %280 = arith.negf %279 : vector<8x32xf32>
    %281 = math.exp %280 : vector<8x32xf32>
    %cst_80 = arith.constant 1.000000e+00 : f32
    %282 = vector.broadcast %cst_80 : f32 to vector<8x32xf32>
    %283 = arith.addf %282, %281 : vector<8x32xf32>
    %284 = arith.divf %282, %283 : vector<8x32xf32>
    %285 = vector.extract_strided_slice %265 {offsets = [0, 64], sizes = [8, 32], strides = [1, 1]} : vector<8x96xf32> to vector<8x32xf32>
    %286 = vector.extract_strided_slice %268 {offsets = [0, 64], sizes = [8, 32], strides = [1, 1]} : vector<8x96xf32> to vector<8x32xf32>
    %287 = arith.mulf %276, %286 : vector<8x32xf32>
    %288 = arith.addf %285, %287 : vector<8x32xf32>
    %289 = math.tanh %288 : vector<8x32xf32>
    %cst_81 = arith.constant 1.000000e+00 : f32
    %290 = vector.broadcast %cst_81 : f32 to vector<8x32xf32>
    %291 = arith.subf %290, %284 : vector<8x32xf32>
    %292 = arith.mulf %291, %289 : vector<8x32xf32>
    %293 = arith.mulf %284, %234 : vector<8x32xf32>
    %294 = arith.addf %292, %293 : vector<8x32xf32>
    %295 = arith.truncf %294 : vector<8x32xf32> to vector<8x32xbf16>
    %296 = vector.shape_cast %295 : vector<8x32xbf16> to vector<8x1x32xbf16>
    "tpu.trace_start"() <{level = 10 : i32, message = "bqh,bsh->bqs"}> : () -> ()
    %cst_82 = arith.constant dense<0.000000e+00> : vector<8x1x128xf32>
    %297 = tpu.matmul %296, %8, %cst_82 {dimension_numbers = #tpu.dot_dimension_numbers<[2], [2], [1], [1], [0, 0, 0, 1, 1, 1], [0], [0]>} : vector<8x1x32xbf16>, vector<8x128x32xbf16>, vector<8x1x128xf32> -> vector<8x1x128xf32>
    "tpu.trace_stop"() : () -> ()
    %298 = vector.shape_cast %297 : vector<8x1x128xf32> to vector<8x128xf32>
    %299 = arith.addf %298, %19 : vector<8x128xf32>
    %cst_83 = arith.constant dense<0xFF800000> : vector<8xf32>
    %300 = vector.multi_reduction <maximumf>, %299, %cst_83 [1] : vector<8x128xf32> to vector<8xf32>
    %301 = vector.shape_cast %300 : vector<8xf32> to vector<8x1xf32>
    %302 = vector.broadcast %301 : vector<8x1xf32> to vector<8x128xf32>
    %303 = arith.subf %299, %302 : vector<8x128xf32>
    %304 = math.exp %303 : vector<8x128xf32>
    %cst_84 = arith.constant dense<0.000000e+00> : vector<8xf32>
    %305 = vector.multi_reduction <add>, %304, %cst_84 [1] : vector<8x128xf32> to vector<8xf32>
    %306 = vector.shape_cast %305 : vector<8xf32> to vector<8x1xf32>
    %307 = tpu.reciprocal %306 {approx = true} : vector<8x1xf32> -> vector<8x1xf32>
    %308 = vector.broadcast %307 : vector<8x1xf32> to vector<8x128xf32>
    %309 = arith.mulf %304, %308 : vector<8x128xf32>
    %310 = arith.truncf %309 : vector<8x128xf32> to vector<8x128xbf16>
    %311 = vector.shape_cast %310 : vector<8x128xbf16> to vector<8x1x128xbf16>
    "tpu.trace_start"() <{level = 10 : i32, message = "bqs,bsh->bqh"}> : () -> ()
    %cst_85 = arith.constant dense<0.000000e+00> : vector<8x1x32xf32>
    %312 = tpu.matmul %311, %8, %cst_85 {dimension_numbers = #tpu.dot_dimension_numbers<[2], [1], [1], [2], [0, 0, 0, 1, 1, 2], [0], [0]>} : vector<8x1x128xbf16>, vector<8x128x32xbf16>, vector<8x1x32xf32> -> vector<8x1x32xf32>
    "tpu.trace_stop"() : () -> ()
    %313 = vector.shape_cast %312 : vector<8x1x32xf32> to vector<8x32xf32>
    %314 = arith.truncf %313 : vector<8x32xf32> to vector<8x32xbf16>
    %c0_86 = arith.constant 0 : index
    %c4 = arith.constant 4 : index
    %c0_87 = arith.constant 0 : index
    %315 = vector.load %arg8[%c0_86, %c4, %c0_87] : memref<8x6x128xf32, #tpu.memory_space<vmem>>, vector<8x1x128xf32>
    %316 = vector.shape_cast %315 : vector<8x1x128xf32> to vector<8x128xf32>
    %317 = vector.shape_cast %309 : vector<8x128xf32> to vector<8x1x128xf32>
    tpu.vector_store %arg8[%c0_86, %c4, %c0_87], %317 {strides = array<i32>} : memref<8x6x128xf32, #tpu.memory_space<vmem>>, vector<8x1x128xf32>,
    %318 = tpu.concatenate %314, %295 in 1 : vector<8x32xbf16>, vector<8x32xbf16> -> vector<8x64xbf16>
    %c0_88 = arith.constant 0 : index
    %c4_89 = arith.constant 4 : index
    %c0_90 = arith.constant 0 : index
    %319 = vector.load %arg9[%c0_88, %c4_89, %c0_90] : memref<8x6x64xbf16, #tpu.memory_space<vmem>>, vector<8x1x64xbf16>
    %320 = vector.shape_cast %319 : vector<8x1x64xbf16> to vector<8x64xbf16>
    %321 = vector.shape_cast %318 : vector<8x64xbf16> to vector<8x1x64xbf16>
    tpu.vector_store %arg9[%c0_88, %c4_89, %c0_90], %321 {strides = array<i32>} : memref<8x6x64xbf16, #tpu.memory_space<vmem>>, vector<8x1x64xbf16>,
    %322 = vector.extract_strided_slice %7 {offsets = [5, 0, 0], sizes = [1, 8, 96], strides = [1, 1, 1]} : vector<6x8x96xf32> to vector<1x8x96xf32>
    %323 = vector.shape_cast %322 : vector<1x8x96xf32> to vector<8x96xf32>
    %cst_91 = arith.constant dense<0.000000e+00> : vector<8x96xf32>
    %324 = tpu.matmul %314, %9, %cst_91 {dimension_numbers = #tpu.dot_dimension_numbers<[1], [0], [0], [1], [0, 0, 1, 1], [], []>} : vector<8x32xbf16>, vector<32x96xbf16>, vector<8x96xf32> -> vector<8x96xf32>
    %325 = arith.addf %323, %324 : vector<8x96xf32>
    %326 = arith.truncf %294 : vector<8x32xf32> to vector<8x32xbf16>
    %cst_92 = arith.constant dense<0.000000e+00> : vector<8x96xf32>
    %327 = tpu.matmul %326, %10, %cst_92 {dimension_numbers = #tpu.dot_dimension_numbers<[1], [0], [0], [1], [0, 0, 1, 1], [], []>} : vector<8x32xbf16>, vector<32x96xbf16>, vector<8x96xf32> -> vector<8x96xf32>
    %328 = arith.addf %327, %13 : vector<8x96xf32>
    %329 = vector.extract_strided_slice %325 {offsets = [0, 0], sizes = [8, 32], strides = [1, 1]} : vector<8x96xf32> to vector<8x32xf32>
    %330 = vector.extract_strided_slice %328 {offsets = [0, 0], sizes = [8, 32], strides = [1, 1]} : vector<8x96xf32> to vector<8x32xf32>
    %331 = arith.addf %329, %330 : vector<8x32xf32>
    %332 = arith.negf %331 : vector<8x32xf32>
    %333 = math.exp %332 : vector<8x32xf32>
    %cst_93 = arith.constant 1.000000e+00 : f32
    %334 = vector.broadcast %cst_93 : f32 to vector<8x32xf32>
    %335 = arith.addf %334, %333 : vector<8x32xf32>
    %336 = arith.divf %334, %335 : vector<8x32xf32>
    %337 = vector.extract_strided_slice %325 {offsets = [0, 32], sizes = [8, 32], strides = [1, 1]} : vector<8x96xf32> to vector<8x32xf32>
    %338 = vector.extract_strided_slice %328 {offsets = [0, 32], sizes = [8, 32], strides = [1, 1]} : vector<8x96xf32> to vector<8x32xf32>
    %339 = arith.addf %337, %338 : vector<8x32xf32>
    %340 = arith.negf %339 : vector<8x32xf32>
    %341 = math.exp %340 : vector<8x32xf32>
    %cst_94 = arith.constant 1.000000e+00 : f32
    %342 = vector.broadcast %cst_94 : f32 to vector<8x32xf32>
    %343 = arith.addf %342, %341 : vector<8x32xf32>
    %344 = arith.divf %342, %343 : vector<8x32xf32>
    %345 = vector.extract_strided_slice %325 {offsets = [0, 64], sizes = [8, 32], strides = [1, 1]} : vector<8x96xf32> to vector<8x32xf32>
    %346 = vector.extract_strided_slice %328 {offsets = [0, 64], sizes = [8, 32], strides = [1, 1]} : vector<8x96xf32> to vector<8x32xf32>
    %347 = arith.mulf %336, %346 : vector<8x32xf32>
    %348 = arith.addf %345, %347 : vector<8x32xf32>
    %349 = math.tanh %348 : vector<8x32xf32>
    %cst_95 = arith.constant 1.000000e+00 : f32
    %350 = vector.broadcast %cst_95 : f32 to vector<8x32xf32>
    %351 = arith.subf %350, %344 : vector<8x32xf32>
    %352 = arith.mulf %351, %349 : vector<8x32xf32>
    %353 = arith.mulf %344, %294 : vector<8x32xf32>
    %354 = arith.addf %352, %353 : vector<8x32xf32>
    %355 = arith.truncf %354 : vector<8x32xf32> to vector<8x32xbf16>
    %356 = vector.shape_cast %355 : vector<8x32xbf16> to vector<8x1x32xbf16>
    "tpu.trace_start"() <{level = 10 : i32, message = "bqh,bsh->bqs"}> : () -> ()
    %cst_96 = arith.constant dense<0.000000e+00> : vector<8x1x128xf32>
    %357 = tpu.matmul %356, %8, %cst_96 {dimension_numbers = #tpu.dot_dimension_numbers<[2], [2], [1], [1], [0, 0, 0, 1, 1, 1], [0], [0]>} : vector<8x1x32xbf16>, vector<8x128x32xbf16>, vector<8x1x128xf32> -> vector<8x1x128xf32>
    "tpu.trace_stop"() : () -> ()
    %358 = vector.shape_cast %357 : vector<8x1x128xf32> to vector<8x128xf32>
    %359 = arith.addf %358, %19 : vector<8x128xf32>
    %cst_97 = arith.constant dense<0xFF800000> : vector<8xf32>
    %360 = vector.multi_reduction <maximumf>, %359, %cst_97 [1] : vector<8x128xf32> to vector<8xf32>
    %361 = vector.shape_cast %360 : vector<8xf32> to vector<8x1xf32>
    %362 = vector.broadcast %361 : vector<8x1xf32> to vector<8x128xf32>
    %363 = arith.subf %359, %362 : vector<8x128xf32>
    %364 = math.exp %363 : vector<8x128xf32>
    %cst_98 = arith.constant dense<0.000000e+00> : vector<8xf32>
    %365 = vector.multi_reduction <add>, %364, %cst_98 [1] : vector<8x128xf32> to vector<8xf32>
    %366 = vector.shape_cast %365 : vector<8xf32> to vector<8x1xf32>
    %367 = tpu.reciprocal %366 {approx = true} : vector<8x1xf32> -> vector<8x1xf32>
    %368 = vector.broadcast %367 : vector<8x1xf32> to vector<8x128xf32>
    %369 = arith.mulf %364, %368 : vector<8x128xf32>
    %370 = arith.truncf %369 : vector<8x128xf32> to vector<8x128xbf16>
    %371 = vector.shape_cast %370 : vector<8x128xbf16> to vector<8x1x128xbf16>
    "tpu.trace_start"() <{level = 10 : i32, message = "bqs,bsh->bqh"}> : () -> ()
    %cst_99 = arith.constant dense<0.000000e+00> : vector<8x1x32xf32>
    %372 = tpu.matmul %371, %8, %cst_99 {dimension_numbers = #tpu.dot_dimension_numbers<[2], [1], [1], [2], [0, 0, 0, 1, 1, 2], [0], [0]>} : vector<8x1x128xbf16>, vector<8x128x32xbf16>, vector<8x1x32xf32> -> vector<8x1x32xf32>
    "tpu.trace_stop"() : () -> ()
    %373 = vector.shape_cast %372 : vector<8x1x32xf32> to vector<8x32xf32>
    %374 = arith.truncf %373 : vector<8x32xf32> to vector<8x32xbf16>
    %c0_100 = arith.constant 0 : index
    %c5 = arith.constant 5 : index
    %c0_101 = arith.constant 0 : index
    %375 = vector.load %arg8[%c0_100, %c5, %c0_101] : memref<8x6x128xf32, #tpu.memory_space<vmem>>, vector<8x1x128xf32>
    %376 = vector.shape_cast %375 : vector<8x1x128xf32> to vector<8x128xf32>
    %377 = vector.shape_cast %369 : vector<8x128xf32> to vector<8x1x128xf32>
    tpu.vector_store %arg8[%c0_100, %c5, %c0_101], %377 {strides = array<i32>} : memref<8x6x128xf32, #tpu.memory_space<vmem>>, vector<8x1x128xf32>,
    %378 = tpu.concatenate %374, %355 in 1 : vector<8x32xbf16>, vector<8x32xbf16> -> vector<8x64xbf16>
    %c0_102 = arith.constant 0 : index
    %c5_103 = arith.constant 5 : index
    %c0_104 = arith.constant 0 : index
    %379 = vector.load %arg9[%c0_102, %c5_103, %c0_104] : memref<8x6x64xbf16, #tpu.memory_space<vmem>>, vector<8x1x64xbf16>
    %380 = vector.shape_cast %379 : vector<8x1x64xbf16> to vector<8x64xbf16>
    %381 = vector.shape_cast %378 : vector<8x64xbf16> to vector<8x1x64xbf16>
    tpu.vector_store %arg9[%c0_102, %c5_103, %c0_104], %381 {strides = array<i32>} : memref<8x6x64xbf16, #tpu.memory_space<vmem>>, vector<8x1x64xbf16>,
    return
  }
}

</mosaic_0001>

<bundles_post_ra>
// kernel: tpu_custom_call.1
= control target key start
LH: loop header
LB: loop body
LE: loop exit
PB: predicated region body
PF: predicated region fallthrough
CT: control target
= control target key end

     0   :  { %v16331_v0 = vmov 0.0   ;;  %vm11686_vm0 = vmmov 0   ;;  %vm68_vm1 = vcmask 130048   ;;  %v11687_v6 = vmov 0   ;;  %s11688_s25 = smov 64   ;;  %s11689_s26 = smov 96   ;;  %s16177_s4 = inlined_call_operand.vmem [shape: bf16[32,96], index: 4, kind: input, shape index: {}]   ;;  %s16178_s3 = inlined_call_operand.vmem [shape: bf16[16,96], index: 3, kind: input, shape index: {}]   ;;  %s16179_s0 = inlined_call_operand.vmem [shape: bf16[6,8,16], index: 0, kind: input, shape index: {}]   ;;  %s16180_s5 = inlined_call_operand.vmem [shape: bf16[32,96], index: 5, kind: input, shape index: {}]   ;;  %s16181_s2 = inlined_call_operand.vmem [shape: f32[8,32], index: 2, kind: input, shape index: {}]   ;;  %s16182_s6 = inlined_call_operand.vmem [shape: f32[1,96], index: 6, kind: input, shape index: {}]   ;;  %s16183_s7 = inlined_call_operand.vmem [shape: f32[1,96], index: 7, kind: input, shape index: {}]   ;;  %s16184_s1 = inlined_call_operand.vmem [shape: bf16[8,128,32], index: 1, kind: input, shape index: {}]   ;;  %s16185_s8 = inlined_call_operand.vmem [shape: f32[8,6,128], index: 8, kind: output, shape index: {0}]   ;;  %s16186_s9 = inlined_call_operand.vmem [shape: bf16[8,6,64], index: 9, kind: output, shape index: {1}]  }
   0x1   :  { %9094 = vmatprep.subr.bf16.mxu1 %v16331_v0  ;;  %v11119_v1 = vld [vmem:[%s16177_s4 + $0x8] sm:$0xff]   ;;  %9080 = vmatprep.subr.bf16.mxu0 %v16331_v0  ;;  %v11120_v2 = vld [vmem:[%s16178_s3] sm:$0xff]   ;;  %vm295_vm2 = vcmask 261120   ;;  %s11690_s27 = smov 32   ;;  %v11804_v38 = vld [vmem:[%s16184_s1 + $0x38] sm:$0xff]   ;;  %vm1389_vm4 = vcmask 1041409  }
   0x2   :  { %9082 = vmatprep.mubr.msk.bf16.mxu0 %vm11686_vm0, %v16331_v0  ;;  %9098 = vmatprep.mubr.msk.bf16.mxu1 %vm11686_vm0, %v16331_v0  ;;  %v11121_v3 = vld [vmem:[%s16177_s4] sm:$0xff]   ;;  %v11123_v5 = vld [vmem:[%s16180_s5 + $0x8] sm:$0xff]   ;;  %v11809_v39 = vld [vmem:[%s16184_s1 + $0x78] sm:$0xff]   ;;  %v11814_v40 = vsel %vm295_vm2, %v11804_v38, 0  ;;  %vm1392_vm5 = vcmask 1042434   ;;  %vm1395_vm6 = vcmask 1043459  }
   0x3   :  { %9095 = vmatpush3.bf16.msra.mxu1 %v11119_v1  ;;  %9081 = vmatpush3.bf16.msra.mxu0 %v11120_v2  ;;  %v11122_v4 = vld [vmem:[%s16179_s0] sm:$0xff]   ;;  %v11137_v37 = vld [vmem:[%s16179_s0 + $0x8] sm:$0xff]   ;;  %16348 = vst [vmem:[#allocation3_spill] sm:$0xff] %v11814_v40  ;;  %v11821_v41 = vsel %vm295_vm2, %v11809_v39, 0  ;;  %v11140_v42 = vld [vmem:[%s16179_s0 + $0x10] sm:$0xff]   ;;  %vm1398_vm7 = vcmask 1044484  }
   0x4   :  { %9096 = vmatprep.subr.bf16.mxu1 %v16331_v0  ;;  %9110 = vmatprep.subr.bf16.mxu0 %v16331_v0  ;;  %v11124_v7 = vld [vmem:[%s16180_s5] sm:$0xff]   ;;  %16349 = vst [vmem:[#allocation4_spill] sm:$0xff] %v11821_v41  ;;  %v11831_v43 = vld [vmem:[%s16184_s1 + $0x30] sm:$0xff]   ;;  %v11846_v46 = vld [vmem:[%s16184_s1 + $0x28] sm:$0xff]   ;;  %vm1401_vm8 = vcmask 1045509   ;;  %vm1404_vm9 = vcmask 1046534  }
   0x5   :  { %v282_v8 = vld [vmem:[%s16181_s2] sm:$0xff]  ;;  %v11837_v44 = vld [vmem:[%s16184_s1 + $0x70] sm:$0xff]   ;;  %v11841_v45 = vsel %vm295_vm2, %v11831_v43, 0  ;;  %v11851_v47 = vld [vmem:[%s16184_s1 + $0x68] sm:$0xff]   ;;  %v11896_v55 = vsel %vm295_vm2, %v11846_v46, 0  ;;  %vm1407_vm10 = vcmask 1047559  }
   0x6   :  { %9083 = vmatmul.mubr.msk.bf16.vlgmr.msra.gmra.mxu0 %vm68_vm1, %v11122_v4  ;;  %v340_v9 = vpack.c.bf16 %v282_v8, %v282_v8  ;;  %v7986_v10 = vld [vmem:[%s16182_s6] ss:$0 sm:$0xff]  ;;  %16350 = vst [vmem:[#allocation5_spill] sm:$0xff] %v11841_v45  ;;  %v11855_v48 = vsel %vm295_vm2, %v11837_v44, 0  ;;  %v11871_v51 = vld [vmem:[%s16184_s1 + $0x18] sm:$0xff]   ;;  %v11886_v53 = vld [vmem:[%s16184_s1 + $0x10] sm:$0xff]  }
   0x7   :  { %9097 = vmatpush3.bf16.msra.mxu1 %v11121_v3  ;;  %9086 = vmatprep.mubr.msk.bf16.mxu0 %vm11686_vm0, %v16331_v0  ;;  %v7994_v21 = vld [vmem:[%s16183_s7] ss:$0 sm:$0xff]  ;;  %16351 = vst [vmem:[#allocation6_spill] sm:$0xff] %v11855_v48  ;;  %v11879_v52 = vld [vmem:[%s16184_s1 + $0x58] sm:$0xff]   ;;  %v11892_v54 = vld [vmem:[%s16184_s1 + $0x50] sm:$0xff]   ;;  %v11900_v56 = vsel %vm295_vm2, %v11851_v47, 0 }
   0x8   :  { %9102 = vmatprep.subr.bf16.mxu1 %v16331_v0  ;;  %9111 = vmatpush3.bf16.xpose.msra.mxu0 %v11814_v40  ;;  %v11860_v49 = vld [vmem:[%s16184_s1 + $0x20] sm:$0xff]   ;;  %16352 = vst [vmem:[#allocation7_spill] sm:$0xff] %v11896_v55  ;;  %16353 = vst [vmem:[#allocation8_spill] sm:$0xff] %v11900_v56  ;;  %v11912_v59 = vsel %vm295_vm2, %v11871_v51, 0  ;;  %v11916_v60 = vsel %vm295_vm2, %v11879_v52, 0  ;;  %v11920_v61 = vsel %vm295_vm2, %v11886_v53, 0 }
   0x9   :  { %9112 = vmatprep.subr.bf16.mxu0 %v16331_v0  ;;  %v11865_v50 = vld [vmem:[%s16184_s1 + $0x60] sm:$0xff]   ;;  %v11904_v57 = vsel %vm295_vm2, %v11860_v49, 0  ;;  %16356 = vst [vmem:[#allocation11_spill] sm:$0xff] %v11912_v59  ;;  %16357 = vst [vmem:[#allocation12_spill] sm:$0xff] %v11916_v60  ;;  %v11924_v62 = vsel %vm295_vm2, %v11892_v54, 0  ;;  %v11941_v63 = vld [vmem:[%s16184_s1 + $0x8] sm:$0xff]  }
   0xa   :  { %9099 = vmatmul.mubr.bf16.vlgmr.msra.gmra.mxu1 %v11687_v6  ;;  %16354 = vst [vmem:[#allocation9_spill] sm:$0xff] %v11904_v57  ;;  %v11908_v58 = vsel %vm295_vm2, %v11865_v50, 0  ;;  %16358 = vst [vmem:[#allocation13_spill] sm:$0xff] %v11920_v61  ;;  %v11947_v1 = vld [vmem:[%s16184_s1 + $0x48] sm:$0xff]   ;;  %v11954_v2 = vsel %vm295_vm2, %v11941_v63, 0  ;;  %v11966_v4 = vld [vmem:[%s16184_s1] sm:$0xff]  }
   0xb   :  { %9103 = vmatpush3.bf16.msra.mxu1 %v11123_v5  ;;  %9106 = vmatprep.mubr.msk.bf16.mxu1 %vm11686_vm0, %v16331_v0  ;;  %16355 = vst [vmem:[#allocation10_spill] sm:$0xff] %v11908_v58  ;;  %16359 = vst [vmem:[#allocation14_spill] sm:$0xff] %v11924_v62  ;;  %v11958_v3 = vsel %vm295_vm2, %v11947_v1, 0  ;;  %v11972_v5 = vld [vmem:[%s16184_s1 + $0x40] sm:$0xff]   ;;  %v11976_v6 = vsel %vm295_vm2, %v11966_v4, 0  ;;  %v12519_v40 = vld [vmem:[%s16184_s1 + $0x1d0] sm:$0xff]  }
   0xc   :  { %9104 = vmatprep.subr.bf16.mxu1 %v16331_v0  ;;  %16360 = vst [vmem:[#allocation15_spill] sm:$0xff] %v11954_v2  ;;  %16361 = vst [vmem:[#allocation16_spill] sm:$0xff] %v11958_v3  ;;  %vm2049_vm11 = vcmask 516096   ;;  %vm2050_vm12 = vsmask.f32 256 }
   0xd   :  { %16362 = vst [vmem:[#allocation17_spill] sm:$0xff] %v11976_v6  ;;  %16426 = vst [vmem:[#allocation81_spill] sm:$0xff] %v12519_v40  ;;  %vm3230_vm14 = vsmask.f32 7938 }
   0xe   :  { %9087 = vmatmul.mubr.msk.bf16.gmra.mxu0 %vm68_vm1, %v11137_v37  ;;  %vm12852_vm13 = vmand %vm2049_vm11, %vm2050_vm12  ;;  %vm5591_vm12 = vsmask.f32 7942 }
   0xf   :  { %9105 = vmatpush3.bf16.msra.mxu1 %v11124_v7  ;;  %9090 = vmatprep.mubr.msk.bf16.mxu0 %vm11686_vm0, %v16331_v0  ;;  %v11980_v7 = vsel %vm295_vm2, %v11972_v5, 0  ;;  %vm13520_vm15 = vmand %vm2049_vm11, %vm3230_vm14  ;;  %vm6771_vm14 = vcmask 518146  }
  0x10   :  { %9130 = vmatprep.subr.bf16.mxu1 %v16331_v0  ;;  %9113 = vmatpush3.bf16.xpose.msra.mxu0 %v11841_v45  ;;  %16363 = vst [vmem:[#allocation18_spill] sm:$0xff] %v11980_v7 }
  0x11   :  { %9114 = vmatprep.subr.bf16.mxu0 %v16331_v0 }
  0x12   :  { %9107 = vmatmul.mubr.msk.bf16.vlgmr.msra.gmra.mxu1 %vm295_vm2, %v340_v9  ;;  %v11691_v9 = vmov 1966171168  }
  0x13   :  { %9146 = vmatprep.mubr.msk.bf16.mxu1 %vm11686_vm0, %v16331_v0  ;;  %9131 = vmatpush3.bf16.xpose.msra.mxu1 %v11821_v41  ;;  %v12403_v41 = vld [vmem:[%s16184_s1 + $0x1f8] sm:$0xff]  }
  0x14   :  { %9132 = vmatprep.subr.bf16.mxu1 %v16331_v0  ;;  %16406 = vst [vmem:[#allocation61_spill] sm:$0xff] %v12403_v41 }
  0x16   :  { %9091 = vmatmul.mubr.msk.bf16.gmra.mxu0 %vm68_vm1, %v11140_v42  ;;  %vm4410_vm1 = vcmask 517121  }
  0x17   :  { %9126 = vmatprep.mubr.msk.bf16.mxu0 %vm11686_vm0, %v16331_v0 }
  0x18   :  { %9115 = vmatpush3.bf16.xpose.msra.mxu0 %v11896_v55  ;;  %v12497_v55 = vld [vmem:[%s16184_s1 + $0x1d8] sm:$0xff]  }
  0x19   :  { %9116 = vmatprep.subr.bf16.mxu0 %v16331_v0  ;;  %16422 = vst [vmem:[#allocation77_spill] sm:$0xff] %v12497_v55 }
  0x1b   :  { %9133 = vmatpush3.bf16.xpose.msra.mxu1 %v11855_v48 }
  0x1c   :  { %9134 = vmatprep.subr.bf16.mxu1 %v16331_v0 }
  0x20   :  { %9117 = vmatpush3.bf16.xpose.msra.mxu0 %v11904_v57 }
  0x21   :  { %9118 = vmatprep.subr.bf16.mxu0 %v16331_v0 }
  0x23   :  { %9135 = vmatpush3.bf16.xpose.msra.mxu1 %v11900_v56  ;;  %v12381_v56 = vld [vmem:[%s16184_s1 + $0x140] sm:$0xff]  }
  0x24   :  { %9136 = vmatprep.subr.bf16.mxu1 %v16331_v0 }
  0x28   :  { %9119 = vmatpush3.bf16.xpose.msra.mxu0 %v11912_v59  ;;  %v12475_v59 = vld [vmem:[%s16184_s1 + $0x1e0] sm:$0xff]  }
  0x29   :  { %9120 = vmatprep.subr.bf16.mxu0 %v16331_v0  ;;  %16418 = vst [vmem:[#allocation73_spill] sm:$0xff] %v12475_v59 }
  0x2b   :  { %9137 = vmatpush3.bf16.xpose.msra.mxu1 %v11908_v58 }
  0x2c   :  { %9138 = vmatprep.subr.bf16.mxu1 %v16331_v0 }
  0x30   :  { %9121 = vmatpush3.bf16.xpose.msra.mxu0 %v11920_v61 }
  0x31   :  { %9122 = vmatprep.subr.bf16.mxu0 %v16331_v0 }
  0x33   :  { %9139 = vmatpush3.bf16.xpose.msra.mxu1 %v11916_v60  ;;  %v12359_v60 = vld [vmem:[%s16184_s1 + $0x148] sm:$0xff]  }
  0x34   :  { %9140 = vmatprep.subr.bf16.mxu1 %v16331_v0 }
  0x38   :  { %9123 = vmatpush3.bf16.xpose.msra.mxu0 %v11954_v2  ;;  %v12453_v2 = vld [vmem:[%s16184_s1 + $0x1e8] sm:$0xff]  }
  0x39   :  { %9124 = vmatprep.subr.bf16.mxu0 %v16331_v0  ;;  %16414 = vst [vmem:[#allocation69_spill] sm:$0xff] %v12453_v2 }
  0x3b   :  { %9141 = vmatpush3.bf16.xpose.msra.mxu1 %v11924_v62 }
  0x3c   :  { %9142 = vmatprep.subr.bf16.mxu1 %v16331_v0 }
  0x40   :  { %9125 = vmatpush3.bf16.xpose.msra.mxu0 %v11976_v6 }
  0x41   :  { %9150 = vmatprep.subr.bf16.mxu0 %v16331_v0 }
  0x43   :  { %9143 = vmatpush3.bf16.xpose.msra.mxu1 %v11958_v3  ;;  %v12337_v3 = vld [vmem:[%s16184_s1 + $0x150] sm:$0xff]  }
  0x44   :  { %9144 = vmatprep.subr.bf16.mxu1 %v16331_v0 }
  0x4b   :  { %9145 = vmatpush3.bf16.xpose.msra.mxu1 %v11980_v7 }
  0x4c   :  { %9170 = vmatprep.subr.bf16.mxu1 %v16331_v0 }
  0xc6   :  { %v112_v11 = vpop.f32.mrf.mxu0 }
  0xc7   :  { %v113_v12 = vadd.f32 %v7986_v10, %v112_v11  ;;  %v429_v10 = vunpack.c.l.s4 %v11691_v9 }
  0xc8   :  { %v9084_v13 = vpop.f32.mrf.mxu0 }
  0xc9   :  { %v430_v13 = vunpack.c.0.s8 %v429_v10 }
  0xca   :  { %v333_v14 = vpop.f32.mrf.mxu1  ;;  %v11787_v16 = vpop.f32.mrf.mxu0 }
  0xcb   :  { %v339_v15 = vadd.f32 %v333_v14, %v113_v12  ;;  %16347 = vst [vmem:[#allocation2_spill] sm:$0xff] %v11787_v16  ;;  %v12315_v16 = vld [vmem:[%s16184_s1 + $0x158] sm:$0xff]  }
  0xcc   :  { %v9100_v17 = vpop.f32.mrf.mxu1  ;;  %v9085_v18 = vpop.f32.mrf.mxu0 }
  0xce   :  { %v336_v19 = vpop.f32.mrf.mxu1 }
  0xd0   :  { %v9101_v20 = vpop.f32.mrf.mxu1 }
  0xd2   :  { %v390_v22 = vpop.f32.mrf.mxu1 }
  0xd3   :  { %v391_v23 = vadd.f32 %v7994_v21, %v390_v22 }
  0xd4   :  { %v9108_v24 = vpop.f32.mrf.mxu1 }
  0xd5   :  { %404 = vrot.lane.b32.xlu0 %v391_v23, %s11688_s25  ;;  %v396_v27 = vadd.f32 %v391_v23, %v339_v15 }
  0xd6   :  { %v393_v25 = vpop.f32.mrf.mxu1 }
  0xd7   :  { %v8000_v28 = vmul.f32 -1.442695, %v396_v27 }
  0xd8   :  { %v9109_v26 = vpop.f32.mrf.mxu1 }
  0xd9   :  { %11191 = vpow2.f32 %v8000_v28 }
  0xe6   :  { %v11192_v29 = vpop.eup %11191 }
  0xe7   :  { %v400_v30 = vadd.f32 1.0, %v11192_v29 }
  0xe9   :  { %11193 = vrcp.f32 %v400_v30 }
  0xf6   :  { %v11793_v31 = vpop.eup %11193 }
  0xf7   :  { %v414_v12 = vsub.f32 1.0, %v11793_v31 }
 0x147   :  { %v405_v32 = vpop.permute.xlu0 %404 }
 0x148   :  { %v407_v33 = vmul.f32 %v11793_v31, %v405_v32 }
 0x14a   :  { %409 = vrot.lane.b32.xlu0 %v407_v33, %s11688_s25 }
 0x1bc   :  { %v410_v34 = vpop.permute.xlu0 %409 }
 0x1bd   :  { %v412_v35 = vadd.f32 %v410_v34, %v339_v15 }
 0x1bf   :  { %11195 = vtanh.f32 %v412_v35 }
 0x1cc   :  { %v11196_v36 = vpop.eup %11195 }
 0x1cd   :  { %416 = vrot.lane.b32.xlu1 %v11196_v36, %s11689_s26 }
 0x1d1   :  { %421 = vrot.lane.b32.xlu1 %v282_v8, %s11690_s27  ;;  %v16187_v8 = vlaneseq }
 0x1d3   :  { %v11988_v14 = vshrl.u32 %v16187_v8, 7  ;;  %v12162_v8 = vld [vmem:[%s16184_s1 + $0x88] sm:$0xff]  }
 0x1d5   :  { %16364 = vst [vmem:[#allocation19_spill] sm:$0xff] %v11988_v14  ;;  %v11992_v19 = vsub.s32 %v430_v13, %v11988_v14  ;;  %v12003_v23 = vsub.s32 0, %v11988_v14 }
 0x1d7   :  { %16365 = vst [vmem:[#allocation20_spill] sm:$0xff] %v11992_v19  ;;  %16368 = vst [vmem:[#allocation23_spill] sm:$0xff] %v12003_v23 }
 0x23f   :  { %v417_v11 = vpop.permute.xlu1 %416 }
 0x240   :  { %v419_v17 = vmul.f32 %v417_v11, %v414_v12 }
 0x243   :  { %v422_v15 = vpop.permute.xlu1 %421 }
 0x244   :  { %v424_v18 = vmul.f32 %v11793_v31, %v422_v15 }
 0x246   :  { %v11994_v20 = vadd.f32 %v424_v18, %v419_v17 }
 0x248   :  { %16366 = vst [vmem:[#allocation21_spill] sm:$0xff] %v11994_v20  ;;  %v11998_v21 = vpack.c.bf16 %v11994_v20, %v11994_v20 }
 0x24a   :  { %16367 = vst [vmem:[#allocation22_spill] sm:$0xff] %v11998_v21  ;;  %v434_v22 = vrot.slane %v11998_v21, %v11992_v19 }
 0x24c   :  { %v435_v24 = vcombine.high %v434_v22, %v434_v22  ;;  %v442_v25 = vrot.slane %v434_v22, %v11992_v19 }
 0x24e   :  { %v8001_v26 = vpack.i.b16 %v442_v25, %v442_v25  ;;  %v453_v27 = vunpack.i.h.s16 %v442_v25  ;;  %v449_v28 = vrot.slane %v435_v24, %v11992_v19  ;;  %v450_v29 = vcombine.high %v442_v25, %v442_v25  ;;  %v12026_v25 = vld [vmem:[%s16184_s1 + $0xb8] sm:$0xff]  }
 0x24f   :  { %v12412_v19 = vsel %vm295_vm2, %v12403_v41, 0 }
 0x250   :  { %v464_v30 = vrot.slane %v8001_v26, %v12003_v23  ;;  %v574_v31 = vpack.i.b16 %v453_v27, %v453_v27  ;;  %v8020_v32 = vpack.i.b16 %v449_v28, %v449_v28  ;;  %v455_v33 = vunpack.i.h.s16 %v449_v28  ;;  %v12031_v26 = vld [vmem:[%s16184_s1 + $0xf8] sm:$0xff]   ;;  %16408 = vst [vmem:[#allocation63_spill] sm:$0xff] %v12412_v19 }
 0x251   :  { %v457_v36 = vunpack.i.h.s16 %v450_v29  ;;  %v451_v37 = vcombine.high %v449_v28, %v449_v28  ;;  %v8039_v9 = vpack.i.b16 %v450_v29, %v450_v29  ;;  %v12035_v27 = vsel %vm295_vm2, %v12026_v25, 0 }
 0x252   :  { %465 = vrot.lane.b32.xlu0 %v464_v30, %s11689_s26  ;;  %v578_v34 = vrot.slane %v574_v31, %v12003_v23  ;;  %v802_v35 = vpack.i.b16 %v455_v33, %v455_v33  ;;  %v692_v42 = vrot.slane %v8020_v32, %v12003_v23  ;;  %16369 = vst [vmem:[#allocation24_spill] sm:$0xff] %v12035_v27  ;;  %v12040_v29 = vsel %vm295_vm2, %v12031_v26, 0  ;;  %v12050_v31 = vld [vmem:[%s16184_s1 + $0xb0] sm:$0xff]  }
 0x253   :  { %v1030_v11 = vpack.i.b16 %v457_v36, %v457_v36  ;;  %v459_v12 = vunpack.i.h.s16 %v451_v37  ;;  %v920_v13 = vrot.slane %v8039_v9, %v12003_v23  ;;  %v8058_v15 = vpack.i.b16 %v451_v37, %v451_v37  ;;  %16370 = vst [vmem:[#allocation25_spill] sm:$0xff] %v12040_v29  ;;  %v12059_v32 = vld [vmem:[%s16184_s1 + $0xf0] sm:$0xff]   ;;  %v12081_v36 = vld [vmem:[%s16184_s1 + $0xe8] sm:$0xff]   ;;  %v12096_v9 = vld [vmem:[%s16184_s1 + $0xa0] sm:$0xff]  }
 0x254   :  { %579 = vrot.lane.b32.xlu1 %v578_v34, %s11689_s26  ;;  %v806_v10 = vrot.slane %v802_v35, %v12003_v23  ;;  %v12063_v33 = vsel %vm295_vm2, %v12050_v31, 0  ;;  %v12067_v34 = vsel %vm295_vm2, %v12059_v32, 0  ;;  %v12074_v35 = vld [vmem:[%s16184_s1 + $0xa8] sm:$0xff]  }
 0x255   :  { %v1034_v17 = vrot.slane %v1030_v11, %v12003_v23  ;;  %v1258_v18 = vpack.i.b16 %v459_v12, %v459_v12  ;;  %v1148_v22 = vrot.slane %v8058_v15, %v12003_v23  ;;  %16371 = vst [vmem:[#allocation26_spill] sm:$0xff] %v12063_v33  ;;  %16372 = vst [vmem:[#allocation27_spill] sm:$0xff] %v12067_v34  ;;  %v12085_v37 = vsel %vm295_vm2, %v12074_v35, 0  ;;  %v12125_v15 = vld [vmem:[%s16184_s1 + $0xd8] sm:$0xff]  }
 0x256   :  { %693 = vrot.lane.b32.xlu0 %v692_v42, %s11689_s26  ;;  %16373 = vst [vmem:[#allocation28_spill] sm:$0xff] %v12085_v37  ;;  %v12089_v42 = vsel %vm295_vm2, %v12081_v36, 0  ;;  %v12107_v11 = vsel %vm295_vm2, %v12096_v9, 0 }
 0x257   :  { %v1262_v24 = vrot.slane %v1258_v18, %v12003_v23  ;;  %16374 = vst [vmem:[#allocation29_spill] sm:$0xff] %v12089_v42  ;;  %16375 = vst [vmem:[#allocation30_spill] sm:$0xff] %v12107_v11  ;;  %v12133_v18 = vsel %vm295_vm2, %v12125_v15, 0  ;;  %v12293_v23 = vld [vmem:[%s16184_s1 + $0x160] sm:$0xff]  }
 0x258   :  { %807 = vrot.lane.b32.xlu1 %v806_v10, %s11689_s26  ;;  %v12103_v10 = vld [vmem:[%s16184_s1 + $0xe0] sm:$0xff]   ;;  %16378 = vst [vmem:[#allocation33_spill] sm:$0xff] %v12133_v18 }
 0x259   :  { %v12111_v12 = vsel %vm295_vm2, %v12103_v10, 0 }
 0x25a   :  { %921 = vrot.lane.b32.xlu0 %v920_v13, %s11689_s26  ;;  %16376 = vst [vmem:[#allocation31_spill] sm:$0xff] %v12111_v12  ;;  %v12118_v13 = vld [vmem:[%s16184_s1 + $0x98] sm:$0xff]  }
 0x25c   :  { %1035 = vrot.lane.b32.xlu1 %v1034_v17, %s11689_s26  ;;  %v12129_v17 = vsel %vm295_vm2, %v12118_v13, 0 }
 0x25d   :  { %16377 = vst [vmem:[#allocation32_spill] sm:$0xff] %v12129_v17 }
 0x25e   :  { %1149 = vrot.lane.b32.xlu0 %v1148_v22, %s11689_s26  ;;  %v12140_v22 = vld [vmem:[%s16184_s1 + $0x90] sm:$0xff]  }
 0x260   :  { %1263 = vrot.lane.b32.xlu1 %v1262_v24, %s11689_s26  ;;  %v12147_v24 = vld [vmem:[%s16184_s1 + $0xd0] sm:$0xff]  }
 0x2c4   :  { %v466_v28 = vpop.permute.xlu0 %465 }
 0x2c5   :  { %9127 = vmatmul.mubr.msk.bf16.vlgmr.msra.gmra.mxu0 %vm295_vm2, %v466_v28  ;;  %v12151_v28 = vsel %vm295_vm2, %v12140_v22, 0 }
 0x2c6   :  { %9151 = vmatpush3.bf16.xpose.msra.mxu0 %v12035_v27  ;;  %v580_v30 = vpop.permute.xlu1 %579  ;;  %9166 = vmatprep.mubr.msk.bf16.mxu0 %vm11686_vm0, %v16331_v0  ;;  %16379 = vst [vmem:[#allocation34_spill] sm:$0xff] %v12151_v28 }
 0x2c7   :  { %9147 = vmatmul.mubr.msk.bf16.vlgmr.msra.gmra.mxu1 %vm295_vm2, %v580_v30  ;;  %9152 = vmatprep.subr.bf16.mxu0 %v16331_v0  ;;  %v12155_v30 = vsel %vm295_vm2, %v12147_v24, 0 }
 0x2c8   :  { %9171 = vmatpush3.bf16.xpose.msra.mxu1 %v12040_v29  ;;  %9186 = vmatprep.mubr.msk.bf16.mxu1 %vm11686_vm0, %v16331_v0  ;;  %16380 = vst [vmem:[#allocation35_spill] sm:$0xff] %v12155_v30  ;;  %v12271_v29 = vld [vmem:[%s16184_s1 + $0x168] sm:$0xff]  }
 0x2c9   :  { %9172 = vmatprep.subr.bf16.mxu1 %v16331_v0 }
 0x2ce   :  { %9153 = vmatpush3.bf16.xpose.msra.mxu0 %v12063_v33  ;;  %v808_v33 = vpop.permute.xlu1 %807 }
 0x2cf   :  { %9154 = vmatprep.subr.bf16.mxu0 %v16331_v0 }
 0x2d0   :  { %9173 = vmatpush3.bf16.xpose.msra.mxu1 %v12067_v34 }
 0x2d1   :  { %9174 = vmatprep.subr.bf16.mxu1 %v16331_v0 }
 0x2d2   :  { %v1036_v6 = vpop.permute.xlu1 %1035 }
 0x2d6   :  { %9155 = vmatpush3.bf16.xpose.msra.mxu0 %v12085_v37 }
 0x2d7   :  { %9156 = vmatprep.subr.bf16.mxu0 %v16331_v0 }
 0x2d8   :  { %9175 = vmatpush3.bf16.xpose.msra.mxu1 %v12089_v42 }
 0x2d9   :  { %9176 = vmatprep.subr.bf16.mxu1 %v16331_v0 }
 0x2de   :  { %9157 = vmatpush3.bf16.xpose.msra.mxu0 %v12107_v11 }
 0x2df   :  { %9158 = vmatprep.subr.bf16.mxu0 %v16331_v0 }
 0x2e0   :  { %9177 = vmatpush3.bf16.xpose.msra.mxu1 %v12111_v12 }
 0x2e1   :  { %9178 = vmatprep.subr.bf16.mxu1 %v16331_v0 }
 0x2e6   :  { %9159 = vmatpush3.bf16.xpose.msra.mxu0 %v12129_v17  ;;  %v12171_v17 = vld [vmem:[%s16184_s1 + $0xc8] sm:$0xff]  }
 0x2e7   :  { %9160 = vmatprep.subr.bf16.mxu0 %v16331_v0  ;;  %v12181_v42 = vsel %vm295_vm2, %v12171_v17, 0 }
 0x2e8   :  { %9179 = vmatpush3.bf16.xpose.msra.mxu1 %v12133_v18  ;;  %v12165_v18 = vpop.f32.mrf.mxu0  ;;  %16384 = vst [vmem:[#allocation39_spill] sm:$0xff] %v12181_v42 }
 0x2e9   :  { %9180 = vmatprep.subr.bf16.mxu1 %v16331_v0  ;;  %16381 = vst [vmem:[#allocation36_spill] sm:$0xff] %v12165_v18 }
 0x2ea   :  { %v9088_v12 = vpop.f32.mrf.mxu0 }
 0x2ec   :  { %v12177_v11 = vpop.f32.mrf.mxu0 }
 0x2ed   :  { %16383 = vst [vmem:[#allocation38_spill] sm:$0xff] %v12177_v11  ;;  %v12197_v11 = vld [vmem:[%s16184_s1 + $0xc0] sm:$0xff]  }
 0x2ee   :  { %9161 = vmatpush3.bf16.xpose.msra.mxu0 %v12151_v28  ;;  %v12175_v28 = vsel %vm295_vm2, %v12162_v8, 0  ;;  %v9089_v18 = vpop.f32.mrf.mxu0  ;;  %v12207_v34 = vsel %vm295_vm2, %v12197_v11, 0 }
 0x2ef   :  { %9162 = vmatprep.subr.bf16.mxu0 %v16331_v0  ;;  %16382 = vst [vmem:[#allocation37_spill] sm:$0xff] %v12175_v28  ;;  %16388 = vst [vmem:[#allocation43_spill] sm:$0xff] %v12207_v34 }
 0x2f0   :  { %9181 = vmatpush3.bf16.xpose.msra.mxu1 %v12155_v30  ;;  %v12188_v30 = vld [vmem:[%s16184_s1 + $0x80] sm:$0xff]   ;;  %v12191_v12 = vpop.f32.mrf.mxu0 }
 0x2f1   :  { %9182 = vmatprep.subr.bf16.mxu1 %v16331_v0  ;;  %16385 = vst [vmem:[#allocation40_spill] sm:$0xff] %v12191_v12  ;;  %v12201_v18 = vsel %vm295_vm2, %v12188_v30, 0 }
 0x2f2   :  { %16386 = vst [vmem:[#allocation41_spill] sm:$0xff] %v12201_v18 }
 0x2f6   :  { %9163 = vmatpush3.bf16.xpose.msra.mxu0 %v12175_v28  ;;  %v9092_v28 = vpop.f32.mrf.mxu0 }
 0x2f7   :  { %9164 = vmatprep.subr.bf16.mxu0 %v16331_v0  ;;  %v12221_v28 = vld [vmem:[%s16184_s1 + $0x178] sm:$0xff]  }
 0x2f8   :  { %9183 = vmatpush3.bf16.xpose.msra.mxu1 %v12181_v42  ;;  %v12203_v37 = vpop.f32.mrf.mxu0  ;;  %v12214_v42 = vld [vmem:[%s16184_s1 + $0x138] sm:$0xff]  }
 0x2f9   :  { %9184 = vmatprep.subr.bf16.mxu1 %v16331_v0  ;;  %16387 = vst [vmem:[#allocation42_spill] sm:$0xff] %v12203_v37  ;;  %v12225_v37 = vsel %vm295_vm2, %v12214_v42, 0 }
 0x2fa   :  { %v9093_v12 = vpop.f32.mrf.mxu0  ;;  %16389 = vst [vmem:[#allocation44_spill] sm:$0xff] %v12225_v37 }
 0x2fb   :  { %v694_v12 = vpop.permute.xlu0 %693 }
 0x2fe   :  { %9165 = vmatpush3.bf16.xpose.msra.mxu0 %v12201_v18  ;;  %v12230_v18 = vsel %vm295_vm2, %v12221_v28, 0 }
 0x2ff   :  { %9190 = vmatprep.subr.bf16.mxu0 %v16331_v0  ;;  %16390 = vst [vmem:[#allocation45_spill] sm:$0xff] %v12230_v18 }
 0x300   :  { %9185 = vmatpush3.bf16.xpose.msra.mxu1 %v12207_v34  ;;  %v12240_v34 = vld [vmem:[%s16184_s1 + $0x130] sm:$0xff]  }
 0x301   :  { %9210 = vmatprep.subr.bf16.mxu1 %v16331_v0 }
 0x305   :  { %9167 = vmatmul.mubr.msk.bf16.vlgmr.msra.gmra.mxu0 %vm295_vm2, %v694_v12  ;;  %v12249_v12 = vld [vmem:[%s16184_s1 + $0x170] sm:$0xff]  }
 0x306   :  { %9191 = vmatpush3.bf16.xpose.msra.mxu0 %v12225_v37  ;;  %9206 = vmatprep.mubr.msk.bf16.mxu0 %vm11686_vm0, %v16331_v0  ;;  %v12257_v37 = vsel %vm295_vm2, %v12249_v12, 0 }
 0x307   :  { %9187 = vmatmul.mubr.msk.bf16.vlgmr.msra.gmra.mxu1 %vm295_vm2, %v808_v33  ;;  %9192 = vmatprep.subr.bf16.mxu0 %v16331_v0  ;;  %v12253_v33 = vsel %vm295_vm2, %v12240_v34, 0  ;;  %16392 = vst [vmem:[#allocation47_spill] sm:$0xff] %v12257_v37 }
 0x308   :  { %9211 = vmatpush3.bf16.xpose.msra.mxu1 %v12230_v18  ;;  %9226 = vmatprep.mubr.msk.bf16.mxu1 %vm11686_vm0, %v16331_v0  ;;  %16391 = vst [vmem:[#allocation46_spill] sm:$0xff] %v12253_v33  ;;  %v12264_v18 = vld [vmem:[%s16184_s1 + $0x128] sm:$0xff]  }
 0x309   :  { %9212 = vmatprep.subr.bf16.mxu1 %v16331_v0  ;;  %v12275_v27 = vsel %vm295_vm2, %v12264_v18, 0 }
 0x30a   :  { %16393 = vst [vmem:[#allocation48_spill] sm:$0xff] %v12275_v27 }
 0x30e   :  { %9193 = vmatpush3.bf16.xpose.msra.mxu0 %v12253_v33  ;;  %v12279_v33 = vsel %vm295_vm2, %v12271_v29, 0 }
 0x30f   :  { %9194 = vmatprep.subr.bf16.mxu0 %v16331_v0  ;;  %16394 = vst [vmem:[#allocation49_spill] sm:$0xff] %v12279_v33 }
 0x310   :  { %9213 = vmatpush3.bf16.xpose.msra.mxu1 %v12257_v37  ;;  %v12286_v37 = vld [vmem:[%s16184_s1 + $0x120] sm:$0xff]  }
 0x311   :  { %9214 = vmatprep.subr.bf16.mxu1 %v16331_v0  ;;  %v12297_v20 = vsel %vm295_vm2, %v12286_v37, 0 }
 0x312   :  { %16395 = vst [vmem:[#allocation50_spill] sm:$0xff] %v12297_v20 }
 0x316   :  { %9195 = vmatpush3.bf16.xpose.msra.mxu0 %v12275_v27  ;;  %v12301_v27 = vsel %vm295_vm2, %v12293_v23, 0 }
 0x317   :  { %9196 = vmatprep.subr.bf16.mxu0 %v16331_v0  ;;  %16396 = vst [vmem:[#allocation51_spill] sm:$0xff] %v12301_v27 }
 0x318   :  { %9215 = vmatpush3.bf16.xpose.msra.mxu1 %v12279_v33  ;;  %v12308_v33 = vld [vmem:[%s16184_s1 + $0x118] sm:$0xff]  }
 0x319   :  { %9216 = vmatprep.subr.bf16.mxu1 %v16331_v0  ;;  %v12319_v7 = vsel %vm295_vm2, %v12308_v33, 0 }
 0x31a   :  { %16397 = vst [vmem:[#allocation52_spill] sm:$0xff] %v12319_v7 }
 0x31e   :  { %9197 = vmatpush3.bf16.xpose.msra.mxu0 %v12297_v20  ;;  %v12323_v20 = vsel %vm295_vm2, %v12315_v16, 0 }
 0x31f   :  { %9198 = vmatprep.subr.bf16.mxu0 %v16331_v0  ;;  %16398 = vst [vmem:[#allocation53_spill] sm:$0xff] %v12323_v20 }
 0x320   :  { %9217 = vmatpush3.bf16.xpose.msra.mxu1 %v12301_v27  ;;  %v12330_v27 = vld [vmem:[%s16184_s1 + $0x110] sm:$0xff]  }
 0x321   :  { %9218 = vmatprep.subr.bf16.mxu1 %v16331_v0  ;;  %v12341_v62 = vsel %vm295_vm2, %v12330_v27, 0 }
 0x322   :  { %16399 = vst [vmem:[#allocation54_spill] sm:$0xff] %v12341_v62 }
 0x326   :  { %9199 = vmatpush3.bf16.xpose.msra.mxu0 %v12319_v7  ;;  %v12345_v7 = vsel %vm295_vm2, %v12337_v3, 0 }
 0x327   :  { %9200 = vmatprep.subr.bf16.mxu0 %v16331_v0  ;;  %16400 = vst [vmem:[#allocation55_spill] sm:$0xff] %v12345_v7 }
 0x328   :  { %9219 = vmatpush3.bf16.xpose.msra.mxu1 %v12323_v20  ;;  %v12352_v20 = vld [vmem:[%s16184_s1 + $0x108] sm:$0xff]  }
 0x329   :  { %9220 = vmatprep.subr.bf16.mxu1 %v16331_v0  ;;  %v12363_v58 = vsel %vm295_vm2, %v12352_v20, 0 }
 0x32a   :  { %16401 = vst [vmem:[#allocation56_spill] sm:$0xff] %v12363_v58 }
 0x32e   :  { %9201 = vmatpush3.bf16.xpose.msra.mxu0 %v12341_v62  ;;  %v12367_v62 = vsel %vm295_vm2, %v12359_v60, 0 }
 0x32f   :  { %9202 = vmatprep.subr.bf16.mxu0 %v16331_v0  ;;  %16402 = vst [vmem:[#allocation57_spill] sm:$0xff] %v12367_v62 }
 0x330   :  { %9221 = vmatpush3.bf16.xpose.msra.mxu1 %v12345_v7  ;;  %v12374_v7 = vld [vmem:[%s16184_s1 + $0x100] sm:$0xff]  }
 0x331   :  { %9222 = vmatprep.subr.bf16.mxu1 %v16331_v0  ;;  %v12385_v48 = vsel %vm295_vm2, %v12374_v7, 0 }
 0x332   :  { %16403 = vst [vmem:[#allocation58_spill] sm:$0xff] %v12385_v48 }
 0x336   :  { %9203 = vmatpush3.bf16.xpose.msra.mxu0 %v12363_v58  ;;  %v12389_v58 = vsel %vm295_vm2, %v12381_v56, 0 }
 0x337   :  { %9204 = vmatprep.subr.bf16.mxu0 %v16331_v0  ;;  %16404 = vst [vmem:[#allocation59_spill] sm:$0xff] %v12389_v58 }
 0x338   :  { %9223 = vmatpush3.bf16.xpose.msra.mxu1 %v12367_v62  ;;  %v12396_v62 = vld [vmem:[%s16184_s1 + $0x1b8] sm:$0xff]  }
 0x339   :  { %9224 = vmatprep.subr.bf16.mxu1 %v16331_v0  ;;  %16405 = vst [vmem:[#allocation60_spill] sm:$0xff] %v12396_v62  ;;  %v12407_v14 = vsel %vm295_vm2, %v12396_v62, 0 }
 0x33a   :  { %16407 = vst [vmem:[#allocation62_spill] sm:$0xff] %v12407_v14 }
 0x33e   :  { %9205 = vmatpush3.bf16.xpose.msra.mxu0 %v12385_v48  ;;  %v922_v48 = vpop.permute.xlu0 %921 }
 0x33f   :  { %9230 = vmatprep.subr.bf16.mxu0 %v16331_v0 }
 0x340   :  { %9225 = vmatpush3.bf16.xpose.msra.mxu1 %v12389_v58  ;;  %v12422_v58 = vld [vmem:[%s16184_s1 + $0x1b0] sm:$0xff]  }
 0x341   :  { %9250 = vmatprep.subr.bf16.mxu1 %v16331_v0  ;;  %16409 = vst [vmem:[#allocation64_spill] sm:$0xff] %v12422_v58 }
 0x345   :  { %9207 = vmatmul.mubr.msk.bf16.vlgmr.msra.gmra.mxu0 %vm295_vm2, %v922_v48  ;;  %v12431_v48 = vld [vmem:[%s16184_s1 + $0x1f0] sm:$0xff]  }
 0x346   :  { %9231 = vmatpush3.bf16.xpose.msra.mxu0 %v12407_v14  ;;  %9246 = vmatprep.mubr.msk.bf16.mxu0 %vm11686_vm0, %v16331_v0  ;;  %16410 = vst [vmem:[#allocation65_spill] sm:$0xff] %v12431_v48  ;;  %v12439_v14 = vsel %vm295_vm2, %v12431_v48, 0 }
 0x347   :  { %9227 = vmatmul.mubr.msk.bf16.vlgmr.msra.gmra.mxu1 %vm295_vm2, %v1036_v6  ;;  %9232 = vmatprep.subr.bf16.mxu0 %v16331_v0  ;;  %v12435_v6 = vsel %vm295_vm2, %v12422_v58, 0  ;;  %16412 = vst [vmem:[#allocation67_spill] sm:$0xff] %v12439_v14 }
 0x348   :  { %9251 = vmatpush3.bf16.xpose.msra.mxu1 %v12412_v19  ;;  %9266 = vmatprep.mubr.msk.bf16.mxu1 %vm11686_vm0, %v16331_v0  ;;  %16411 = vst [vmem:[#allocation66_spill] sm:$0xff] %v12435_v6  ;;  %v12446_v19 = vld [vmem:[%s16184_s1 + $0x1a8] sm:$0xff]  }
 0x349   :  { %9252 = vmatprep.subr.bf16.mxu1 %v16331_v0  ;;  %16413 = vst [vmem:[#allocation68_spill] sm:$0xff] %v12446_v19  ;;  %v12457_v61 = vsel %vm295_vm2, %v12446_v19, 0 }
 0x34a   :  { %16415 = vst [vmem:[#allocation70_spill] sm:$0xff] %v12457_v61 }
 0x34e   :  { %9233 = vmatpush3.bf16.xpose.msra.mxu0 %v12435_v6  ;;  %v12461_v6 = vsel %vm295_vm2, %v12453_v2, 0 }
 0x34f   :  { %9234 = vmatprep.subr.bf16.mxu0 %v16331_v0  ;;  %16416 = vst [vmem:[#allocation71_spill] sm:$0xff] %v12461_v6 }
 0x350   :  { %9253 = vmatpush3.bf16.xpose.msra.mxu1 %v12439_v14  ;;  %v12468_v14 = vld [vmem:[%s16184_s1 + $0x1a0] sm:$0xff]  }
 0x351   :  { %9254 = vmatprep.subr.bf16.mxu1 %v16331_v0  ;;  %16417 = vst [vmem:[#allocation72_spill] sm:$0xff] %v12468_v14  ;;  %v12479_v57 = vsel %vm295_vm2, %v12468_v14, 0 }
 0x352   :  { %16419 = vst [vmem:[#allocation74_spill] sm:$0xff] %v12479_v57 }
 0x356   :  { %9235 = vmatpush3.bf16.xpose.msra.mxu0 %v12457_v61  ;;  %v12483_v61 = vsel %vm295_vm2, %v12475_v59, 0  ;;  %v1264_v59 = vpop.permute.xlu1 %1263 }
 0x357   :  { %9236 = vmatprep.subr.bf16.mxu0 %v16331_v0  ;;  %16420 = vst [vmem:[#allocation75_spill] sm:$0xff] %v12483_v61 }
 0x358   :  { %9255 = vmatpush3.bf16.xpose.msra.mxu1 %v12461_v6  ;;  %v12490_v6 = vld [vmem:[%s16184_s1 + $0x198] sm:$0xff]  }
 0x359   :  { %9256 = vmatprep.subr.bf16.mxu1 %v16331_v0  ;;  %16421 = vst [vmem:[#allocation76_spill] sm:$0xff] %v12490_v6  ;;  %v12501_v45 = vsel %vm295_vm2, %v12490_v6, 0 }
 0x35a   :  { %16423 = vst [vmem:[#allocation78_spill] sm:$0xff] %v12501_v45 }
 0x35e   :  { %9237 = vmatpush3.bf16.xpose.msra.mxu0 %v12479_v57  ;;  %v12505_v57 = vsel %vm295_vm2, %v12497_v55, 0 }
 0x35f   :  { %9238 = vmatprep.subr.bf16.mxu0 %v16331_v0  ;;  %16424 = vst [vmem:[#allocation79_spill] sm:$0xff] %v12505_v57 }
 0x360   :  { %9257 = vmatpush3.bf16.xpose.msra.mxu1 %v12483_v61  ;;  %v12512_v61 = vld [vmem:[%s16184_s1 + $0x190] sm:$0xff]  }
 0x361   :  { %9258 = vmatprep.subr.bf16.mxu1 %v16331_v0  ;;  %16425 = vst [vmem:[#allocation80_spill] sm:$0xff] %v12512_v61  ;;  %v12523_v55 = vsel %vm295_vm2, %v12512_v61, 0  ;;  %v12541_v61 = vld [vmem:[%s16184_s1 + $0x1c8] sm:$0xff]  }
 0x362   :  { %16427 = vst [vmem:[#allocation82_spill] sm:$0xff] %v12523_v55  ;;  %16430 = vst [vmem:[#allocation85_spill] sm:$0xff] %v12541_v61 }
 0x366   :  { %9239 = vmatpush3.bf16.xpose.msra.mxu0 %v12501_v45  ;;  %v12527_v45 = vsel %vm295_vm2, %v12519_v40, 0 }
 0x367   :  { %9240 = vmatprep.subr.bf16.mxu0 %v16331_v0  ;;  %16428 = vst [vmem:[#allocation83_spill] sm:$0xff] %v12527_v45 }
 0x368   :  { %9259 = vmatpush3.bf16.xpose.msra.mxu1 %v12505_v57  ;;  %v12534_v57 = vld [vmem:[%s16184_s1 + $0x188] sm:$0xff]  }
 0x369   :  { %9260 = vmatprep.subr.bf16.mxu1 %v16331_v0  ;;  %16429 = vst [vmem:[#allocation84_spill] sm:$0xff] %v12534_v57  ;;  %v12545_v40 = vsel %vm295_vm2, %v12534_v57, 0  ;;  %v12563_v57 = vld [vmem:[%s16184_s1 + $0x1c0] sm:$0xff]  }
 0x36a   :  { %16431 = vst [vmem:[#allocation86_spill] sm:$0xff] %v12545_v40  ;;  %16434 = vst [vmem:[#allocation89_spill] sm:$0xff] %v12563_v57 }
 0x36e   :  { %9241 = vmatpush3.bf16.xpose.msra.mxu0 %v12523_v55  ;;  %v12549_v55 = vsel %vm295_vm2, %v12541_v61, 0 }
 0x36f   :  { %9242 = vmatprep.subr.bf16.mxu0 %v16331_v0  ;;  %16432 = vst [vmem:[#allocation87_spill] sm:$0xff] %v12549_v55 }
 0x370   :  { %9261 = vmatpush3.bf16.xpose.msra.mxu1 %v12527_v45  ;;  %v12556_v45 = vld [vmem:[%s16184_s1 + $0x180] sm:$0xff]  }
 0x371   :  { %9262 = vmatprep.subr.bf16.mxu1 %v16331_v0  ;;  %16433 = vst [vmem:[#allocation88_spill] sm:$0xff] %v12556_v45  ;;  %v12567_v61 = vsel %vm295_vm2, %v12556_v45, 0 }
 0x372   :  { %16435 = vst [vmem:[#allocation90_spill] sm:$0xff] %v12567_v61 }
 0x376   :  { %9243 = vmatpush3.bf16.xpose.msra.mxu0 %v12545_v40  ;;  %v12571_v40 = vsel %vm295_vm2, %v12563_v57, 0 }
 0x377   :  { %9244 = vmatprep.subr.bf16.mxu0 %v16331_v0  ;;  %16436 = vst [vmem:[#allocation91_spill] sm:$0xff] %v12571_v40 }
 0x378   :  { %9263 = vmatpush3.bf16.xpose.msra.mxu1 %v12549_v55  ;;  %v1150_v55 = vpop.permute.xlu0 %1149 }
 0x379   :  { %9264 = vmatprep.subr.bf16.mxu1 %v16331_v0 }
 0x37e   :  { %9245 = vmatpush3.bf16.xpose.msra.mxu0 %v12567_v61 }
 0x37f   :  { %9270 = vmatprep.subr.bf16.mxu0 %v16331_v0 }
 0x380   :  { %9265 = vmatpush3.bf16.xpose.msra.mxu1 %v12571_v40 }
 0x381   :  { %9290 = vmatprep.subr.bf16.mxu1 %v16331_v0 }
 0x385   :  { %9247 = vmatmul.mubr.msk.bf16.vlgmr.msra.gmra.mxu0 %vm295_vm2, %v1150_v55  ;;  %v12578_v6 = vpop.f32.mrf.mxu0 }
 0x386   :  { %9271 = vmatpush3.bf16.msra.mxu0 %v11804_v38  ;;  %9286 = vmatprep.mubr.msk.bf16.mxu0 %vm11686_vm0, %v16331_v0 }
 0x387   :  { %9267 = vmatmul.mubr.msk.bf16.vlgmr.msra.gmra.mxu1 %vm295_vm2, %v1264_v59  ;;  %v9128_v61 = vpop.f32.mrf.mxu0  ;;  %v682_v57 = vpop.f32.mrf.mxu1  ;;  %9272 = vmatprep.subr.bf16.mxu0 %v16331_v0 }
 0x388   :  { %9291 = vmatpush3.bf16.msra.mxu1 %v11809_v39  ;;  %9306 = vmatprep.mubr.msk.bf16.mxu1 %vm11686_vm0, %v16331_v0 }
 0x389   :  { %v571_v55 = vpop.f32.mrf.mxu0  ;;  %v9148_v40 = vpop.f32.mrf.mxu1  ;;  %9292 = vmatprep.subr.bf16.mxu1 %v16331_v0 }
 0x38a   :  { %9273 = vmatpush3.bf16.msra.mxu0 %v11831_v43  ;;  %v11692_v55 = vmov -1e+30  }
 0x38b   :  { %v9129_v38 = vpop.f32.mrf.mxu0  ;;  %v685_v45 = vpop.f32.mrf.mxu1  ;;  %9274 = vmatprep.subr.bf16.mxu0 %v16331_v0 }
 0x38c   :  { %9293 = vmatpush3.bf16.msra.mxu1 %v11837_v44 }
 0x38d   :  { %v9149_v59 = vpop.f32.mrf.mxu1  ;;  %9294 = vmatprep.subr.bf16.mxu1 %v16331_v0 }
 0x38e   :  { %9275 = vmatpush3.bf16.msra.mxu0 %v11846_v46 }
 0x38f   :  { %9276 = vmatprep.subr.bf16.mxu0 %v16331_v0 }
 0x390   :  { %9295 = vmatpush3.bf16.msra.mxu1 %v11851_v47 }
 0x391   :  { %9296 = vmatprep.subr.bf16.mxu1 %v16331_v0 }
 0x392   :  { %9277 = vmatpush3.bf16.msra.mxu0 %v11860_v49 }
 0x393   :  { %9278 = vmatprep.subr.bf16.mxu0 %v16331_v0 }
 0x394   :  { %9297 = vmatpush3.bf16.msra.mxu1 %v11865_v50 }
 0x395   :  { %9298 = vmatprep.subr.bf16.mxu1 %v16331_v0 }
 0x396   :  { %9279 = vmatpush3.bf16.msra.mxu0 %v11871_v51 }
 0x397   :  { %9280 = vmatprep.subr.bf16.mxu0 %v16331_v0 }
 0x398   :  { %9299 = vmatpush3.bf16.msra.mxu1 %v11879_v52 }
 0x399   :  { %9300 = vmatprep.subr.bf16.mxu1 %v16331_v0 }
 0x39a   :  { %9281 = vmatpush3.bf16.msra.mxu0 %v11886_v53 }
 0x39b   :  { %9282 = vmatprep.subr.bf16.mxu0 %v16331_v0 }
 0x39c   :  { %9301 = vmatpush3.bf16.msra.mxu1 %v11892_v54 }
 0x39d   :  { %9302 = vmatprep.subr.bf16.mxu1 %v16331_v0 }
 0x39e   :  { %9283 = vmatpush3.bf16.msra.mxu0 %v11941_v63 }
 0x39f   :  { %9284 = vmatprep.subr.bf16.mxu0 %v16331_v0 }
 0x3a0   :  { %9303 = vmatpush3.bf16.msra.mxu1 %v11947_v1 }
 0x3a1   :  { %9304 = vmatprep.subr.bf16.mxu1 %v16331_v0 }
 0x3a2   :  { %9285 = vmatpush3.bf16.msra.mxu0 %v11966_v4  ;;  %v16437_v4 = vlaneseq }
 0x3a3   :  { %9310 = vmatprep.subr.bf16.mxu0 %v16331_v0 }
 0x3a4   :  { %9305 = vmatpush3.bf16.msra.mxu1 %v11972_v5  ;;  %v279_v5 = vand.u32 127, %v16437_v4 }
 0x3a5   :  { %9330 = vmatprep.subr.bf16.mxu1 %v16331_v0 }
 0x3a6   :  { %vm280_vm3 = vcmp.lt.s32.totalorder %v279_v5, 8 }
 0x3a7   :  { %v12618_v38 = vsel %vm280_vm3, 0.0, %v11692_v55  ;;  %vm4411_vm3 = vsmask.f32 1280 }
 0x3a8   :  { %16438 = vst [vmem:[#allocation92_spill] sm:$0xff] %v12618_v38  ;;  %v1373_v59 = vadd.f32 %v682_v57, %v12618_v38  ;;  %vm14180_vm11 = vmand %vm4410_vm1, %vm4411_vm3 }
 0x3c5   :  { %v796_v39 = vpop.f32.mrf.mxu0 }
 0x3c7   :  { %v9168_v40 = vpop.f32.mrf.mxu0  ;;  %v910_v43 = vpop.f32.mrf.mxu1 }
 0x3c8   :  { %v1374_v40 = vadd.f32 %v796_v39, %v12618_v38 }
 0x3c9   :  { %v799_v44 = vpop.f32.mrf.mxu0  ;;  %v9188_v45 = vpop.f32.mrf.mxu1 }
 0x3ca   :  { %v1388_v44 = vrot.slane %v1373_v59, 7  ;;  %v1375_v45 = vadd.f32 %v910_v43, %v12618_v38 }
 0x3cb   :  { %v9169_v46 = vpop.f32.mrf.mxu0  ;;  %v913_v47 = vpop.f32.mrf.mxu1 }
 0x3cc   :  { %v1391_v46 = vrot.slane %v1374_v40, 6 }
 0x3cd   :  { %v9189_v49 = vpop.f32.mrf.mxu1 }
 0x3ce   :  { %v1372_v49 = vadd.f32 %v12578_v6, %v12618_v38 }
 0x405   :  { %v1024_v50 = vpop.f32.mrf.mxu0 }
 0x406   :  { %v1376_v47 = vadd.f32 %v1024_v50, %v12618_v38 }
 0x407   :  { %v9208_v51 = vpop.f32.mrf.mxu0  ;;  %v1138_v52 = vpop.f32.mrf.mxu1 }
 0x408   :  { %v1390_v51 = vsel %vm1389_vm4, %v1388_v44, %v1372_v49  ;;  %v1397_v39 = vrot.slane %v1376_v47, 4 }
 0x409   :  { %v1027_v53 = vpop.f32.mrf.mxu0  ;;  %v9228_v54 = vpop.f32.mrf.mxu1  ;;  %v1393_v57 = vsel %vm1392_vm5, %v1391_v46, %v1390_v51 }
 0x40a   :  { %v1394_v53 = vrot.slane %v1375_v45, 5  ;;  %v1377_v54 = vadd.f32 %v1138_v52, %v12618_v38 }
 0x40b   :  { %v9209_v61 = vpop.f32.mrf.mxu0  ;;  %v1141_v63 = vpop.f32.mrf.mxu1 }
 0x40c   :  { %v1396_v43 = vsel %vm1395_vm6, %v1394_v53, %v1393_v57  ;;  %v1400_v61 = vrot.slane %v1377_v54, 3 }
 0x40d   :  { %v9229_v1 = vpop.f32.mrf.mxu1  ;;  %v1399_v50 = vsel %vm1398_vm7, %v1397_v39, %v1396_v43 }
 0x40e   :  { %v1402_v46 = vsel %vm1401_vm8, %v1400_v61, %v1399_v50 }
 0x445   :  { %v1252_v63 = vpop.f32.mrf.mxu0 }
 0x446   :  { %v1378_v1 = vadd.f32 %v1252_v63, %v12618_v38 }
 0x447   :  { %v9248_v6 = vpop.f32.mrf.mxu0  ;;  %v1366_v4 = vpop.f32.mrf.mxu1 }
 0x448   :  { %v1403_v5 = vrot.slane %v1378_v1, 2  ;;  %v1379_v52 = vadd.f32 %v1366_v4, %v12618_v38 }
 0x449   :  { %v1255_v55 = vpop.f32.mrf.mxu0  ;;  %v9268_v44 = vpop.f32.mrf.mxu1 }
 0x44a   :  { %v1406_v51 = vrot.slane %v1379_v52, 1  ;;  %v1405_v53 = vsel %vm1404_vm9, %v1403_v5, %v1402_v46 }
 0x44b   :  { %v9249_v57 = vpop.f32.mrf.mxu0  ;;  %v1369_v0 = vpop.f32.mrf.mxu1 }
 0x44c   :  { %v1408_v39 = vsel %vm1407_vm10, %v1406_v51, %v1405_v53 }
 0x44d   :  { %v9269_v43 = vpop.f32.mrf.mxu1  ;;  %1410 = vmax.xlane.f32.xlu0 %v1408_v39 }
 0x463   :  { %2119 = vrot.lane.b32.xlu0 %v11998_v21, %s11689_s26 }
 0x4d6   :  { %v1411_v63 = vpop.xlane.xlu0 %1410 }
 0x4d7   :  { %v1413_v6 = vrot.slane %v1411_v63, 1  ;;  %v1414_v4 = vrot.slane %v1411_v63, 2  ;;  %v1415_v55 = vrot.slane %v1411_v63, 3  ;;  %v1416_v44 = vrot.slane %v1411_v63, 4 }
 0x4d8   :  { %v1417_v38 = vrot.slane %v1411_v63, 5  ;;  %v1418_v61 = vrot.slane %v1411_v63, 6  ;;  %v1419_v50 = vrot.slane %v1411_v63, 7  ;;  %v1428_v14 = vsub.f32 %v1372_v49, %v1411_v63 }
 0x4d9   :  { %v1429_v2 = vsub.f32 %v1373_v59, %v1413_v6  ;;  %v1430_v5 = vsub.f32 %v1374_v40, %v1414_v4  ;;  %v1431_v46 = vsub.f32 %v1375_v45, %v1415_v55  ;;  %v1432_v0 = vsub.f32 %v1376_v47, %v1416_v44 }
 0x4da   :  { %v1433_v57 = vsub.f32 %v1377_v54, %v1417_v38  ;;  %v1434_v51 = vsub.f32 %v1378_v1, %v1418_v61  ;;  %v1436_v53 = vmul.f32 1.442695, %v1428_v14  ;;  %v1435_v21 = vsub.f32 %v1379_v52, %v1419_v50 }
 0x4db   :  { %v1438_v39 = vmul.f32 1.442695, %v1429_v2  ;;  %v1440_v43 = vmul.f32 1.442695, %v1430_v5  ;;  %v1442_v19 = vmul.f32 1.442695, %v1431_v46 }
 0x4dc   :  { %11197 = vpow2.f32 %v1436_v53  ;;  %v1444_v48 = vmul.f32 1.442695, %v1432_v0  ;;  %v1446_v58 = vmul.f32 1.442695, %v1433_v57  ;;  %v1448_v41 = vmul.f32 1.442695, %v1434_v51 }
 0x4dd   :  { %11199 = vpow2.f32 %v1438_v39  ;;  %v1450_v62 = vmul.f32 1.442695, %v1435_v21 }
 0x4de   :  { %11201 = vpow2.f32 %v1440_v43 }
 0x4df   :  { %11203 = vpow2.f32 %v1442_v19 }
 0x4e0   :  { %11205 = vpow2.f32 %v1444_v48 }
 0x4e1   :  { %11207 = vpow2.f32 %v1446_v58 }
 0x4e2   :  { %11209 = vpow2.f32 %v1448_v41 }
 0x4e3   :  { %11211 = vpow2.f32 %v1450_v62 }
 0x4e9   :  { %v11198_v59 = vpop.eup %11197 }
 0x4ea   :  { %v11200_v38 = vpop.eup %11199 }
 0x4eb   :  { %v11202_v40 = vpop.eup %11201  ;;  %v1460_v14 = vrot.slane %v11200_v38, 7 }
 0x4ec   :  { %v11204_v2 = vpop.eup %11203  ;;  %v1462_v45 = vrot.slane %v11202_v40, 6 }
 0x4ed   :  { %v11206_v47 = vpop.eup %11205  ;;  %v1461_v49 = vsel %vm1389_vm4, %v1460_v14, %v11198_v59  ;;  %v1464_v54 = vrot.slane %v11204_v2, 5 }
 0x4ee   :  { %v11208_v1 = vpop.eup %11207  ;;  %v1463_v52 = vsel %vm1392_vm5, %v1462_v45, %v1461_v49  ;;  %v1466_v63 = vrot.slane %v11206_v47, 4 }
 0x4ef   :  { %v11210_v19 = vpop.eup %11209  ;;  %v1465_v21 = vsel %vm1395_vm6, %v1464_v54, %v1463_v52  ;;  %v1468_v58 = vrot.slane %v11208_v1, 3 }
 0x4f0   :  { %v11212_v41 = vpop.eup %11211  ;;  %v1467_v62 = vsel %vm1398_vm7, %v1466_v63, %v1465_v21  ;;  %v1470_v48 = vrot.slane %v11210_v19, 2 }
 0x4f1   :  { %v1469_v6 = vsel %vm1401_vm8, %v1468_v58, %v1467_v62  ;;  %v1472_v4 = vrot.slane %v11212_v41, 1 }
 0x4f2   :  { %v1471_v55 = vsel %vm1404_vm9, %v1470_v48, %v1469_v6 }
 0x4f3   :  { %v1473_v44 = vsel %vm1407_vm10, %v1472_v4, %v1471_v55 }
 0x4f4   :  { %1475 = vadd.xlane.f32.xlu1 %v1473_v44 }
 0x57d   :  { %v1476_v61 = vpop.xlane.xlu1 %1475 }
 0x57e   :  { %11213 = vrcp.f32 %v1476_v61 }
 0x58b   :  { %v11214_v50 = vpop.eup %11213 }
 0x58c   :  { %v1494_v5 = vmul.f32 %v11214_v50, %v11198_v59  ;;  %v1479_v46 = vrot.slane %v11214_v50, 1  ;;  %v1480_v0 = vrot.slane %v11214_v50, 2  ;;  %v1481_v57 = vrot.slane %v11214_v50, 3 }
 0x58d   :  { %v1482_v51 = vrot.slane %v11214_v50, 4  ;;  %v1483_v53 = vrot.slane %v11214_v50, 5  ;;  %v1484_v39 = vrot.slane %v11214_v50, 6  ;;  %v1485_v43 = vrot.slane %v11214_v50, 7 }
 0x58e   :  { %v1502_v14 = vpack.c.bf16 %v1494_v5, %v1494_v5  ;;  %1902 = vst [vmem:[%s16185_s8] sm:$0x1] %v1494_v5  ;;  %v1495_v45 = vmul.f32 %v11200_v38, %v1479_v46  ;;  %v1496_v49 = vmul.f32 %v11202_v40, %v1480_v0  ;;  %v1497_v54 = vmul.f32 %v11204_v2, %v1481_v57 }
 0x58f   :  { %v12648_v52 = vmul.f32 %v11206_v47, %v1482_v51  ;;  %v12650_v63 = vmul.f32 %v11208_v1, %v1483_v53  ;;  %v12652_v59 = vmul.f32 %v11210_v19, %v1484_v39  ;;  %v12654_v21 = vmul.f32 %v11212_v41, %v1485_v43 }
 0x590   :  { %9287 = vmatmul.mubr.bf16.vlgmr.msra.gmra.mxu0 %v1502_v14  ;;  %v1503_v58 = vpack.c.bf16 %v1495_v45, %v1495_v45  ;;  %1903 = vst [vmem:[%s16185_s8 + $0x8] sm:$0x1] %v1495_v45  ;;  %1904 = vst [vmem:[%s16185_s8 + $0x10] sm:$0x1] %v1496_v49  ;;  %v16439_v38 = vmov 0.0  }
 0x591   :  { %1905 = vst [vmem:[%s16185_s8 + $0x18] sm:$0x1] %v1497_v54  ;;  %9311 = vmatpush3.bf16.msra.mxu0 %v12026_v25  ;;  %9326 = vmatprep.mubr.msk.bf16.mxu0 %vm11686_vm0, %v16439_v38  ;;  %1906 = vst [vmem:[%s16185_s8 + $0x20] sm:$0x1] %v12648_v52  ;;  %v1504_v25 = vpack.c.bf16 %v1496_v49, %v1496_v49 }
 0x592   :  { %1907 = vst [vmem:[%s16185_s8 + $0x28] sm:$0x1] %v12650_v63  ;;  %1908 = vst [vmem:[%s16185_s8 + $0x30] sm:$0x1] %v12652_v59  ;;  %9307 = vmatmul.mubr.bf16.vlgmr.msra.gmra.mxu1 %v1503_v58  ;;  %9312 = vmatprep.subr.bf16.mxu0 %v16439_v38 }
 0x593   :  { %1909 = vst [vmem:[%s16185_s8 + $0x38] sm:$0x1] %v12654_v21  ;;  %9331 = vmatpush3.bf16.msra.mxu1 %v12031_v26  ;;  %9346 = vmatprep.mubr.msk.bf16.mxu1 %vm11686_vm0, %v16439_v38  ;;  %v1505_v26 = vpack.c.bf16 %v1497_v54, %v1497_v54 }
 0x594   :  { %9332 = vmatprep.subr.bf16.mxu1 %v16439_v38 }
 0x595   :  { %9313 = vmatpush3.bf16.msra.mxu0 %v12050_v31  ;;  %v16448_v31 = vld [vmem:[#allocation76_spill] sm:$0xff] }
 0x596   :  { %9314 = vmatprep.subr.bf16.mxu0 %v16439_v38 }
 0x597   :  { %9333 = vmatpush3.bf16.msra.mxu1 %v12059_v32  ;;  %v16449_v32 = vld [vmem:[#allocation77_spill] sm:$0xff] }
 0x598   :  { %9334 = vmatprep.subr.bf16.mxu1 %v16439_v38 }
 0x599   :  { %9315 = vmatpush3.bf16.msra.mxu0 %v12074_v35  ;;  %v16451_v35 = vld [vmem:[#allocation81_spill] sm:$0xff] }
 0x59a   :  { %9316 = vmatprep.subr.bf16.mxu0 %v16439_v38 }
 0x59b   :  { %9335 = vmatpush3.bf16.msra.mxu1 %v12081_v36  ;;  %v16452_v36 = vld [vmem:[#allocation84_spill] sm:$0xff] }
 0x59c   :  { %9336 = vmatprep.subr.bf16.mxu1 %v16439_v38 }
 0x59d   :  { %9317 = vmatpush3.bf16.msra.mxu0 %v12096_v9  ;;  %v1508_v9 = vpack.c.bf16 %v12652_v59, %v12652_v59 }
 0x59e   :  { %9318 = vmatprep.subr.bf16.mxu0 %v16439_v38 }
 0x59f   :  { %9337 = vmatpush3.bf16.msra.mxu1 %v12103_v10  ;;  %v16455_v10 = vld [vmem:[#allocation89_spill] sm:$0xff] }
 0x5a0   :  { %9338 = vmatprep.subr.bf16.mxu1 %v16439_v38 }
 0x5a1   :  { %9319 = vmatpush3.bf16.msra.mxu0 %v12118_v13  ;;  %v11335_v13 = vld [vmem:[%s16177_s4 + $0x8] sm:$0xff]  }
 0x5a2   :  { %9320 = vmatprep.subr.bf16.mxu0 %v16439_v38 }
 0x5a3   :  { %9339 = vmatpush3.bf16.msra.mxu1 %v12125_v15  ;;  %v16456_v15 = vld [vmem:[#allocation3_spill] sm:$0xff] }
 0x5a4   :  { %9340 = vmatprep.subr.bf16.mxu1 %v16439_v38 }
 0x5a5   :  { %9321 = vmatpush3.bf16.msra.mxu0 %v12140_v22  ;;  %v16457_v22 = vld [vmem:[#allocation5_spill] sm:$0xff] }
 0x5a6   :  { %9322 = vmatprep.subr.bf16.mxu0 %v16439_v38 }
 0x5a7   :  { %9341 = vmatpush3.bf16.msra.mxu1 %v12147_v24  ;;  %v16458_v24 = vld [vmem:[#allocation7_spill] sm:$0xff] }
 0x5a8   :  { %9342 = vmatprep.subr.bf16.mxu1 %v16439_v38 }
 0x5a9   :  { %9323 = vmatpush3.bf16.msra.mxu0 %v12162_v8  ;;  %v16440_v8 = vld [vmem:[#allocation60_spill] sm:$0xff] }
 0x5aa   :  { %9324 = vmatprep.subr.bf16.mxu0 %v16439_v38 }
 0x5ab   :  { %9343 = vmatpush3.bf16.msra.mxu1 %v12171_v17  ;;  %v11336_v17 = vld [vmem:[%s16177_s4] sm:$0xff]  }
 0x5ac   :  { %9344 = vmatprep.subr.bf16.mxu1 %v16439_v38 }
 0x5ad   :  { %9325 = vmatpush3.bf16.msra.mxu0 %v12188_v30  ;;  %v16459_v30 = vld [vmem:[#allocation9_spill] sm:$0xff] }
 0x5ae   :  { %9350 = vmatprep.subr.bf16.mxu0 %v16439_v38 }
 0x5af   :  { %9345 = vmatpush3.bf16.msra.mxu1 %v12197_v11  ;;  %v1509_v11 = vpack.c.bf16 %v12654_v21, %v12654_v21 }
 0x5b0   :  { %9327 = vmatmul.mubr.bf16.vlgmr.msra.gmra.mxu0 %v1504_v25  ;;  %9370 = vmatprep.subr.bf16.mxu1 %v16439_v38 }
 0x5b1   :  { %9351 = vmatpush3.bf16.msra.mxu0 %v12214_v42  ;;  %9366 = vmatprep.mubr.msk.bf16.mxu0 %vm11686_vm0, %v16439_v38  ;;  %v16454_v42 = vld [vmem:[#allocation88_spill] sm:$0xff] }
 0x5b2   :  { %9347 = vmatmul.mubr.bf16.vlgmr.msra.gmra.mxu1 %v1505_v26  ;;  %9352 = vmatprep.subr.bf16.mxu0 %v16439_v38 }
 0x5b3   :  { %9371 = vmatpush3.bf16.msra.mxu1 %v12221_v28  ;;  %9386 = vmatprep.mubr.msk.bf16.mxu1 %vm11686_vm0, %v16439_v38  ;;  %v16461_v28 = vld [vmem:[#allocation13_spill] sm:$0xff] }
 0x5b4   :  { %9372 = vmatprep.subr.bf16.mxu1 %v16439_v38 }
 0x5b5   :  { %9353 = vmatpush3.bf16.msra.mxu0 %v12240_v34  ;;  %v16450_v34 = vld [vmem:[#allocation80_spill] sm:$0xff] }
 0x5b6   :  { %9354 = vmatprep.subr.bf16.mxu0 %v16439_v38 }
 0x5b7   :  { %9373 = vmatpush3.bf16.msra.mxu1 %v12249_v12  ;;  %v16462_v12 = vld [vmem:[#allocation15_spill] sm:$0xff] }
 0x5b8   :  { %9374 = vmatprep.subr.bf16.mxu1 %v16439_v38 }
 0x5b9   :  { %9355 = vmatpush3.bf16.msra.mxu0 %v12264_v18  ;;  %v16460_v18 = vld [vmem:[#allocation11_spill] sm:$0xff] }
 0x5ba   :  { %9356 = vmatprep.subr.bf16.mxu0 %v16439_v38 }
 0x5bb   :  { %9375 = vmatpush3.bf16.msra.mxu1 %v12271_v29  ;;  %v16447_v29 = vld [vmem:[#allocation73_spill] sm:$0xff] }
 0x5bc   :  { %9376 = vmatprep.subr.bf16.mxu1 %v16439_v38 }
 0x5bd   :  { %9357 = vmatpush3.bf16.msra.mxu0 %v12286_v37  ;;  %v16453_v37 = vld [vmem:[#allocation85_spill] sm:$0xff] }
 0x5be   :  { %9358 = vmatprep.subr.bf16.mxu0 %v16439_v38 }
 0x5bf   :  { %9377 = vmatpush3.bf16.msra.mxu1 %v12293_v23  ;;  %v16445_v23 = vld [vmem:[#allocation69_spill] sm:$0xff] }
 0x5c0   :  { %9378 = vmatprep.subr.bf16.mxu1 %v16439_v38 }
 0x5c1   :  { %9359 = vmatpush3.bf16.msra.mxu0 %v12308_v33  ;;  %v16463_v33 = vld [vmem:[#allocation17_spill] sm:$0xff] }
 0x5c2   :  { %9360 = vmatprep.subr.bf16.mxu0 %v16439_v38 }
 0x5c3   :  { %9379 = vmatpush3.bf16.msra.mxu1 %v12315_v16  ;;  %v1506_v16 = vpack.c.bf16 %v12648_v52, %v12648_v52 }
 0x5c4   :  { %9380 = vmatprep.subr.bf16.mxu1 %v16439_v38 }
 0x5c5   :  { %9361 = vmatpush3.bf16.msra.mxu0 %v12330_v27  ;;  %v16446_v27 = vld [vmem:[#allocation72_spill] sm:$0xff] }
 0x5c6   :  { %9362 = vmatprep.subr.bf16.mxu0 %v16439_v38 }
 0x5c7   :  { %9381 = vmatpush3.bf16.msra.mxu1 %v12337_v3  ;;  %v1507_v3 = vpack.c.bf16 %v12650_v63, %v12650_v63 }
 0x5c8   :  { %9382 = vmatprep.subr.bf16.mxu1 %v16439_v38 }
 0x5c9   :  { %9363 = vmatpush3.bf16.msra.mxu0 %v12352_v20  ;;  %v16444_v20 = vld [vmem:[#allocation68_spill] sm:$0xff] }
 0x5ca   :  { %9364 = vmatprep.subr.bf16.mxu0 %v16439_v38 }
 0x5cb   :  { %9383 = vmatpush3.bf16.msra.mxu1 %v12359_v60  ;;  %v16441_v60 = vld [vmem:[#allocation61_spill] sm:$0xff] }
 0x5cc   :  { %9384 = vmatprep.subr.bf16.mxu1 %v16439_v38 }
 0x5cd   :  { %9365 = vmatpush3.bf16.msra.mxu0 %v12374_v7  ;;  %v16443_v7 = vld [vmem:[#allocation65_spill] sm:$0xff] }
 0x5ce   :  { %9390 = vmatprep.subr.bf16.mxu0 %v16439_v38 }
 0x5cf   :  { %9385 = vmatpush3.bf16.msra.mxu1 %v12381_v56  ;;  %v16442_v56 = vld [vmem:[#allocation64_spill] sm:$0xff] }
 0x5d0   :  { %9367 = vmatmul.mubr.bf16.vlgmr.msra.gmra.mxu0 %v1506_v16  ;;  %9410 = vmatprep.subr.bf16.mxu1 %v16439_v38 }
 0x5d1   :  { %9391 = vmatpush3.bf16.msra.mxu0 %v16440_v8  ;;  %9406 = vmatprep.mubr.msk.bf16.mxu0 %vm11686_vm0, %v16439_v38 }
 0x5d2   :  { %9387 = vmatmul.mubr.bf16.vlgmr.msra.gmra.mxu1 %v1507_v3  ;;  %9392 = vmatprep.subr.bf16.mxu0 %v16439_v38 }
 0x5d3   :  { %9411 = vmatpush3.bf16.msra.mxu1 %v16441_v60  ;;  %9426 = vmatprep.mubr.msk.bf16.mxu1 %vm11686_vm0, %v16439_v38 }
 0x5d4   :  { %9412 = vmatprep.subr.bf16.mxu1 %v16439_v38 }
 0x5d5   :  { %9393 = vmatpush3.bf16.msra.mxu0 %v16442_v56 }
 0x5d6   :  { %9394 = vmatprep.subr.bf16.mxu0 %v16439_v38 }
 0x5d7   :  { %9413 = vmatpush3.bf16.msra.mxu1 %v16443_v7 }
 0x5d8   :  { %9414 = vmatprep.subr.bf16.mxu1 %v16439_v38 }
 0x5d9   :  { %9395 = vmatpush3.bf16.msra.mxu0 %v16444_v20 }
 0x5da   :  { %9396 = vmatprep.subr.bf16.mxu0 %v16439_v38 }
 0x5db   :  { %9415 = vmatpush3.bf16.msra.mxu1 %v16445_v23 }
 0x5dc   :  { %9416 = vmatprep.subr.bf16.mxu1 %v16439_v38 }
 0x5dd   :  { %9397 = vmatpush3.bf16.msra.mxu0 %v16446_v27 }
 0x5de   :  { %9398 = vmatprep.subr.bf16.mxu0 %v16439_v38 }
 0x5df   :  { %9417 = vmatpush3.bf16.msra.mxu1 %v16447_v29 }
 0x5e0   :  { %9418 = vmatprep.subr.bf16.mxu1 %v16439_v38 }
 0x5e1   :  { %9399 = vmatpush3.bf16.msra.mxu0 %v16448_v31 }
 0x5e2   :  { %9400 = vmatprep.subr.bf16.mxu0 %v16439_v38 }
 0x5e3   :  { %9419 = vmatpush3.bf16.msra.mxu1 %v16449_v32 }
 0x5e4   :  { %9420 = vmatprep.subr.bf16.mxu1 %v16439_v38 }
 0x5e5   :  { %9401 = vmatpush3.bf16.msra.mxu0 %v16450_v34 }
 0x5e6   :  { %9402 = vmatprep.subr.bf16.mxu0 %v16439_v38 }
 0x5e7   :  { %9421 = vmatpush3.bf16.msra.mxu1 %v16451_v35 }
 0x5e8   :  { %9422 = vmatprep.subr.bf16.mxu1 %v16439_v38 }
 0x5e9   :  { %9403 = vmatpush3.bf16.msra.mxu0 %v16452_v36 }
 0x5ea   :  { %9404 = vmatprep.subr.bf16.mxu0 %v16439_v38 }
 0x5eb   :  { %9423 = vmatpush3.bf16.msra.mxu1 %v16453_v37 }
 0x5ec   :  { %9424 = vmatprep.subr.bf16.mxu1 %v16439_v38 }
 0x5ed   :  { %9405 = vmatpush3.bf16.msra.mxu0 %v16454_v42 }
 0x5ee   :  { %9430 = vmatprep.subr.bf16.mxu0 %v16439_v38 }
 0x5ef   :  { %9425 = vmatpush3.bf16.msra.mxu1 %v16455_v10 }
 0x5f0   :  { %9407 = vmatmul.mubr.bf16.vlgmr.msra.gmra.mxu0 %v1508_v9  ;;  %9446 = vmatprep.subr.bf16.mxu1 %v16439_v38 }
 0x5f1   :  { %9431 = vmatpush3.bf16.msra.mxu0 %v11335_v13  ;;  %9434 = vmatprep.mubr.msk.bf16.mxu0 %vm11686_vm0, %v16439_v38 }
 0x5f2   :  { %9427 = vmatmul.mubr.bf16.vlgmr.msra.gmra.mxu1 %v1509_v11  ;;  %9432 = vmatprep.subr.bf16.mxu0 %v16439_v38 }
 0x5f3   :  { %9447 = vmatpush3.bf16.xpose.msra.mxu1 %v16456_v15  ;;  %9462 = vmatprep.mubr.msk.bf16.mxu1 %vm11686_vm0, %v16439_v38 }
 0x5f4   :  { %9448 = vmatprep.subr.bf16.mxu1 %v16439_v38 }
 0x5f5   :  { %9433 = vmatpush3.bf16.msra.mxu0 %v11336_v17 }
 0x5f6   :  { %9438 = vmatprep.subr.bf16.mxu0 %v16439_v38 }
 0x5fb   :  { %9449 = vmatpush3.bf16.xpose.msra.mxu1 %v16457_v22 }
 0x5fc   :  { %9450 = vmatprep.subr.bf16.mxu1 %v16439_v38 }
 0x603   :  { %9451 = vmatpush3.bf16.xpose.msra.mxu1 %v16458_v24 }
 0x604   :  { %9452 = vmatprep.subr.bf16.mxu1 %v16439_v38 }
 0x60b   :  { %9453 = vmatpush3.bf16.xpose.msra.mxu1 %v16459_v30 }
 0x60c   :  { %9454 = vmatprep.subr.bf16.mxu1 %v16439_v38 }
 0x613   :  { %9455 = vmatpush3.bf16.xpose.msra.mxu1 %v16460_v18 }
 0x614   :  { %9456 = vmatprep.subr.bf16.mxu1 %v16439_v38 }
 0x61b   :  { %9457 = vmatpush3.bf16.xpose.msra.mxu1 %v16461_v28 }
 0x61c   :  { %9458 = vmatprep.subr.bf16.mxu1 %v16439_v38 }
 0x623   :  { %9459 = vmatpush3.bf16.xpose.msra.mxu1 %v16462_v12 }
 0x624   :  { %9460 = vmatprep.subr.bf16.mxu1 %v16439_v38 }
 0x62b   :  { %9461 = vmatpush3.bf16.xpose.msra.mxu1 %v16463_v33 }
 0x62c   :  { %9486 = vmatprep.subr.bf16.mxu1 %v16439_v38 }
 0x650   :  { %v1552_v40 = vpop.f32.mrf.mxu0 }
 0x651   :  { %v1894_v1 = vpack.c.bf16 %v1552_v40, %v1552_v40 }
 0x652   :  { %v9288_v2 = vpop.f32.mrf.mxu0  ;;  %v1600_v47 = vpop.f32.mrf.mxu1 }
 0x653   :  { %v1895_v19 = vpack.c.bf16 %v1600_v47, %v1600_v47  ;;  %v1918_v55 = vunpack.c.l.b16 %v1894_v1 }
 0x654   :  { %v1555_v41 = vpop.f32.mrf.mxu0  ;;  %v9308_v62 = vpop.f32.mrf.mxu1 }
 0x655   :  { %v1919_v48 = vunpack.c.l.b16 %v1895_v19  ;;  %v11693_v41 = vmov 286326784  }
 0x656   :  { %v9289_v6 = vpop.f32.mrf.mxu0  ;;  %v1603_v4 = vpop.f32.mrf.mxu1  ;;  %v1986_v62 = vunpack.c.l.s4 %v11693_v41 }
 0x657   :  { %v1926_v44 = vrot.slane %v1919_v48, 7 }
 0x658   :  { %v9309_v61 = vpop.f32.mrf.mxu1 }
 0x659   :  { %v1927_v50 = vsel %vm1389_vm4, %v1926_v44, %v1918_v55  ;;  %v1987_v55 = vunpack.c.0.s8 %v1986_v62  ;;  %v16464_v44 = vld [vmem:[#allocation22_spill] sm:$0xff] }
 0x670   :  { %v1648_v5 = vpop.f32.mrf.mxu0 }
 0x671   :  { %v1896_v58 = vpack.c.bf16 %v1648_v5, %v1648_v5 }
 0x672   :  { %v9328_v46 = vpop.f32.mrf.mxu0  ;;  %v1696_v0 = vpop.f32.mrf.mxu1 }
 0x673   :  { %v1897_v25 = vpack.c.bf16 %v1696_v0, %v1696_v0  ;;  %v1920_v26 = vunpack.c.l.b16 %v1896_v58  ;;  %v11337_v46 = vld [vmem:[%s16180_s5 + $0x8] sm:$0xff]  }
 0x674   :  { %v1651_v57 = vpop.f32.mrf.mxu0  ;;  %v9348_v51 = vpop.f32.mrf.mxu1 }
 0x675   :  { %v1921_v3 = vunpack.c.l.b16 %v1897_v25  ;;  %v1928_v60 = vrot.slane %v1920_v26, 6  ;;  %v16466_v51 = vld [vmem:[#allocation19_spill] sm:$0xff]  ;;  %v2052_v25 = vld [vmem:[%s16186_s9] sm:$0x1] }
 0x676   :  { %v9329_v53 = vpop.f32.mrf.mxu0  ;;  %v1699_v39 = vpop.f32.mrf.mxu1 }
 0x677   :  { %v1930_v7 = vrot.slane %v1921_v3, 5  ;;  %v1929_v23 = vsel %vm1392_vm5, %v1928_v60, %v1927_v50  ;;  %v16465_v50 = vld [vmem:[#allocation20_spill] sm:$0xff]  ;;  %v12844_v53 = vsub.s32 %v1987_v55, %v16466_v51  ;;  %v16472_v55 = vld [vmem:[#allocation10_spill] sm:$0xff] }
 0x678   :  { %v9349_v43 = vpop.f32.mrf.mxu1 }
 0x679   :  { %v1931_v32 = vsel %vm1395_vm6, %v1930_v7, %v1929_v23  ;;  %v2058_v23 = vld [vmem:[%s16186_s9 + $0x8] sm:$0x1] }
 0x690   :  { %v1744_v14 = vpop.f32.mrf.mxu0 }
 0x691   :  { %v1898_v16 = vpack.c.bf16 %v1744_v14, %v1744_v14 }
 0x692   :  { %v9368_v45 = vpop.f32.mrf.mxu0  ;;  %v1792_v49 = vpop.f32.mrf.mxu1 }
 0x693   :  { %v1899_v8 = vpack.c.bf16 %v1792_v49, %v1792_v49  ;;  %v1922_v56 = vunpack.c.l.b16 %v1898_v16  ;;  %v11338_v49 = vld [vmem:[%s16180_s5] sm:$0xff]  }
 0x694   :  { %v1747_v54 = vpop.f32.mrf.mxu0  ;;  %v9388_v52 = vpop.f32.mrf.mxu1 }
 0x695   :  { %v1923_v20 = vunpack.c.l.b16 %v1899_v8  ;;  %v1932_v27 = vrot.slane %v1922_v56, 4  ;;  %v2120_v54 = vpop.permute.xlu0 %2119 }
 0x696   :  { %v9369_v63 = vpop.f32.mrf.mxu0  ;;  %v1795_v59 = vpop.f32.mrf.mxu1 }
 0x697   :  { %v1934_v34 = vrot.slane %v1923_v20, 3  ;;  %v1933_v37 = vsel %vm1398_vm7, %v1932_v27, %v1931_v32  ;;  %v2055_v20 = vld [vmem:[%s16186_s9 + $0x4] sm:$0x1]  ;;  %v2064_v27 = vld [vmem:[%s16186_s9 + $0x10] sm:$0x1] }
 0x698   :  { %v9389_v21 = vpop.f32.mrf.mxu1 }
 0x699   :  { %v1935_v40 = vsel %vm1401_vm8, %v1934_v34, %v1933_v37  ;;  %v2067_v37 = vld [vmem:[%s16186_s9 + $0x14] sm:$0x1] }
 0x6b0   :  { %v1840_v29 = vpop.f32.mrf.mxu0 }
 0x6b1   :  { %v1900_v31 = vpack.c.bf16 %v1840_v29, %v1840_v29  ;;  %v16469_v29 = vld [vmem:[#allocation4_spill] sm:$0xff] }
 0x6b2   :  { %v9408_v35 = vpop.f32.mrf.mxu0  ;;  %v1888_v36 = vpop.f32.mrf.mxu1 }
 0x6b3   :  { %v1924_v42 = vunpack.c.l.b16 %v1900_v31  ;;  %v1901_v9 = vpack.c.bf16 %v1888_v36, %v1888_v36  ;;  %v2061_v36 = vld [vmem:[%s16186_s9 + $0xc] sm:$0x1] }
 0x6b4   :  { %v1843_v10 = vpop.f32.mrf.mxu0  ;;  %v9428_v11 = vpop.f32.mrf.mxu1 }
 0x6b5   :  { %v1936_v13 = vrot.slane %v1924_v42, 2  ;;  %v1925_v17 = vunpack.c.l.b16 %v1901_v9  ;;  %v2070_v42 = vld [vmem:[%s16186_s9 + $0x18] sm:$0x1] }
 0x6b6   :  { %v9409_v2 = vpop.f32.mrf.mxu0  ;;  %v1891_v47 = vpop.f32.mrf.mxu1 }
 0x6b7   :  { %v1937_v1 = vsel %vm1404_vm9, %v1936_v13, %v1935_v40  ;;  %v1938_v19 = vrot.slane %v1925_v17, 1  ;;  %v2073_v47 = vld [vmem:[%s16186_s9 + $0x1c] sm:$0x1] }
 0x6b8   :  { %v9429_v48 = vpop.f32.mrf.mxu1 }
 0x6b9   :  { %v1939_v6 = vsel %vm1407_vm10, %v1938_v19, %v1937_v1 }
 0x6ba   :  { %v1940_v4 = vpack.c.b16 %v1939_v6, %v1939_v6  ;;  %v16470_v6 = vld [vmem:[#allocation6_spill] sm:$0xff] }
 0x6bc   :  { %v1943_v61 = vsel %vm295_vm2, %v1940_v4, %v16464_v44  ;;  %9435 = vmatmul.mubr.msk.bf16.vlgmr.msra.gmra.mxu0 %vm295_vm2, %v1940_v4  ;;  %v16471_v4 = vld [vmem:[#allocation8_spill] sm:$0xff] }
 0x6bd   :  { %v1951_v5 = vrot.slane %v1943_v61, %v16465_v50  ;;  %9439 = vmatpush3.bf16.msra.mxu0 %v11337_v46  ;;  %9442 = vmatprep.mubr.msk.bf16.mxu0 %vm11686_vm0, %v16439_v38  ;;  %v16473_v44 = vld [vmem:[#allocation12_spill] sm:$0xff]  ;;  %v16474_v61 = vld [vmem:[#allocation14_spill] sm:$0xff] }
 0x6be   :  { %9440 = vmatprep.subr.bf16.mxu0 %v16439_v38  ;;  %v16476_v46 = vld [vmem:[#allocation18_spill] sm:$0xff] }
 0x6bf   :  { %v1952_v0 = vcombine.high %v1951_v5, %v1951_v5  ;;  %v1959_v57 = vrot.slane %v1951_v5, %v16465_v50  ;;  %v16475_v5 = vld [vmem:[#allocation16_spill] sm:$0xff] }
 0x6c1   :  { %v1966_v39 = vrot.slane %v1952_v0, %v16465_v50  ;;  %v1967_v43 = vcombine.high %v1959_v57, %v1959_v57  ;;  %v1970_v14 = vunpack.i.h.s16 %v1959_v57  ;;  %v8077_v45 = vpack.i.b16 %v1959_v57, %v1959_v57  ;;  %9441 = vmatpush3.bf16.msra.mxu0 %v11338_v49  ;;  %v11339_v0 = vld [vmem:[%s16182_s6] ss:$0 sm:$0xff] }
 0x6c2   :  { %9466 = vmatprep.subr.bf16.mxu0 %v16439_v38  ;;  %v16477_v57 = vld [vmem:[#allocation2_spill] sm:$0xff] }
 0x6c3   :  { %v1968_v52 = vcombine.high %v1966_v39, %v1966_v39  ;;  %v1972_v63 = vunpack.i.h.s16 %v1966_v39  ;;  %v1974_v59 = vunpack.i.h.s16 %v1967_v43  ;;  %v1978_v21 = vpack.i.b16 %v1970_v14, %v1970_v14 }
 0x6c4   :  { %v8078_v26 = vpack.i.b16 %v1966_v39, %v1966_v39  ;;  %v8079_v16 = vpack.i.b16 %v1967_v43, %v1967_v43  ;;  %v1991_v3 = vrot.slane %v8077_v45, %v12844_v53  ;;  %9443 = vmatmul.mubr.msk.bf16.vlgmr.msra.gmra.mxu0 %vm295_vm2, %v2120_v54  ;;  %v116_v51 = vadd.f32 %v11339_v0, %v16477_v57 }
 0x6c5   :  { %v1976_v8 = vunpack.i.h.s16 %v1968_v52  ;;  %v1980_v60 = vpack.i.b16 %v1972_v63, %v1972_v63  ;;  %v1982_v56 = vpack.i.b16 %v1974_v59, %v1974_v59  ;;  %v8080_v7 = vpack.i.b16 %v1968_v52, %v1968_v52  ;;  %9467 = vmatpush3.bf16.xpose.msra.mxu0 %v16469_v29  ;;  %9482 = vmatprep.mubr.msk.bf16.mxu0 %vm11686_vm0, %v16439_v38  ;;  %v11340_v52 = vld [vmem:[%s16183_s7] ss:$0 sm:$0xff] }
 0x6c6   :  { %v1998_v31 = vrot.slane %v1978_v21, %v12844_v53  ;;  %v2005_v32 = vrot.slane %v8078_v26, %v12844_v53  ;;  %v2019_v34 = vrot.slane %v8079_v16, %v12844_v53  ;;  %v2053_v35 = vsel %vm12852_vm13, %v1991_v3, %v2052_v25  ;;  %9468 = vmatprep.subr.bf16.mxu0 %v16439_v38 }
 0x6c7   :  { %v1984_v9 = vpack.i.b16 %v1976_v8, %v1976_v8  ;;  %v2012_v10 = vrot.slane %v1980_v60, %v12844_v53  ;;  %v2026_v11 = vrot.slane %v1982_v56, %v12844_v53  ;;  %v2033_v13 = vrot.slane %v8080_v7, %v12844_v53  ;;  %2054 = vst [vmem:[%s16186_s9] sm:$0x1] %v2053_v35 }
 0x6c8   :  { %v2056_v17 = vsel %vm12852_vm13, %v1998_v31, %v2055_v20  ;;  %v2059_v40 = vsel %vm12852_vm13, %v2005_v32, %v2058_v23  ;;  %v2065_v2 = vsel %vm12852_vm13, %v2019_v34, %v2064_v27  ;;  %v16478_v32 = vld [vmem:[#allocation21_spill] sm:$0xff] }
 0x6c9   :  { %v2040_v1 = vrot.slane %v1984_v9, %v12844_v53  ;;  %2057 = vst [vmem:[%s16186_s9 + $0x4] sm:$0x1] %v2056_v17  ;;  %2060 = vst [vmem:[%s16186_s9 + $0x8] sm:$0x1] %v2059_v40  ;;  %v2062_v19 = vsel %vm12852_vm13, %v2012_v10, %v2061_v36  ;;  %v2068_v41 = vsel %vm12852_vm13, %v2026_v11, %v2067_v37 }
 0x6ca   :  { %2066 = vst [vmem:[%s16186_s9 + $0x10] sm:$0x1] %v2065_v2  ;;  %v2071_v62 = vsel %vm12852_vm13, %v2033_v13, %v2070_v42  ;;  %2063 = vst [vmem:[%s16186_s9 + $0xc] sm:$0x1] %v2062_v19  ;;  %v16479_v2 = vld [vmem:[#allocation23_spill] sm:$0xff] }
 0x6cb   :  { %2069 = vst [vmem:[%s16186_s9 + $0x14] sm:$0x1] %v2068_v41  ;;  %2072 = vst [vmem:[%s16186_s9 + $0x18] sm:$0x1] %v2071_v62  ;;  %v2074_v48 = vsel %vm12852_vm13, %v2040_v1, %v2073_v47 }
 0x6cc   :  { %2075 = vst [vmem:[%s16186_s9 + $0x1c] sm:$0x1] %v2074_v48  ;;  %vm14840_vm13 = vmand %vm4410_vm1, %vm5591_vm12 }
 0x6cd   :  { %9469 = vmatpush3.bf16.xpose.msra.mxu0 %v16470_v6 }
 0x6ce   :  { %9470 = vmatprep.subr.bf16.mxu0 %v16439_v38 }
 0x6d5   :  { %9471 = vmatpush3.bf16.xpose.msra.mxu0 %v16471_v4 }
 0x6d6   :  { %9472 = vmatprep.subr.bf16.mxu0 %v16439_v38 }
 0x6dd   :  { %9473 = vmatpush3.bf16.xpose.msra.mxu0 %v16472_v55 }
 0x6de   :  { %9474 = vmatprep.subr.bf16.mxu0 %v16439_v38 }
 0x6e5   :  { %9475 = vmatpush3.bf16.xpose.msra.mxu0 %v16473_v44 }
 0x6e6   :  { %9476 = vmatprep.subr.bf16.mxu0 %v16439_v38 }
 0x6ed   :  { %9477 = vmatpush3.bf16.xpose.msra.mxu0 %v16474_v61 }
 0x6ee   :  { %9478 = vmatprep.subr.bf16.mxu0 %v16439_v38 }
 0x6f5   :  { %9479 = vmatpush3.bf16.xpose.msra.mxu0 %v16475_v5 }
 0x6f6   :  { %9480 = vmatprep.subr.bf16.mxu0 %v16439_v38 }
 0x6fd   :  { %9481 = vmatpush3.bf16.xpose.msra.mxu0 %v16476_v46 }
 0x6fe   :  { %9506 = vmatprep.subr.bf16.mxu0 %v16439_v38 }
 0x77c   :  { %v2112_v39 = vpop.f32.mrf.mxu0 }
 0x77d   :  { %v2118_v43 = vadd.f32 %v2112_v39, %v116_v51 }
 0x77e   :  { %v9436_v14 = vpop.f32.mrf.mxu0 }
 0x780   :  { %v2115_v45 = vpop.f32.mrf.mxu0 }
 0x782   :  { %v9437_v49 = vpop.f32.mrf.mxu0 }
 0x784   :  { %v2158_v54 = vpop.f32.mrf.mxu0 }
 0x785   :  { %v2159_v63 = vadd.f32 %v11340_v52, %v2158_v54 }
 0x786   :  { %v9444_v59 = vpop.f32.mrf.mxu0 }
 0x787   :  { %2172 = vrot.lane.b32.xlu1 %v2159_v63, %s11688_s25  ;;  %v2164_v25 = vadd.f32 %v2159_v63, %v2118_v43 }
 0x788   :  { %v2161_v21 = vpop.f32.mrf.mxu0 }
 0x789   :  { %v8083_v26 = vmul.f32 -1.442695, %v2164_v25  ;;  %v16480_v25 = vld [vmem:[#allocation24_spill] sm:$0xff] }
 0x78a   :  { %v9445_v58 = vpop.f32.mrf.mxu0 }
 0x78b   :  { %11215 = vpow2.f32 %v8083_v26 }
 0x798   :  { %v11216_v16 = vpop.eup %11215 }
 0x799   :  { %v2168_v3 = vadd.f32 1.0, %v11216_v16  ;;  %v16481_v16 = vld [vmem:[#allocation25_spill] sm:$0xff] }
 0x79b   :  { %11217 = vrcp.f32 %v2168_v3  ;;  %v16482_v3 = vld [vmem:[#allocation26_spill] sm:$0xff] }
 0x7a8   :  { %v11218_v8 = vpop.eup %11217 }
 0x7a9   :  { %v2182_v27 = vsub.f32 1.0, %v11218_v8  ;;  %v2188_v34 = vmul.f32 %v11218_v8, %v16478_v32  ;;  %v16491_v32 = vld [vmem:[#allocation35_spill] sm:$0xff] }
 0x7f9   :  { %v2173_v60 = vpop.permute.xlu1 %2172 }
 0x7fa   :  { %v2175_v56 = vmul.f32 %v11218_v8, %v2173_v60  ;;  %v16483_v8 = vld [vmem:[#allocation27_spill] sm:$0xff]  ;;  %v16484_v60 = vld [vmem:[#allocation28_spill] sm:$0xff] }
 0x7fc   :  { %2177 = vrot.lane.b32.xlu0 %v2175_v56, %s11688_s25  ;;  %v16485_v56 = vld [vmem:[#allocation29_spill] sm:$0xff] }
 0x86e   :  { %v2178_v7 = vpop.permute.xlu0 %2177 }
 0x86f   :  { %v2180_v20 = vadd.f32 %v2178_v7, %v2118_v43  ;;  %v16486_v7 = vld [vmem:[#allocation30_spill] sm:$0xff] }
 0x871   :  { %11219 = vtanh.f32 %v2180_v20  ;;  %v16487_v20 = vld [vmem:[#allocation31_spill] sm:$0xff] }
 0x87e   :  { %v11220_v23 = vpop.eup %11219 }
 0x87f   :  { %2184 = vrot.lane.b32.xlu1 %v11220_v23, %s11689_s26  ;;  %v16488_v23 = vld [vmem:[#allocation32_spill] sm:$0xff] }
 0x8f1   :  { %v2185_v31 = vpop.permute.xlu1 %2184 }
 0x8f2   :  { %v2187_v35 = vmul.f32 %v2185_v31, %v2182_v27  ;;  %v16489_v27 = vld [vmem:[#allocation33_spill] sm:$0xff]  ;;  %v16490_v31 = vld [vmem:[#allocation34_spill] sm:$0xff] }
 0x8f4   :  { %v12958_v36 = vadd.f32 %v2188_v34, %v2187_v35  ;;  %v16492_v34 = vld [vmem:[#allocation37_spill] sm:$0xff]  ;;  %v16493_v35 = vld [vmem:[#allocation39_spill] sm:$0xff] }
 0x8f6   :  { %v12962_v37 = vpack.c.bf16 %v12958_v36, %v12958_v36 }
 0x8f8   :  { %v2198_v42 = vrot.slane %v12962_v37, %v16465_v50 }
 0x8fa   :  { %v2199_v9 = vcombine.high %v2198_v42, %v2198_v42  ;;  %v2206_v10 = vrot.slane %v2198_v42, %v16465_v50  ;;  %v16494_v42 = vld [vmem:[#allocation41_spill] sm:$0xff] }
 0x8fc   :  { %v8084_v11 = vpack.i.b16 %v2206_v10, %v2206_v10  ;;  %v2217_v13 = vunpack.i.h.s16 %v2206_v10  ;;  %v2213_v17 = vrot.slane %v2199_v9, %v16465_v50  ;;  %v2214_v40 = vcombine.high %v2206_v10, %v2206_v10  ;;  %v16495_v9 = vld [vmem:[#allocation43_spill] sm:$0xff] }
 0x8fe   :  { %v2228_v47 = vrot.slane %v8084_v11, %v16479_v2  ;;  %v2274_v1 = vpack.i.b16 %v2217_v13, %v2217_v13  ;;  %v8087_v19 = vpack.i.b16 %v2213_v17, %v2213_v17  ;;  %v2219_v41 = vunpack.i.h.s16 %v2213_v17  ;;  %v16496_v13 = vld [vmem:[#allocation44_spill] sm:$0xff] }
 0x8ff   :  { %v2221_v0 = vunpack.i.h.s16 %v2214_v40  ;;  %v2215_v57 = vcombine.high %v2213_v17, %v2213_v17  ;;  %v8090_v39 = vpack.i.b16 %v2214_v40, %v2214_v40  ;;  %v16497_v17 = vld [vmem:[#allocation45_spill] sm:$0xff]  ;;  %v16498_v40 = vld [vmem:[#allocation46_spill] sm:$0xff] }
 0x900   :  { %2229 = vrot.lane.b32.xlu0 %v2228_v47, %s11689_s26  ;;  %v2278_v62 = vrot.slane %v2274_v1, %v16479_v2  ;;  %v2374_v48 = vpack.i.b16 %v2219_v41, %v2219_v41  ;;  %v2328_v51 = vrot.slane %v8087_v19, %v16479_v2  ;;  %v16499_v47 = vld [vmem:[#allocation47_spill] sm:$0xff]  ;;  %v16500_v1 = vld [vmem:[#allocation48_spill] sm:$0xff]  ;;  %v16501_v19 = vld [vmem:[#allocation49_spill] sm:$0xff] }
 0x901   :  { %v2474_v14 = vpack.i.b16 %v2221_v0, %v2221_v0  ;;  %v2223_v45 = vunpack.i.h.s16 %v2215_v57  ;;  %v2428_v49 = vrot.slane %v8090_v39, %v16479_v2  ;;  %v8093_v54 = vpack.i.b16 %v2215_v57, %v2215_v57  ;;  %v16502_v41 = vld [vmem:[#allocation50_spill] sm:$0xff]  ;;  %v16505_v0 = vld [vmem:[#allocation53_spill] sm:$0xff]  ;;  %v16508_v39 = vld [vmem:[#allocation56_spill] sm:$0xff] }
 0x902   :  { %2279 = vrot.lane.b32.xlu1 %v2278_v62, %s11689_s26  ;;  %v2378_v43 = vrot.slane %v2374_v48, %v16479_v2  ;;  %v16503_v62 = vld [vmem:[#allocation51_spill] sm:$0xff]  ;;  %v16504_v48 = vld [vmem:[#allocation52_spill] sm:$0xff]  ;;  %v16506_v57 = vld [vmem:[#allocation54_spill] sm:$0xff] }
 0x903   :  { %v2478_v52 = vrot.slane %v2474_v14, %v16479_v2  ;;  %v2574_v63 = vpack.i.b16 %v2223_v45, %v2223_v45  ;;  %v2528_v59 = vrot.slane %v8093_v54, %v16479_v2  ;;  %v16510_v14 = vld [vmem:[#allocation58_spill] sm:$0xff]  ;;  %v16511_v45 = vld [vmem:[#allocation59_spill] sm:$0xff] }
 0x904   :  { %2329 = vrot.lane.b32.xlu0 %v2328_v51, %s11689_s26  ;;  %v16507_v51 = vld [vmem:[#allocation55_spill] sm:$0xff] }
 0x905   :  { %v2578_v21 = vrot.slane %v2574_v63, %v16479_v2  ;;  %v16513_v63 = vld [vmem:[#allocation63_spill] sm:$0xff] }
 0x906   :  { %2379 = vrot.lane.b32.xlu1 %v2378_v43, %s11689_s26  ;;  %v16509_v43 = vld [vmem:[#allocation57_spill] sm:$0xff] }
 0x908   :  { %2429 = vrot.lane.b32.xlu0 %v2428_v49, %s11689_s26 }
 0x90a   :  { %2479 = vrot.lane.b32.xlu1 %v2478_v52, %s11689_s26  ;;  %v16512_v52 = vld [vmem:[#allocation62_spill] sm:$0xff] }
 0x90c   :  { %2529 = vrot.lane.b32.xlu0 %v2528_v59, %s11689_s26  ;;  %v16514_v59 = vld [vmem:[#allocation66_spill] sm:$0xff] }
 0x90e   :  { %2579 = vrot.lane.b32.xlu1 %v2578_v21, %s11689_s26  ;;  %v16515_v21 = vld [vmem:[#allocation67_spill] sm:$0xff] }
 0x972   :  { %v2230_v58 = vpop.permute.xlu0 %2229 }
 0x973   :  { %9463 = vmatmul.mubr.msk.bf16.vlgmr.msra.gmra.mxu1 %vm295_vm2, %v2230_v58  ;;  %v16516_v58 = vld [vmem:[#allocation70_spill] sm:$0xff] }
 0x974   :  { %9487 = vmatpush3.bf16.xpose.msra.mxu1 %v16480_v25  ;;  %v2280_v26 = vpop.permute.xlu1 %2279  ;;  %9502 = vmatprep.mubr.msk.bf16.mxu1 %vm11686_vm0, %v16439_v38 }
 0x975   :  { %9483 = vmatmul.mubr.msk.bf16.vlgmr.msra.gmra.mxu0 %vm295_vm2, %v2280_v26  ;;  %9488 = vmatprep.subr.bf16.mxu1 %v16439_v38  ;;  %v16517_v26 = vld [vmem:[#allocation71_spill] sm:$0xff] }
 0x976   :  { %9507 = vmatpush3.bf16.xpose.msra.mxu0 %v16481_v16  ;;  %9522 = vmatprep.mubr.msk.bf16.mxu0 %vm11686_vm0, %v16439_v38  ;;  %v2330_v10 = vpop.permute.xlu0 %2329 }
 0x977   :  { %9508 = vmatprep.subr.bf16.mxu0 %v16439_v38 }
 0x978   :  { %v2380_v11 = vpop.permute.xlu1 %2379 }
 0x97a   :  { %v2430_v49 = vpop.permute.xlu0 %2429 }
 0x97c   :  { %9489 = vmatpush3.bf16.xpose.msra.mxu1 %v16482_v3  ;;  %v2480_v54 = vpop.permute.xlu1 %2479 }
 0x97d   :  { %9490 = vmatprep.subr.bf16.mxu1 %v16439_v38 }
 0x97e   :  { %9509 = vmatpush3.bf16.xpose.msra.mxu0 %v16483_v8 }
 0x97f   :  { %9510 = vmatprep.subr.bf16.mxu0 %v16439_v38 }
 0x984   :  { %9491 = vmatpush3.bf16.xpose.msra.mxu1 %v16484_v60 }
 0x985   :  { %9492 = vmatprep.subr.bf16.mxu1 %v16439_v38 }
 0x986   :  { %9511 = vmatpush3.bf16.xpose.msra.mxu0 %v16485_v56 }
 0x987   :  { %9512 = vmatprep.subr.bf16.mxu0 %v16439_v38 }
 0x98c   :  { %9493 = vmatpush3.bf16.xpose.msra.mxu1 %v16486_v7 }
 0x98d   :  { %9494 = vmatprep.subr.bf16.mxu1 %v16439_v38 }
 0x98e   :  { %9513 = vmatpush3.bf16.xpose.msra.mxu0 %v16487_v20 }
 0x98f   :  { %9514 = vmatprep.subr.bf16.mxu0 %v16439_v38 }
 0x994   :  { %9495 = vmatpush3.bf16.xpose.msra.mxu1 %v16488_v23 }
 0x995   :  { %9496 = vmatprep.subr.bf16.mxu1 %v16439_v38 }
 0x996   :  { %9515 = vmatpush3.bf16.xpose.msra.mxu0 %v16489_v27 }
 0x997   :  { %9516 = vmatprep.subr.bf16.mxu0 %v16439_v38 }
 0x99c   :  { %9497 = vmatpush3.bf16.xpose.msra.mxu1 %v16490_v31 }
 0x99d   :  { %9498 = vmatprep.subr.bf16.mxu1 %v16439_v38 }
 0x99e   :  { %9517 = vmatpush3.bf16.xpose.msra.mxu0 %v16491_v32 }
 0x99f   :  { %9518 = vmatprep.subr.bf16.mxu0 %v16439_v38 }
 0x9a4   :  { %9499 = vmatpush3.bf16.xpose.msra.mxu1 %v16492_v34 }
 0x9a5   :  { %9500 = vmatprep.subr.bf16.mxu1 %v16439_v38 }
 0x9a6   :  { %9519 = vmatpush3.bf16.xpose.msra.mxu0 %v16493_v35 }
 0x9a7   :  { %9520 = vmatprep.subr.bf16.mxu0 %v16439_v38 }
 0x9ac   :  { %9501 = vmatpush3.bf16.xpose.msra.mxu1 %v16494_v42 }
 0x9ad   :  { %9526 = vmatprep.subr.bf16.mxu1 %v16439_v38 }
 0x9ae   :  { %9521 = vmatpush3.bf16.xpose.msra.mxu0 %v16495_v9 }
 0x9af   :  { %9546 = vmatprep.subr.bf16.mxu0 %v16439_v38 }
 0x9b3   :  { %9503 = vmatmul.mubr.msk.bf16.vlgmr.msra.gmra.mxu1 %vm295_vm2, %v2330_v10  ;;  %v16518_v10 = vld [vmem:[#allocation74_spill] sm:$0xff] }
 0x9b4   :  { %9527 = vmatpush3.bf16.xpose.msra.mxu1 %v16496_v13  ;;  %9542 = vmatprep.mubr.msk.bf16.mxu1 %vm11686_vm0, %v16439_v38 }
 0x9b5   :  { %9523 = vmatmul.mubr.msk.bf16.vlgmr.msra.gmra.mxu0 %vm295_vm2, %v2380_v11  ;;  %9528 = vmatprep.subr.bf16.mxu1 %v16439_v38  ;;  %v16519_v11 = vld [vmem:[#allocation75_spill] sm:$0xff] }
 0x9b6   :  { %9547 = vmatpush3.bf16.xpose.msra.mxu0 %v16497_v17  ;;  %9562 = vmatprep.mubr.msk.bf16.mxu0 %vm11686_vm0, %v16439_v38 }
 0x9b7   :  { %9548 = vmatprep.subr.bf16.mxu0 %v16439_v38 }
 0x9bc   :  { %9529 = vmatpush3.bf16.xpose.msra.mxu1 %v16498_v40 }
 0x9bd   :  { %9530 = vmatprep.subr.bf16.mxu1 %v16439_v38 }
 0x9be   :  { %9549 = vmatpush3.bf16.xpose.msra.mxu0 %v16499_v47 }
 0x9bf   :  { %9550 = vmatprep.subr.bf16.mxu0 %v16439_v38 }
 0x9c4   :  { %9531 = vmatpush3.bf16.xpose.msra.mxu1 %v16500_v1 }
 0x9c5   :  { %9532 = vmatprep.subr.bf16.mxu1 %v16439_v38 }
 0x9c6   :  { %9551 = vmatpush3.bf16.xpose.msra.mxu0 %v16501_v19 }
 0x9c7   :  { %9552 = vmatprep.subr.bf16.mxu0 %v16439_v38 }
 0x9cc   :  { %9533 = vmatpush3.bf16.xpose.msra.mxu1 %v16502_v41  ;;  %v16528_v41 = vld [vmem:[#allocation92_spill] sm:$0xff] }
 0x9cd   :  { %9534 = vmatprep.subr.bf16.mxu1 %v16439_v38 }
 0x9ce   :  { %9553 = vmatpush3.bf16.xpose.msra.mxu0 %v16503_v62 }
 0x9cf   :  { %9554 = vmatprep.subr.bf16.mxu0 %v16439_v38 }
 0x9d4   :  { %9535 = vmatpush3.bf16.xpose.msra.mxu1 %v16504_v48 }
 0x9d5   :  { %9536 = vmatprep.subr.bf16.mxu1 %v16439_v38 }
 0x9d6   :  { %9555 = vmatpush3.bf16.xpose.msra.mxu0 %v16505_v0 }
 0x9d7   :  { %9556 = vmatprep.subr.bf16.mxu0 %v16439_v38 }
 0x9dc   :  { %9537 = vmatpush3.bf16.xpose.msra.mxu1 %v16506_v57 }
 0x9dd   :  { %9538 = vmatprep.subr.bf16.mxu1 %v16439_v38 }
 0x9de   :  { %9557 = vmatpush3.bf16.xpose.msra.mxu0 %v16507_v51 }
 0x9df   :  { %9558 = vmatprep.subr.bf16.mxu0 %v16439_v38 }
 0x9e4   :  { %9539 = vmatpush3.bf16.xpose.msra.mxu1 %v16508_v39 }
 0x9e5   :  { %9540 = vmatprep.subr.bf16.mxu1 %v16439_v38 }
 0x9e6   :  { %9559 = vmatpush3.bf16.xpose.msra.mxu0 %v16509_v43 }
 0x9e7   :  { %9560 = vmatprep.subr.bf16.mxu0 %v16439_v38 }
 0x9ec   :  { %9541 = vmatpush3.bf16.xpose.msra.mxu1 %v16510_v14 }
 0x9ed   :  { %9566 = vmatprep.subr.bf16.mxu1 %v16439_v38 }
 0x9ee   :  { %9561 = vmatpush3.bf16.xpose.msra.mxu0 %v16511_v45 }
 0x9ef   :  { %9586 = vmatprep.subr.bf16.mxu0 %v16439_v38 }
 0x9f3   :  { %9543 = vmatmul.mubr.msk.bf16.vlgmr.msra.gmra.mxu1 %vm295_vm2, %v2430_v49  ;;  %v16520_v49 = vld [vmem:[#allocation78_spill] sm:$0xff] }
 0x9f4   :  { %9567 = vmatpush3.bf16.xpose.msra.mxu1 %v16512_v52  ;;  %9582 = vmatprep.mubr.msk.bf16.mxu1 %vm11686_vm0, %v16439_v38 }
 0x9f5   :  { %9563 = vmatmul.mubr.msk.bf16.vlgmr.msra.gmra.mxu0 %vm295_vm2, %v2480_v54  ;;  %9568 = vmatprep.subr.bf16.mxu1 %v16439_v38  ;;  %v16521_v54 = vld [vmem:[#allocation79_spill] sm:$0xff] }
 0x9f6   :  { %9587 = vmatpush3.bf16.xpose.msra.mxu0 %v16513_v63  ;;  %9602 = vmatprep.mubr.msk.bf16.mxu0 %vm11686_vm0, %v16439_v38 }
 0x9f7   :  { %9588 = vmatprep.subr.bf16.mxu0 %v16439_v38 }
 0x9fc   :  { %9569 = vmatpush3.bf16.xpose.msra.mxu1 %v16514_v59 }
 0x9fd   :  { %9570 = vmatprep.subr.bf16.mxu1 %v16439_v38 }
 0x9fe   :  { %9589 = vmatpush3.bf16.xpose.msra.mxu0 %v16515_v21 }
 0x9ff   :  { %9590 = vmatprep.subr.bf16.mxu0 %v16439_v38 }
 0xa04   :  { %9571 = vmatpush3.bf16.xpose.msra.mxu1 %v16516_v58  ;;  %v16522_v58 = vld [vmem:[#allocation82_spill] sm:$0xff] }
 0xa05   :  { %9572 = vmatprep.subr.bf16.mxu1 %v16439_v38 }
 0xa06   :  { %9591 = vmatpush3.bf16.xpose.msra.mxu0 %v16517_v26  ;;  %v16523_v26 = vld [vmem:[#allocation83_spill] sm:$0xff] }
 0xa07   :  { %9592 = vmatprep.subr.bf16.mxu0 %v16439_v38 }
 0xa0c   :  { %9573 = vmatpush3.bf16.xpose.msra.mxu1 %v16518_v10  ;;  %v16524_v10 = vld [vmem:[#allocation86_spill] sm:$0xff] }
 0xa0d   :  { %9574 = vmatprep.subr.bf16.mxu1 %v16439_v38 }
 0xa0e   :  { %9593 = vmatpush3.bf16.xpose.msra.mxu0 %v16519_v11  ;;  %v16525_v11 = vld [vmem:[#allocation87_spill] sm:$0xff] }
 0xa0f   :  { %9594 = vmatprep.subr.bf16.mxu0 %v16439_v38 }
 0xa14   :  { %9575 = vmatpush3.bf16.xpose.msra.mxu1 %v16520_v49  ;;  %v16526_v49 = vld [vmem:[#allocation90_spill] sm:$0xff] }
 0xa15   :  { %9576 = vmatprep.subr.bf16.mxu1 %v16439_v38 }
 0xa16   :  { %9595 = vmatpush3.bf16.xpose.msra.mxu0 %v16521_v54  ;;  %v16527_v54 = vld [vmem:[#allocation91_spill] sm:$0xff] }
 0xa17   :  { %9596 = vmatprep.subr.bf16.mxu0 %v16439_v38 }
 0xa1c   :  { %9577 = vmatpush3.bf16.xpose.msra.mxu1 %v16522_v58  ;;  %v2530_v58 = vpop.permute.xlu0 %2529 }
 0xa1d   :  { %9578 = vmatprep.subr.bf16.mxu1 %v16439_v38 }
 0xa1e   :  { %9597 = vmatpush3.bf16.xpose.msra.mxu0 %v16523_v26 }
 0xa1f   :  { %9598 = vmatprep.subr.bf16.mxu0 %v16439_v38 }
 0xa24   :  { %9579 = vmatpush3.bf16.xpose.msra.mxu1 %v16524_v10  ;;  %v2580_v10 = vpop.permute.xlu1 %2579 }
 0xa25   :  { %9580 = vmatprep.subr.bf16.mxu1 %v16439_v38 }
 0xa26   :  { %9599 = vmatpush3.bf16.xpose.msra.mxu0 %v16525_v11  ;;  %v11341_v11 = vld [vmem:[%s16184_s1 + $0x38] sm:$0xff]  }
 0xa27   :  { %9600 = vmatprep.subr.bf16.mxu0 %v16439_v38 }
 0xa2c   :  { %9581 = vmatpush3.bf16.xpose.msra.mxu1 %v16526_v49 }
 0xa2d   :  { %9606 = vmatprep.subr.bf16.mxu1 %v16439_v38 }
 0xa2e   :  { %9601 = vmatpush3.bf16.xpose.msra.mxu0 %v16527_v54 }
 0xa2f   :  { %9626 = vmatprep.subr.bf16.mxu0 %v16439_v38 }
 0xa33   :  { %9583 = vmatmul.mubr.msk.bf16.vlgmr.msra.gmra.mxu1 %vm295_vm2, %v2530_v58  ;;  %v13099_v26 = vpop.f32.mrf.mxu1  ;;  %v11342_v58 = vld [vmem:[%s16184_s1 + $0x78] sm:$0xff]  }
 0xa34   :  { %9607 = vmatpush3.bf16.msra.mxu1 %v11341_v11  ;;  %9622 = vmatprep.mubr.msk.bf16.mxu1 %vm11686_vm0, %v16439_v38 }
 0xa35   :  { %9603 = vmatmul.mubr.msk.bf16.vlgmr.msra.gmra.mxu0 %vm295_vm2, %v2580_v10  ;;  %v9464_v49 = vpop.f32.mrf.mxu1  ;;  %v13107_v54 = vpop.f32.mrf.mxu0  ;;  %9608 = vmatprep.subr.bf16.mxu1 %v16439_v38  ;;  %v11343_v10 = vld [vmem:[%s16184_s1 + $0x30] sm:$0xff]  }
 0xa36   :  { %9627 = vmatpush3.bf16.msra.mxu0 %v11342_v58  ;;  %9642 = vmatprep.mubr.msk.bf16.mxu0 %vm11686_vm0, %v16439_v38  ;;  %v11344_v58 = vld [vmem:[%s16184_s1 + $0x70] sm:$0xff]  }
 0xa37   :  { %v2271_v21 = vpop.f32.mrf.mxu1  ;;  %v9484_v11 = vpop.f32.mrf.mxu0  ;;  %9628 = vmatprep.subr.bf16.mxu0 %v16439_v38 }
 0xa38   :  { %9609 = vmatpush3.bf16.msra.mxu1 %v11343_v10  ;;  %v11345_v21 = vld [vmem:[%s16184_s1 + $0x28] sm:$0xff]   ;;  %v11348_v11 = vld [vmem:[%s16184_s1 + $0x60] sm:$0xff]   ;;  %v11349_v10 = vld [vmem:[%s16184_s1 + $0x18] sm:$0xff]  }
 0xa39   :  { %v9465_v49 = vpop.f32.mrf.mxu1  ;;  %v2321_v59 = vpop.f32.mrf.mxu0  ;;  %9610 = vmatprep.subr.bf16.mxu1 %v16439_v38 }
 0xa3a   :  { %9629 = vmatpush3.bf16.msra.mxu0 %v11344_v58  ;;  %v11346_v59 = vld [vmem:[%s16184_s1 + $0x68] sm:$0xff]   ;;  %v11350_v49 = vld [vmem:[%s16184_s1 + $0x58] sm:$0xff]   ;;  %v11351_v58 = vld [vmem:[%s16184_s1 + $0x10] sm:$0xff]  }
 0xa3b   :  { %v9485_v63 = vpop.f32.mrf.mxu0  ;;  %9630 = vmatprep.subr.bf16.mxu0 %v16439_v38 }
 0xa3c   :  { %9611 = vmatpush3.bf16.msra.mxu1 %v11345_v21  ;;  %v11347_v63 = vld [vmem:[%s16184_s1 + $0x20] sm:$0xff]   ;;  %v11352_v21 = vld [vmem:[%s16184_s1 + $0x50] sm:$0xff]  }
 0xa3d   :  { %9612 = vmatprep.subr.bf16.mxu1 %v16439_v38 }
 0xa3e   :  { %9631 = vmatpush3.bf16.msra.mxu0 %v11346_v59  ;;  %v11353_v59 = vld [vmem:[%s16184_s1 + $0x8] sm:$0xff]  }
 0xa3f   :  { %9632 = vmatprep.subr.bf16.mxu0 %v16439_v38 }
 0xa40   :  { %9613 = vmatpush3.bf16.msra.mxu1 %v11347_v63  ;;  %v11354_v63 = vld [vmem:[%s16184_s1 + $0x48] sm:$0xff]  }
 0xa41   :  { %9614 = vmatprep.subr.bf16.mxu1 %v16439_v38 }
 0xa42   :  { %9633 = vmatpush3.bf16.msra.mxu0 %v11348_v11  ;;  %v11355_v11 = vld [vmem:[%s16184_s1] sm:$0xff]  }
 0xa43   :  { %9634 = vmatprep.subr.bf16.mxu0 %v16439_v38 }
 0xa44   :  { %9615 = vmatpush3.bf16.msra.mxu1 %v11349_v10  ;;  %v11356_v10 = vld [vmem:[%s16184_s1 + $0x40] sm:$0xff]  }
 0xa45   :  { %9616 = vmatprep.subr.bf16.mxu1 %v16439_v38 }
 0xa46   :  { %9635 = vmatpush3.bf16.msra.mxu0 %v11350_v49 }
 0xa47   :  { %9636 = vmatprep.subr.bf16.mxu0 %v16439_v38 }
 0xa48   :  { %9617 = vmatpush3.bf16.msra.mxu1 %v11351_v58 }
 0xa49   :  { %9618 = vmatprep.subr.bf16.mxu1 %v16439_v38 }
 0xa4a   :  { %9637 = vmatpush3.bf16.msra.mxu0 %v11352_v21 }
 0xa4b   :  { %9638 = vmatprep.subr.bf16.mxu0 %v16439_v38 }
 0xa4c   :  { %9619 = vmatpush3.bf16.msra.mxu1 %v11353_v59 }
 0xa4d   :  { %9620 = vmatprep.subr.bf16.mxu1 %v16439_v38 }
 0xa4e   :  { %9639 = vmatpush3.bf16.msra.mxu0 %v11354_v63 }
 0xa4f   :  { %9640 = vmatprep.subr.bf16.mxu0 %v16439_v38 }
 0xa50   :  { %9621 = vmatpush3.bf16.msra.mxu1 %v11355_v11 }
 0xa51   :  { %9646 = vmatprep.subr.bf16.mxu1 %v16439_v38 }
 0xa52   :  { %9641 = vmatpush3.bf16.msra.mxu0 %v11356_v10  ;;  %v2625_v10 = vadd.f32 %v13107_v54, %v16528_v41 }
 0xa53   :  { %9666 = vmatprep.subr.bf16.mxu0 %v16439_v38 }
 0xa73   :  { %v2368_v49 = vpop.f32.mrf.mxu1 }
 0xa74   :  { %v2626_v19 = vadd.f32 %v2368_v49, %v16528_v41 }
 0xa75   :  { %v9504_v58 = vpop.f32.mrf.mxu1  ;;  %v2418_v21 = vpop.f32.mrf.mxu0 }
 0xa76   :  { %v2640_v58 = vrot.slane %v2625_v10, 7 }
 0xa77   :  { %v2371_v59 = vpop.f32.mrf.mxu1  ;;  %v9524_v63 = vpop.f32.mrf.mxu0 }
 0xa78   :  { %v2627_v59 = vadd.f32 %v2418_v21, %v16528_v41  ;;  %v2642_v63 = vrot.slane %v2626_v19, 6 }
 0xa79   :  { %v9505_v52 = vpop.f32.mrf.mxu1  ;;  %v2421_v45 = vpop.f32.mrf.mxu0 }
 0xa7b   :  { %v9525_v14 = vpop.f32.mrf.mxu0 }
 0xab3   :  { %v2468_v43 = vpop.f32.mrf.mxu1 }
 0xab4   :  { %v2628_v45 = vadd.f32 %v2468_v43, %v16528_v41 }
 0xab5   :  { %v9544_v39 = vpop.f32.mrf.mxu1  ;;  %v2518_v11 = vpop.f32.mrf.mxu0 }
 0xab6   :  { %v2624_v39 = vadd.f32 %v13099_v26, %v16528_v41 }
 0xab7   :  { %v2471_v51 = vpop.f32.mrf.mxu1  ;;  %v9564_v57 = vpop.f32.mrf.mxu0 }
 0xab8   :  { %v2641_v51 = vsel %vm1389_vm4, %v2640_v58, %v2624_v39  ;;  %v2644_v57 = vrot.slane %v2627_v59, 5 }
 0xab9   :  { %v9545_v0 = vpop.f32.mrf.mxu1  ;;  %v2521_v48 = vpop.f32.mrf.mxu0 }
 0xaba   :  { %v2629_v48 = vadd.f32 %v2518_v11, %v16528_v41  ;;  %v2646_v0 = vrot.slane %v2628_v45, 4 }
 0xabb   :  { %v9565_v62 = vpop.f32.mrf.mxu0 }
 0xabc   :  { %v2643_v62 = vsel %vm1392_vm5, %v2642_v63, %v2641_v51  ;;  %v2648_v52 = vrot.slane %v2629_v48, 3 }
 0xabd   :  { %v2645_v14 = vsel %vm1395_vm6, %v2644_v57, %v2643_v62 }
 0xabe   :  { %v2647_v49 = vsel %vm1398_vm7, %v2646_v0, %v2645_v14 }
 0xabf   :  { %v2649_v11 = vsel %vm1401_vm8, %v2648_v52, %v2647_v49 }
 0xaf3   :  { %v2568_v54 = vpop.f32.mrf.mxu1 }
 0xaf4   :  { %v2630_v21 = vadd.f32 %v2568_v54, %v16528_v41 }
 0xaf5   :  { %v9584_v43 = vpop.f32.mrf.mxu1  ;;  %v2618_v1 = vpop.f32.mrf.mxu0 }
 0xaf6   :  { %v2650_v47 = vrot.slane %v2630_v21, 2  ;;  %v2631_v26 = vadd.f32 %v2618_v1, %v16528_v41 }
 0xaf7   :  { %v2571_v58 = vpop.f32.mrf.mxu1  ;;  %v9604_v40 = vpop.f32.mrf.mxu0 }
 0xaf8   :  { %v2652_v17 = vrot.slane %v2631_v26, 1  ;;  %v2651_v63 = vsel %vm1404_vm9, %v2650_v47, %v2649_v11 }
 0xaf9   :  { %v9585_v51 = vpop.f32.mrf.mxu1  ;;  %v2621_v57 = vpop.f32.mrf.mxu0 }
 0xafa   :  { %v2653_v62 = vsel %vm1407_vm10, %v2652_v17, %v2651_v63 }
 0xafb   :  { %2655 = vmax.xlane.f32.xlu0 %v2653_v62  ;;  %v9605_v0 = vpop.f32.mrf.mxu0 }
 0xb11   :  { %3299 = vrot.lane.b32.xlu0 %v12962_v37, %s11689_s26 }
 0xb84   :  { %v2656_v14 = vpop.xlane.xlu0 %2655 }
 0xb85   :  { %v2658_v54 = vrot.slane %v2656_v14, 1  ;;  %v2659_v43 = vrot.slane %v2656_v14, 2  ;;  %v2660_v1 = vrot.slane %v2656_v14, 3  ;;  %v2661_v58 = vrot.slane %v2656_v14, 4 }
 0xb86   :  { %v2662_v40 = vrot.slane %v2656_v14, 5  ;;  %v2663_v41 = vrot.slane %v2656_v14, 6  ;;  %v2664_v52 = vrot.slane %v2656_v14, 7  ;;  %v2673_v49 = vsub.f32 %v2624_v39, %v2656_v14 }
 0xb87   :  { %v2674_v13 = vsub.f32 %v2625_v10, %v2658_v54  ;;  %v2675_v47 = vsub.f32 %v2626_v19, %v2659_v43  ;;  %v2676_v11 = vsub.f32 %v2627_v59, %v2660_v1  ;;  %v2677_v51 = vsub.f32 %v2628_v45, %v2661_v58 }
 0xb88   :  { %v2678_v57 = vsub.f32 %v2629_v48, %v2662_v40  ;;  %v2679_v17 = vsub.f32 %v2630_v21, %v2663_v41  ;;  %v2681_v63 = vmul.f32 1.442695, %v2673_v49  ;;  %v2680_v42 = vsub.f32 %v2631_v26, %v2664_v52 }
 0xb89   :  { %v2683_v62 = vmul.f32 1.442695, %v2674_v13  ;;  %v2685_v0 = vmul.f32 1.442695, %v2675_v47  ;;  %v2687_v9 = vmul.f32 1.442695, %v2676_v11 }
 0xb8a   :  { %11221 = vpow2.f32 %v2681_v63  ;;  %v2689_v35 = vmul.f32 1.442695, %v2677_v51  ;;  %v2691_v34 = vmul.f32 1.442695, %v2678_v57  ;;  %v2693_v32 = vmul.f32 1.442695, %v2679_v17 }
 0xb8b   :  { %11223 = vpow2.f32 %v2683_v62  ;;  %v2695_v31 = vmul.f32 1.442695, %v2680_v42 }
 0xb8c   :  { %11225 = vpow2.f32 %v2685_v0 }
 0xb8d   :  { %11227 = vpow2.f32 %v2687_v9 }
 0xb8e   :  { %11229 = vpow2.f32 %v2689_v35 }
 0xb8f   :  { %11231 = vpow2.f32 %v2691_v34 }
 0xb90   :  { %11233 = vpow2.f32 %v2693_v32 }
 0xb91   :  { %11235 = vpow2.f32 %v2695_v31 }
 0xb97   :  { %v11222_v19 = vpop.eup %11221 }
 0xb98   :  { %v11224_v10 = vpop.eup %11223 }
 0xb99   :  { %v11226_v41 = vpop.eup %11225  ;;  %v2705_v59 = vrot.slane %v11224_v10, 7 }
 0xb9a   :  { %v11228_v13 = vpop.eup %11227  ;;  %v2707_v45 = vrot.slane %v11226_v41, 6 }
 0xb9b   :  { %v11230_v39 = vpop.eup %11229  ;;  %v2706_v48 = vsel %vm1389_vm4, %v2705_v59, %v11222_v19  ;;  %v2709_v21 = vrot.slane %v11228_v13, 5 }
 0xb9c   :  { %v11232_v26 = vpop.eup %11231  ;;  %v2708_v14 = vsel %vm1392_vm5, %v2707_v45, %v2706_v48  ;;  %v2711_v54 = vrot.slane %v11230_v39, 4 }
 0xb9d   :  { %v11234_v9 = vpop.eup %11233  ;;  %v2710_v35 = vsel %vm1395_vm6, %v2709_v21, %v2708_v14  ;;  %v2713_v34 = vrot.slane %v11232_v26, 3 }
 0xb9e   :  { %v11236_v32 = vpop.eup %11235  ;;  %v2712_v31 = vsel %vm1398_vm7, %v2711_v54, %v2710_v35  ;;  %v2715_v42 = vrot.slane %v11234_v9, 2 }
 0xb9f   :  { %v2714_v43 = vsel %vm1401_vm8, %v2713_v34, %v2712_v31  ;;  %v2717_v1 = vrot.slane %v11236_v32, 1  ;;  %v11364_v31 = vld [vmem:[%s16184_s1 + $0xe0] sm:$0xff]  }
 0xba0   :  { %v2716_v58 = vsel %vm1404_vm9, %v2715_v42, %v2714_v43  ;;  %v11365_v42 = vld [vmem:[%s16184_s1 + $0x98] sm:$0xff]  }
 0xba1   :  { %v2718_v40 = vsel %vm1407_vm10, %v2717_v1, %v2716_v58  ;;  %v11366_v43 = vld [vmem:[%s16184_s1 + $0xd8] sm:$0xff]   ;;  %v11367_v1 = vld [vmem:[%s16184_s1 + $0x90] sm:$0xff]  }
 0xba2   :  { %2720 = vadd.xlane.f32.xlu1 %v2718_v40  ;;  %v11368_v58 = vld [vmem:[%s16184_s1 + $0xd0] sm:$0xff]   ;;  %v11369_v40 = vld [vmem:[%s16184_s1 + $0x88] sm:$0xff]  }
 0xc2b   :  { %v2721_v52 = vpop.xlane.xlu1 %2720 }
 0xc2c   :  { %11237 = vrcp.f32 %v2721_v52  ;;  %v11370_v52 = vld [vmem:[%s16184_s1 + $0xc8] sm:$0xff]  }
 0xc39   :  { %v11238_v49 = vpop.eup %11237 }
 0xc3a   :  { %v2739_v47 = vmul.f32 %v11238_v49, %v11222_v19  ;;  %v2724_v11 = vrot.slane %v11238_v49, 1  ;;  %v2725_v51 = vrot.slane %v11238_v49, 2  ;;  %v2726_v57 = vrot.slane %v11238_v49, 3 }
 0xc3b   :  { %v2727_v17 = vrot.slane %v11238_v49, 4  ;;  %v2728_v63 = vrot.slane %v11238_v49, 5  ;;  %v2729_v62 = vrot.slane %v11238_v49, 6  ;;  %v2730_v0 = vrot.slane %v11238_v49, 7  ;;  %v11371_v49 = vld [vmem:[%s16184_s1 + $0x80] sm:$0xff]  }
 0xc3c   :  { %v2747_v59 = vpack.c.bf16 %v2739_v47, %v2739_v47  ;;  %3083 = vst [vmem:[%s16185_s8 + $0x1] sm:$0x1] %v2739_v47  ;;  %v2740_v45 = vmul.f32 %v11224_v10, %v2724_v11  ;;  %v13201_v48 = vmul.f32 %v11226_v41, %v2725_v51  ;;  %v13203_v21 = vmul.f32 %v11228_v13, %v2726_v57  ;;  %v11357_v10 = vld [vmem:[%s16184_s1 + $0xb8] sm:$0xff]   ;;  %v11359_v13 = vld [vmem:[%s16184_s1 + $0xb0] sm:$0xff]   ;;  %v11372_v11 = vld [vmem:[%s16184_s1 + $0xc0] sm:$0xff]  }
 0xc3d   :  { %v13205_v14 = vmul.f32 %v11230_v39, %v2727_v17  ;;  %v13207_v19 = vmul.f32 %v11232_v26, %v2728_v63  ;;  %v13209_v54 = vmul.f32 %v11234_v9, %v2729_v62  ;;  %v13211_v35 = vmul.f32 %v11236_v32, %v2730_v0  ;;  %v11358_v41 = vld [vmem:[%s16184_s1 + $0xf8] sm:$0xff]   ;;  %v11360_v39 = vld [vmem:[%s16184_s1 + $0xf0] sm:$0xff]   ;;  %v11361_v26 = vld [vmem:[%s16184_s1 + $0xa8] sm:$0xff]  }
 0xc3e   :  { %9623 = vmatmul.mubr.bf16.vlgmr.msra.gmra.mxu1 %v2747_v59  ;;  %v2748_v34 = vpack.c.bf16 %v2740_v45, %v2740_v45  ;;  %3084 = vst [vmem:[%s16185_s8 + $0x9] sm:$0x1] %v2740_v45  ;;  %3085 = vst [vmem:[%s16185_s8 + $0x11] sm:$0x1] %v13201_v48  ;;  %v11362_v9 = vld [vmem:[%s16184_s1 + $0xe8] sm:$0xff]   ;;  %v11363_v32 = vld [vmem:[%s16184_s1 + $0xa0] sm:$0xff]   ;;  %v2749_v47 = vpack.c.bf16 %v13201_v48, %v13201_v48  ;;  %v2750_v51 = vpack.c.bf16 %v13203_v21, %v13203_v21 }
 0xc3f   :  { %3086 = vst [vmem:[%s16185_s8 + $0x19] sm:$0x1] %v13203_v21  ;;  %9647 = vmatpush3.bf16.msra.mxu1 %v11357_v10  ;;  %9662 = vmatprep.mubr.msk.bf16.mxu1 %vm11686_vm0, %v16439_v38  ;;  %3087 = vst [vmem:[%s16185_s8 + $0x21] sm:$0x1] %v13205_v14  ;;  %v11373_v57 = vld [vmem:[%s16184_s1 + $0x138] sm:$0xff]   ;;  %v11375_v63 = vld [vmem:[%s16184_s1 + $0x130] sm:$0xff]  }
 0xc40   :  { %3088 = vst [vmem:[%s16185_s8 + $0x29] sm:$0x1] %v13207_v19  ;;  %3089 = vst [vmem:[%s16185_s8 + $0x31] sm:$0x1] %v13209_v54  ;;  %9643 = vmatmul.mubr.bf16.vlgmr.msra.gmra.mxu0 %v2748_v34  ;;  %9648 = vmatprep.subr.bf16.mxu1 %v16439_v38  ;;  %v11374_v17 = vld [vmem:[%s16184_s1 + $0x178] sm:$0xff]   ;;  %v11376_v62 = vld [vmem:[%s16184_s1 + $0x170] sm:$0xff]  }
 0xc41   :  { %3090 = vst [vmem:[%s16185_s8 + $0x39] sm:$0x1] %v13211_v35  ;;  %9667 = vmatpush3.bf16.msra.mxu0 %v11358_v41  ;;  %9682 = vmatprep.mubr.msk.bf16.mxu0 %vm11686_vm0, %v16439_v38  ;;  %v11377_v0 = vld [vmem:[%s16184_s1 + $0x128] sm:$0xff]   ;;  %v11379_v45 = vld [vmem:[%s16184_s1 + $0x120] sm:$0xff]   ;;  %v11381_v21 = vld [vmem:[%s16184_s1 + $0x118] sm:$0xff]  }
 0xc42   :  { %9668 = vmatprep.subr.bf16.mxu0 %v16439_v38  ;;  %v11378_v59 = vld [vmem:[%s16184_s1 + $0x168] sm:$0xff]   ;;  %v11380_v48 = vld [vmem:[%s16184_s1 + $0x160] sm:$0xff]   ;;  %v11382_v34 = vld [vmem:[%s16184_s1 + $0x158] sm:$0xff]  }
 0xc43   :  { %9649 = vmatpush3.bf16.msra.mxu1 %v11359_v13  ;;  %v11383_v10 = vld [vmem:[%s16184_s1 + $0x110] sm:$0xff]   ;;  %v11385_v13 = vld [vmem:[%s16184_s1 + $0x108] sm:$0xff]  }
 0xc44   :  { %9650 = vmatprep.subr.bf16.mxu1 %v16439_v38  ;;  %v11384_v41 = vld [vmem:[%s16184_s1 + $0x150] sm:$0xff]  }
 0xc45   :  { %9669 = vmatpush3.bf16.msra.mxu0 %v11360_v39  ;;  %v11386_v39 = vld [vmem:[%s16184_s1 + $0x148] sm:$0xff]  }
 0xc46   :  { %9670 = vmatprep.subr.bf16.mxu0 %v16439_v38 }
 0xc47   :  { %9651 = vmatpush3.bf16.msra.mxu1 %v11361_v26  ;;  %v11387_v26 = vld [vmem:[%s16184_s1 + $0x100] sm:$0xff]  }
 0xc48   :  { %9652 = vmatprep.subr.bf16.mxu1 %v16439_v38 }
 0xc49   :  { %9671 = vmatpush3.bf16.msra.mxu0 %v11362_v9  ;;  %v2751_v9 = vpack.c.bf16 %v13205_v14, %v13205_v14  ;;  %v11390_v14 = vld [vmem:[%s16184_s1 + $0x1f8] sm:$0xff]  }
 0xc4a   :  { %9672 = vmatprep.subr.bf16.mxu0 %v16439_v38 }
 0xc4b   :  { %9653 = vmatpush3.bf16.msra.mxu1 %v11363_v32  ;;  %v11388_v32 = vld [vmem:[%s16184_s1 + $0x140] sm:$0xff]  }
 0xc4c   :  { %9654 = vmatprep.subr.bf16.mxu1 %v16439_v38 }
 0xc4d   :  { %9673 = vmatpush3.bf16.msra.mxu0 %v11364_v31  ;;  %v2752_v31 = vpack.c.bf16 %v13207_v19, %v13207_v19  ;;  %v11391_v19 = vld [vmem:[%s16184_s1 + $0x1b0] sm:$0xff]  }
 0xc4e   :  { %9674 = vmatprep.subr.bf16.mxu0 %v16439_v38 }
 0xc4f   :  { %9655 = vmatpush3.bf16.msra.mxu1 %v11365_v42  ;;  %v11389_v42 = vld [vmem:[%s16184_s1 + $0x1b8] sm:$0xff]  }
 0xc50   :  { %9656 = vmatprep.subr.bf16.mxu1 %v16439_v38 }
 0xc51   :  { %9675 = vmatpush3.bf16.msra.mxu0 %v11366_v43  ;;  %v11392_v43 = vld [vmem:[%s16184_s1 + $0x1f0] sm:$0xff]  }
 0xc52   :  { %9676 = vmatprep.subr.bf16.mxu0 %v16439_v38 }
 0xc53   :  { %9657 = vmatpush3.bf16.msra.mxu1 %v11367_v1  ;;  %v11393_v1 = vld [vmem:[%s16184_s1 + $0x1a8] sm:$0xff]  }
 0xc54   :  { %9658 = vmatprep.subr.bf16.mxu1 %v16439_v38 }
 0xc55   :  { %9677 = vmatpush3.bf16.msra.mxu0 %v11368_v58  ;;  %v11394_v58 = vld [vmem:[%s16184_s1 + $0x1e8] sm:$0xff]  }
 0xc56   :  { %9678 = vmatprep.subr.bf16.mxu0 %v16439_v38 }
 0xc57   :  { %9659 = vmatpush3.bf16.msra.mxu1 %v11369_v40  ;;  %v11395_v40 = vld [vmem:[%s16184_s1 + $0x1a0] sm:$0xff]  }
 0xc58   :  { %9660 = vmatprep.subr.bf16.mxu1 %v16439_v38 }
 0xc59   :  { %9679 = vmatpush3.bf16.msra.mxu0 %v11370_v52  ;;  %v11396_v52 = vld [vmem:[%s16184_s1 + $0x1e0] sm:$0xff]  }
 0xc5a   :  { %9680 = vmatprep.subr.bf16.mxu0 %v16439_v38 }
 0xc5b   :  { %9661 = vmatpush3.bf16.msra.mxu1 %v11371_v49  ;;  %v11397_v49 = vld [vmem:[%s16184_s1 + $0x198] sm:$0xff]  }
 0xc5c   :  { %9686 = vmatprep.subr.bf16.mxu1 %v16439_v38 }
 0xc5d   :  { %9681 = vmatpush3.bf16.msra.mxu0 %v11372_v11  ;;  %v11399_v11 = vld [vmem:[%s16184_s1 + $0x190] sm:$0xff]  }
 0xc5e   :  { %9663 = vmatmul.mubr.bf16.vlgmr.msra.gmra.mxu1 %v2749_v47  ;;  %9706 = vmatprep.subr.bf16.mxu0 %v16439_v38  ;;  %v11398_v47 = vld [vmem:[%s16184_s1 + $0x1d8] sm:$0xff]  }
 0xc5f   :  { %9687 = vmatpush3.bf16.msra.mxu1 %v11373_v57  ;;  %9702 = vmatprep.mubr.msk.bf16.mxu1 %vm11686_vm0, %v16439_v38  ;;  %v11401_v57 = vld [vmem:[%s16184_s1 + $0x188] sm:$0xff]  }
 0xc60   :  { %9683 = vmatmul.mubr.bf16.vlgmr.msra.gmra.mxu0 %v2750_v51  ;;  %9688 = vmatprep.subr.bf16.mxu1 %v16439_v38  ;;  %v11400_v51 = vld [vmem:[%s16184_s1 + $0x1d0] sm:$0xff]  }
 0xc61   :  { %9707 = vmatpush3.bf16.msra.mxu0 %v11374_v17  ;;  %9722 = vmatprep.mubr.msk.bf16.mxu0 %vm11686_vm0, %v16439_v38  ;;  %v11402_v17 = vld [vmem:[%s16184_s1 + $0x1c8] sm:$0xff]  }
 0xc62   :  { %9708 = vmatprep.subr.bf16.mxu0 %v16439_v38 }
 0xc63   :  { %9689 = vmatpush3.bf16.msra.mxu1 %v11375_v63  ;;  %v11403_v63 = vld [vmem:[%s16184_s1 + $0x180] sm:$0xff]  }
 0xc64   :  { %9690 = vmatprep.subr.bf16.mxu1 %v16439_v38 }
 0xc65   :  { %9709 = vmatpush3.bf16.msra.mxu0 %v11376_v62  ;;  %v2753_v62 = vpack.c.bf16 %v13209_v54, %v13209_v54  ;;  %v11406_v54 = vld [vmem:[%s16180_s5 + $0x8] sm:$0xff]  }
 0xc66   :  { %9710 = vmatprep.subr.bf16.mxu0 %v16439_v38 }
 0xc67   :  { %9691 = vmatpush3.bf16.msra.mxu1 %v11377_v0  ;;  %v11404_v0 = vld [vmem:[%s16184_s1 + $0x1c0] sm:$0xff]  }
 0xc68   :  { %9692 = vmatprep.subr.bf16.mxu1 %v16439_v38 }
 0xc69   :  { %9711 = vmatpush3.bf16.msra.mxu0 %v11378_v59  ;;  %v2754_v59 = vpack.c.bf16 %v13211_v35, %v13211_v35  ;;  %v11407_v35 = vld [vmem:[%s16177_s4] sm:$0xff]  }
 0xc6a   :  { %9712 = vmatprep.subr.bf16.mxu0 %v16439_v38 }
 0xc6b   :  { %9693 = vmatpush3.bf16.msra.mxu1 %v11379_v45  ;;  %v11405_v45 = vld [vmem:[%s16177_s4 + $0x8] sm:$0xff]  }
 0xc6c   :  { %9694 = vmatprep.subr.bf16.mxu1 %v16439_v38 }
 0xc6d   :  { %9713 = vmatpush3.bf16.msra.mxu0 %v11380_v48  ;;  %v11408_v48 = vld [vmem:[%s16180_s5] sm:$0xff]  }
 0xc6e   :  { %9714 = vmatprep.subr.bf16.mxu0 %v16439_v38 }
 0xc6f   :  { %9695 = vmatpush3.bf16.msra.mxu1 %v11381_v21  ;;  %v3300_v21 = vpop.permute.xlu0 %3299 }
 0xc70   :  { %9696 = vmatprep.subr.bf16.mxu1 %v16439_v38 }
 0xc71   :  { %9715 = vmatpush3.bf16.msra.mxu0 %v11382_v34 }
 0xc72   :  { %9716 = vmatprep.subr.bf16.mxu0 %v16439_v38 }
 0xc73   :  { %9697 = vmatpush3.bf16.msra.mxu1 %v11383_v10 }
 0xc74   :  { %9698 = vmatprep.subr.bf16.mxu1 %v16439_v38 }
 0xc75   :  { %9717 = vmatpush3.bf16.msra.mxu0 %v11384_v41 }
 0xc76   :  { %9718 = vmatprep.subr.bf16.mxu0 %v16439_v38 }
 0xc77   :  { %9699 = vmatpush3.bf16.msra.mxu1 %v11385_v13 }
 0xc78   :  { %9700 = vmatprep.subr.bf16.mxu1 %v16439_v38 }
 0xc79   :  { %9719 = vmatpush3.bf16.msra.mxu0 %v11386_v39 }
 0xc7a   :  { %9720 = vmatprep.subr.bf16.mxu0 %v16439_v38 }
 0xc7b   :  { %9701 = vmatpush3.bf16.msra.mxu1 %v11387_v26 }
 0xc7c   :  { %9726 = vmatprep.subr.bf16.mxu1 %v16439_v38 }
 0xc7d   :  { %9721 = vmatpush3.bf16.msra.mxu0 %v11388_v32 }
 0xc7e   :  { %9703 = vmatmul.mubr.bf16.vlgmr.msra.gmra.mxu1 %v2751_v9  ;;  %9746 = vmatprep.subr.bf16.mxu0 %v16439_v38 }
 0xc7f   :  { %9727 = vmatpush3.bf16.msra.mxu1 %v11389_v42  ;;  %9742 = vmatprep.mubr.msk.bf16.mxu1 %vm11686_vm0, %v16439_v38 }
 0xc80   :  { %9723 = vmatmul.mubr.bf16.vlgmr.msra.gmra.mxu0 %v2752_v31  ;;  %9728 = vmatprep.subr.bf16.mxu1 %v16439_v38 }
 0xc81   :  { %9747 = vmatpush3.bf16.msra.mxu0 %v11390_v14  ;;  %9762 = vmatprep.mubr.msk.bf16.mxu0 %vm11686_vm0, %v16439_v38 }
 0xc82   :  { %9748 = vmatprep.subr.bf16.mxu0 %v16439_v38 }
 0xc83   :  { %9729 = vmatpush3.bf16.msra.mxu1 %v11391_v19 }
 0xc84   :  { %9730 = vmatprep.subr.bf16.mxu1 %v16439_v38 }
 0xc85   :  { %9749 = vmatpush3.bf16.msra.mxu0 %v11392_v43 }
 0xc86   :  { %9750 = vmatprep.subr.bf16.mxu0 %v16439_v38 }
 0xc87   :  { %9731 = vmatpush3.bf16.msra.mxu1 %v11393_v1 }
 0xc88   :  { %9732 = vmatprep.subr.bf16.mxu1 %v16439_v38 }
 0xc89   :  { %9751 = vmatpush3.bf16.msra.mxu0 %v11394_v58 }
 0xc8a   :  { %9752 = vmatprep.subr.bf16.mxu0 %v16439_v38 }
 0xc8b   :  { %9733 = vmatpush3.bf16.msra.mxu1 %v11395_v40 }
 0xc8c   :  { %9734 = vmatprep.subr.bf16.mxu1 %v16439_v38 }
 0xc8d   :  { %9753 = vmatpush3.bf16.msra.mxu0 %v11396_v52 }
 0xc8e   :  { %9754 = vmatprep.subr.bf16.mxu0 %v16439_v38 }
 0xc8f   :  { %9735 = vmatpush3.bf16.msra.mxu1 %v11397_v49 }
 0xc90   :  { %9736 = vmatprep.subr.bf16.mxu1 %v16439_v38 }
 0xc91   :  { %9755 = vmatpush3.bf16.msra.mxu0 %v11398_v47 }
 0xc92   :  { %9756 = vmatprep.subr.bf16.mxu0 %v16439_v38 }
 0xc93   :  { %9737 = vmatpush3.bf16.msra.mxu1 %v11399_v11 }
 0xc94   :  { %9738 = vmatprep.subr.bf16.mxu1 %v16439_v38 }
 0xc95   :  { %9757 = vmatpush3.bf16.msra.mxu0 %v11400_v51 }
 0xc96   :  { %9758 = vmatprep.subr.bf16.mxu0 %v16439_v38 }
 0xc97   :  { %9739 = vmatpush3.bf16.msra.mxu1 %v11401_v57 }
 0xc98   :  { %9740 = vmatprep.subr.bf16.mxu1 %v16439_v38 }
 0xc99   :  { %9759 = vmatpush3.bf16.msra.mxu0 %v11402_v17 }
 0xc9a   :  { %9760 = vmatprep.subr.bf16.mxu0 %v16439_v38 }
 0xc9b   :  { %9741 = vmatpush3.bf16.msra.mxu1 %v11403_v63 }
 0xc9c   :  { %9766 = vmatprep.subr.bf16.mxu1 %v16439_v38 }
 0xc9d   :  { %9761 = vmatpush3.bf16.msra.mxu0 %v11404_v0 }
 0xc9e   :  { %9743 = vmatmul.mubr.bf16.vlgmr.msra.gmra.mxu1 %v2753_v62  ;;  %9774 = vmatprep.subr.bf16.mxu0 %v16439_v38 }
 0xc9f   :  { %9767 = vmatpush3.bf16.msra.mxu1 %v11405_v45  ;;  %9770 = vmatprep.mubr.msk.bf16.mxu1 %vm11686_vm0, %v16439_v38 }
 0xca0   :  { %9763 = vmatmul.mubr.bf16.vlgmr.msra.gmra.mxu0 %v2754_v59  ;;  %9768 = vmatprep.subr.bf16.mxu1 %v16439_v38 }
 0xca1   :  { %9775 = vmatpush3.bf16.msra.mxu0 %v11406_v54  ;;  %9778 = vmatprep.mubr.msk.bf16.mxu0 %vm11686_vm0, %v16439_v38 }
 0xca2   :  { %9776 = vmatprep.subr.bf16.mxu0 %v16439_v38 }
 0xca3   :  { %9769 = vmatpush3.bf16.msra.mxu1 %v11407_v35 }
 0xca4   :  { %9782 = vmatprep.subr.bf16.mxu1 %v16439_v38 }
 0xca5   :  { %9777 = vmatpush3.bf16.msra.mxu0 %v11408_v48 }
 0xca6   :  { %9802 = vmatprep.subr.bf16.mxu0 %v16439_v38 }
 0xca8   :  { %9779 = vmatmul.mubr.msk.bf16.vlgmr.msra.gmra.mxu0 %vm295_vm2, %v3300_v21 }
 0xca9   :  { %9803 = vmatpush3.bf16.xpose.msra.mxu0 %v16469_v29  ;;  %9818 = vmatprep.mubr.msk.bf16.mxu0 %vm11686_vm0, %v16439_v38 }
 0xcaa   :  { %9804 = vmatprep.subr.bf16.mxu0 %v16439_v38 }
 0xcb1   :  { %9805 = vmatpush3.bf16.xpose.msra.mxu0 %v16470_v6 }
 0xcb2   :  { %9806 = vmatprep.subr.bf16.mxu0 %v16439_v38 }
 0xcb9   :  { %9807 = vmatpush3.bf16.xpose.msra.mxu0 %v16471_v4 }
 0xcba   :  { %9808 = vmatprep.subr.bf16.mxu0 %v16439_v38 }
 0xcc1   :  { %9809 = vmatpush3.bf16.xpose.msra.mxu0 %v16472_v55 }
 0xcc2   :  { %9810 = vmatprep.subr.bf16.mxu0 %v16439_v38 }
 0xcc9   :  { %9811 = vmatpush3.bf16.xpose.msra.mxu0 %v16473_v44 }
 0xcca   :  { %9812 = vmatprep.subr.bf16.mxu0 %v16439_v38 }
 0xcd1   :  { %9813 = vmatpush3.bf16.xpose.msra.mxu0 %v16474_v61 }
 0xcd2   :  { %9814 = vmatprep.subr.bf16.mxu0 %v16439_v38 }
 0xcd9   :  { %9815 = vmatpush3.bf16.xpose.msra.mxu0 %v16475_v5 }
 0xcda   :  { %9816 = vmatprep.subr.bf16.mxu0 %v16439_v38 }
 0xce1   :  { %9817 = vmatpush3.bf16.xpose.msra.mxu0 %v16476_v46 }
 0xce2   :  { %9842 = vmatprep.subr.bf16.mxu0 %v16439_v38 }
 0xcfe   :  { %v2789_v34 = vpop.f32.mrf.mxu1 }
 0xcff   :  { %v3075_v13 = vpack.c.bf16 %v2789_v34, %v2789_v34 }
 0xd00   :  { %v9624_v10 = vpop.f32.mrf.mxu1  ;;  %v2829_v41 = vpop.f32.mrf.mxu0 }
 0xd01   :  { %v3076_v39 = vpack.c.bf16 %v2829_v41, %v2829_v41  ;;  %v3099_v14 = vunpack.c.l.b16 %v3075_v13 }
 0xd02   :  { %v2792_v26 = vpop.f32.mrf.mxu1  ;;  %v9644_v9 = vpop.f32.mrf.mxu0 }
 0xd03   :  { %v3100_v32 = vunpack.c.l.b16 %v3076_v39 }
 0xd04   :  { %v9625_v31 = vpop.f32.mrf.mxu1  ;;  %v2832_v42 = vpop.f32.mrf.mxu0 }
 0xd05   :  { %v3107_v19 = vrot.slane %v3100_v32, 7 }
 0xd06   :  { %v9645_v43 = vpop.f32.mrf.mxu0 }
 0xd07   :  { %v3108_v1 = vsel %vm1389_vm4, %v3107_v19, %v3099_v14 }
 0xd1e   :  { %v2869_v58 = vpop.f32.mrf.mxu1 }
 0xd1f   :  { %v3077_v48 = vpack.c.bf16 %v2869_v58, %v2869_v58 }
 0xd20   :  { %v9664_v40 = vpop.f32.mrf.mxu1  ;;  %v2909_v52 = vpop.f32.mrf.mxu0 }
 0xd21   :  { %v3078_v21 = vpack.c.bf16 %v2909_v52, %v2909_v52  ;;  %v3101_v34 = vunpack.c.l.b16 %v3077_v48 }
 0xd22   :  { %v2872_v49 = vpop.f32.mrf.mxu1  ;;  %v9684_v47 = vpop.f32.mrf.mxu0 }
 0xd23   :  { %v3102_v41 = vunpack.c.l.b16 %v3078_v21  ;;  %v3109_v39 = vrot.slane %v3101_v34, 6  ;;  %v11409_v34 = vld [vmem:[%s16183_s7] ss:$0 sm:$0xff] }
 0xd24   :  { %v9665_v11 = vpop.f32.mrf.mxu1  ;;  %v2912_v51 = vpop.f32.mrf.mxu0 }
 0xd25   :  { %v3111_v9 = vrot.slane %v3102_v41, 5  ;;  %v3110_v31 = vsel %vm1392_vm5, %v3109_v39, %v3108_v1 }
 0xd26   :  { %v9685_v57 = vpop.f32.mrf.mxu0 }
 0xd27   :  { %v3112_v43 = vsel %vm1395_vm6, %v3111_v9, %v3110_v31 }
 0xd3e   :  { %v2949_v17 = vpop.f32.mrf.mxu1 }
 0xd3f   :  { %v3079_v10 = vpack.c.bf16 %v2949_v17, %v2949_v17 }
 0xd40   :  { %v9704_v63 = vpop.f32.mrf.mxu1  ;;  %v2989_v62 = vpop.f32.mrf.mxu0 }
 0xd41   :  { %v3080_v13 = vpack.c.bf16 %v2989_v62, %v2989_v62  ;;  %v3103_v26 = vunpack.c.l.b16 %v3079_v10 }
 0xd42   :  { %v2952_v0 = vpop.f32.mrf.mxu1  ;;  %v9724_v59 = vpop.f32.mrf.mxu0 }
 0xd43   :  { %v3104_v32 = vunpack.c.l.b16 %v3080_v13  ;;  %v3113_v42 = vrot.slane %v3103_v26, 4 }
 0xd44   :  { %v9705_v45 = vpop.f32.mrf.mxu1  ;;  %v2992_v54 = vpop.f32.mrf.mxu0 }
 0xd45   :  { %v3115_v40 = vrot.slane %v3104_v32, 3  ;;  %v3114_v58 = vsel %vm1398_vm7, %v3113_v42, %v3112_v43 }
 0xd46   :  { %v9725_v35 = vpop.f32.mrf.mxu0 }
 0xd47   :  { %v3116_v62 = vsel %vm1401_vm8, %v3115_v40, %v3114_v58  ;;  %v11410_v58 = vld [vmem:[%s16182_s6] ss:$0 sm:$0xff] }
 0xd5e   :  { %v3029_v14 = vpop.f32.mrf.mxu1 }
 0xd5f   :  { %v3081_v19 = vpack.c.bf16 %v3029_v14, %v3029_v14 }
 0xd60   :  { %v9744_v49 = vpop.f32.mrf.mxu1  ;;  %v3069_v47 = vpop.f32.mrf.mxu0 }
 0xd61   :  { %v3105_v52 = vunpack.c.l.b16 %v3081_v19  ;;  %v3082_v11 = vpack.c.bf16 %v3069_v47, %v3069_v47 }
 0xd62   :  { %v3032_v51 = vpop.f32.mrf.mxu1  ;;  %v9764_v57 = vpop.f32.mrf.mxu0 }
 0xd63   :  { %v3117_v17 = vrot.slane %v3105_v52, 2  ;;  %v3106_v63 = vunpack.c.l.b16 %v3082_v11 }
 0xd64   :  { %v9745_v0 = vpop.f32.mrf.mxu1  ;;  %v3072_v1 = vpop.f32.mrf.mxu0 }
 0xd65   :  { %v3118_v59 = vsel %vm1404_vm9, %v3117_v17, %v3116_v62  ;;  %v3119_v45 = vrot.slane %v3106_v63, 1  ;;  %v3232_v0 = vld [vmem:[%s16186_s9] sm:$0x1] }
 0xd66   :  { %v9765_v54 = vpop.f32.mrf.mxu0 }
 0xd67   :  { %v3120_v35 = vsel %vm1407_vm10, %v3119_v45, %v3118_v59 }
 0xd68   :  { %v3121_v48 = vpack.c.b16 %v3120_v35, %v3120_v35  ;;  %v3338_v21 = vpop.f32.mrf.mxu0 }
 0xd69   :  { %v13505_v10 = vadd.f32 %v11409_v34, %v3338_v21 }
 0xd6a   :  { %v3124_v41 = vsel %vm295_vm2, %v3121_v48, %v12962_v37  ;;  %9771 = vmatmul.mubr.msk.bf16.vlgmr.msra.gmra.mxu1 %vm295_vm2, %v3121_v48  ;;  %v9780_v13 = vpop.f32.mrf.mxu0 }
 0xd6b   :  { %v3132_v39 = vrot.slane %v3124_v41, %v16465_v50  ;;  %3352 = vrot.lane.b32.xlu1 %v13505_v10, %s11688_s25  ;;  %9783 = vmatpush3.bf16.xpose.msra.mxu1 %v16456_v15  ;;  %v3235_v41 = vld [vmem:[%s16186_s9 + $0x4] sm:$0x1]  ;;  %v3238_v13 = vld [vmem:[%s16186_s9 + $0x8] sm:$0x1] }
 0xd6c   :  { %v3341_v26 = vpop.f32.mrf.mxu0  ;;  %9784 = vmatprep.subr.bf16.mxu1 %v16439_v38  ;;  %9798 = vmatprep.mubr.msk.bf16.mxu1 %vm11686_vm0, %v16439_v38 }
 0xd6d   :  { %v3133_v9 = vcombine.high %v3132_v39, %v3132_v39  ;;  %v3140_v32 = vrot.slane %v3132_v39, %v16465_v50  ;;  %v3244_v39 = vld [vmem:[%s16186_s9 + $0x10] sm:$0x1] }
 0xd6e   :  { %v9781_v37 = vpop.f32.mrf.mxu0 }
 0xd6f   :  { %v3147_v31 = vrot.slane %v3133_v9, %v16465_v50  ;;  %v3148_v42 = vcombine.high %v3140_v32, %v3140_v32  ;;  %v3151_v14 = vunpack.i.h.s16 %v3140_v32  ;;  %v8096_v19 = vpack.i.b16 %v3140_v32, %v3140_v32  ;;  %v3241_v32 = vld [vmem:[%s16186_s9 + $0xc] sm:$0x1] }
 0xd71   :  { %v3149_v43 = vcombine.high %v3147_v31, %v3147_v31  ;;  %v3153_v40 = vunpack.i.h.s16 %v3147_v31  ;;  %v3155_v49 = vunpack.i.h.s16 %v3148_v42  ;;  %v3159_v47 = vpack.i.b16 %v3151_v14, %v3151_v14 }
 0xd72   :  { %v8097_v52 = vpack.i.b16 %v3147_v31, %v3147_v31  ;;  %v8098_v11 = vpack.i.b16 %v3148_v42, %v3148_v42  ;;  %v3172_v51 = vrot.slane %v8096_v19, %v12844_v53  ;;  %v3247_v31 = vld [vmem:[%s16186_s9 + $0x14] sm:$0x1]  ;;  %v3250_v42 = vld [vmem:[%s16186_s9 + $0x18] sm:$0x1] }
 0xd73   :  { %v3157_v57 = vunpack.i.h.s16 %v3149_v43  ;;  %v3161_v17 = vpack.i.b16 %v3153_v40, %v3153_v40  ;;  %v3163_v63 = vpack.i.b16 %v3155_v49, %v3155_v49  ;;  %v8099_v62 = vpack.i.b16 %v3149_v43, %v3149_v43  ;;  %9785 = vmatpush3.bf16.xpose.msra.mxu1 %v16457_v22  ;;  %v3253_v49 = vld [vmem:[%s16186_s9 + $0x1c] sm:$0x1] }
 0xd74   :  { %v3179_v1 = vrot.slane %v3159_v47, %v12844_v53  ;;  %v3186_v59 = vrot.slane %v8097_v52, %v12844_v53  ;;  %v3200_v45 = vrot.slane %v8098_v11, %v12844_v53  ;;  %v3233_v54 = vsel %vm13520_vm15, %v3172_v51, %v3232_v0  ;;  %9786 = vmatprep.subr.bf16.mxu1 %v16439_v38  ;;  %v16531_v52 = vld [vmem:[#allocation36_spill] sm:$0xff] }
 0xd75   :  { %v3165_v35 = vpack.i.b16 %v3157_v57, %v3157_v57  ;;  %v3193_v48 = vrot.slane %v3161_v17, %v12844_v53  ;;  %v3207_v21 = vrot.slane %v3163_v63, %v12844_v53  ;;  %v3214_v34 = vrot.slane %v8099_v62, %v12844_v53  ;;  %3234 = vst [vmem:[%s16186_s9] sm:$0x1] %v3233_v54 }
 0xd76   :  { %v3236_v26 = vsel %vm13520_vm15, %v3179_v1, %v3235_v41  ;;  %v3239_v9 = vsel %vm13520_vm15, %v3186_v59, %v3238_v13  ;;  %v3245_v37 = vsel %vm13520_vm15, %v3200_v45, %v3244_v39  ;;  %v121_v11 = vadd.f32 %v11410_v58, %v16531_v52 }
 0xd77   :  { %v3221_v14 = vrot.slane %v3165_v35, %v12844_v53  ;;  %3237 = vst [vmem:[%s16186_s9 + $0x4] sm:$0x1] %v3236_v26  ;;  %3240 = vst [vmem:[%s16186_s9 + $0x8] sm:$0x1] %v3239_v9  ;;  %v3242_v19 = vsel %vm13520_vm15, %v3193_v48, %v3241_v32  ;;  %v3248_v43 = vsel %vm13520_vm15, %v3207_v21, %v3247_v31 }
 0xd78   :  { %3246 = vst [vmem:[%s16186_s9 + $0x10] sm:$0x1] %v3245_v37  ;;  %v3251_v40 = vsel %vm13520_vm15, %v3214_v34, %v3250_v42  ;;  %3243 = vst [vmem:[%s16186_s9 + $0xc] sm:$0x1] %v3242_v19 }
 0xd79   :  { %3249 = vst [vmem:[%s16186_s9 + $0x14] sm:$0x1] %v3248_v43  ;;  %3252 = vst [vmem:[%s16186_s9 + $0x18] sm:$0x1] %v3251_v40  ;;  %v3254_v47 = vsel %vm13520_vm15, %v3221_v14, %v3253_v49  ;;  %vm6772_vm15 = vsmask.f32 2304 }
 0xd7a   :  { %3255 = vst [vmem:[%s16186_s9 + $0x1c] sm:$0x1] %v3254_v47  ;;  %vm15500_vm1 = vmand %vm6771_vm14, %vm6772_vm15 }
 0xd7b   :  { %9787 = vmatpush3.bf16.xpose.msra.mxu1 %v16458_v24 }
 0xd7c   :  { %9788 = vmatprep.subr.bf16.mxu1 %v16439_v38 }
 0xd83   :  { %9789 = vmatpush3.bf16.xpose.msra.mxu1 %v16459_v30 }
 0xd84   :  { %9790 = vmatprep.subr.bf16.mxu1 %v16439_v38 }
 0xd8b   :  { %9791 = vmatpush3.bf16.xpose.msra.mxu1 %v16460_v18 }
 0xd8c   :  { %9792 = vmatprep.subr.bf16.mxu1 %v16439_v38 }
 0xd93   :  { %9793 = vmatpush3.bf16.xpose.msra.mxu1 %v16461_v28 }
 0xd94   :  { %9794 = vmatprep.subr.bf16.mxu1 %v16439_v38 }
 0xd9b   :  { %9795 = vmatpush3.bf16.xpose.msra.mxu1 %v16462_v12 }
 0xd9c   :  { %9796 = vmatprep.subr.bf16.mxu1 %v16439_v38 }
 0xda3   :  { %9797 = vmatpush3.bf16.xpose.msra.mxu1 %v16463_v33 }
 0xda4   :  { %9822 = vmatprep.subr.bf16.mxu1 %v16439_v38 }
 0xddd   :  { %v3353_v35 = vpop.permute.xlu1 %3352 }
 0xe2a   :  { %v3292_v51 = vpop.f32.mrf.mxu1 }
 0xe2b   :  { %v3298_v57 = vadd.f32 %v3292_v51, %v121_v11 }
 0xe2c   :  { %v9772_v17 = vpop.f32.mrf.mxu1 }
 0xe2d   :  { %v3344_v63 = vadd.f32 %v13505_v10, %v3298_v57 }
 0xe2e   :  { %v3295_v62 = vpop.f32.mrf.mxu1 }
 0xe2f   :  { %v8102_v0 = vmul.f32 -1.442695, %v3344_v63 }
 0xe30   :  { %v9773_v1 = vpop.f32.mrf.mxu1 }
 0xe31   :  { %11239 = vpow2.f32 %v8102_v0 }
 0xe3e   :  { %v11240_v59 = vpop.eup %11239 }
 0xe3f   :  { %v3348_v45 = vadd.f32 1.0, %v11240_v59 }
 0xe41   :  { %11241 = vrcp.f32 %v3348_v45 }
 0xe4e   :  { %v11242_v54 = vpop.eup %11241 }
 0xe4f   :  { %v3355_v48 = vmul.f32 %v11242_v54, %v3353_v35  ;;  %v3362_v13 = vsub.f32 1.0, %v11242_v54  ;;  %v3368_v39 = vmul.f32 %v11242_v54, %v12958_v36 }
 0xe51   :  { %3357 = vrot.lane.b32.xlu0 %v3355_v48, %s11688_s25 }
 0xec3   :  { %v3358_v21 = vpop.permute.xlu0 %3357 }
 0xec4   :  { %v3360_v34 = vadd.f32 %v3358_v21, %v3298_v57 }
 0xec6   :  { %11243 = vtanh.f32 %v3360_v34 }
 0xed3   :  { %v11244_v41 = vpop.eup %11243 }
 0xed4   :  { %3364 = vrot.lane.b32.xlu1 %v11244_v41, %s11689_s26 }
 0xf46   :  { %v3365_v10 = vpop.permute.xlu1 %3364 }
 0xf47   :  { %v3367_v26 = vmul.f32 %v3365_v10, %v3362_v13  ;;  %v16532_v13 = vld [vmem:[#allocation34_spill] sm:$0xff]  ;;  %v16533_v10 = vld [vmem:[#allocation35_spill] sm:$0xff] }
 0xf49   :  { %v13618_v9 = vadd.f32 %v3368_v39, %v3367_v26  ;;  %v16534_v39 = vld [vmem:[#allocation37_spill] sm:$0xff]  ;;  %v16535_v26 = vld [vmem:[#allocation39_spill] sm:$0xff] }
 0xf4b   :  { %v13622_v32 = vpack.c.bf16 %v13618_v9, %v13618_v9 }
 0xf4d   :  { %v3378_v37 = vrot.slane %v13622_v32, %v16465_v50 }
 0xf4f   :  { %v3379_v31 = vcombine.high %v3378_v37, %v3378_v37  ;;  %v3386_v42 = vrot.slane %v3378_v37, %v16465_v50  ;;  %v16536_v37 = vld [vmem:[#allocation41_spill] sm:$0xff] }
 0xf51   :  { %v8103_v14 = vpack.i.b16 %v3386_v42, %v3386_v42  ;;  %v3397_v19 = vunpack.i.h.s16 %v3386_v42  ;;  %v3393_v43 = vrot.slane %v3379_v31, %v16465_v50  ;;  %v3394_v40 = vcombine.high %v3386_v42, %v3386_v42  ;;  %v16537_v31 = vld [vmem:[#allocation43_spill] sm:$0xff] }
 0xf53   :  { %v3408_v36 = vrot.slane %v8103_v14, %v16479_v2  ;;  %v3454_v49 = vpack.i.b16 %v3397_v19, %v3397_v19  ;;  %v8106_v47 = vpack.i.b16 %v3393_v43, %v3393_v43  ;;  %v3399_v58 = vunpack.i.h.s16 %v3393_v43  ;;  %v16538_v19 = vld [vmem:[#allocation44_spill] sm:$0xff] }
 0xf54   :  { %v3401_v51 = vunpack.i.h.s16 %v3394_v40  ;;  %v3395_v57 = vcombine.high %v3393_v43, %v3393_v43  ;;  %v8109_v63 = vpack.i.b16 %v3394_v40, %v3394_v40  ;;  %v16539_v43 = vld [vmem:[#allocation45_spill] sm:$0xff]  ;;  %v16540_v40 = vld [vmem:[#allocation46_spill] sm:$0xff] }
 0xf55   :  { %3409 = vrot.lane.b32.xlu0 %v3408_v36, %s11689_s26  ;;  %v3458_v52 = vrot.slane %v3454_v49, %v16479_v2  ;;  %v3554_v11 = vpack.i.b16 %v3399_v58, %v3399_v58  ;;  %v3508_v17 = vrot.slane %v8106_v47, %v16479_v2  ;;  %v16541_v36 = vld [vmem:[#allocation47_spill] sm:$0xff]  ;;  %v16542_v49 = vld [vmem:[#allocation48_spill] sm:$0xff]  ;;  %v16543_v47 = vld [vmem:[#allocation49_spill] sm:$0xff] }
 0xf56   :  { %v3654_v0 = vpack.i.b16 %v3401_v51, %v3401_v51  ;;  %v3403_v1 = vunpack.i.h.s16 %v3395_v57  ;;  %v3608_v59 = vrot.slane %v8109_v63, %v16479_v2  ;;  %v8112_v45 = vpack.i.b16 %v3395_v57, %v3395_v57  ;;  %v16544_v58 = vld [vmem:[#allocation50_spill] sm:$0xff]  ;;  %v16547_v51 = vld [vmem:[#allocation53_spill] sm:$0xff]  ;;  %v16550_v63 = vld [vmem:[#allocation56_spill] sm:$0xff] }
 0xf57   :  { %3459 = vrot.lane.b32.xlu1 %v3458_v52, %s11689_s26  ;;  %v3558_v62 = vrot.slane %v3554_v11, %v16479_v2  ;;  %v16545_v52 = vld [vmem:[#allocation51_spill] sm:$0xff]  ;;  %v16546_v11 = vld [vmem:[#allocation52_spill] sm:$0xff]  ;;  %v16548_v57 = vld [vmem:[#allocation54_spill] sm:$0xff] }
 0xf58   :  { %v3658_v54 = vrot.slane %v3654_v0, %v16479_v2  ;;  %v3754_v35 = vpack.i.b16 %v3403_v1, %v3403_v1  ;;  %v3708_v48 = vrot.slane %v8112_v45, %v16479_v2  ;;  %v16552_v0 = vld [vmem:[#allocation58_spill] sm:$0xff]  ;;  %v16553_v1 = vld [vmem:[#allocation59_spill] sm:$0xff] }
 0xf59   :  { %3509 = vrot.lane.b32.xlu0 %v3508_v17, %s11689_s26  ;;  %v16549_v17 = vld [vmem:[#allocation55_spill] sm:$0xff] }
 0xf5a   :  { %v3758_v21 = vrot.slane %v3754_v35, %v16479_v2  ;;  %v16555_v35 = vld [vmem:[#allocation63_spill] sm:$0xff] }
 0xf5b   :  { %3559 = vrot.lane.b32.xlu1 %v3558_v62, %s11689_s26  ;;  %v16551_v62 = vld [vmem:[#allocation57_spill] sm:$0xff] }
 0xf5d   :  { %3609 = vrot.lane.b32.xlu0 %v3608_v59, %s11689_s26 }
 0xf5f   :  { %3659 = vrot.lane.b32.xlu1 %v3658_v54, %s11689_s26  ;;  %v16554_v54 = vld [vmem:[#allocation62_spill] sm:$0xff] }
 0xf61   :  { %3709 = vrot.lane.b32.xlu0 %v3708_v48, %s11689_s26  ;;  %v16556_v48 = vld [vmem:[#allocation66_spill] sm:$0xff] }
 0xf63   :  { %3759 = vrot.lane.b32.xlu1 %v3758_v21, %s11689_s26  ;;  %v16557_v21 = vld [vmem:[#allocation67_spill] sm:$0xff] }
 0xfc7   :  { %v3410_v34 = vpop.permute.xlu0 %3409 }
 0xfc8   :  { %9799 = vmatmul.mubr.msk.bf16.vlgmr.msra.gmra.mxu1 %vm295_vm2, %v3410_v34  ;;  %v16558_v34 = vld [vmem:[#allocation70_spill] sm:$0xff] }
 0xfc9   :  { %9823 = vmatpush3.bf16.xpose.msra.mxu1 %v16480_v25  ;;  %v3460_v41 = vpop.permute.xlu1 %3459  ;;  %9838 = vmatprep.mubr.msk.bf16.mxu1 %vm11686_vm0, %v16439_v38 }
 0xfca   :  { %9819 = vmatmul.mubr.msk.bf16.vlgmr.msra.gmra.mxu0 %vm295_vm2, %v3460_v41  ;;  %9824 = vmatprep.subr.bf16.mxu1 %v16439_v38  ;;  %v16559_v41 = vld [vmem:[#allocation71_spill] sm:$0xff] }
 0xfcb   :  { %9843 = vmatpush3.bf16.xpose.msra.mxu0 %v16481_v16  ;;  %9858 = vmatprep.mubr.msk.bf16.mxu0 %vm11686_vm0, %v16439_v38  ;;  %v3510_v42 = vpop.permute.xlu0 %3509 }
 0xfcc   :  { %9844 = vmatprep.subr.bf16.mxu0 %v16439_v38 }
 0xfcd   :  { %v3560_v14 = vpop.permute.xlu1 %3559 }
 0xfcf   :  { %v3610_v59 = vpop.permute.xlu0 %3609 }
 0xfd1   :  { %9825 = vmatpush3.bf16.xpose.msra.mxu1 %v16482_v3  ;;  %v3660_v45 = vpop.permute.xlu1 %3659 }
 0xfd2   :  { %9826 = vmatprep.subr.bf16.mxu1 %v16439_v38 }
 0xfd3   :  { %9845 = vmatpush3.bf16.xpose.msra.mxu0 %v16483_v8 }
 0xfd4   :  { %9846 = vmatprep.subr.bf16.mxu0 %v16439_v38 }
 0xfd9   :  { %9827 = vmatpush3.bf16.xpose.msra.mxu1 %v16484_v60 }
 0xfda   :  { %9828 = vmatprep.subr.bf16.mxu1 %v16439_v38 }
 0xfdb   :  { %9847 = vmatpush3.bf16.xpose.msra.mxu0 %v16485_v56 }
 0xfdc   :  { %9848 = vmatprep.subr.bf16.mxu0 %v16439_v38 }
 0xfe1   :  { %9829 = vmatpush3.bf16.xpose.msra.mxu1 %v16486_v7 }
 0xfe2   :  { %9830 = vmatprep.subr.bf16.mxu1 %v16439_v38 }
 0xfe3   :  { %9849 = vmatpush3.bf16.xpose.msra.mxu0 %v16487_v20 }
 0xfe4   :  { %9850 = vmatprep.subr.bf16.mxu0 %v16439_v38 }
 0xfe9   :  { %9831 = vmatpush3.bf16.xpose.msra.mxu1 %v16488_v23 }
 0xfea   :  { %9832 = vmatprep.subr.bf16.mxu1 %v16439_v38 }
 0xfeb   :  { %9851 = vmatpush3.bf16.xpose.msra.mxu0 %v16489_v27 }
 0xfec   :  { %9852 = vmatprep.subr.bf16.mxu0 %v16439_v38 }
 0xff1   :  { %9833 = vmatpush3.bf16.xpose.msra.mxu1 %v16532_v13 }
 0xff2   :  { %9834 = vmatprep.subr.bf16.mxu1 %v16439_v38 }
 0xff3   :  { %9853 = vmatpush3.bf16.xpose.msra.mxu0 %v16533_v10 }
 0xff4   :  { %9854 = vmatprep.subr.bf16.mxu0 %v16439_v38 }
 0xff9   :  { %9835 = vmatpush3.bf16.xpose.msra.mxu1 %v16534_v39 }
 0xffa   :  { %9836 = vmatprep.subr.bf16.mxu1 %v16439_v38 }
 0xffb   :  { %9855 = vmatpush3.bf16.xpose.msra.mxu0 %v16535_v26 }
 0xffc   :  { %9856 = vmatprep.subr.bf16.mxu0 %v16439_v38 }
0x1001   :  { %9837 = vmatpush3.bf16.xpose.msra.mxu1 %v16536_v37 }
0x1002   :  { %9862 = vmatprep.subr.bf16.mxu1 %v16439_v38 }
0x1003   :  { %9857 = vmatpush3.bf16.xpose.msra.mxu0 %v16537_v31 }
0x1004   :  { %9882 = vmatprep.subr.bf16.mxu0 %v16439_v38 }
0x1008   :  { %9839 = vmatmul.mubr.msk.bf16.vlgmr.msra.gmra.mxu1 %vm295_vm2, %v3510_v42  ;;  %v16560_v42 = vld [vmem:[#allocation74_spill] sm:$0xff] }
0x1009   :  { %9863 = vmatpush3.bf16.xpose.msra.mxu1 %v16538_v19  ;;  %9878 = vmatprep.mubr.msk.bf16.mxu1 %vm11686_vm0, %v16439_v38 }
0x100a   :  { %9859 = vmatmul.mubr.msk.bf16.vlgmr.msra.gmra.mxu0 %vm295_vm2, %v3560_v14  ;;  %9864 = vmatprep.subr.bf16.mxu1 %v16439_v38  ;;  %v16561_v14 = vld [vmem:[#allocation75_spill] sm:$0xff] }
0x100b   :  { %9883 = vmatpush3.bf16.xpose.msra.mxu0 %v16539_v43  ;;  %9898 = vmatprep.mubr.msk.bf16.mxu0 %vm11686_vm0, %v16439_v38 }
0x100c   :  { %9884 = vmatprep.subr.bf16.mxu0 %v16439_v38 }
0x1011   :  { %9865 = vmatpush3.bf16.xpose.msra.mxu1 %v16540_v40 }
0x1012   :  { %9866 = vmatprep.subr.bf16.mxu1 %v16439_v38 }
0x1013   :  { %9885 = vmatpush3.bf16.xpose.msra.mxu0 %v16541_v36 }
0x1014   :  { %9886 = vmatprep.subr.bf16.mxu0 %v16439_v38 }
0x1019   :  { %9867 = vmatpush3.bf16.xpose.msra.mxu1 %v16542_v49 }
0x101a   :  { %9868 = vmatprep.subr.bf16.mxu1 %v16439_v38 }
0x101b   :  { %9887 = vmatpush3.bf16.xpose.msra.mxu0 %v16543_v47 }
0x101c   :  { %9888 = vmatprep.subr.bf16.mxu0 %v16439_v38 }
0x1021   :  { %9869 = vmatpush3.bf16.xpose.msra.mxu1 %v16544_v58  ;;  %v16570_v58 = vld [vmem:[#allocation92_spill] sm:$0xff] }
0x1022   :  { %9870 = vmatprep.subr.bf16.mxu1 %v16439_v38 }
0x1023   :  { %9889 = vmatpush3.bf16.xpose.msra.mxu0 %v16545_v52 }
0x1024   :  { %9890 = vmatprep.subr.bf16.mxu0 %v16439_v38 }
0x1029   :  { %9871 = vmatpush3.bf16.xpose.msra.mxu1 %v16546_v11 }
0x102a   :  { %9872 = vmatprep.subr.bf16.mxu1 %v16439_v38 }
0x102b   :  { %9891 = vmatpush3.bf16.xpose.msra.mxu0 %v16547_v51 }
0x102c   :  { %9892 = vmatprep.subr.bf16.mxu0 %v16439_v38 }
0x1031   :  { %9873 = vmatpush3.bf16.xpose.msra.mxu1 %v16548_v57 }
0x1032   :  { %9874 = vmatprep.subr.bf16.mxu1 %v16439_v38 }
0x1033   :  { %9893 = vmatpush3.bf16.xpose.msra.mxu0 %v16549_v17 }
0x1034   :  { %9894 = vmatprep.subr.bf16.mxu0 %v16439_v38 }
0x1039   :  { %9875 = vmatpush3.bf16.xpose.msra.mxu1 %v16550_v63 }
0x103a   :  { %9876 = vmatprep.subr.bf16.mxu1 %v16439_v38 }
0x103b   :  { %9895 = vmatpush3.bf16.xpose.msra.mxu0 %v16551_v62 }
0x103c   :  { %9896 = vmatprep.subr.bf16.mxu0 %v16439_v38 }
0x1041   :  { %9877 = vmatpush3.bf16.xpose.msra.mxu1 %v16552_v0 }
0x1042   :  { %9902 = vmatprep.subr.bf16.mxu1 %v16439_v38 }
0x1043   :  { %9897 = vmatpush3.bf16.xpose.msra.mxu0 %v16553_v1 }
0x1044   :  { %9922 = vmatprep.subr.bf16.mxu0 %v16439_v38 }
0x1048   :  { %9879 = vmatmul.mubr.msk.bf16.vlgmr.msra.gmra.mxu1 %vm295_vm2, %v3610_v59  ;;  %v16562_v59 = vld [vmem:[#allocation78_spill] sm:$0xff] }
0x1049   :  { %9903 = vmatpush3.bf16.xpose.msra.mxu1 %v16554_v54  ;;  %9918 = vmatprep.mubr.msk.bf16.mxu1 %vm11686_vm0, %v16439_v38 }
0x104a   :  { %9899 = vmatmul.mubr.msk.bf16.vlgmr.msra.gmra.mxu0 %vm295_vm2, %v3660_v45  ;;  %9904 = vmatprep.subr.bf16.mxu1 %v16439_v38  ;;  %v16563_v45 = vld [vmem:[#allocation79_spill] sm:$0xff] }
0x104b   :  { %9923 = vmatpush3.bf16.xpose.msra.mxu0 %v16555_v35  ;;  %9938 = vmatprep.mubr.msk.bf16.mxu0 %vm11686_vm0, %v16439_v38 }
0x104c   :  { %9924 = vmatprep.subr.bf16.mxu0 %v16439_v38 }
0x1051   :  { %9905 = vmatpush3.bf16.xpose.msra.mxu1 %v16556_v48 }
0x1052   :  { %9906 = vmatprep.subr.bf16.mxu1 %v16439_v38 }
0x1053   :  { %9925 = vmatpush3.bf16.xpose.msra.mxu0 %v16557_v21 }
0x1054   :  { %9926 = vmatprep.subr.bf16.mxu0 %v16439_v38 }
0x1059   :  { %9907 = vmatpush3.bf16.xpose.msra.mxu1 %v16558_v34  ;;  %v16564_v34 = vld [vmem:[#allocation82_spill] sm:$0xff] }
0x105a   :  { %9908 = vmatprep.subr.bf16.mxu1 %v16439_v38 }
0x105b   :  { %9927 = vmatpush3.bf16.xpose.msra.mxu0 %v16559_v41  ;;  %v16565_v41 = vld [vmem:[#allocation83_spill] sm:$0xff] }
0x105c   :  { %9928 = vmatprep.subr.bf16.mxu0 %v16439_v38 }
0x1061   :  { %9909 = vmatpush3.bf16.xpose.msra.mxu1 %v16560_v42  ;;  %v16566_v42 = vld [vmem:[#allocation86_spill] sm:$0xff] }
0x1062   :  { %9910 = vmatprep.subr.bf16.mxu1 %v16439_v38 }
0x1063   :  { %9929 = vmatpush3.bf16.xpose.msra.mxu0 %v16561_v14  ;;  %v16567_v14 = vld [vmem:[#allocation87_spill] sm:$0xff] }
0x1064   :  { %9930 = vmatprep.subr.bf16.mxu0 %v16439_v38 }
0x1069   :  { %9911 = vmatpush3.bf16.xpose.msra.mxu1 %v16562_v59  ;;  %v16568_v59 = vld [vmem:[#allocation90_spill] sm:$0xff] }
0x106a   :  { %9912 = vmatprep.subr.bf16.mxu1 %v16439_v38 }
0x106b   :  { %9931 = vmatpush3.bf16.xpose.msra.mxu0 %v16563_v45  ;;  %v16569_v45 = vld [vmem:[#allocation91_spill] sm:$0xff] }
0x106c   :  { %9932 = vmatprep.subr.bf16.mxu0 %v16439_v38 }
0x1071   :  { %9913 = vmatpush3.bf16.xpose.msra.mxu1 %v16564_v34  ;;  %v3710_v34 = vpop.permute.xlu0 %3709 }
0x1072   :  { %9914 = vmatprep.subr.bf16.mxu1 %v16439_v38 }
0x1073   :  { %9933 = vmatpush3.bf16.xpose.msra.mxu0 %v16565_v41 }
0x1074   :  { %9934 = vmatprep.subr.bf16.mxu0 %v16439_v38 }
0x1079   :  { %9915 = vmatpush3.bf16.xpose.msra.mxu1 %v16566_v42  ;;  %v3760_v42 = vpop.permute.xlu1 %3759 }
0x107a   :  { %9916 = vmatprep.subr.bf16.mxu1 %v16439_v38 }
0x107b   :  { %9935 = vmatpush3.bf16.xpose.msra.mxu0 %v16567_v14  ;;  %v11411_v14 = vld [vmem:[%s16184_s1 + $0x38] sm:$0xff]  }
0x107c   :  { %9936 = vmatprep.subr.bf16.mxu0 %v16439_v38 }
0x1081   :  { %9917 = vmatpush3.bf16.xpose.msra.mxu1 %v16568_v59 }
0x1082   :  { %9942 = vmatprep.subr.bf16.mxu1 %v16439_v38 }
0x1083   :  { %9937 = vmatpush3.bf16.xpose.msra.mxu0 %v16569_v45 }
0x1084   :  { %9962 = vmatprep.subr.bf16.mxu0 %v16439_v38 }
0x1088   :  { %9919 = vmatmul.mubr.msk.bf16.vlgmr.msra.gmra.mxu1 %vm295_vm2, %v3710_v34  ;;  %v13759_v41 = vpop.f32.mrf.mxu1  ;;  %v11412_v34 = vld [vmem:[%s16184_s1 + $0x78] sm:$0xff]  }
0x1089   :  { %9943 = vmatpush3.bf16.msra.mxu1 %v11411_v14  ;;  %9958 = vmatprep.mubr.msk.bf16.mxu1 %vm11686_vm0, %v16439_v38 }
0x108a   :  { %9939 = vmatmul.mubr.msk.bf16.vlgmr.msra.gmra.mxu0 %vm295_vm2, %v3760_v42  ;;  %v9800_v59 = vpop.f32.mrf.mxu1  ;;  %v13767_v45 = vpop.f32.mrf.mxu0  ;;  %9944 = vmatprep.subr.bf16.mxu1 %v16439_v38  ;;  %v11413_v42 = vld [vmem:[%s16184_s1 + $0x30] sm:$0xff]  }
0x108b   :  { %9963 = vmatpush3.bf16.msra.mxu0 %v11412_v34  ;;  %9978 = vmatprep.mubr.msk.bf16.mxu0 %vm11686_vm0, %v16439_v38  ;;  %v11414_v34 = vld [vmem:[%s16184_s1 + $0x70] sm:$0xff]  }
0x108c   :  { %v3451_v21 = vpop.f32.mrf.mxu1  ;;  %v9820_v14 = vpop.f32.mrf.mxu0  ;;  %9964 = vmatprep.subr.bf16.mxu0 %v16439_v38 }
0x108d   :  { %9945 = vmatpush3.bf16.msra.mxu1 %v11413_v42  ;;  %v11415_v21 = vld [vmem:[%s16184_s1 + $0x28] sm:$0xff]   ;;  %v11418_v14 = vld [vmem:[%s16184_s1 + $0x60] sm:$0xff]   ;;  %v11419_v42 = vld [vmem:[%s16184_s1 + $0x18] sm:$0xff]  }
0x108e   :  { %v9801_v59 = vpop.f32.mrf.mxu1  ;;  %v3501_v48 = vpop.f32.mrf.mxu0  ;;  %9946 = vmatprep.subr.bf16.mxu1 %v16439_v38 }
0x108f   :  { %9965 = vmatpush3.bf16.msra.mxu0 %v11414_v34  ;;  %v11416_v48 = vld [vmem:[%s16184_s1 + $0x68] sm:$0xff]   ;;  %v11420_v59 = vld [vmem:[%s16184_s1 + $0x58] sm:$0xff]   ;;  %v11421_v34 = vld [vmem:[%s16184_s1 + $0x10] sm:$0xff]  }
0x1090   :  { %v9821_v35 = vpop.f32.mrf.mxu0  ;;  %9966 = vmatprep.subr.bf16.mxu0 %v16439_v38 }
0x1091   :  { %9947 = vmatpush3.bf16.msra.mxu1 %v11415_v21  ;;  %v11417_v35 = vld [vmem:[%s16184_s1 + $0x20] sm:$0xff]   ;;  %v11422_v21 = vld [vmem:[%s16184_s1 + $0x50] sm:$0xff]  }
0x1092   :  { %9948 = vmatprep.subr.bf16.mxu1 %v16439_v38 }
0x1093   :  { %9967 = vmatpush3.bf16.msra.mxu0 %v11416_v48  ;;  %v11423_v48 = vld [vmem:[%s16184_s1 + $0x8] sm:$0xff]  }
0x1094   :  { %9968 = vmatprep.subr.bf16.mxu0 %v16439_v38 }
0x1095   :  { %9949 = vmatpush3.bf16.msra.mxu1 %v11417_v35  ;;  %v11424_v35 = vld [vmem:[%s16184_s1 + $0x48] sm:$0xff]  }
0x1096   :  { %9950 = vmatprep.subr.bf16.mxu1 %v16439_v38 }
0x1097   :  { %9969 = vmatpush3.bf16.msra.mxu0 %v11418_v14  ;;  %v11425_v14 = vld [vmem:[%s16184_s1] sm:$0xff]  }
0x1098   :  { %9970 = vmatprep.subr.bf16.mxu0 %v16439_v38 }
0x1099   :  { %9951 = vmatpush3.bf16.msra.mxu1 %v11419_v42  ;;  %v11426_v42 = vld [vmem:[%s16184_s1 + $0x40] sm:$0xff]  }
0x109a   :  { %9952 = vmatprep.subr.bf16.mxu1 %v16439_v38 }
0x109b   :  { %9971 = vmatpush3.bf16.msra.mxu0 %v11420_v59 }
0x109c   :  { %9972 = vmatprep.subr.bf16.mxu0 %v16439_v38 }
0x109d   :  { %9953 = vmatpush3.bf16.msra.mxu1 %v11421_v34 }
0x109e   :  { %9954 = vmatprep.subr.bf16.mxu1 %v16439_v38 }
0x109f   :  { %9973 = vmatpush3.bf16.msra.mxu0 %v11422_v21 }
0x10a0   :  { %9974 = vmatprep.subr.bf16.mxu0 %v16439_v38 }
0x10a1   :  { %9955 = vmatpush3.bf16.msra.mxu1 %v11423_v48 }
0x10a2   :  { %9956 = vmatprep.subr.bf16.mxu1 %v16439_v38 }
0x10a3   :  { %9975 = vmatpush3.bf16.msra.mxu0 %v11424_v35 }
0x10a4   :  { %9976 = vmatprep.subr.bf16.mxu0 %v16439_v38 }
0x10a5   :  { %9957 = vmatpush3.bf16.msra.mxu1 %v11425_v14 }
0x10a6   :  { %9982 = vmatprep.subr.bf16.mxu1 %v16439_v38 }
0x10a7   :  { %9977 = vmatpush3.bf16.msra.mxu0 %v11426_v42  ;;  %v3805_v42 = vadd.f32 %v13767_v45, %v16570_v58 }
0x10a8   :  { %10002 = vmatprep.subr.bf16.mxu0 %v16439_v38 }
0x10c8   :  { %v3548_v59 = vpop.f32.mrf.mxu1 }
0x10c9   :  { %v3806_v47 = vadd.f32 %v3548_v59, %v16570_v58 }
0x10ca   :  { %v9840_v34 = vpop.f32.mrf.mxu1  ;;  %v3598_v21 = vpop.f32.mrf.mxu0 }
0x10cb   :  { %v3820_v34 = vrot.slane %v3805_v42, 7 }
0x10cc   :  { %v3551_v48 = vpop.f32.mrf.mxu1  ;;  %v9860_v35 = vpop.f32.mrf.mxu0 }
0x10cd   :  { %v3807_v48 = vadd.f32 %v3598_v21, %v16570_v58  ;;  %v3822_v35 = vrot.slane %v3806_v47, 6 }
0x10ce   :  { %v9841_v54 = vpop.f32.mrf.mxu1  ;;  %v3601_v1 = vpop.f32.mrf.mxu0 }
0x10d0   :  { %v9861_v0 = vpop.f32.mrf.mxu0 }
0x1108   :  { %v3648_v62 = vpop.f32.mrf.mxu1 }
0x1109   :  { %v3808_v1 = vadd.f32 %v3648_v62, %v16570_v58 }
0x110a   :  { %v9880_v63 = vpop.f32.mrf.mxu1  ;;  %v3698_v14 = vpop.f32.mrf.mxu0 }
0x110b   :  { %v3804_v63 = vadd.f32 %v13759_v41, %v16570_v58 }
0x110c   :  { %v3651_v17 = vpop.f32.mrf.mxu1  ;;  %v9900_v57 = vpop.f32.mrf.mxu0 }
0x110d   :  { %v3821_v17 = vsel %vm1389_vm4, %v3820_v34, %v3804_v63  ;;  %v3824_v57 = vrot.slane %v3807_v48, 5 }
0x110e   :  { %v9881_v51 = vpop.f32.mrf.mxu1  ;;  %v3701_v11 = vpop.f32.mrf.mxu0 }
0x110f   :  { %v3809_v11 = vadd.f32 %v3698_v14, %v16570_v58  ;;  %v3826_v51 = vrot.slane %v3808_v1, 4 }
0x1110   :  { %v9901_v52 = vpop.f32.mrf.mxu0 }
0x1111   :  { %v3823_v52 = vsel %vm1392_vm5, %v3822_v35, %v3821_v17  ;;  %v3828_v54 = vrot.slane %v3809_v11, 3 }
0x1112   :  { %v3825_v0 = vsel %vm1395_vm6, %v3824_v57, %v3823_v52 }
0x1113   :  { %v3827_v59 = vsel %vm1398_vm7, %v3826_v51, %v3825_v0 }
0x1114   :  { %v3829_v14 = vsel %vm1401_vm8, %v3828_v54, %v3827_v59 }
0x1148   :  { %v3748_v45 = vpop.f32.mrf.mxu1 }
0x1149   :  { %v3810_v21 = vadd.f32 %v3748_v45, %v16570_v58 }
0x114a   :  { %v9920_v62 = vpop.f32.mrf.mxu1  ;;  %v3798_v49 = vpop.f32.mrf.mxu0 }
0x114b   :  { %v3830_v36 = vrot.slane %v3810_v21, 2  ;;  %v3811_v41 = vadd.f32 %v3798_v49, %v16570_v58 }
0x114c   :  { %v3751_v34 = vpop.f32.mrf.mxu1  ;;  %v9940_v40 = vpop.f32.mrf.mxu0 }
0x114d   :  { %v3832_v43 = vrot.slane %v3811_v41, 1  ;;  %v3831_v35 = vsel %vm1404_vm9, %v3830_v36, %v3829_v14 }
0x114e   :  { %v9921_v17 = vpop.f32.mrf.mxu1  ;;  %v3801_v57 = vpop.f32.mrf.mxu0 }
0x114f   :  { %v3833_v52 = vsel %vm1407_vm10, %v3832_v43, %v3831_v35 }
0x1150   :  { %3835 = vmax.xlane.f32.xlu0 %v3833_v52  ;;  %v9941_v51 = vpop.f32.mrf.mxu0 }
0x1166   :  { %4480 = vrot.lane.b32.xlu0 %v13622_v32, %s11689_s26 }
0x11d9   :  { %v3836_v0 = vpop.xlane.xlu0 %3835 }
0x11da   :  { %v3838_v45 = vrot.slane %v3836_v0, 1  ;;  %v3839_v62 = vrot.slane %v3836_v0, 2  ;;  %v3840_v49 = vrot.slane %v3836_v0, 3  ;;  %v3841_v34 = vrot.slane %v3836_v0, 4 }
0x11db   :  { %v3842_v40 = vrot.slane %v3836_v0, 5  ;;  %v3843_v58 = vrot.slane %v3836_v0, 6  ;;  %v3844_v54 = vrot.slane %v3836_v0, 7  ;;  %v3853_v59 = vsub.f32 %v3804_v63, %v3836_v0 }
0x11dc   :  { %v3854_v19 = vsub.f32 %v3805_v42, %v3838_v45  ;;  %v3855_v36 = vsub.f32 %v3806_v47, %v3839_v62  ;;  %v3856_v14 = vsub.f32 %v3807_v48, %v3840_v49  ;;  %v3857_v17 = vsub.f32 %v3808_v1, %v3841_v34 }
0x11dd   :  { %v3858_v57 = vsub.f32 %v3809_v11, %v3842_v40  ;;  %v3859_v43 = vsub.f32 %v3810_v21, %v3843_v58  ;;  %v3861_v35 = vmul.f32 1.442695, %v3853_v59  ;;  %v3860_v37 = vsub.f32 %v3811_v41, %v3844_v54 }
0x11de   :  { %v3863_v52 = vmul.f32 1.442695, %v3854_v19  ;;  %v3865_v51 = vmul.f32 1.442695, %v3855_v36  ;;  %v3867_v31 = vmul.f32 1.442695, %v3856_v14 }
0x11df   :  { %11245 = vpow2.f32 %v3861_v35  ;;  %v3869_v26 = vmul.f32 1.442695, %v3857_v17  ;;  %v3871_v39 = vmul.f32 1.442695, %v3858_v57  ;;  %v3873_v10 = vmul.f32 1.442695, %v3859_v43 }
0x11e0   :  { %11247 = vpow2.f32 %v3863_v52  ;;  %v3875_v13 = vmul.f32 1.442695, %v3860_v37 }
0x11e1   :  { %11249 = vpow2.f32 %v3865_v51 }
0x11e2   :  { %11251 = vpow2.f32 %v3867_v31 }
0x11e3   :  { %11253 = vpow2.f32 %v3869_v26 }
0x11e4   :  { %11255 = vpow2.f32 %v3871_v39 }
0x11e5   :  { %11257 = vpow2.f32 %v3873_v10 }
0x11e6   :  { %11259 = vpow2.f32 %v3875_v13 }
0x11ec   :  { %v11246_v47 = vpop.eup %11245 }
0x11ed   :  { %v11248_v42 = vpop.eup %11247 }
0x11ee   :  { %v11250_v58 = vpop.eup %11249  ;;  %v3885_v48 = vrot.slane %v11248_v42, 7 }
0x11ef   :  { %v11252_v19 = vpop.eup %11251  ;;  %v3887_v1 = vrot.slane %v11250_v58, 6 }
0x11f0   :  { %v11254_v63 = vpop.eup %11253  ;;  %v3886_v11 = vsel %vm1389_vm4, %v3885_v48, %v11246_v47  ;;  %v3889_v21 = vrot.slane %v11252_v19, 5 }
0x11f1   :  { %v11256_v41 = vpop.eup %11255  ;;  %v3888_v0 = vsel %vm1392_vm5, %v3887_v1, %v3886_v11  ;;  %v3891_v45 = vrot.slane %v11254_v63, 4 }
0x11f2   :  { %v11258_v31 = vpop.eup %11257  ;;  %v3890_v26 = vsel %vm1395_vm6, %v3889_v21, %v3888_v0  ;;  %v3893_v39 = vrot.slane %v11256_v41, 3 }
0x11f3   :  { %v11260_v10 = vpop.eup %11259  ;;  %v3892_v13 = vsel %vm1398_vm7, %v3891_v45, %v3890_v26  ;;  %v3895_v37 = vrot.slane %v11258_v31, 2 }
0x11f4   :  { %v3894_v62 = vsel %vm1401_vm8, %v3893_v39, %v3892_v13  ;;  %v3897_v49 = vrot.slane %v11260_v10, 1  ;;  %v11434_v13 = vld [vmem:[%s16184_s1 + $0xe0] sm:$0xff]  }
0x11f5   :  { %v3896_v34 = vsel %vm1404_vm9, %v3895_v37, %v3894_v62  ;;  %v11435_v37 = vld [vmem:[%s16184_s1 + $0x98] sm:$0xff]  }
0x11f6   :  { %v3898_v40 = vsel %vm1407_vm10, %v3897_v49, %v3896_v34  ;;  %v11436_v62 = vld [vmem:[%s16184_s1 + $0xd8] sm:$0xff]   ;;  %v11437_v49 = vld [vmem:[%s16184_s1 + $0x90] sm:$0xff]  }
0x11f7   :  { %3900 = vadd.xlane.f32.xlu1 %v3898_v40  ;;  %v11438_v34 = vld [vmem:[%s16184_s1 + $0xd0] sm:$0xff]   ;;  %v11439_v40 = vld [vmem:[%s16184_s1 + $0x88] sm:$0xff]  }
0x1280   :  { %v3901_v54 = vpop.xlane.xlu1 %3900 }
0x1281   :  { %11261 = vrcp.f32 %v3901_v54  ;;  %v11440_v54 = vld [vmem:[%s16184_s1 + $0xc8] sm:$0xff]  }
0x128e   :  { %v11262_v59 = vpop.eup %11261 }
0x128f   :  { %v3919_v36 = vmul.f32 %v11262_v59, %v11246_v47  ;;  %v3904_v14 = vrot.slane %v11262_v59, 1  ;;  %v3905_v17 = vrot.slane %v11262_v59, 2  ;;  %v3906_v57 = vrot.slane %v11262_v59, 3 }
0x1290   :  { %v3907_v43 = vrot.slane %v11262_v59, 4  ;;  %v3908_v35 = vrot.slane %v11262_v59, 5  ;;  %v3909_v52 = vrot.slane %v11262_v59, 6  ;;  %v3910_v51 = vrot.slane %v11262_v59, 7  ;;  %v11441_v59 = vld [vmem:[%s16184_s1 + $0x80] sm:$0xff]  }
0x1291   :  { %v3927_v48 = vpack.c.bf16 %v3919_v36, %v3919_v36  ;;  %4263 = vst [vmem:[%s16185_s8 + $0x2] sm:$0x1] %v3919_v36  ;;  %v3920_v1 = vmul.f32 %v11248_v42, %v3904_v14  ;;  %v13861_v11 = vmul.f32 %v11250_v58, %v3905_v17  ;;  %v13863_v21 = vmul.f32 %v11252_v19, %v3906_v57  ;;  %v11427_v42 = vld [vmem:[%s16184_s1 + $0xb8] sm:$0xff]   ;;  %v11429_v19 = vld [vmem:[%s16184_s1 + $0xb0] sm:$0xff]   ;;  %v11442_v14 = vld [vmem:[%s16184_s1 + $0xc0] sm:$0xff]  }
0x1292   :  { %v13865_v0 = vmul.f32 %v11254_v63, %v3907_v43  ;;  %v13867_v47 = vmul.f32 %v11256_v41, %v3908_v35  ;;  %v13869_v45 = vmul.f32 %v11258_v31, %v3909_v52  ;;  %v13871_v26 = vmul.f32 %v11260_v10, %v3910_v51  ;;  %v11428_v58 = vld [vmem:[%s16184_s1 + $0xf8] sm:$0xff]   ;;  %v11430_v63 = vld [vmem:[%s16184_s1 + $0xf0] sm:$0xff]   ;;  %v11431_v41 = vld [vmem:[%s16184_s1 + $0xa8] sm:$0xff]  }
0x1293   :  { %9959 = vmatmul.mubr.bf16.vlgmr.msra.gmra.mxu1 %v3927_v48  ;;  %v3928_v39 = vpack.c.bf16 %v3920_v1, %v3920_v1  ;;  %4264 = vst [vmem:[%s16185_s8 + $0xa] sm:$0x1] %v3920_v1  ;;  %4265 = vst [vmem:[%s16185_s8 + $0x12] sm:$0x1] %v13861_v11  ;;  %v11432_v31 = vld [vmem:[%s16184_s1 + $0xe8] sm:$0xff]   ;;  %v11433_v10 = vld [vmem:[%s16184_s1 + $0xa0] sm:$0xff]   ;;  %v3929_v36 = vpack.c.bf16 %v13861_v11, %v13861_v11  ;;  %v3930_v17 = vpack.c.bf16 %v13863_v21, %v13863_v21 }
0x1294   :  { %4266 = vst [vmem:[%s16185_s8 + $0x1a] sm:$0x1] %v13863_v21  ;;  %9983 = vmatpush3.bf16.msra.mxu1 %v11427_v42  ;;  %9998 = vmatprep.mubr.msk.bf16.mxu1 %vm11686_vm0, %v16439_v38  ;;  %4267 = vst [vmem:[%s16185_s8 + $0x22] sm:$0x1] %v13865_v0  ;;  %v11443_v57 = vld [vmem:[%s16184_s1 + $0x138] sm:$0xff]   ;;  %v11445_v35 = vld [vmem:[%s16184_s1 + $0x130] sm:$0xff]  }
0x1295   :  { %4268 = vst [vmem:[%s16185_s8 + $0x2a] sm:$0x1] %v13867_v47  ;;  %4269 = vst [vmem:[%s16185_s8 + $0x32] sm:$0x1] %v13869_v45  ;;  %9979 = vmatmul.mubr.bf16.vlgmr.msra.gmra.mxu0 %v3928_v39  ;;  %9984 = vmatprep.subr.bf16.mxu1 %v16439_v38  ;;  %v11444_v43 = vld [vmem:[%s16184_s1 + $0x178] sm:$0xff]   ;;  %v11446_v52 = vld [vmem:[%s16184_s1 + $0x170] sm:$0xff]  }
0x1296   :  { %4270 = vst [vmem:[%s16185_s8 + $0x3a] sm:$0x1] %v13871_v26  ;;  %10003 = vmatpush3.bf16.msra.mxu0 %v11428_v58  ;;  %10018 = vmatprep.mubr.msk.bf16.mxu0 %vm11686_vm0, %v16439_v38  ;;  %v11447_v51 = vld [vmem:[%s16184_s1 + $0x128] sm:$0xff]   ;;  %v11449_v1 = vld [vmem:[%s16184_s1 + $0x120] sm:$0xff]   ;;  %v11451_v21 = vld [vmem:[%s16184_s1 + $0x118] sm:$0xff]  }
0x1297   :  { %10004 = vmatprep.subr.bf16.mxu0 %v16439_v38  ;;  %v11448_v48 = vld [vmem:[%s16184_s1 + $0x168] sm:$0xff]   ;;  %v11450_v11 = vld [vmem:[%s16184_s1 + $0x160] sm:$0xff]   ;;  %v11452_v39 = vld [vmem:[%s16184_s1 + $0x158] sm:$0xff]  }
0x1298   :  { %9985 = vmatpush3.bf16.msra.mxu1 %v11429_v19  ;;  %v11453_v42 = vld [vmem:[%s16184_s1 + $0x110] sm:$0xff]   ;;  %v11455_v19 = vld [vmem:[%s16184_s1 + $0x108] sm:$0xff]  }
0x1299   :  { %9986 = vmatprep.subr.bf16.mxu1 %v16439_v38  ;;  %v11454_v58 = vld [vmem:[%s16184_s1 + $0x150] sm:$0xff]  }
0x129a   :  { %10005 = vmatpush3.bf16.msra.mxu0 %v11430_v63  ;;  %v11456_v63 = vld [vmem:[%s16184_s1 + $0x148] sm:$0xff]  }
0x129b   :  { %10006 = vmatprep.subr.bf16.mxu0 %v16439_v38 }
0x129c   :  { %9987 = vmatpush3.bf16.msra.mxu1 %v11431_v41  ;;  %v11457_v41 = vld [vmem:[%s16184_s1 + $0x100] sm:$0xff]  }
0x129d   :  { %9988 = vmatprep.subr.bf16.mxu1 %v16439_v38 }
0x129e   :  { %10007 = vmatpush3.bf16.msra.mxu0 %v11432_v31  ;;  %v3931_v31 = vpack.c.bf16 %v13865_v0, %v13865_v0  ;;  %v11460_v0 = vld [vmem:[%s16184_s1 + $0x1f8] sm:$0xff]  }
0x129f   :  { %10008 = vmatprep.subr.bf16.mxu0 %v16439_v38 }
0x12a0   :  { %9989 = vmatpush3.bf16.msra.mxu1 %v11433_v10  ;;  %v11458_v10 = vld [vmem:[%s16184_s1 + $0x140] sm:$0xff]  }
0x12a1   :  { %9990 = vmatprep.subr.bf16.mxu1 %v16439_v38 }
0x12a2   :  { %10009 = vmatpush3.bf16.msra.mxu0 %v11434_v13  ;;  %v3932_v13 = vpack.c.bf16 %v13867_v47, %v13867_v47  ;;  %v11461_v47 = vld [vmem:[%s16184_s1 + $0x1b0] sm:$0xff]  }
0x12a3   :  { %10010 = vmatprep.subr.bf16.mxu0 %v16439_v38 }
0x12a4   :  { %9991 = vmatpush3.bf16.msra.mxu1 %v11435_v37  ;;  %v11459_v37 = vld [vmem:[%s16184_s1 + $0x1b8] sm:$0xff]  }
0x12a5   :  { %9992 = vmatprep.subr.bf16.mxu1 %v16439_v38 }
0x12a6   :  { %10011 = vmatpush3.bf16.msra.mxu0 %v11436_v62  ;;  %v11462_v62 = vld [vmem:[%s16184_s1 + $0x1f0] sm:$0xff]  }
0x12a7   :  { %10012 = vmatprep.subr.bf16.mxu0 %v16439_v38 }
0x12a8   :  { %9993 = vmatpush3.bf16.msra.mxu1 %v11437_v49  ;;  %v11463_v49 = vld [vmem:[%s16184_s1 + $0x1a8] sm:$0xff]  }
0x12a9   :  { %9994 = vmatprep.subr.bf16.mxu1 %v16439_v38 }
0x12aa   :  { %10013 = vmatpush3.bf16.msra.mxu0 %v11438_v34  ;;  %v11464_v34 = vld [vmem:[%s16184_s1 + $0x1e8] sm:$0xff]  }
0x12ab   :  { %10014 = vmatprep.subr.bf16.mxu0 %v16439_v38 }
0x12ac   :  { %9995 = vmatpush3.bf16.msra.mxu1 %v11439_v40  ;;  %v11465_v40 = vld [vmem:[%s16184_s1 + $0x1a0] sm:$0xff]  }
0x12ad   :  { %9996 = vmatprep.subr.bf16.mxu1 %v16439_v38 }
0x12ae   :  { %10015 = vmatpush3.bf16.msra.mxu0 %v11440_v54  ;;  %v11466_v54 = vld [vmem:[%s16184_s1 + $0x1e0] sm:$0xff]  }
0x12af   :  { %10016 = vmatprep.subr.bf16.mxu0 %v16439_v38 }
0x12b0   :  { %9997 = vmatpush3.bf16.msra.mxu1 %v11441_v59  ;;  %v11467_v59 = vld [vmem:[%s16184_s1 + $0x198] sm:$0xff]  }
0x12b1   :  { %10022 = vmatprep.subr.bf16.mxu1 %v16439_v38 }
0x12b2   :  { %10017 = vmatpush3.bf16.msra.mxu0 %v11442_v14  ;;  %v11469_v14 = vld [vmem:[%s16184_s1 + $0x190] sm:$0xff]  }
0x12b3   :  { %9999 = vmatmul.mubr.bf16.vlgmr.msra.gmra.mxu1 %v3929_v36  ;;  %10042 = vmatprep.subr.bf16.mxu0 %v16439_v38  ;;  %v11468_v36 = vld [vmem:[%s16184_s1 + $0x1d8] sm:$0xff]  }
0x12b4   :  { %10023 = vmatpush3.bf16.msra.mxu1 %v11443_v57  ;;  %10038 = vmatprep.mubr.msk.bf16.mxu1 %vm11686_vm0, %v16439_v38  ;;  %v11471_v57 = vld [vmem:[%s16184_s1 + $0x188] sm:$0xff]  }
0x12b5   :  { %10019 = vmatmul.mubr.bf16.vlgmr.msra.gmra.mxu0 %v3930_v17  ;;  %10024 = vmatprep.subr.bf16.mxu1 %v16439_v38  ;;  %v11470_v17 = vld [vmem:[%s16184_s1 + $0x1d0] sm:$0xff]  }
0x12b6   :  { %10043 = vmatpush3.bf16.msra.mxu0 %v11444_v43  ;;  %10058 = vmatprep.mubr.msk.bf16.mxu0 %vm11686_vm0, %v16439_v38  ;;  %v11472_v43 = vld [vmem:[%s16184_s1 + $0x1c8] sm:$0xff]  }
0x12b7   :  { %10044 = vmatprep.subr.bf16.mxu0 %v16439_v38 }
0x12b8   :  { %10025 = vmatpush3.bf16.msra.mxu1 %v11445_v35  ;;  %v11473_v35 = vld [vmem:[%s16184_s1 + $0x180] sm:$0xff]  }
0x12b9   :  { %10026 = vmatprep.subr.bf16.mxu1 %v16439_v38 }
0x12ba   :  { %10045 = vmatpush3.bf16.msra.mxu0 %v11446_v52  ;;  %v3933_v52 = vpack.c.bf16 %v13869_v45, %v13869_v45  ;;  %v11476_v45 = vld [vmem:[%s16180_s5 + $0x8] sm:$0xff]  }
0x12bb   :  { %10046 = vmatprep.subr.bf16.mxu0 %v16439_v38 }
0x12bc   :  { %10027 = vmatpush3.bf16.msra.mxu1 %v11447_v51  ;;  %v11474_v51 = vld [vmem:[%s16184_s1 + $0x1c0] sm:$0xff]  }
0x12bd   :  { %10028 = vmatprep.subr.bf16.mxu1 %v16439_v38 }
0x12be   :  { %10047 = vmatpush3.bf16.msra.mxu0 %v11448_v48  ;;  %v3934_v48 = vpack.c.bf16 %v13871_v26, %v13871_v26  ;;  %v11477_v26 = vld [vmem:[%s16177_s4] sm:$0xff]  }
0x12bf   :  { %10048 = vmatprep.subr.bf16.mxu0 %v16439_v38 }
0x12c0   :  { %10029 = vmatpush3.bf16.msra.mxu1 %v11449_v1  ;;  %v11475_v1 = vld [vmem:[%s16177_s4 + $0x8] sm:$0xff]  }
0x12c1   :  { %10030 = vmatprep.subr.bf16.mxu1 %v16439_v38 }
0x12c2   :  { %10049 = vmatpush3.bf16.msra.mxu0 %v11450_v11  ;;  %v11478_v11 = vld [vmem:[%s16180_s5] sm:$0xff]  }
0x12c3   :  { %10050 = vmatprep.subr.bf16.mxu0 %v16439_v38 }
0x12c4   :  { %10031 = vmatpush3.bf16.msra.mxu1 %v11451_v21  ;;  %v4481_v21 = vpop.permute.xlu0 %4480 }
0x12c5   :  { %10032 = vmatprep.subr.bf16.mxu1 %v16439_v38 }
0x12c6   :  { %10051 = vmatpush3.bf16.msra.mxu0 %v11452_v39 }
0x12c7   :  { %10052 = vmatprep.subr.bf16.mxu0 %v16439_v38 }
0x12c8   :  { %10033 = vmatpush3.bf16.msra.mxu1 %v11453_v42 }
0x12c9   :  { %10034 = vmatprep.subr.bf16.mxu1 %v16439_v38 }
0x12ca   :  { %10053 = vmatpush3.bf16.msra.mxu0 %v11454_v58 }
0x12cb   :  { %10054 = vmatprep.subr.bf16.mxu0 %v16439_v38 }
0x12cc   :  { %10035 = vmatpush3.bf16.msra.mxu1 %v11455_v19 }
0x12cd   :  { %10036 = vmatprep.subr.bf16.mxu1 %v16439_v38 }
0x12ce   :  { %10055 = vmatpush3.bf16.msra.mxu0 %v11456_v63 }
0x12cf   :  { %10056 = vmatprep.subr.bf16.mxu0 %v16439_v38 }
0x12d0   :  { %10037 = vmatpush3.bf16.msra.mxu1 %v11457_v41 }
0x12d1   :  { %10062 = vmatprep.subr.bf16.mxu1 %v16439_v38 }
0x12d2   :  { %10057 = vmatpush3.bf16.msra.mxu0 %v11458_v10 }
0x12d3   :  { %10039 = vmatmul.mubr.bf16.vlgmr.msra.gmra.mxu1 %v3931_v31  ;;  %10082 = vmatprep.subr.bf16.mxu0 %v16439_v38 }
0x12d4   :  { %10063 = vmatpush3.bf16.msra.mxu1 %v11459_v37  ;;  %10078 = vmatprep.mubr.msk.bf16.mxu1 %vm11686_vm0, %v16439_v38 }
0x12d5   :  { %10059 = vmatmul.mubr.bf16.vlgmr.msra.gmra.mxu0 %v3932_v13  ;;  %10064 = vmatprep.subr.bf16.mxu1 %v16439_v38 }
0x12d6   :  { %10083 = vmatpush3.bf16.msra.mxu0 %v11460_v0  ;;  %10098 = vmatprep.mubr.msk.bf16.mxu0 %vm11686_vm0, %v16439_v38 }
0x12d7   :  { %10084 = vmatprep.subr.bf16.mxu0 %v16439_v38 }
0x12d8   :  { %10065 = vmatpush3.bf16.msra.mxu1 %v11461_v47 }
0x12d9   :  { %10066 = vmatprep.subr.bf16.mxu1 %v16439_v38 }
0x12da   :  { %10085 = vmatpush3.bf16.msra.mxu0 %v11462_v62 }
0x12db   :  { %10086 = vmatprep.subr.bf16.mxu0 %v16439_v38 }
0x12dc   :  { %10067 = vmatpush3.bf16.msra.mxu1 %v11463_v49 }
0x12dd   :  { %10068 = vmatprep.subr.bf16.mxu1 %v16439_v38 }
0x12de   :  { %10087 = vmatpush3.bf16.msra.mxu0 %v11464_v34 }
0x12df   :  { %10088 = vmatprep.subr.bf16.mxu0 %v16439_v38 }
0x12e0   :  { %10069 = vmatpush3.bf16.msra.mxu1 %v11465_v40 }
0x12e1   :  { %10070 = vmatprep.subr.bf16.mxu1 %v16439_v38 }
0x12e2   :  { %10089 = vmatpush3.bf16.msra.mxu0 %v11466_v54 }
0x12e3   :  { %10090 = vmatprep.subr.bf16.mxu0 %v16439_v38 }
0x12e4   :  { %10071 = vmatpush3.bf16.msra.mxu1 %v11467_v59 }
0x12e5   :  { %10072 = vmatprep.subr.bf16.mxu1 %v16439_v38 }
0x12e6   :  { %10091 = vmatpush3.bf16.msra.mxu0 %v11468_v36 }
0x12e7   :  { %10092 = vmatprep.subr.bf16.mxu0 %v16439_v38 }
0x12e8   :  { %10073 = vmatpush3.bf16.msra.mxu1 %v11469_v14 }
0x12e9   :  { %10074 = vmatprep.subr.bf16.mxu1 %v16439_v38 }
0x12ea   :  { %10093 = vmatpush3.bf16.msra.mxu0 %v11470_v17 }
0x12eb   :  { %10094 = vmatprep.subr.bf16.mxu0 %v16439_v38 }
0x12ec   :  { %10075 = vmatpush3.bf16.msra.mxu1 %v11471_v57 }
0x12ed   :  { %10076 = vmatprep.subr.bf16.mxu1 %v16439_v38 }
0x12ee   :  { %10095 = vmatpush3.bf16.msra.mxu0 %v11472_v43 }
0x12ef   :  { %10096 = vmatprep.subr.bf16.mxu0 %v16439_v38 }
0x12f0   :  { %10077 = vmatpush3.bf16.msra.mxu1 %v11473_v35 }
0x12f1   :  { %10102 = vmatprep.subr.bf16.mxu1 %v16439_v38 }
0x12f2   :  { %10097 = vmatpush3.bf16.msra.mxu0 %v11474_v51 }
0x12f3   :  { %10079 = vmatmul.mubr.bf16.vlgmr.msra.gmra.mxu1 %v3933_v52  ;;  %10110 = vmatprep.subr.bf16.mxu0 %v16439_v38 }
0x12f4   :  { %10103 = vmatpush3.bf16.msra.mxu1 %v11475_v1  ;;  %10106 = vmatprep.mubr.msk.bf16.mxu1 %vm11686_vm0, %v16439_v38 }
0x12f5   :  { %10099 = vmatmul.mubr.bf16.vlgmr.msra.gmra.mxu0 %v3934_v48  ;;  %10104 = vmatprep.subr.bf16.mxu1 %v16439_v38 }
0x12f6   :  { %10111 = vmatpush3.bf16.msra.mxu0 %v11476_v45  ;;  %10114 = vmatprep.mubr.msk.bf16.mxu0 %vm11686_vm0, %v16439_v38 }
0x12f7   :  { %10112 = vmatprep.subr.bf16.mxu0 %v16439_v38 }
0x12f8   :  { %10105 = vmatpush3.bf16.msra.mxu1 %v11477_v26 }
0x12f9   :  { %10118 = vmatprep.subr.bf16.mxu1 %v16439_v38 }
0x12fa   :  { %10113 = vmatpush3.bf16.msra.mxu0 %v11478_v11 }
0x12fb   :  { %10138 = vmatprep.subr.bf16.mxu0 %v16439_v38 }
0x12fd   :  { %10115 = vmatmul.mubr.msk.bf16.vlgmr.msra.gmra.mxu0 %vm295_vm2, %v4481_v21 }
0x12fe   :  { %10139 = vmatpush3.bf16.xpose.msra.mxu0 %v16469_v29  ;;  %10154 = vmatprep.mubr.msk.bf16.mxu0 %vm11686_vm0, %v16439_v38 }
0x12ff   :  { %10140 = vmatprep.subr.bf16.mxu0 %v16439_v38 }
0x1306   :  { %10141 = vmatpush3.bf16.xpose.msra.mxu0 %v16470_v6 }
0x1307   :  { %10142 = vmatprep.subr.bf16.mxu0 %v16439_v38 }
0x130e   :  { %10143 = vmatpush3.bf16.xpose.msra.mxu0 %v16471_v4 }
0x130f   :  { %10144 = vmatprep.subr.bf16.mxu0 %v16439_v38 }
0x1316   :  { %10145 = vmatpush3.bf16.xpose.msra.mxu0 %v16472_v55 }
0x1317   :  { %10146 = vmatprep.subr.bf16.mxu0 %v16439_v38 }
0x131e   :  { %10147 = vmatpush3.bf16.xpose.msra.mxu0 %v16473_v44 }
0x131f   :  { %10148 = vmatprep.subr.bf16.mxu0 %v16439_v38 }
0x1326   :  { %10149 = vmatpush3.bf16.xpose.msra.mxu0 %v16474_v61 }
0x1327   :  { %10150 = vmatprep.subr.bf16.mxu0 %v16439_v38 }
0x132e   :  { %10151 = vmatpush3.bf16.xpose.msra.mxu0 %v16475_v5 }
0x132f   :  { %10152 = vmatprep.subr.bf16.mxu0 %v16439_v38 }
0x1336   :  { %10153 = vmatpush3.bf16.xpose.msra.mxu0 %v16476_v46 }
0x1337   :  { %10178 = vmatprep.subr.bf16.mxu0 %v16439_v38 }
0x1353   :  { %v3969_v39 = vpop.f32.mrf.mxu1 }
0x1354   :  { %v4255_v19 = vpack.c.bf16 %v3969_v39, %v3969_v39 }
0x1355   :  { %v9960_v42 = vpop.f32.mrf.mxu1  ;;  %v4009_v58 = vpop.f32.mrf.mxu0 }
0x1356   :  { %v4256_v63 = vpack.c.bf16 %v4009_v58, %v4009_v58  ;;  %v4279_v0 = vunpack.c.l.b16 %v4255_v19 }
0x1357   :  { %v3972_v41 = vpop.f32.mrf.mxu1  ;;  %v9980_v31 = vpop.f32.mrf.mxu0 }
0x1358   :  { %v4280_v10 = vunpack.c.l.b16 %v4256_v63 }
0x1359   :  { %v9961_v13 = vpop.f32.mrf.mxu1  ;;  %v4012_v37 = vpop.f32.mrf.mxu0 }
0x135a   :  { %v4287_v47 = vrot.slane %v4280_v10, 7 }
0x135b   :  { %v9981_v62 = vpop.f32.mrf.mxu0 }
0x135c   :  { %v4288_v49 = vsel %vm1389_vm4, %v4287_v47, %v4279_v0 }
0x1373   :  { %v4049_v34 = vpop.f32.mrf.mxu1 }
0x1374   :  { %v4257_v11 = vpack.c.bf16 %v4049_v34, %v4049_v34 }
0x1375   :  { %v10000_v40 = vpop.f32.mrf.mxu1  ;;  %v4089_v54 = vpop.f32.mrf.mxu0 }
0x1376   :  { %v4258_v21 = vpack.c.bf16 %v4089_v54, %v4089_v54  ;;  %v4281_v39 = vunpack.c.l.b16 %v4257_v11 }
0x1377   :  { %v4052_v59 = vpop.f32.mrf.mxu1  ;;  %v10020_v36 = vpop.f32.mrf.mxu0 }
0x1378   :  { %v4282_v58 = vunpack.c.l.b16 %v4258_v21  ;;  %v4289_v63 = vrot.slane %v4281_v39, 6  ;;  %v11479_v39 = vld [vmem:[%s16183_s7] ss:$0 sm:$0xff] }
0x1379   :  { %v10001_v14 = vpop.f32.mrf.mxu1  ;;  %v4092_v17 = vpop.f32.mrf.mxu0 }
0x137a   :  { %v4291_v31 = vrot.slane %v4282_v58, 5  ;;  %v4290_v13 = vsel %vm1392_vm5, %v4289_v63, %v4288_v49 }
0x137b   :  { %v10021_v57 = vpop.f32.mrf.mxu0 }
0x137c   :  { %v4292_v62 = vsel %vm1395_vm6, %v4291_v31, %v4290_v13 }
0x1393   :  { %v4129_v43 = vpop.f32.mrf.mxu1 }
0x1394   :  { %v4259_v42 = vpack.c.bf16 %v4129_v43, %v4129_v43 }
0x1395   :  { %v10040_v35 = vpop.f32.mrf.mxu1  ;;  %v4169_v52 = vpop.f32.mrf.mxu0 }
0x1396   :  { %v4260_v19 = vpack.c.bf16 %v4169_v52, %v4169_v52  ;;  %v4283_v41 = vunpack.c.l.b16 %v4259_v42 }
0x1397   :  { %v4132_v51 = vpop.f32.mrf.mxu1  ;;  %v10060_v48 = vpop.f32.mrf.mxu0 }
0x1398   :  { %v4284_v10 = vunpack.c.l.b16 %v4260_v19  ;;  %v4293_v37 = vrot.slane %v4283_v41, 4 }
0x1399   :  { %v10041_v1 = vpop.f32.mrf.mxu1  ;;  %v4172_v45 = vpop.f32.mrf.mxu0 }
0x139a   :  { %v4295_v40 = vrot.slane %v4284_v10, 3  ;;  %v4294_v34 = vsel %vm1398_vm7, %v4293_v37, %v4292_v62 }
0x139b   :  { %v10061_v26 = vpop.f32.mrf.mxu0 }
0x139c   :  { %v4296_v52 = vsel %vm1401_vm8, %v4295_v40, %v4294_v34  ;;  %v11480_v34 = vld [vmem:[%s16182_s6] ss:$0 sm:$0xff] }
0x13b3   :  { %v4209_v0 = vpop.f32.mrf.mxu1 }
0x13b4   :  { %v4261_v47 = vpack.c.bf16 %v4209_v0, %v4209_v0 }
0x13b5   :  { %v10080_v59 = vpop.f32.mrf.mxu1  ;;  %v4249_v36 = vpop.f32.mrf.mxu0 }
0x13b6   :  { %v4285_v54 = vunpack.c.l.b16 %v4261_v47  ;;  %v4262_v14 = vpack.c.bf16 %v4249_v36, %v4249_v36 }
0x13b7   :  { %v4212_v17 = vpop.f32.mrf.mxu1  ;;  %v10100_v57 = vpop.f32.mrf.mxu0 }
0x13b8   :  { %v4297_v43 = vrot.slane %v4285_v54, 2  ;;  %v4286_v35 = vunpack.c.l.b16 %v4262_v14  ;;  %v4413_v54 = vld [vmem:[%s16186_s9] sm:$0x2] }
0x13b9   :  { %v10081_v51 = vpop.f32.mrf.mxu1  ;;  %v4252_v49 = vpop.f32.mrf.mxu0 }
0x13ba   :  { %v4298_v48 = vsel %vm1404_vm9, %v4297_v43, %v4296_v52  ;;  %v4299_v1 = vrot.slane %v4286_v35, 1  ;;  %v4416_v49 = vld [vmem:[%s16186_s9 + $0x4] sm:$0x2] }
0x13bb   :  { %v10101_v45 = vpop.f32.mrf.mxu0 }
0x13bc   :  { %v4300_v26 = vsel %vm1407_vm10, %v4299_v1, %v4298_v48  ;;  %v4419_v48 = vld [vmem:[%s16186_s9 + $0x8] sm:$0x2]  ;;  %v4425_v1 = vld [vmem:[%s16186_s9 + $0x10] sm:$0x2] }
0x13bd   :  { %v4301_v11 = vpack.c.b16 %v4300_v26, %v4300_v26  ;;  %v4519_v21 = vpop.f32.mrf.mxu0 }
0x13be   :  { %v14165_v42 = vadd.f32 %v11479_v39, %v4519_v21  ;;  %v4422_v39 = vld [vmem:[%s16186_s9 + $0xc] sm:$0x2] }
0x13bf   :  { %v4304_v58 = vsel %vm295_vm2, %v4301_v11, %v13622_v32  ;;  %10107 = vmatmul.mubr.msk.bf16.vlgmr.msra.gmra.mxu1 %vm295_vm2, %v4301_v11  ;;  %v10116_v19 = vpop.f32.mrf.mxu0 }
0x13c0   :  { %v4312_v63 = vrot.slane %v4304_v58, %v16465_v50  ;;  %4533 = vrot.lane.b32.xlu1 %v14165_v42, %s11688_s25  ;;  %10119 = vmatpush3.bf16.xpose.msra.mxu1 %v16456_v15  ;;  %v4428_v58 = vld [vmem:[%s16186_s9 + $0x14] sm:$0x2]  ;;  %v4431_v19 = vld [vmem:[%s16186_s9 + $0x18] sm:$0x2] }
0x13c1   :  { %v4522_v41 = vpop.f32.mrf.mxu0  ;;  %10120 = vmatprep.subr.bf16.mxu1 %v16439_v38  ;;  %10134 = vmatprep.mubr.msk.bf16.mxu1 %vm11686_vm0, %v16439_v38 }
0x13c2   :  { %v4313_v31 = vcombine.high %v4312_v63, %v4312_v63  ;;  %v4320_v10 = vrot.slane %v4312_v63, %v16465_v50 }
0x13c3   :  { %v10117_v32 = vpop.f32.mrf.mxu0 }
0x13c4   :  { %v4327_v13 = vrot.slane %v4313_v31, %v16465_v50  ;;  %v4328_v37 = vcombine.high %v4320_v10, %v4320_v10  ;;  %v4331_v0 = vunpack.i.h.s16 %v4320_v10  ;;  %v8115_v47 = vpack.i.b16 %v4320_v10, %v4320_v10 }
0x13c6   :  { %v4329_v62 = vcombine.high %v4327_v13, %v4327_v13  ;;  %v4333_v40 = vunpack.i.h.s16 %v4327_v13  ;;  %v4335_v59 = vunpack.i.h.s16 %v4328_v37  ;;  %v4339_v36 = vpack.i.b16 %v4331_v0, %v4331_v0  ;;  %v4434_v0 = vld [vmem:[%s16186_s9 + $0x1c] sm:$0x2] }
0x13c7   :  { %v8116_v14 = vpack.i.b16 %v4327_v13, %v4327_v13  ;;  %v8117_v17 = vpack.i.b16 %v4328_v37, %v4328_v37  ;;  %v4352_v57 = vrot.slane %v8115_v47, %v12844_v53 }
0x13c8   :  { %v4337_v43 = vunpack.i.h.s16 %v4329_v62  ;;  %v4341_v35 = vpack.i.b16 %v4333_v40, %v4333_v40  ;;  %v4343_v52 = vpack.i.b16 %v4335_v59, %v4335_v59  ;;  %v8118_v51 = vpack.i.b16 %v4329_v62, %v4329_v62  ;;  %10121 = vmatpush3.bf16.xpose.msra.mxu1 %v16457_v22 }
0x13c9   :  { %v4359_v45 = vrot.slane %v4339_v36, %v12844_v53  ;;  %v4366_v26 = vrot.slane %v8116_v14, %v12844_v53  ;;  %v4380_v11 = vrot.slane %v8117_v17, %v12844_v53  ;;  %v4414_v21 = vsel %vm14180_vm11, %v4352_v57, %v4413_v54  ;;  %10122 = vmatprep.subr.bf16.mxu1 %v16439_v38  ;;  %v16573_v54 = vld [vmem:[#allocation38_spill] sm:$0xff] }
0x13ca   :  { %v4345_v63 = vpack.i.b16 %v4337_v43, %v4337_v43  ;;  %v4373_v41 = vrot.slane %v4341_v35, %v12844_v53  ;;  %v4387_v31 = vrot.slane %v4343_v52, %v12844_v53  ;;  %v4394_v10 = vrot.slane %v8118_v51, %v12844_v53  ;;  %4415 = vst [vmem:[%s16186_s9] sm:$0x2] %v4414_v21 }
0x13cb   :  { %v4417_v32 = vsel %vm14180_vm11, %v4359_v45, %v4416_v49  ;;  %v4420_v13 = vsel %vm14180_vm11, %v4366_v26, %v4419_v48  ;;  %v4426_v37 = vsel %vm14180_vm11, %v4380_v11, %v4425_v1  ;;  %v124_v14 = vadd.f32 %v11480_v34, %v16573_v54 }
0x13cc   :  { %v4401_v47 = vrot.slane %v4345_v63, %v12844_v53  ;;  %4418 = vst [vmem:[%s16186_s9 + $0x4] sm:$0x2] %v4417_v32  ;;  %4421 = vst [vmem:[%s16186_s9 + $0x8] sm:$0x2] %v4420_v13  ;;  %v4423_v62 = vsel %vm14180_vm11, %v4373_v41, %v4422_v39  ;;  %v4429_v40 = vsel %vm14180_vm11, %v4387_v31, %v4428_v58 }
0x13cd   :  { %4427 = vst [vmem:[%s16186_s9 + $0x10] sm:$0x2] %v4426_v37  ;;  %v4432_v59 = vsel %vm14180_vm11, %v4394_v10, %v4431_v19  ;;  %4424 = vst [vmem:[%s16186_s9 + $0xc] sm:$0x2] %v4423_v62 }
0x13ce   :  { %4430 = vst [vmem:[%s16186_s9 + $0x14] sm:$0x2] %v4429_v40  ;;  %4433 = vst [vmem:[%s16186_s9 + $0x18] sm:$0x2] %v4432_v59  ;;  %v4435_v36 = vsel %vm14180_vm11, %v4401_v47, %v4434_v0 }
0x13cf   :  { %4436 = vst [vmem:[%s16186_s9 + $0x1c] sm:$0x2] %v4435_v36 }
0x13d0   :  { %10123 = vmatpush3.bf16.xpose.msra.mxu1 %v16458_v24 }
0x13d1   :  { %10124 = vmatprep.subr.bf16.mxu1 %v16439_v38 }
0x13d8   :  { %10125 = vmatpush3.bf16.xpose.msra.mxu1 %v16459_v30 }
0x13d9   :  { %10126 = vmatprep.subr.bf16.mxu1 %v16439_v38 }
0x13e0   :  { %10127 = vmatpush3.bf16.xpose.msra.mxu1 %v16460_v18 }
0x13e1   :  { %10128 = vmatprep.subr.bf16.mxu1 %v16439_v38 }
0x13e8   :  { %10129 = vmatpush3.bf16.xpose.msra.mxu1 %v16461_v28 }
0x13e9   :  { %10130 = vmatprep.subr.bf16.mxu1 %v16439_v38 }
0x13f0   :  { %10131 = vmatpush3.bf16.xpose.msra.mxu1 %v16462_v12 }
0x13f1   :  { %10132 = vmatprep.subr.bf16.mxu1 %v16439_v38 }
0x13f8   :  { %10133 = vmatpush3.bf16.xpose.msra.mxu1 %v16463_v33 }
0x13f9   :  { %10158 = vmatprep.subr.bf16.mxu1 %v16439_v38 }
0x1432   :  { %v4534_v26 = vpop.permute.xlu1 %4533 }
0x147f   :  { %v4473_v17 = vpop.f32.mrf.mxu1 }
0x1480   :  { %v4479_v57 = vadd.f32 %v4473_v17, %v124_v14 }
0x1481   :  { %v10108_v43 = vpop.f32.mrf.mxu1 }
0x1482   :  { %v4525_v35 = vadd.f32 %v14165_v42, %v4479_v57 }
0x1483   :  { %v4476_v52 = vpop.f32.mrf.mxu1 }
0x1484   :  { %v8121_v51 = vmul.f32 -1.442695, %v4525_v35 }
0x1485   :  { %v10109_v49 = vpop.f32.mrf.mxu1 }
0x1486   :  { %11263 = vpow2.f32 %v8121_v51 }
0x1493   :  { %v11264_v48 = vpop.eup %11263 }
0x1494   :  { %v4529_v1 = vadd.f32 1.0, %v11264_v48 }
0x1496   :  { %11265 = vrcp.f32 %v4529_v1 }
0x14a3   :  { %v11266_v45 = vpop.eup %11265 }
0x14a4   :  { %v4536_v11 = vmul.f32 %v11266_v45, %v4534_v26  ;;  %v4543_v19 = vsub.f32 1.0, %v11266_v45  ;;  %v4549_v63 = vmul.f32 %v11266_v45, %v13618_v9 }
0x14a6   :  { %4538 = vrot.lane.b32.xlu0 %v4536_v11, %s11688_s25 }
0x1518   :  { %v4539_v21 = vpop.permute.xlu0 %4538 }
0x1519   :  { %v4541_v39 = vadd.f32 %v4539_v21, %v4479_v57 }
0x151b   :  { %11267 = vtanh.f32 %v4541_v39 }
0x1528   :  { %v11268_v58 = vpop.eup %11267 }
0x1529   :  { %4545 = vrot.lane.b32.xlu1 %v11268_v58, %s11689_s26 }
0x159b   :  { %v4546_v42 = vpop.permute.xlu1 %4545 }
0x159c   :  { %v4548_v41 = vmul.f32 %v4546_v42, %v4543_v19  ;;  %v16574_v19 = vld [vmem:[#allocation34_spill] sm:$0xff]  ;;  %v16575_v42 = vld [vmem:[#allocation35_spill] sm:$0xff] }
0x159e   :  { %v14278_v31 = vadd.f32 %v4549_v63, %v4548_v41  ;;  %v16576_v63 = vld [vmem:[#allocation37_spill] sm:$0xff]  ;;  %v16577_v41 = vld [vmem:[#allocation39_spill] sm:$0xff] }
0x15a0   :  { %v14282_v10 = vpack.c.bf16 %v14278_v31, %v14278_v31 }
0x15a2   :  { %v4559_v32 = vrot.slane %v14282_v10, %v16465_v50 }
0x15a4   :  { %v4560_v13 = vcombine.high %v4559_v32, %v4559_v32  ;;  %v4567_v37 = vrot.slane %v4559_v32, %v16465_v50  ;;  %v16578_v32 = vld [vmem:[#allocation41_spill] sm:$0xff] }
0x15a6   :  { %v8122_v0 = vpack.i.b16 %v4567_v37, %v4567_v37  ;;  %v4578_v47 = vunpack.i.h.s16 %v4567_v37  ;;  %v4574_v62 = vrot.slane %v4560_v13, %v16465_v50  ;;  %v4575_v40 = vcombine.high %v4567_v37, %v4567_v37  ;;  %v16579_v13 = vld [vmem:[#allocation43_spill] sm:$0xff] }
0x15a8   :  { %v4589_v9 = vrot.slane %v8122_v0, %v16479_v2  ;;  %v4635_v59 = vpack.i.b16 %v4578_v47, %v4578_v47  ;;  %v8125_v36 = vpack.i.b16 %v4574_v62, %v4574_v62  ;;  %v4580_v34 = vunpack.i.h.s16 %v4574_v62  ;;  %v16580_v47 = vld [vmem:[#allocation44_spill] sm:$0xff] }
0x15a9   :  { %v4582_v17 = vunpack.i.h.s16 %v4575_v40  ;;  %v4576_v57 = vcombine.high %v4574_v62, %v4574_v62  ;;  %v8128_v35 = vpack.i.b16 %v4575_v40, %v4575_v40  ;;  %v16581_v62 = vld [vmem:[#allocation45_spill] sm:$0xff]  ;;  %v16582_v40 = vld [vmem:[#allocation46_spill] sm:$0xff] }
0x15aa   :  { %4590 = vrot.lane.b32.xlu0 %v4589_v9, %s11689_s26  ;;  %v4639_v54 = vrot.slane %v4635_v59, %v16479_v2  ;;  %v4735_v14 = vpack.i.b16 %v4580_v34, %v4580_v34  ;;  %v4689_v43 = vrot.slane %v8125_v36, %v16479_v2  ;;  %v16583_v9 = vld [vmem:[#allocation47_spill] sm:$0xff]  ;;  %v16584_v59 = vld [vmem:[#allocation48_spill] sm:$0xff]  ;;  %v16585_v36 = vld [vmem:[#allocation49_spill] sm:$0xff] }
0x15ab   :  { %v4835_v51 = vpack.i.b16 %v4582_v17, %v4582_v17  ;;  %v4584_v49 = vunpack.i.h.s16 %v4576_v57  ;;  %v4789_v48 = vrot.slane %v8128_v35, %v16479_v2  ;;  %v8131_v1 = vpack.i.b16 %v4576_v57, %v4576_v57  ;;  %v16586_v34 = vld [vmem:[#allocation50_spill] sm:$0xff]  ;;  %v16589_v17 = vld [vmem:[#allocation53_spill] sm:$0xff]  ;;  %v16592_v35 = vld [vmem:[#allocation56_spill] sm:$0xff] }
0x15ac   :  { %4640 = vrot.lane.b32.xlu1 %v4639_v54, %s11689_s26  ;;  %v4739_v52 = vrot.slane %v4735_v14, %v16479_v2  ;;  %v16587_v54 = vld [vmem:[#allocation51_spill] sm:$0xff]  ;;  %v16588_v14 = vld [vmem:[#allocation52_spill] sm:$0xff]  ;;  %v16590_v57 = vld [vmem:[#allocation54_spill] sm:$0xff] }
0x15ad   :  { %v4839_v45 = vrot.slane %v4835_v51, %v16479_v2  ;;  %v4935_v26 = vpack.i.b16 %v4584_v49, %v4584_v49  ;;  %v4889_v11 = vrot.slane %v8131_v1, %v16479_v2  ;;  %v16594_v51 = vld [vmem:[#allocation58_spill] sm:$0xff]  ;;  %v16595_v49 = vld [vmem:[#allocation59_spill] sm:$0xff] }
0x15ae   :  { %4690 = vrot.lane.b32.xlu0 %v4689_v43, %s11689_s26  ;;  %v16591_v43 = vld [vmem:[#allocation55_spill] sm:$0xff] }
0x15af   :  { %v4939_v21 = vrot.slane %v4935_v26, %v16479_v2  ;;  %v16597_v26 = vld [vmem:[#allocation63_spill] sm:$0xff] }
0x15b0   :  { %4740 = vrot.lane.b32.xlu1 %v4739_v52, %s11689_s26  ;;  %v16593_v52 = vld [vmem:[#allocation57_spill] sm:$0xff] }
0x15b2   :  { %4790 = vrot.lane.b32.xlu0 %v4789_v48, %s11689_s26 }
0x15b4   :  { %4840 = vrot.lane.b32.xlu1 %v4839_v45, %s11689_s26  ;;  %v16596_v45 = vld [vmem:[#allocation62_spill] sm:$0xff] }
0x15b6   :  { %4890 = vrot.lane.b32.xlu0 %v4889_v11, %s11689_s26  ;;  %v16598_v11 = vld [vmem:[#allocation66_spill] sm:$0xff] }
0x15b8   :  { %4940 = vrot.lane.b32.xlu1 %v4939_v21, %s11689_s26  ;;  %v16599_v21 = vld [vmem:[#allocation67_spill] sm:$0xff] }
0x161c   :  { %v4591_v39 = vpop.permute.xlu0 %4590 }
0x161d   :  { %10135 = vmatmul.mubr.msk.bf16.vlgmr.msra.gmra.mxu1 %vm295_vm2, %v4591_v39  ;;  %v16600_v39 = vld [vmem:[#allocation70_spill] sm:$0xff] }
0x161e   :  { %10159 = vmatpush3.bf16.xpose.msra.mxu1 %v16480_v25  ;;  %v4641_v58 = vpop.permute.xlu1 %4640  ;;  %10174 = vmatprep.mubr.msk.bf16.mxu1 %vm11686_vm0, %v16439_v38 }
0x161f   :  { %10155 = vmatmul.mubr.msk.bf16.vlgmr.msra.gmra.mxu0 %vm295_vm2, %v4641_v58  ;;  %10160 = vmatprep.subr.bf16.mxu1 %v16439_v38  ;;  %v16601_v58 = vld [vmem:[#allocation71_spill] sm:$0xff] }
0x1620   :  { %10179 = vmatpush3.bf16.xpose.msra.mxu0 %v16481_v16  ;;  %10194 = vmatprep.mubr.msk.bf16.mxu0 %vm11686_vm0, %v16439_v38  ;;  %v4691_v37 = vpop.permute.xlu0 %4690 }
0x1621   :  { %10180 = vmatprep.subr.bf16.mxu0 %v16439_v38 }
0x1622   :  { %v4741_v0 = vpop.permute.xlu1 %4740 }
0x1624   :  { %v4791_v48 = vpop.permute.xlu0 %4790 }
0x1626   :  { %10161 = vmatpush3.bf16.xpose.msra.mxu1 %v16482_v3  ;;  %v4841_v1 = vpop.permute.xlu1 %4840 }
0x1627   :  { %10162 = vmatprep.subr.bf16.mxu1 %v16439_v38 }
0x1628   :  { %10181 = vmatpush3.bf16.xpose.msra.mxu0 %v16483_v8 }
0x1629   :  { %10182 = vmatprep.subr.bf16.mxu0 %v16439_v38 }
0x162e   :  { %10163 = vmatpush3.bf16.xpose.msra.mxu1 %v16484_v60 }
0x162f   :  { %10164 = vmatprep.subr.bf16.mxu1 %v16439_v38 }
0x1630   :  { %10183 = vmatpush3.bf16.xpose.msra.mxu0 %v16485_v56 }
0x1631   :  { %10184 = vmatprep.subr.bf16.mxu0 %v16439_v38 }
0x1636   :  { %10165 = vmatpush3.bf16.xpose.msra.mxu1 %v16486_v7 }
0x1637   :  { %10166 = vmatprep.subr.bf16.mxu1 %v16439_v38 }
0x1638   :  { %10185 = vmatpush3.bf16.xpose.msra.mxu0 %v16487_v20 }
0x1639   :  { %10186 = vmatprep.subr.bf16.mxu0 %v16439_v38 }
0x163e   :  { %10167 = vmatpush3.bf16.xpose.msra.mxu1 %v16488_v23 }
0x163f   :  { %10168 = vmatprep.subr.bf16.mxu1 %v16439_v38 }
0x1640   :  { %10187 = vmatpush3.bf16.xpose.msra.mxu0 %v16489_v27 }
0x1641   :  { %10188 = vmatprep.subr.bf16.mxu0 %v16439_v38 }
0x1646   :  { %10169 = vmatpush3.bf16.xpose.msra.mxu1 %v16574_v19 }
0x1647   :  { %10170 = vmatprep.subr.bf16.mxu1 %v16439_v38 }
0x1648   :  { %10189 = vmatpush3.bf16.xpose.msra.mxu0 %v16575_v42 }
0x1649   :  { %10190 = vmatprep.subr.bf16.mxu0 %v16439_v38 }
0x164e   :  { %10171 = vmatpush3.bf16.xpose.msra.mxu1 %v16576_v63 }
0x164f   :  { %10172 = vmatprep.subr.bf16.mxu1 %v16439_v38 }
0x1650   :  { %10191 = vmatpush3.bf16.xpose.msra.mxu0 %v16577_v41 }
0x1651   :  { %10192 = vmatprep.subr.bf16.mxu0 %v16439_v38 }
0x1656   :  { %10173 = vmatpush3.bf16.xpose.msra.mxu1 %v16578_v32 }
0x1657   :  { %10198 = vmatprep.subr.bf16.mxu1 %v16439_v38 }
0x1658   :  { %10193 = vmatpush3.bf16.xpose.msra.mxu0 %v16579_v13 }
0x1659   :  { %10218 = vmatprep.subr.bf16.mxu0 %v16439_v38 }
0x165d   :  { %10175 = vmatmul.mubr.msk.bf16.vlgmr.msra.gmra.mxu1 %vm295_vm2, %v4691_v37  ;;  %v16602_v37 = vld [vmem:[#allocation74_spill] sm:$0xff] }
0x165e   :  { %10199 = vmatpush3.bf16.xpose.msra.mxu1 %v16580_v47  ;;  %10214 = vmatprep.mubr.msk.bf16.mxu1 %vm11686_vm0, %v16439_v38 }
0x165f   :  { %10195 = vmatmul.mubr.msk.bf16.vlgmr.msra.gmra.mxu0 %vm295_vm2, %v4741_v0  ;;  %10200 = vmatprep.subr.bf16.mxu1 %v16439_v38  ;;  %v16603_v0 = vld [vmem:[#allocation75_spill] sm:$0xff] }
0x1660   :  { %10219 = vmatpush3.bf16.xpose.msra.mxu0 %v16581_v62  ;;  %10234 = vmatprep.mubr.msk.bf16.mxu0 %vm11686_vm0, %v16439_v38 }
0x1661   :  { %10220 = vmatprep.subr.bf16.mxu0 %v16439_v38 }
0x1666   :  { %10201 = vmatpush3.bf16.xpose.msra.mxu1 %v16582_v40 }
0x1667   :  { %10202 = vmatprep.subr.bf16.mxu1 %v16439_v38 }
0x1668   :  { %10221 = vmatpush3.bf16.xpose.msra.mxu0 %v16583_v9 }
0x1669   :  { %10222 = vmatprep.subr.bf16.mxu0 %v16439_v38 }
0x166e   :  { %10203 = vmatpush3.bf16.xpose.msra.mxu1 %v16584_v59 }
0x166f   :  { %10204 = vmatprep.subr.bf16.mxu1 %v16439_v38 }
0x1670   :  { %10223 = vmatpush3.bf16.xpose.msra.mxu0 %v16585_v36 }
0x1671   :  { %10224 = vmatprep.subr.bf16.mxu0 %v16439_v38 }
0x1676   :  { %10205 = vmatpush3.bf16.xpose.msra.mxu1 %v16586_v34  ;;  %v16612_v34 = vld [vmem:[#allocation92_spill] sm:$0xff] }
0x1677   :  { %10206 = vmatprep.subr.bf16.mxu1 %v16439_v38 }
0x1678   :  { %10225 = vmatpush3.bf16.xpose.msra.mxu0 %v16587_v54 }
0x1679   :  { %10226 = vmatprep.subr.bf16.mxu0 %v16439_v38 }
0x167e   :  { %10207 = vmatpush3.bf16.xpose.msra.mxu1 %v16588_v14 }
0x167f   :  { %10208 = vmatprep.subr.bf16.mxu1 %v16439_v38 }
0x1680   :  { %10227 = vmatpush3.bf16.xpose.msra.mxu0 %v16589_v17 }
0x1681   :  { %10228 = vmatprep.subr.bf16.mxu0 %v16439_v38 }
0x1686   :  { %10209 = vmatpush3.bf16.xpose.msra.mxu1 %v16590_v57 }
0x1687   :  { %10210 = vmatprep.subr.bf16.mxu1 %v16439_v38 }
0x1688   :  { %10229 = vmatpush3.bf16.xpose.msra.mxu0 %v16591_v43 }
0x1689   :  { %10230 = vmatprep.subr.bf16.mxu0 %v16439_v38 }
0x168e   :  { %10211 = vmatpush3.bf16.xpose.msra.mxu1 %v16592_v35 }
0x168f   :  { %10212 = vmatprep.subr.bf16.mxu1 %v16439_v38 }
0x1690   :  { %10231 = vmatpush3.bf16.xpose.msra.mxu0 %v16593_v52 }
0x1691   :  { %10232 = vmatprep.subr.bf16.mxu0 %v16439_v38 }
0x1696   :  { %10213 = vmatpush3.bf16.xpose.msra.mxu1 %v16594_v51 }
0x1697   :  { %10238 = vmatprep.subr.bf16.mxu1 %v16439_v38 }
0x1698   :  { %10233 = vmatpush3.bf16.xpose.msra.mxu0 %v16595_v49 }
0x1699   :  { %10258 = vmatprep.subr.bf16.mxu0 %v16439_v38 }
0x169d   :  { %10215 = vmatmul.mubr.msk.bf16.vlgmr.msra.gmra.mxu1 %vm295_vm2, %v4791_v48  ;;  %v16604_v48 = vld [vmem:[#allocation78_spill] sm:$0xff] }
0x169e   :  { %10239 = vmatpush3.bf16.xpose.msra.mxu1 %v16596_v45  ;;  %10254 = vmatprep.mubr.msk.bf16.mxu1 %vm11686_vm0, %v16439_v38 }
0x169f   :  { %10235 = vmatmul.mubr.msk.bf16.vlgmr.msra.gmra.mxu0 %vm295_vm2, %v4841_v1  ;;  %10240 = vmatprep.subr.bf16.mxu1 %v16439_v38  ;;  %v16605_v1 = vld [vmem:[#allocation79_spill] sm:$0xff] }
0x16a0   :  { %10259 = vmatpush3.bf16.xpose.msra.mxu0 %v16597_v26  ;;  %10274 = vmatprep.mubr.msk.bf16.mxu0 %vm11686_vm0, %v16439_v38 }
0x16a1   :  { %10260 = vmatprep.subr.bf16.mxu0 %v16439_v38 }
0x16a6   :  { %10241 = vmatpush3.bf16.xpose.msra.mxu1 %v16598_v11 }
0x16a7   :  { %10242 = vmatprep.subr.bf16.mxu1 %v16439_v38 }
0x16a8   :  { %10261 = vmatpush3.bf16.xpose.msra.mxu0 %v16599_v21 }
0x16a9   :  { %10262 = vmatprep.subr.bf16.mxu0 %v16439_v38 }
0x16ae   :  { %10243 = vmatpush3.bf16.xpose.msra.mxu1 %v16600_v39  ;;  %v16606_v39 = vld [vmem:[#allocation82_spill] sm:$0xff] }
0x16af   :  { %10244 = vmatprep.subr.bf16.mxu1 %v16439_v38 }
0x16b0   :  { %10263 = vmatpush3.bf16.xpose.msra.mxu0 %v16601_v58  ;;  %v16607_v58 = vld [vmem:[#allocation83_spill] sm:$0xff] }
0x16b1   :  { %10264 = vmatprep.subr.bf16.mxu0 %v16439_v38 }
0x16b6   :  { %10245 = vmatpush3.bf16.xpose.msra.mxu1 %v16602_v37  ;;  %v16608_v37 = vld [vmem:[#allocation86_spill] sm:$0xff] }
0x16b7   :  { %10246 = vmatprep.subr.bf16.mxu1 %v16439_v38 }
0x16b8   :  { %10265 = vmatpush3.bf16.xpose.msra.mxu0 %v16603_v0  ;;  %v16609_v0 = vld [vmem:[#allocation87_spill] sm:$0xff] }
0x16b9   :  { %10266 = vmatprep.subr.bf16.mxu0 %v16439_v38 }
0x16be   :  { %10247 = vmatpush3.bf16.xpose.msra.mxu1 %v16604_v48  ;;  %v16610_v48 = vld [vmem:[#allocation90_spill] sm:$0xff] }
0x16bf   :  { %10248 = vmatprep.subr.bf16.mxu1 %v16439_v38 }
0x16c0   :  { %10267 = vmatpush3.bf16.xpose.msra.mxu0 %v16605_v1  ;;  %v16611_v1 = vld [vmem:[#allocation91_spill] sm:$0xff] }
0x16c1   :  { %10268 = vmatprep.subr.bf16.mxu0 %v16439_v38 }
0x16c6   :  { %10249 = vmatpush3.bf16.xpose.msra.mxu1 %v16606_v39  ;;  %v4891_v39 = vpop.permute.xlu0 %4890 }
0x16c7   :  { %10250 = vmatprep.subr.bf16.mxu1 %v16439_v38 }
0x16c8   :  { %10269 = vmatpush3.bf16.xpose.msra.mxu0 %v16607_v58 }
0x16c9   :  { %10270 = vmatprep.subr.bf16.mxu0 %v16439_v38 }
0x16ce   :  { %10251 = vmatpush3.bf16.xpose.msra.mxu1 %v16608_v37  ;;  %v4941_v37 = vpop.permute.xlu1 %4940 }
0x16cf   :  { %10252 = vmatprep.subr.bf16.mxu1 %v16439_v38 }
0x16d0   :  { %10271 = vmatpush3.bf16.xpose.msra.mxu0 %v16609_v0  ;;  %v11481_v0 = vld [vmem:[%s16184_s1 + $0x38] sm:$0xff]  }
0x16d1   :  { %10272 = vmatprep.subr.bf16.mxu0 %v16439_v38 }
0x16d6   :  { %10253 = vmatpush3.bf16.xpose.msra.mxu1 %v16610_v48 }
0x16d7   :  { %10278 = vmatprep.subr.bf16.mxu1 %v16439_v38 }
0x16d8   :  { %10273 = vmatpush3.bf16.xpose.msra.mxu0 %v16611_v1 }
0x16d9   :  { %10298 = vmatprep.subr.bf16.mxu0 %v16439_v38 }
0x16dd   :  { %10255 = vmatmul.mubr.msk.bf16.vlgmr.msra.gmra.mxu1 %vm295_vm2, %v4891_v39  ;;  %v14419_v58 = vpop.f32.mrf.mxu1  ;;  %v11482_v39 = vld [vmem:[%s16184_s1 + $0x78] sm:$0xff]  }
0x16de   :  { %10279 = vmatpush3.bf16.msra.mxu1 %v11481_v0  ;;  %10294 = vmatprep.mubr.msk.bf16.mxu1 %vm11686_vm0, %v16439_v38 }
0x16df   :  { %10275 = vmatmul.mubr.msk.bf16.vlgmr.msra.gmra.mxu0 %vm295_vm2, %v4941_v37  ;;  %v10136_v48 = vpop.f32.mrf.mxu1  ;;  %v14427_v1 = vpop.f32.mrf.mxu0  ;;  %10280 = vmatprep.subr.bf16.mxu1 %v16439_v38  ;;  %v11483_v37 = vld [vmem:[%s16184_s1 + $0x30] sm:$0xff]  }
0x16e0   :  { %10299 = vmatpush3.bf16.msra.mxu0 %v11482_v39  ;;  %10314 = vmatprep.mubr.msk.bf16.mxu0 %vm11686_vm0, %v16439_v38  ;;  %v11484_v39 = vld [vmem:[%s16184_s1 + $0x70] sm:$0xff]  }
0x16e1   :  { %v4632_v21 = vpop.f32.mrf.mxu1  ;;  %v10156_v0 = vpop.f32.mrf.mxu0  ;;  %10300 = vmatprep.subr.bf16.mxu0 %v16439_v38 }
0x16e2   :  { %10281 = vmatpush3.bf16.msra.mxu1 %v11483_v37  ;;  %v11485_v21 = vld [vmem:[%s16184_s1 + $0x28] sm:$0xff]   ;;  %v11488_v0 = vld [vmem:[%s16184_s1 + $0x60] sm:$0xff]   ;;  %v11489_v37 = vld [vmem:[%s16184_s1 + $0x18] sm:$0xff]  }
0x16e3   :  { %v10137_v48 = vpop.f32.mrf.mxu1  ;;  %v4682_v11 = vpop.f32.mrf.mxu0  ;;  %10282 = vmatprep.subr.bf16.mxu1 %v16439_v38 }
0x16e4   :  { %10301 = vmatpush3.bf16.msra.mxu0 %v11484_v39  ;;  %v11486_v11 = vld [vmem:[%s16184_s1 + $0x68] sm:$0xff]   ;;  %v11490_v48 = vld [vmem:[%s16184_s1 + $0x58] sm:$0xff]   ;;  %v11491_v39 = vld [vmem:[%s16184_s1 + $0x10] sm:$0xff]  }
0x16e5   :  { %v10157_v26 = vpop.f32.mrf.mxu0  ;;  %10302 = vmatprep.subr.bf16.mxu0 %v16439_v38 }
0x16e6   :  { %10283 = vmatpush3.bf16.msra.mxu1 %v11485_v21  ;;  %v11487_v26 = vld [vmem:[%s16184_s1 + $0x20] sm:$0xff]   ;;  %v11492_v21 = vld [vmem:[%s16184_s1 + $0x50] sm:$0xff]  }
0x16e7   :  { %10284 = vmatprep.subr.bf16.mxu1 %v16439_v38 }
0x16e8   :  { %10303 = vmatpush3.bf16.msra.mxu0 %v11486_v11  ;;  %v11493_v11 = vld [vmem:[%s16184_s1 + $0x8] sm:$0xff]  }
0x16e9   :  { %10304 = vmatprep.subr.bf16.mxu0 %v16439_v38 }
0x16ea   :  { %10285 = vmatpush3.bf16.msra.mxu1 %v11487_v26  ;;  %v11494_v26 = vld [vmem:[%s16184_s1 + $0x48] sm:$0xff]  }
0x16eb   :  { %10286 = vmatprep.subr.bf16.mxu1 %v16439_v38 }
0x16ec   :  { %10305 = vmatpush3.bf16.msra.mxu0 %v11488_v0  ;;  %v11495_v0 = vld [vmem:[%s16184_s1] sm:$0xff]  }
0x16ed   :  { %10306 = vmatprep.subr.bf16.mxu0 %v16439_v38 }
0x16ee   :  { %10287 = vmatpush3.bf16.msra.mxu1 %v11489_v37  ;;  %v11496_v37 = vld [vmem:[%s16184_s1 + $0x40] sm:$0xff]  }
0x16ef   :  { %10288 = vmatprep.subr.bf16.mxu1 %v16439_v38 }
0x16f0   :  { %10307 = vmatpush3.bf16.msra.mxu0 %v11490_v48 }
0x16f1   :  { %10308 = vmatprep.subr.bf16.mxu0 %v16439_v38 }
0x16f2   :  { %10289 = vmatpush3.bf16.msra.mxu1 %v11491_v39 }
0x16f3   :  { %10290 = vmatprep.subr.bf16.mxu1 %v16439_v38 }
0x16f4   :  { %10309 = vmatpush3.bf16.msra.mxu0 %v11492_v21 }
0x16f5   :  { %10310 = vmatprep.subr.bf16.mxu0 %v16439_v38 }
0x16f6   :  { %10291 = vmatpush3.bf16.msra.mxu1 %v11493_v11 }
0x16f7   :  { %10292 = vmatprep.subr.bf16.mxu1 %v16439_v38 }
0x16f8   :  { %10311 = vmatpush3.bf16.msra.mxu0 %v11494_v26 }
0x16f9   :  { %10312 = vmatprep.subr.bf16.mxu0 %v16439_v38 }
0x16fa   :  { %10293 = vmatpush3.bf16.msra.mxu1 %v11495_v0 }
0x16fb   :  { %10318 = vmatprep.subr.bf16.mxu1 %v16439_v38 }
0x16fc   :  { %10313 = vmatpush3.bf16.msra.mxu0 %v11496_v37  ;;  %v4986_v37 = vadd.f32 %v14427_v1, %v16612_v34 }
0x16fd   :  { %10338 = vmatprep.subr.bf16.mxu0 %v16439_v38 }
0x171d   :  { %v4729_v48 = vpop.f32.mrf.mxu1 }
0x171e   :  { %v4987_v36 = vadd.f32 %v4729_v48, %v16612_v34 }
0x171f   :  { %v10176_v39 = vpop.f32.mrf.mxu1  ;;  %v4779_v21 = vpop.f32.mrf.mxu0 }
0x1720   :  { %v5001_v39 = vrot.slane %v4986_v37, 7 }
0x1721   :  { %v4732_v11 = vpop.f32.mrf.mxu1  ;;  %v10196_v26 = vpop.f32.mrf.mxu0 }
0x1722   :  { %v4988_v11 = vadd.f32 %v4779_v21, %v16612_v34  ;;  %v5003_v26 = vrot.slane %v4987_v36, 6 }
0x1723   :  { %v10177_v45 = vpop.f32.mrf.mxu1  ;;  %v4782_v49 = vpop.f32.mrf.mxu0 }
0x1725   :  { %v10197_v51 = vpop.f32.mrf.mxu0 }
0x175d   :  { %v4829_v52 = vpop.f32.mrf.mxu1 }
0x175e   :  { %v4989_v49 = vadd.f32 %v4829_v52, %v16612_v34 }
0x175f   :  { %v10216_v35 = vpop.f32.mrf.mxu1  ;;  %v4879_v0 = vpop.f32.mrf.mxu0 }
0x1760   :  { %v4985_v35 = vadd.f32 %v14419_v58, %v16612_v34 }
0x1761   :  { %v4832_v43 = vpop.f32.mrf.mxu1  ;;  %v10236_v57 = vpop.f32.mrf.mxu0 }
0x1762   :  { %v5002_v43 = vsel %vm1389_vm4, %v5001_v39, %v4985_v35  ;;  %v5005_v57 = vrot.slane %v4988_v11, 5 }
0x1763   :  { %v10217_v17 = vpop.f32.mrf.mxu1  ;;  %v4882_v14 = vpop.f32.mrf.mxu0 }
0x1764   :  { %v4990_v14 = vadd.f32 %v4879_v0, %v16612_v34  ;;  %v5007_v17 = vrot.slane %v4989_v49, 4 }
0x1765   :  { %v10237_v54 = vpop.f32.mrf.mxu0 }
0x1766   :  { %v5004_v54 = vsel %vm1392_vm5, %v5003_v26, %v5002_v43  ;;  %v5009_v45 = vrot.slane %v4990_v14, 3 }
0x1767   :  { %v5006_v51 = vsel %vm1395_vm6, %v5005_v57, %v5004_v54 }
0x1768   :  { %v5008_v48 = vsel %vm1398_vm7, %v5007_v17, %v5006_v51 }
0x1769   :  { %v5010_v0 = vsel %vm1401_vm8, %v5009_v45, %v5008_v48 }
0x179d   :  { %v4929_v1 = vpop.f32.mrf.mxu1 }
0x179e   :  { %v4991_v21 = vadd.f32 %v4929_v1, %v16612_v34 }
0x179f   :  { %v10256_v52 = vpop.f32.mrf.mxu1  ;;  %v4979_v59 = vpop.f32.mrf.mxu0 }
0x17a0   :  { %v5011_v9 = vrot.slane %v4991_v21, 2  ;;  %v4992_v58 = vadd.f32 %v4979_v59, %v16612_v34 }
0x17a1   :  { %v4932_v39 = vpop.f32.mrf.mxu1  ;;  %v10276_v40 = vpop.f32.mrf.mxu0 }
0x17a2   :  { %v5013_v62 = vrot.slane %v4992_v58, 1  ;;  %v5012_v26 = vsel %vm1404_vm9, %v5011_v9, %v5010_v0 }
0x17a3   :  { %v10257_v43 = vpop.f32.mrf.mxu1  ;;  %v4982_v57 = vpop.f32.mrf.mxu0 }
0x17a4   :  { %v5014_v54 = vsel %vm1407_vm10, %v5013_v62, %v5012_v26 }
0x17a5   :  { %5016 = vmax.xlane.f32.xlu0 %v5014_v54  ;;  %v10277_v17 = vpop.f32.mrf.mxu0 }
0x17bb   :  { %5660 = vrot.lane.b32.xlu0 %v14282_v10, %s11689_s26 }
0x182e   :  { %v5017_v51 = vpop.xlane.xlu0 %5016 }
0x182f   :  { %v5019_v1 = vrot.slane %v5017_v51, 1  ;;  %v5020_v52 = vrot.slane %v5017_v51, 2  ;;  %v5021_v59 = vrot.slane %v5017_v51, 3  ;;  %v5022_v39 = vrot.slane %v5017_v51, 4 }
0x1830   :  { %v5023_v40 = vrot.slane %v5017_v51, 5  ;;  %v5024_v34 = vrot.slane %v5017_v51, 6  ;;  %v5025_v45 = vrot.slane %v5017_v51, 7  ;;  %v5034_v48 = vsub.f32 %v4985_v35, %v5017_v51 }
0x1831   :  { %v5035_v47 = vsub.f32 %v4986_v37, %v5019_v1  ;;  %v5036_v9 = vsub.f32 %v4987_v36, %v5020_v52  ;;  %v5037_v0 = vsub.f32 %v4988_v11, %v5021_v59  ;;  %v5038_v43 = vsub.f32 %v4989_v49, %v5022_v39 }
0x1832   :  { %v5039_v57 = vsub.f32 %v4990_v14, %v5023_v40  ;;  %v5040_v62 = vsub.f32 %v4991_v21, %v5024_v34  ;;  %v5042_v26 = vmul.f32 1.442695, %v5034_v48  ;;  %v5041_v32 = vsub.f32 %v4992_v58, %v5025_v45 }
0x1833   :  { %v5044_v54 = vmul.f32 1.442695, %v5035_v47  ;;  %v5046_v17 = vmul.f32 1.442695, %v5036_v9  ;;  %v5048_v13 = vmul.f32 1.442695, %v5037_v0 }
0x1834   :  { %11269 = vpow2.f32 %v5042_v26  ;;  %v5050_v41 = vmul.f32 1.442695, %v5038_v43  ;;  %v5052_v63 = vmul.f32 1.442695, %v5039_v57  ;;  %v5054_v42 = vmul.f32 1.442695, %v5040_v62 }
0x1835   :  { %11271 = vpow2.f32 %v5044_v54  ;;  %v5056_v19 = vmul.f32 1.442695, %v5041_v32 }
0x1836   :  { %11273 = vpow2.f32 %v5046_v17 }
0x1837   :  { %11275 = vpow2.f32 %v5048_v13 }
0x1838   :  { %11277 = vpow2.f32 %v5050_v41 }
0x1839   :  { %11279 = vpow2.f32 %v5052_v63 }
0x183a   :  { %11281 = vpow2.f32 %v5054_v42 }
0x183b   :  { %11283 = vpow2.f32 %v5056_v19 }
0x1841   :  { %v11270_v36 = vpop.eup %11269 }
0x1842   :  { %v11272_v37 = vpop.eup %11271 }
0x1843   :  { %v11274_v34 = vpop.eup %11273  ;;  %v5066_v11 = vrot.slane %v11272_v37, 7 }
0x1844   :  { %v11276_v47 = vpop.eup %11275  ;;  %v5068_v49 = vrot.slane %v11274_v34, 6 }
0x1845   :  { %v11278_v35 = vpop.eup %11277  ;;  %v5067_v14 = vsel %vm1389_vm4, %v5066_v11, %v11270_v36  ;;  %v5070_v21 = vrot.slane %v11276_v47, 5 }
0x1846   :  { %v11280_v58 = vpop.eup %11279  ;;  %v5069_v51 = vsel %vm1392_vm5, %v5068_v49, %v5067_v14  ;;  %v5072_v1 = vrot.slane %v11278_v35, 4 }
0x1847   :  { %v11282_v13 = vpop.eup %11281  ;;  %v5071_v41 = vsel %vm1395_vm6, %v5070_v21, %v5069_v51  ;;  %v5074_v63 = vrot.slane %v11280_v58, 3 }
0x1848   :  { %v11284_v42 = vpop.eup %11283  ;;  %v5073_v19 = vsel %vm1398_vm7, %v5072_v1, %v5071_v41  ;;  %v5076_v32 = vrot.slane %v11282_v13, 2 }
0x1849   :  { %v5075_v52 = vsel %vm1401_vm8, %v5074_v63, %v5073_v19  ;;  %v5078_v59 = vrot.slane %v11284_v42, 1  ;;  %v11504_v19 = vld [vmem:[%s16184_s1 + $0xe0] sm:$0xff]  }
0x184a   :  { %v5077_v39 = vsel %vm1404_vm9, %v5076_v32, %v5075_v52  ;;  %v11505_v32 = vld [vmem:[%s16184_s1 + $0x98] sm:$0xff]  }
0x184b   :  { %v5079_v40 = vsel %vm1407_vm10, %v5078_v59, %v5077_v39  ;;  %v11506_v52 = vld [vmem:[%s16184_s1 + $0xd8] sm:$0xff]   ;;  %v11507_v59 = vld [vmem:[%s16184_s1 + $0x90] sm:$0xff]  }
0x184c   :  { %5081 = vadd.xlane.f32.xlu1 %v5079_v40  ;;  %v11508_v39 = vld [vmem:[%s16184_s1 + $0xd0] sm:$0xff]   ;;  %v11509_v40 = vld [vmem:[%s16184_s1 + $0x88] sm:$0xff]  }
0x18d5   :  { %v5082_v45 = vpop.xlane.xlu1 %5081 }
0x18d6   :  { %11285 = vrcp.f32 %v5082_v45  ;;  %v11510_v45 = vld [vmem:[%s16184_s1 + $0xc8] sm:$0xff]  }
0x18e3   :  { %v11286_v48 = vpop.eup %11285 }
0x18e4   :  { %v5100_v9 = vmul.f32 %v11286_v48, %v11270_v36  ;;  %v5085_v0 = vrot.slane %v11286_v48, 1  ;;  %v5086_v43 = vrot.slane %v11286_v48, 2  ;;  %v5087_v57 = vrot.slane %v11286_v48, 3 }
0x18e5   :  { %v5088_v62 = vrot.slane %v11286_v48, 4  ;;  %v5089_v26 = vrot.slane %v11286_v48, 5  ;;  %v5090_v54 = vrot.slane %v11286_v48, 6  ;;  %v5091_v17 = vrot.slane %v11286_v48, 7  ;;  %v11511_v48 = vld [vmem:[%s16184_s1 + $0x80] sm:$0xff]  }
0x18e6   :  { %v5108_v11 = vpack.c.bf16 %v5100_v9, %v5100_v9  ;;  %5444 = vst [vmem:[%s16185_s8 + $0x3] sm:$0x1] %v5100_v9  ;;  %v5101_v49 = vmul.f32 %v11272_v37, %v5085_v0  ;;  %v14521_v14 = vmul.f32 %v11274_v34, %v5086_v43  ;;  %v14523_v21 = vmul.f32 %v11276_v47, %v5087_v57  ;;  %v11497_v37 = vld [vmem:[%s16184_s1 + $0xb8] sm:$0xff]   ;;  %v11499_v47 = vld [vmem:[%s16184_s1 + $0xb0] sm:$0xff]   ;;  %v11512_v0 = vld [vmem:[%s16184_s1 + $0xc0] sm:$0xff]  }
0x18e7   :  { %v14525_v51 = vmul.f32 %v11278_v35, %v5088_v62  ;;  %v14527_v36 = vmul.f32 %v11280_v58, %v5089_v26  ;;  %v14529_v1 = vmul.f32 %v11282_v13, %v5090_v54  ;;  %v14531_v41 = vmul.f32 %v11284_v42, %v5091_v17  ;;  %v11498_v34 = vld [vmem:[%s16184_s1 + $0xf8] sm:$0xff]   ;;  %v11500_v35 = vld [vmem:[%s16184_s1 + $0xf0] sm:$0xff]   ;;  %v11501_v58 = vld [vmem:[%s16184_s1 + $0xa8] sm:$0xff]  }
0x18e8   :  { %10295 = vmatmul.mubr.bf16.vlgmr.msra.gmra.mxu1 %v5108_v11  ;;  %v5109_v63 = vpack.c.bf16 %v5101_v49, %v5101_v49  ;;  %5445 = vst [vmem:[%s16185_s8 + $0xb] sm:$0x1] %v5101_v49  ;;  %5446 = vst [vmem:[%s16185_s8 + $0x13] sm:$0x1] %v14521_v14  ;;  %v11502_v13 = vld [vmem:[%s16184_s1 + $0xe8] sm:$0xff]   ;;  %v11503_v42 = vld [vmem:[%s16184_s1 + $0xa0] sm:$0xff]   ;;  %v5110_v9 = vpack.c.bf16 %v14521_v14, %v14521_v14  ;;  %v5111_v43 = vpack.c.bf16 %v14523_v21, %v14523_v21 }
0x18e9   :  { %5447 = vst [vmem:[%s16185_s8 + $0x1b] sm:$0x1] %v14523_v21  ;;  %10319 = vmatpush3.bf16.msra.mxu1 %v11497_v37  ;;  %10334 = vmatprep.mubr.msk.bf16.mxu1 %vm11686_vm0, %v16439_v38  ;;  %5448 = vst [vmem:[%s16185_s8 + $0x23] sm:$0x1] %v14525_v51  ;;  %v11513_v57 = vld [vmem:[%s16184_s1 + $0x138] sm:$0xff]   ;;  %v11515_v26 = vld [vmem:[%s16184_s1 + $0x130] sm:$0xff]  }
0x18ea   :  { %5449 = vst [vmem:[%s16185_s8 + $0x2b] sm:$0x1] %v14527_v36  ;;  %5450 = vst [vmem:[%s16185_s8 + $0x33] sm:$0x1] %v14529_v1  ;;  %10315 = vmatmul.mubr.bf16.vlgmr.msra.gmra.mxu0 %v5109_v63  ;;  %10320 = vmatprep.subr.bf16.mxu1 %v16439_v38  ;;  %v11514_v62 = vld [vmem:[%s16184_s1 + $0x178] sm:$0xff]   ;;  %v11516_v54 = vld [vmem:[%s16184_s1 + $0x170] sm:$0xff]  }
0x18eb   :  { %5451 = vst [vmem:[%s16185_s8 + $0x3b] sm:$0x1] %v14531_v41  ;;  %10339 = vmatpush3.bf16.msra.mxu0 %v11498_v34  ;;  %10354 = vmatprep.mubr.msk.bf16.mxu0 %vm11686_vm0, %v16439_v38  ;;  %v11517_v17 = vld [vmem:[%s16184_s1 + $0x128] sm:$0xff]   ;;  %v11519_v49 = vld [vmem:[%s16184_s1 + $0x120] sm:$0xff]   ;;  %v11521_v21 = vld [vmem:[%s16184_s1 + $0x118] sm:$0xff]  }
0x18ec   :  { %10340 = vmatprep.subr.bf16.mxu0 %v16439_v38  ;;  %v11518_v11 = vld [vmem:[%s16184_s1 + $0x168] sm:$0xff]   ;;  %v11520_v14 = vld [vmem:[%s16184_s1 + $0x160] sm:$0xff]   ;;  %v11522_v63 = vld [vmem:[%s16184_s1 + $0x158] sm:$0xff]  }
0x18ed   :  { %10321 = vmatpush3.bf16.msra.mxu1 %v11499_v47  ;;  %v11523_v37 = vld [vmem:[%s16184_s1 + $0x110] sm:$0xff]   ;;  %v11525_v47 = vld [vmem:[%s16184_s1 + $0x108] sm:$0xff]  }
0x18ee   :  { %10322 = vmatprep.subr.bf16.mxu1 %v16439_v38  ;;  %v11524_v34 = vld [vmem:[%s16184_s1 + $0x150] sm:$0xff]  }
0x18ef   :  { %10341 = vmatpush3.bf16.msra.mxu0 %v11500_v35  ;;  %v11526_v35 = vld [vmem:[%s16184_s1 + $0x148] sm:$0xff]  }
0x18f0   :  { %10342 = vmatprep.subr.bf16.mxu0 %v16439_v38 }
0x18f1   :  { %10323 = vmatpush3.bf16.msra.mxu1 %v11501_v58  ;;  %v11527_v58 = vld [vmem:[%s16184_s1 + $0x100] sm:$0xff]  }
0x18f2   :  { %10324 = vmatprep.subr.bf16.mxu1 %v16439_v38 }
0x18f3   :  { %10343 = vmatpush3.bf16.msra.mxu0 %v11502_v13  ;;  %v5112_v13 = vpack.c.bf16 %v14525_v51, %v14525_v51  ;;  %v11530_v51 = vld [vmem:[%s16184_s1 + $0x1f8] sm:$0xff]  }
0x18f4   :  { %10344 = vmatprep.subr.bf16.mxu0 %v16439_v38 }
0x18f5   :  { %10325 = vmatpush3.bf16.msra.mxu1 %v11503_v42  ;;  %v11528_v42 = vld [vmem:[%s16184_s1 + $0x140] sm:$0xff]  }
0x18f6   :  { %10326 = vmatprep.subr.bf16.mxu1 %v16439_v38 }
0x18f7   :  { %10345 = vmatpush3.bf16.msra.mxu0 %v11504_v19  ;;  %v5113_v19 = vpack.c.bf16 %v14527_v36, %v14527_v36  ;;  %v11531_v36 = vld [vmem:[%s16184_s1 + $0x1b0] sm:$0xff]  }
0x18f8   :  { %10346 = vmatprep.subr.bf16.mxu0 %v16439_v38 }
0x18f9   :  { %10327 = vmatpush3.bf16.msra.mxu1 %v11505_v32  ;;  %v11529_v32 = vld [vmem:[%s16184_s1 + $0x1b8] sm:$0xff]  }
0x18fa   :  { %10328 = vmatprep.subr.bf16.mxu1 %v16439_v38 }
0x18fb   :  { %10347 = vmatpush3.bf16.msra.mxu0 %v11506_v52  ;;  %v11532_v52 = vld [vmem:[%s16184_s1 + $0x1f0] sm:$0xff]  }
0x18fc   :  { %10348 = vmatprep.subr.bf16.mxu0 %v16439_v38 }
0x18fd   :  { %10329 = vmatpush3.bf16.msra.mxu1 %v11507_v59  ;;  %v11533_v59 = vld [vmem:[%s16184_s1 + $0x1a8] sm:$0xff]  }
0x18fe   :  { %10330 = vmatprep.subr.bf16.mxu1 %v16439_v38 }
0x18ff   :  { %10349 = vmatpush3.bf16.msra.mxu0 %v11508_v39  ;;  %v11534_v39 = vld [vmem:[%s16184_s1 + $0x1e8] sm:$0xff]  }
0x1900   :  { %10350 = vmatprep.subr.bf16.mxu0 %v16439_v38 }
0x1901   :  { %10331 = vmatpush3.bf16.msra.mxu1 %v11509_v40  ;;  %v11535_v40 = vld [vmem:[%s16184_s1 + $0x1a0] sm:$0xff]  }
0x1902   :  { %10332 = vmatprep.subr.bf16.mxu1 %v16439_v38 }
0x1903   :  { %10351 = vmatpush3.bf16.msra.mxu0 %v11510_v45  ;;  %v11536_v45 = vld [vmem:[%s16184_s1 + $0x1e0] sm:$0xff]  }
0x1904   :  { %10352 = vmatprep.subr.bf16.mxu0 %v16439_v38 }
0x1905   :  { %10333 = vmatpush3.bf16.msra.mxu1 %v11511_v48  ;;  %v11537_v48 = vld [vmem:[%s16184_s1 + $0x198] sm:$0xff]  }
0x1906   :  { %10358 = vmatprep.subr.bf16.mxu1 %v16439_v38 }
0x1907   :  { %10353 = vmatpush3.bf16.msra.mxu0 %v11512_v0  ;;  %v11539_v0 = vld [vmem:[%s16184_s1 + $0x190] sm:$0xff]  }
0x1908   :  { %10335 = vmatmul.mubr.bf16.vlgmr.msra.gmra.mxu1 %v5110_v9  ;;  %10378 = vmatprep.subr.bf16.mxu0 %v16439_v38  ;;  %v11538_v9 = vld [vmem:[%s16184_s1 + $0x1d8] sm:$0xff]  }
0x1909   :  { %10359 = vmatpush3.bf16.msra.mxu1 %v11513_v57  ;;  %10374 = vmatprep.mubr.msk.bf16.mxu1 %vm11686_vm0, %v16439_v38  ;;  %v11541_v57 = vld [vmem:[%s16184_s1 + $0x188] sm:$0xff]  }
0x190a   :  { %10355 = vmatmul.mubr.bf16.vlgmr.msra.gmra.mxu0 %v5111_v43  ;;  %10360 = vmatprep.subr.bf16.mxu1 %v16439_v38  ;;  %v11540_v43 = vld [vmem:[%s16184_s1 + $0x1d0] sm:$0xff]  }
0x190b   :  { %10379 = vmatpush3.bf16.msra.mxu0 %v11514_v62  ;;  %10394 = vmatprep.mubr.msk.bf16.mxu0 %vm11686_vm0, %v16439_v38  ;;  %v11542_v62 = vld [vmem:[%s16184_s1 + $0x1c8] sm:$0xff]  }
0x190c   :  { %10380 = vmatprep.subr.bf16.mxu0 %v16439_v38 }
0x190d   :  { %10361 = vmatpush3.bf16.msra.mxu1 %v11515_v26  ;;  %v11543_v26 = vld [vmem:[%s16184_s1 + $0x180] sm:$0xff]  }
0x190e   :  { %10362 = vmatprep.subr.bf16.mxu1 %v16439_v38 }
0x190f   :  { %10381 = vmatpush3.bf16.msra.mxu0 %v11516_v54  ;;  %v5114_v54 = vpack.c.bf16 %v14529_v1, %v14529_v1  ;;  %v11546_v1 = vld [vmem:[%s16180_s5 + $0x8] sm:$0xff]  }
0x1910   :  { %10382 = vmatprep.subr.bf16.mxu0 %v16439_v38 }
0x1911   :  { %10363 = vmatpush3.bf16.msra.mxu1 %v11517_v17  ;;  %v11544_v17 = vld [vmem:[%s16184_s1 + $0x1c0] sm:$0xff]  }
0x1912   :  { %10364 = vmatprep.subr.bf16.mxu1 %v16439_v38 }
0x1913   :  { %10383 = vmatpush3.bf16.msra.mxu0 %v11518_v11  ;;  %v5115_v11 = vpack.c.bf16 %v14531_v41, %v14531_v41  ;;  %v11547_v41 = vld [vmem:[%s16177_s4] sm:$0xff]  }
0x1914   :  { %10384 = vmatprep.subr.bf16.mxu0 %v16439_v38 }
0x1915   :  { %10365 = vmatpush3.bf16.msra.mxu1 %v11519_v49  ;;  %v11545_v49 = vld [vmem:[%s16177_s4 + $0x8] sm:$0xff]  }
0x1916   :  { %10366 = vmatprep.subr.bf16.mxu1 %v16439_v38 }
0x1917   :  { %10385 = vmatpush3.bf16.msra.mxu0 %v11520_v14  ;;  %v11548_v14 = vld [vmem:[%s16180_s5] sm:$0xff]  }
0x1918   :  { %10386 = vmatprep.subr.bf16.mxu0 %v16439_v38 }
0x1919   :  { %10367 = vmatpush3.bf16.msra.mxu1 %v11521_v21  ;;  %v5661_v21 = vpop.permute.xlu0 %5660 }
0x191a   :  { %10368 = vmatprep.subr.bf16.mxu1 %v16439_v38 }
0x191b   :  { %10387 = vmatpush3.bf16.msra.mxu0 %v11522_v63 }
0x191c   :  { %10388 = vmatprep.subr.bf16.mxu0 %v16439_v38 }
0x191d   :  { %10369 = vmatpush3.bf16.msra.mxu1 %v11523_v37 }
0x191e   :  { %10370 = vmatprep.subr.bf16.mxu1 %v16439_v38 }
0x191f   :  { %10389 = vmatpush3.bf16.msra.mxu0 %v11524_v34 }
0x1920   :  { %10390 = vmatprep.subr.bf16.mxu0 %v16439_v38 }
0x1921   :  { %10371 = vmatpush3.bf16.msra.mxu1 %v11525_v47 }
0x1922   :  { %10372 = vmatprep.subr.bf16.mxu1 %v16439_v38 }
0x1923   :  { %10391 = vmatpush3.bf16.msra.mxu0 %v11526_v35 }
0x1924   :  { %10392 = vmatprep.subr.bf16.mxu0 %v16439_v38 }
0x1925   :  { %10373 = vmatpush3.bf16.msra.mxu1 %v11527_v58 }
0x1926   :  { %10398 = vmatprep.subr.bf16.mxu1 %v16439_v38 }
0x1927   :  { %10393 = vmatpush3.bf16.msra.mxu0 %v11528_v42 }
0x1928   :  { %10375 = vmatmul.mubr.bf16.vlgmr.msra.gmra.mxu1 %v5112_v13  ;;  %10418 = vmatprep.subr.bf16.mxu0 %v16439_v38 }
0x1929   :  { %10399 = vmatpush3.bf16.msra.mxu1 %v11529_v32  ;;  %10414 = vmatprep.mubr.msk.bf16.mxu1 %vm11686_vm0, %v16439_v38 }
0x192a   :  { %10395 = vmatmul.mubr.bf16.vlgmr.msra.gmra.mxu0 %v5113_v19  ;;  %10400 = vmatprep.subr.bf16.mxu1 %v16439_v38 }
0x192b   :  { %10419 = vmatpush3.bf16.msra.mxu0 %v11530_v51  ;;  %10434 = vmatprep.mubr.msk.bf16.mxu0 %vm11686_vm0, %v16439_v38 }
0x192c   :  { %10420 = vmatprep.subr.bf16.mxu0 %v16439_v38 }
0x192d   :  { %10401 = vmatpush3.bf16.msra.mxu1 %v11531_v36 }
0x192e   :  { %10402 = vmatprep.subr.bf16.mxu1 %v16439_v38 }
0x192f   :  { %10421 = vmatpush3.bf16.msra.mxu0 %v11532_v52 }
0x1930   :  { %10422 = vmatprep.subr.bf16.mxu0 %v16439_v38 }
0x1931   :  { %10403 = vmatpush3.bf16.msra.mxu1 %v11533_v59 }
0x1932   :  { %10404 = vmatprep.subr.bf16.mxu1 %v16439_v38 }
0x1933   :  { %10423 = vmatpush3.bf16.msra.mxu0 %v11534_v39 }
0x1934   :  { %10424 = vmatprep.subr.bf16.mxu0 %v16439_v38 }
0x1935   :  { %10405 = vmatpush3.bf16.msra.mxu1 %v11535_v40 }
0x1936   :  { %10406 = vmatprep.subr.bf16.mxu1 %v16439_v38 }
0x1937   :  { %10425 = vmatpush3.bf16.msra.mxu0 %v11536_v45 }
0x1938   :  { %10426 = vmatprep.subr.bf16.mxu0 %v16439_v38 }
0x1939   :  { %10407 = vmatpush3.bf16.msra.mxu1 %v11537_v48 }
0x193a   :  { %10408 = vmatprep.subr.bf16.mxu1 %v16439_v38 }
0x193b   :  { %10427 = vmatpush3.bf16.msra.mxu0 %v11538_v9 }
0x193c   :  { %10428 = vmatprep.subr.bf16.mxu0 %v16439_v38 }
0x193d   :  { %10409 = vmatpush3.bf16.msra.mxu1 %v11539_v0 }
0x193e   :  { %10410 = vmatprep.subr.bf16.mxu1 %v16439_v38 }
0x193f   :  { %10429 = vmatpush3.bf16.msra.mxu0 %v11540_v43 }
0x1940   :  { %10430 = vmatprep.subr.bf16.mxu0 %v16439_v38 }
0x1941   :  { %10411 = vmatpush3.bf16.msra.mxu1 %v11541_v57 }
0x1942   :  { %10412 = vmatprep.subr.bf16.mxu1 %v16439_v38 }
0x1943   :  { %10431 = vmatpush3.bf16.msra.mxu0 %v11542_v62 }
0x1944   :  { %10432 = vmatprep.subr.bf16.mxu0 %v16439_v38 }
0x1945   :  { %10413 = vmatpush3.bf16.msra.mxu1 %v11543_v26 }
0x1946   :  { %10438 = vmatprep.subr.bf16.mxu1 %v16439_v38 }
0x1947   :  { %10433 = vmatpush3.bf16.msra.mxu0 %v11544_v17 }
0x1948   :  { %10415 = vmatmul.mubr.bf16.vlgmr.msra.gmra.mxu1 %v5114_v54  ;;  %10446 = vmatprep.subr.bf16.mxu0 %v16439_v38 }
0x1949   :  { %10439 = vmatpush3.bf16.msra.mxu1 %v11545_v49  ;;  %10442 = vmatprep.mubr.msk.bf16.mxu1 %vm11686_vm0, %v16439_v38 }
0x194a   :  { %10435 = vmatmul.mubr.bf16.vlgmr.msra.gmra.mxu0 %v5115_v11  ;;  %10440 = vmatprep.subr.bf16.mxu1 %v16439_v38 }
0x194b   :  { %10447 = vmatpush3.bf16.msra.mxu0 %v11546_v1  ;;  %10450 = vmatprep.mubr.msk.bf16.mxu0 %vm11686_vm0, %v16439_v38 }
0x194c   :  { %10448 = vmatprep.subr.bf16.mxu0 %v16439_v38 }
0x194d   :  { %10441 = vmatpush3.bf16.msra.mxu1 %v11547_v41 }
0x194e   :  { %10454 = vmatprep.subr.bf16.mxu1 %v16439_v38 }
0x194f   :  { %10449 = vmatpush3.bf16.msra.mxu0 %v11548_v14 }
0x1950   :  { %10474 = vmatprep.subr.bf16.mxu0 %v16439_v38 }
0x1952   :  { %10451 = vmatmul.mubr.msk.bf16.vlgmr.msra.gmra.mxu0 %vm295_vm2, %v5661_v21 }
0x1953   :  { %10475 = vmatpush3.bf16.xpose.msra.mxu0 %v16469_v29  ;;  %10490 = vmatprep.mubr.msk.bf16.mxu0 %vm11686_vm0, %v16439_v38 }
0x1954   :  { %10476 = vmatprep.subr.bf16.mxu0 %v16439_v38 }
0x195b   :  { %10477 = vmatpush3.bf16.xpose.msra.mxu0 %v16470_v6 }
0x195c   :  { %10478 = vmatprep.subr.bf16.mxu0 %v16439_v38 }
0x1963   :  { %10479 = vmatpush3.bf16.xpose.msra.mxu0 %v16471_v4 }
0x1964   :  { %10480 = vmatprep.subr.bf16.mxu0 %v16439_v38 }
0x196b   :  { %10481 = vmatpush3.bf16.xpose.msra.mxu0 %v16472_v55 }
0x196c   :  { %10482 = vmatprep.subr.bf16.mxu0 %v16439_v38 }
0x1973   :  { %10483 = vmatpush3.bf16.xpose.msra.mxu0 %v16473_v44 }
0x1974   :  { %10484 = vmatprep.subr.bf16.mxu0 %v16439_v38 }
0x197b   :  { %10485 = vmatpush3.bf16.xpose.msra.mxu0 %v16474_v61 }
0x197c   :  { %10486 = vmatprep.subr.bf16.mxu0 %v16439_v38 }
0x1983   :  { %10487 = vmatpush3.bf16.xpose.msra.mxu0 %v16475_v5 }
0x1984   :  { %10488 = vmatprep.subr.bf16.mxu0 %v16439_v38 }
0x198b   :  { %10489 = vmatpush3.bf16.xpose.msra.mxu0 %v16476_v46 }
0x198c   :  { %10514 = vmatprep.subr.bf16.mxu0 %v16439_v38 }
0x19a8   :  { %v5150_v63 = vpop.f32.mrf.mxu1 }
0x19a9   :  { %v5436_v47 = vpack.c.bf16 %v5150_v63, %v5150_v63 }
0x19aa   :  { %v10296_v37 = vpop.f32.mrf.mxu1  ;;  %v5190_v34 = vpop.f32.mrf.mxu0 }
0x19ab   :  { %v5437_v35 = vpack.c.bf16 %v5190_v34, %v5190_v34  ;;  %v5460_v51 = vunpack.c.l.b16 %v5436_v47 }
0x19ac   :  { %v5153_v58 = vpop.f32.mrf.mxu1  ;;  %v10316_v13 = vpop.f32.mrf.mxu0 }
0x19ad   :  { %v5461_v42 = vunpack.c.l.b16 %v5437_v35 }
0x19ae   :  { %v10297_v19 = vpop.f32.mrf.mxu1  ;;  %v5193_v32 = vpop.f32.mrf.mxu0 }
0x19af   :  { %v5468_v36 = vrot.slane %v5461_v42, 7 }
0x19b0   :  { %v10317_v52 = vpop.f32.mrf.mxu0 }
0x19b1   :  { %v5469_v59 = vsel %vm1389_vm4, %v5468_v36, %v5460_v51 }
0x19c8   :  { %v5230_v39 = vpop.f32.mrf.mxu1 }
0x19c9   :  { %v5438_v14 = vpack.c.bf16 %v5230_v39, %v5230_v39 }
0x19ca   :  { %v10336_v40 = vpop.f32.mrf.mxu1  ;;  %v5270_v45 = vpop.f32.mrf.mxu0 }
0x19cb   :  { %v5439_v21 = vpack.c.bf16 %v5270_v45, %v5270_v45  ;;  %v5462_v63 = vunpack.c.l.b16 %v5438_v14 }
0x19cc   :  { %v5233_v48 = vpop.f32.mrf.mxu1  ;;  %v10356_v9 = vpop.f32.mrf.mxu0 }
0x19cd   :  { %v5463_v34 = vunpack.c.l.b16 %v5439_v21  ;;  %v5470_v35 = vrot.slane %v5462_v63, 6  ;;  %v11549_v63 = vld [vmem:[%s16183_s7] ss:$0 sm:$0xff] }
0x19ce   :  { %v10337_v0 = vpop.f32.mrf.mxu1  ;;  %v5273_v43 = vpop.f32.mrf.mxu0 }
0x19cf   :  { %v5472_v13 = vrot.slane %v5463_v34, 5  ;;  %v5471_v19 = vsel %vm1392_vm5, %v5470_v35, %v5469_v59 }
0x19d0   :  { %v10357_v57 = vpop.f32.mrf.mxu0 }
0x19d1   :  { %v5473_v52 = vsel %vm1395_vm6, %v5472_v13, %v5471_v19 }
0x19e8   :  { %v5310_v62 = vpop.f32.mrf.mxu1 }
0x19e9   :  { %v5440_v37 = vpack.c.bf16 %v5310_v62, %v5310_v62 }
0x19ea   :  { %v10376_v26 = vpop.f32.mrf.mxu1  ;;  %v5350_v54 = vpop.f32.mrf.mxu0 }
0x19eb   :  { %v5441_v47 = vpack.c.bf16 %v5350_v54, %v5350_v54  ;;  %v5464_v58 = vunpack.c.l.b16 %v5440_v37 }
0x19ec   :  { %v5313_v17 = vpop.f32.mrf.mxu1  ;;  %v10396_v11 = vpop.f32.mrf.mxu0 }
0x19ed   :  { %v5465_v42 = vunpack.c.l.b16 %v5441_v47  ;;  %v5474_v32 = vrot.slane %v5464_v58, 4 }
0x19ee   :  { %v10377_v49 = vpop.f32.mrf.mxu1  ;;  %v5353_v1 = vpop.f32.mrf.mxu0 }
0x19ef   :  { %v5476_v40 = vrot.slane %v5465_v42, 3  ;;  %v5475_v39 = vsel %vm1398_vm7, %v5474_v32, %v5473_v52 }
0x19f0   :  { %v10397_v41 = vpop.f32.mrf.mxu0 }
0x19f1   :  { %v5477_v54 = vsel %vm1401_vm8, %v5476_v40, %v5475_v39  ;;  %v11550_v39 = vld [vmem:[%s16182_s6] ss:$0 sm:$0xff] }
0x1a08   :  { %v5390_v51 = vpop.f32.mrf.mxu1 }
0x1a09   :  { %v5442_v36 = vpack.c.bf16 %v5390_v51, %v5390_v51 }
0x1a0a   :  { %v10416_v48 = vpop.f32.mrf.mxu1  ;;  %v5430_v9 = vpop.f32.mrf.mxu0 }
0x1a0b   :  { %v5466_v45 = vunpack.c.l.b16 %v5442_v36  ;;  %v5443_v0 = vpack.c.bf16 %v5430_v9, %v5430_v9 }
0x1a0c   :  { %v5393_v43 = vpop.f32.mrf.mxu1  ;;  %v10436_v57 = vpop.f32.mrf.mxu0 }
0x1a0d   :  { %v5478_v62 = vrot.slane %v5466_v45, 2  ;;  %v5467_v26 = vunpack.c.l.b16 %v5443_v0 }
0x1a0e   :  { %v10417_v17 = vpop.f32.mrf.mxu1  ;;  %v5433_v59 = vpop.f32.mrf.mxu0 }
0x1a0f   :  { %v5479_v11 = vsel %vm1404_vm9, %v5478_v62, %v5477_v54  ;;  %v5480_v49 = vrot.slane %v5467_v26, 1  ;;  %v5593_v17 = vld [vmem:[%s16186_s9] sm:$0x2] }
0x1a10   :  { %v10437_v1 = vpop.f32.mrf.mxu0 }
0x1a11   :  { %v5481_v41 = vsel %vm1407_vm10, %v5480_v49, %v5479_v11 }
0x1a12   :  { %v5482_v14 = vpack.c.b16 %v5481_v41, %v5481_v41  ;;  %v5699_v21 = vpop.f32.mrf.mxu0 }
0x1a13   :  { %v14825_v37 = vadd.f32 %v11549_v63, %v5699_v21 }
0x1a14   :  { %v5485_v34 = vsel %vm295_vm2, %v5482_v14, %v14282_v10  ;;  %10443 = vmatmul.mubr.msk.bf16.vlgmr.msra.gmra.mxu1 %vm295_vm2, %v5482_v14  ;;  %v10452_v47 = vpop.f32.mrf.mxu0 }
0x1a15   :  { %v5493_v35 = vrot.slane %v5485_v34, %v16465_v50  ;;  %5713 = vrot.lane.b32.xlu1 %v14825_v37, %s11688_s25  ;;  %10455 = vmatpush3.bf16.xpose.msra.mxu1 %v16456_v15  ;;  %v5596_v34 = vld [vmem:[%s16186_s9 + $0x4] sm:$0x2]  ;;  %v5599_v47 = vld [vmem:[%s16186_s9 + $0x8] sm:$0x2] }
0x1a16   :  { %v5702_v58 = vpop.f32.mrf.mxu0  ;;  %10456 = vmatprep.subr.bf16.mxu1 %v16439_v38  ;;  %10470 = vmatprep.mubr.msk.bf16.mxu1 %vm11686_vm0, %v16439_v38 }
0x1a17   :  { %v5494_v13 = vcombine.high %v5493_v35, %v5493_v35  ;;  %v5501_v42 = vrot.slane %v5493_v35, %v16465_v50  ;;  %v5605_v35 = vld [vmem:[%s16186_s9 + $0x10] sm:$0x2] }
0x1a18   :  { %v10453_v10 = vpop.f32.mrf.mxu0 }
0x1a19   :  { %v5508_v19 = vrot.slane %v5494_v13, %v16465_v50  ;;  %v5509_v32 = vcombine.high %v5501_v42, %v5501_v42  ;;  %v5512_v51 = vunpack.i.h.s16 %v5501_v42  ;;  %v8134_v36 = vpack.i.b16 %v5501_v42, %v5501_v42  ;;  %v5602_v42 = vld [vmem:[%s16186_s9 + $0xc] sm:$0x2] }
0x1a1b   :  { %v5510_v52 = vcombine.high %v5508_v19, %v5508_v19  ;;  %v5514_v40 = vunpack.i.h.s16 %v5508_v19  ;;  %v5516_v48 = vunpack.i.h.s16 %v5509_v32  ;;  %v5520_v9 = vpack.i.b16 %v5512_v51, %v5512_v51 }
0x1a1c   :  { %v8135_v45 = vpack.i.b16 %v5508_v19, %v5508_v19  ;;  %v8136_v0 = vpack.i.b16 %v5509_v32, %v5509_v32  ;;  %v5533_v43 = vrot.slane %v8134_v36, %v12844_v53  ;;  %v5608_v19 = vld [vmem:[%s16186_s9 + $0x14] sm:$0x2]  ;;  %v5611_v32 = vld [vmem:[%s16186_s9 + $0x18] sm:$0x2] }
0x1a1d   :  { %v5518_v57 = vunpack.i.h.s16 %v5510_v52  ;;  %v5522_v62 = vpack.i.b16 %v5514_v40, %v5514_v40  ;;  %v5524_v26 = vpack.i.b16 %v5516_v48, %v5516_v48  ;;  %v8137_v54 = vpack.i.b16 %v5510_v52, %v5510_v52  ;;  %10457 = vmatpush3.bf16.xpose.msra.mxu1 %v16457_v22  ;;  %v5614_v48 = vld [vmem:[%s16186_s9 + $0x1c] sm:$0x2] }
0x1a1e   :  { %v5540_v59 = vrot.slane %v5520_v9, %v12844_v53  ;;  %v5547_v11 = vrot.slane %v8135_v45, %v12844_v53  ;;  %v5561_v49 = vrot.slane %v8136_v0, %v12844_v53  ;;  %v5594_v1 = vsel %vm14840_vm13, %v5533_v43, %v5593_v17  ;;  %10458 = vmatprep.subr.bf16.mxu1 %v16439_v38  ;;  %v16615_v45 = vld [vmem:[#allocation40_spill] sm:$0xff] }
0x1a1f   :  { %v5526_v41 = vpack.i.b16 %v5518_v57, %v5518_v57  ;;  %v5554_v14 = vrot.slane %v5522_v62, %v12844_v53  ;;  %v5568_v21 = vrot.slane %v5524_v26, %v12844_v53  ;;  %v5575_v63 = vrot.slane %v8137_v54, %v12844_v53  ;;  %5595 = vst [vmem:[%s16186_s9] sm:$0x2] %v5594_v1 }
0x1a20   :  { %v5597_v58 = vsel %vm14840_vm13, %v5540_v59, %v5596_v34  ;;  %v5600_v13 = vsel %vm14840_vm13, %v5547_v11, %v5599_v47  ;;  %v5606_v10 = vsel %vm14840_vm13, %v5561_v49, %v5605_v35  ;;  %v129_v0 = vadd.f32 %v11550_v39, %v16615_v45 }
0x1a21   :  { %v5582_v51 = vrot.slane %v5526_v41, %v12844_v53  ;;  %5598 = vst [vmem:[%s16186_s9 + $0x4] sm:$0x2] %v5597_v58  ;;  %5601 = vst [vmem:[%s16186_s9 + $0x8] sm:$0x2] %v5600_v13  ;;  %v5603_v36 = vsel %vm14840_vm13, %v5554_v14, %v5602_v42  ;;  %v5609_v52 = vsel %vm14840_vm13, %v5568_v21, %v5608_v19 }
0x1a22   :  { %5607 = vst [vmem:[%s16186_s9 + $0x10] sm:$0x2] %v5606_v10  ;;  %v5612_v40 = vsel %vm14840_vm13, %v5575_v63, %v5611_v32  ;;  %5604 = vst [vmem:[%s16186_s9 + $0xc] sm:$0x2] %v5603_v36 }
0x1a23   :  { %5610 = vst [vmem:[%s16186_s9 + $0x14] sm:$0x2] %v5609_v52  ;;  %5613 = vst [vmem:[%s16186_s9 + $0x18] sm:$0x2] %v5612_v40  ;;  %v5615_v9 = vsel %vm14840_vm13, %v5582_v51, %v5614_v48 }
0x1a24   :  { %5616 = vst [vmem:[%s16186_s9 + $0x1c] sm:$0x2] %v5615_v9 }
0x1a25   :  { %10459 = vmatpush3.bf16.xpose.msra.mxu1 %v16458_v24 }
0x1a26   :  { %10460 = vmatprep.subr.bf16.mxu1 %v16439_v38 }
0x1a2d   :  { %10461 = vmatpush3.bf16.xpose.msra.mxu1 %v16459_v30 }
0x1a2e   :  { %10462 = vmatprep.subr.bf16.mxu1 %v16439_v38 }
0x1a35   :  { %10463 = vmatpush3.bf16.xpose.msra.mxu1 %v16460_v18 }
0x1a36   :  { %10464 = vmatprep.subr.bf16.mxu1 %v16439_v38 }
0x1a3d   :  { %10465 = vmatpush3.bf16.xpose.msra.mxu1 %v16461_v28 }
0x1a3e   :  { %10466 = vmatprep.subr.bf16.mxu1 %v16439_v38 }
0x1a45   :  { %10467 = vmatpush3.bf16.xpose.msra.mxu1 %v16462_v12 }
0x1a46   :  { %10468 = vmatprep.subr.bf16.mxu1 %v16439_v38 }
0x1a4d   :  { %10469 = vmatpush3.bf16.xpose.msra.mxu1 %v16463_v33 }
0x1a4e   :  { %10494 = vmatprep.subr.bf16.mxu1 %v16439_v38 }
0x1a87   :  { %v5714_v41 = vpop.permute.xlu1 %5713 }
0x1ad4   :  { %v5653_v43 = vpop.f32.mrf.mxu1 }
0x1ad5   :  { %v5659_v57 = vadd.f32 %v5653_v43, %v129_v0 }
0x1ad6   :  { %v10444_v62 = vpop.f32.mrf.mxu1 }
0x1ad7   :  { %v5705_v26 = vadd.f32 %v14825_v37, %v5659_v57 }
0x1ad8   :  { %v5656_v54 = vpop.f32.mrf.mxu1 }
0x1ad9   :  { %v8140_v17 = vmul.f32 -1.442695, %v5705_v26 }
0x1ada   :  { %v10445_v59 = vpop.f32.mrf.mxu1 }
0x1adb   :  { %11287 = vpow2.f32 %v8140_v17 }
0x1ae8   :  { %v11288_v11 = vpop.eup %11287 }
0x1ae9   :  { %v5709_v49 = vadd.f32 1.0, %v11288_v11 }
0x1aeb   :  { %11289 = vrcp.f32 %v5709_v49 }
0x1af8   :  { %v11290_v1 = vpop.eup %11289 }
0x1af9   :  { %v5716_v14 = vmul.f32 %v11290_v1, %v5714_v41  ;;  %v5723_v47 = vsub.f32 1.0, %v11290_v1  ;;  %v5729_v35 = vmul.f32 %v11290_v1, %v14278_v31 }
0x1afb   :  { %5718 = vrot.lane.b32.xlu0 %v5716_v14, %s11688_s25 }
0x1b6d   :  { %v5719_v21 = vpop.permute.xlu0 %5718 }
0x1b6e   :  { %v5721_v63 = vadd.f32 %v5719_v21, %v5659_v57 }
0x1b70   :  { %11291 = vtanh.f32 %v5721_v63 }
0x1b7d   :  { %v11292_v34 = vpop.eup %11291 }
0x1b7e   :  { %5725 = vrot.lane.b32.xlu1 %v11292_v34, %s11689_s26 }
0x1bf0   :  { %v5726_v37 = vpop.permute.xlu1 %5725 }
0x1bf1   :  { %v5728_v58 = vmul.f32 %v5726_v37, %v5723_v47  ;;  %v16616_v47 = vld [vmem:[#allocation34_spill] sm:$0xff]  ;;  %v16617_v37 = vld [vmem:[#allocation35_spill] sm:$0xff] }
0x1bf3   :  { %v14938_v13 = vadd.f32 %v5729_v35, %v5728_v58  ;;  %v16618_v35 = vld [vmem:[#allocation37_spill] sm:$0xff]  ;;  %v16619_v58 = vld [vmem:[#allocation39_spill] sm:$0xff] }
0x1bf5   :  { %v14942_v42 = vpack.c.bf16 %v14938_v13, %v14938_v13 }
0x1bf7   :  { %v5739_v10 = vrot.slane %v14942_v42, %v16465_v50 }
0x1bf9   :  { %v5740_v19 = vcombine.high %v5739_v10, %v5739_v10  ;;  %v5747_v32 = vrot.slane %v5739_v10, %v16465_v50  ;;  %v16620_v10 = vld [vmem:[#allocation41_spill] sm:$0xff] }
0x1bfb   :  { %v8141_v51 = vpack.i.b16 %v5747_v32, %v5747_v32  ;;  %v5758_v36 = vunpack.i.h.s16 %v5747_v32  ;;  %v5754_v52 = vrot.slane %v5740_v19, %v16465_v50  ;;  %v5755_v40 = vcombine.high %v5747_v32, %v5747_v32  ;;  %v16621_v19 = vld [vmem:[#allocation43_spill] sm:$0xff] }
0x1bfd   :  { %v5769_v31 = vrot.slane %v8141_v51, %v16479_v2  ;;  %v5815_v48 = vpack.i.b16 %v5758_v36, %v5758_v36  ;;  %v8144_v9 = vpack.i.b16 %v5754_v52, %v5754_v52  ;;  %v5760_v39 = vunpack.i.h.s16 %v5754_v52  ;;  %v16622_v36 = vld [vmem:[#allocation44_spill] sm:$0xff] }
0x1bfe   :  { %v5762_v43 = vunpack.i.h.s16 %v5755_v40  ;;  %v5756_v57 = vcombine.high %v5754_v52, %v5754_v52  ;;  %v8147_v26 = vpack.i.b16 %v5755_v40, %v5755_v40  ;;  %v16623_v52 = vld [vmem:[#allocation45_spill] sm:$0xff]  ;;  %v16624_v40 = vld [vmem:[#allocation46_spill] sm:$0xff] }
0x1bff   :  { %5770 = vrot.lane.b32.xlu0 %v5769_v31, %s11689_s26  ;;  %v5819_v45 = vrot.slane %v5815_v48, %v16479_v2  ;;  %v5915_v0 = vpack.i.b16 %v5760_v39, %v5760_v39  ;;  %v5869_v62 = vrot.slane %v8144_v9, %v16479_v2  ;;  %v16625_v31 = vld [vmem:[#allocation47_spill] sm:$0xff]  ;;  %v16626_v48 = vld [vmem:[#allocation48_spill] sm:$0xff]  ;;  %v16627_v9 = vld [vmem:[#allocation49_spill] sm:$0xff] }
0x1c00   :  { %v6015_v17 = vpack.i.b16 %v5762_v43, %v5762_v43  ;;  %v5764_v59 = vunpack.i.h.s16 %v5756_v57  ;;  %v5969_v11 = vrot.slane %v8147_v26, %v16479_v2  ;;  %v8150_v49 = vpack.i.b16 %v5756_v57, %v5756_v57  ;;  %v16628_v39 = vld [vmem:[#allocation50_spill] sm:$0xff]  ;;  %v16631_v43 = vld [vmem:[#allocation53_spill] sm:$0xff]  ;;  %v16634_v26 = vld [vmem:[#allocation56_spill] sm:$0xff] }
0x1c01   :  { %5820 = vrot.lane.b32.xlu1 %v5819_v45, %s11689_s26  ;;  %v5919_v54 = vrot.slane %v5915_v0, %v16479_v2  ;;  %v16629_v45 = vld [vmem:[#allocation51_spill] sm:$0xff]  ;;  %v16630_v0 = vld [vmem:[#allocation52_spill] sm:$0xff]  ;;  %v16632_v57 = vld [vmem:[#allocation54_spill] sm:$0xff] }
0x1c02   :  { %v6019_v1 = vrot.slane %v6015_v17, %v16479_v2  ;;  %v6115_v41 = vpack.i.b16 %v5764_v59, %v5764_v59  ;;  %v6069_v14 = vrot.slane %v8150_v49, %v16479_v2  ;;  %v16636_v17 = vld [vmem:[#allocation58_spill] sm:$0xff]  ;;  %v16637_v59 = vld [vmem:[#allocation59_spill] sm:$0xff] }
0x1c03   :  { %5870 = vrot.lane.b32.xlu0 %v5869_v62, %s11689_s26  ;;  %v16633_v62 = vld [vmem:[#allocation55_spill] sm:$0xff] }
0x1c04   :  { %v6119_v21 = vrot.slane %v6115_v41, %v16479_v2  ;;  %v16639_v41 = vld [vmem:[#allocation63_spill] sm:$0xff] }
0x1c05   :  { %5920 = vrot.lane.b32.xlu1 %v5919_v54, %s11689_s26  ;;  %v16635_v54 = vld [vmem:[#allocation57_spill] sm:$0xff] }
0x1c07   :  { %5970 = vrot.lane.b32.xlu0 %v5969_v11, %s11689_s26 }
0x1c09   :  { %6020 = vrot.lane.b32.xlu1 %v6019_v1, %s11689_s26  ;;  %v16638_v1 = vld [vmem:[#allocation62_spill] sm:$0xff] }
0x1c0b   :  { %6070 = vrot.lane.b32.xlu0 %v6069_v14, %s11689_s26  ;;  %v16640_v14 = vld [vmem:[#allocation66_spill] sm:$0xff] }
0x1c0d   :  { %6120 = vrot.lane.b32.xlu1 %v6119_v21, %s11689_s26  ;;  %v16641_v21 = vld [vmem:[#allocation67_spill] sm:$0xff] }
0x1c71   :  { %v5771_v63 = vpop.permute.xlu0 %5770 }
0x1c72   :  { %10471 = vmatmul.mubr.msk.bf16.vlgmr.msra.gmra.mxu1 %vm295_vm2, %v5771_v63  ;;  %v16642_v63 = vld [vmem:[#allocation70_spill] sm:$0xff] }
0x1c73   :  { %10495 = vmatpush3.bf16.xpose.msra.mxu1 %v16480_v25  ;;  %v5821_v34 = vpop.permute.xlu1 %5820  ;;  %10510 = vmatprep.mubr.msk.bf16.mxu1 %vm11686_vm0, %v16439_v38 }
0x1c74   :  { %10491 = vmatmul.mubr.msk.bf16.vlgmr.msra.gmra.mxu0 %vm295_vm2, %v5821_v34  ;;  %10496 = vmatprep.subr.bf16.mxu1 %v16439_v38  ;;  %v16643_v34 = vld [vmem:[#allocation71_spill] sm:$0xff] }
0x1c75   :  { %10515 = vmatpush3.bf16.xpose.msra.mxu0 %v16481_v16  ;;  %10530 = vmatprep.mubr.msk.bf16.mxu0 %vm11686_vm0, %v16439_v38  ;;  %v5871_v32 = vpop.permute.xlu0 %5870 }
0x1c76   :  { %10516 = vmatprep.subr.bf16.mxu0 %v16439_v38 }
0x1c77   :  { %v5921_v51 = vpop.permute.xlu1 %5920 }
0x1c79   :  { %v5971_v11 = vpop.permute.xlu0 %5970 }
0x1c7b   :  { %10497 = vmatpush3.bf16.xpose.msra.mxu1 %v16482_v3  ;;  %v6021_v49 = vpop.permute.xlu1 %6020 }
0x1c7c   :  { %10498 = vmatprep.subr.bf16.mxu1 %v16439_v38 }
0x1c7d   :  { %10517 = vmatpush3.bf16.xpose.msra.mxu0 %v16483_v8 }
0x1c7e   :  { %10518 = vmatprep.subr.bf16.mxu0 %v16439_v38 }
0x1c83   :  { %10499 = vmatpush3.bf16.xpose.msra.mxu1 %v16484_v60 }
0x1c84   :  { %10500 = vmatprep.subr.bf16.mxu1 %v16439_v38 }
0x1c85   :  { %10519 = vmatpush3.bf16.xpose.msra.mxu0 %v16485_v56 }
0x1c86   :  { %10520 = vmatprep.subr.bf16.mxu0 %v16439_v38 }
0x1c8b   :  { %10501 = vmatpush3.bf16.xpose.msra.mxu1 %v16486_v7 }
0x1c8c   :  { %10502 = vmatprep.subr.bf16.mxu1 %v16439_v38 }
0x1c8d   :  { %10521 = vmatpush3.bf16.xpose.msra.mxu0 %v16487_v20 }
0x1c8e   :  { %10522 = vmatprep.subr.bf16.mxu0 %v16439_v38 }
0x1c93   :  { %10503 = vmatpush3.bf16.xpose.msra.mxu1 %v16488_v23 }
0x1c94   :  { %10504 = vmatprep.subr.bf16.mxu1 %v16439_v38 }
0x1c95   :  { %10523 = vmatpush3.bf16.xpose.msra.mxu0 %v16489_v27 }
0x1c96   :  { %10524 = vmatprep.subr.bf16.mxu0 %v16439_v38 }
0x1c9b   :  { %10505 = vmatpush3.bf16.xpose.msra.mxu1 %v16616_v47 }
0x1c9c   :  { %10506 = vmatprep.subr.bf16.mxu1 %v16439_v38 }
0x1c9d   :  { %10525 = vmatpush3.bf16.xpose.msra.mxu0 %v16617_v37 }
0x1c9e   :  { %10526 = vmatprep.subr.bf16.mxu0 %v16439_v38 }
0x1ca3   :  { %10507 = vmatpush3.bf16.xpose.msra.mxu1 %v16618_v35 }
0x1ca4   :  { %10508 = vmatprep.subr.bf16.mxu1 %v16439_v38 }
0x1ca5   :  { %10527 = vmatpush3.bf16.xpose.msra.mxu0 %v16619_v58 }
0x1ca6   :  { %10528 = vmatprep.subr.bf16.mxu0 %v16439_v38 }
0x1cab   :  { %10509 = vmatpush3.bf16.xpose.msra.mxu1 %v16620_v10 }
0x1cac   :  { %10534 = vmatprep.subr.bf16.mxu1 %v16439_v38 }
0x1cad   :  { %10529 = vmatpush3.bf16.xpose.msra.mxu0 %v16621_v19 }
0x1cae   :  { %10554 = vmatprep.subr.bf16.mxu0 %v16439_v38 }
0x1cb2   :  { %10511 = vmatmul.mubr.msk.bf16.vlgmr.msra.gmra.mxu1 %vm295_vm2, %v5871_v32  ;;  %v16644_v32 = vld [vmem:[#allocation74_spill] sm:$0xff] }
0x1cb3   :  { %10535 = vmatpush3.bf16.xpose.msra.mxu1 %v16622_v36  ;;  %10550 = vmatprep.mubr.msk.bf16.mxu1 %vm11686_vm0, %v16439_v38 }
0x1cb4   :  { %10531 = vmatmul.mubr.msk.bf16.vlgmr.msra.gmra.mxu0 %vm295_vm2, %v5921_v51  ;;  %10536 = vmatprep.subr.bf16.mxu1 %v16439_v38  ;;  %v16645_v51 = vld [vmem:[#allocation75_spill] sm:$0xff] }
0x1cb5   :  { %10555 = vmatpush3.bf16.xpose.msra.mxu0 %v16623_v52  ;;  %10570 = vmatprep.mubr.msk.bf16.mxu0 %vm11686_vm0, %v16439_v38 }
0x1cb6   :  { %10556 = vmatprep.subr.bf16.mxu0 %v16439_v38 }
0x1cbb   :  { %10537 = vmatpush3.bf16.xpose.msra.mxu1 %v16624_v40 }
0x1cbc   :  { %10538 = vmatprep.subr.bf16.mxu1 %v16439_v38 }
0x1cbd   :  { %10557 = vmatpush3.bf16.xpose.msra.mxu0 %v16625_v31 }
0x1cbe   :  { %10558 = vmatprep.subr.bf16.mxu0 %v16439_v38 }
0x1cc3   :  { %10539 = vmatpush3.bf16.xpose.msra.mxu1 %v16626_v48 }
0x1cc4   :  { %10540 = vmatprep.subr.bf16.mxu1 %v16439_v38 }
0x1cc5   :  { %10559 = vmatpush3.bf16.xpose.msra.mxu0 %v16627_v9 }
0x1cc6   :  { %10560 = vmatprep.subr.bf16.mxu0 %v16439_v38 }
0x1ccb   :  { %10541 = vmatpush3.bf16.xpose.msra.mxu1 %v16628_v39  ;;  %v16654_v39 = vld [vmem:[#allocation92_spill] sm:$0xff] }
0x1ccc   :  { %10542 = vmatprep.subr.bf16.mxu1 %v16439_v38 }
0x1ccd   :  { %10561 = vmatpush3.bf16.xpose.msra.mxu0 %v16629_v45 }
0x1cce   :  { %10562 = vmatprep.subr.bf16.mxu0 %v16439_v38 }
0x1cd3   :  { %10543 = vmatpush3.bf16.xpose.msra.mxu1 %v16630_v0 }
0x1cd4   :  { %10544 = vmatprep.subr.bf16.mxu1 %v16439_v38 }
0x1cd5   :  { %10563 = vmatpush3.bf16.xpose.msra.mxu0 %v16631_v43 }
0x1cd6   :  { %10564 = vmatprep.subr.bf16.mxu0 %v16439_v38 }
0x1cdb   :  { %10545 = vmatpush3.bf16.xpose.msra.mxu1 %v16632_v57 }
0x1cdc   :  { %10546 = vmatprep.subr.bf16.mxu1 %v16439_v38 }
0x1cdd   :  { %10565 = vmatpush3.bf16.xpose.msra.mxu0 %v16633_v62 }
0x1cde   :  { %10566 = vmatprep.subr.bf16.mxu0 %v16439_v38 }
0x1ce3   :  { %10547 = vmatpush3.bf16.xpose.msra.mxu1 %v16634_v26 }
0x1ce4   :  { %10548 = vmatprep.subr.bf16.mxu1 %v16439_v38 }
0x1ce5   :  { %10567 = vmatpush3.bf16.xpose.msra.mxu0 %v16635_v54 }
0x1ce6   :  { %10568 = vmatprep.subr.bf16.mxu0 %v16439_v38 }
0x1ceb   :  { %10549 = vmatpush3.bf16.xpose.msra.mxu1 %v16636_v17 }
0x1cec   :  { %10574 = vmatprep.subr.bf16.mxu1 %v16439_v38 }
0x1ced   :  { %10569 = vmatpush3.bf16.xpose.msra.mxu0 %v16637_v59 }
0x1cee   :  { %10594 = vmatprep.subr.bf16.mxu0 %v16439_v38 }
0x1cf2   :  { %10551 = vmatmul.mubr.msk.bf16.vlgmr.msra.gmra.mxu1 %vm295_vm2, %v5971_v11  ;;  %v16646_v11 = vld [vmem:[#allocation78_spill] sm:$0xff] }
0x1cf3   :  { %10575 = vmatpush3.bf16.xpose.msra.mxu1 %v16638_v1  ;;  %10590 = vmatprep.mubr.msk.bf16.mxu1 %vm11686_vm0, %v16439_v38 }
0x1cf4   :  { %10571 = vmatmul.mubr.msk.bf16.vlgmr.msra.gmra.mxu0 %vm295_vm2, %v6021_v49  ;;  %10576 = vmatprep.subr.bf16.mxu1 %v16439_v38  ;;  %v16647_v49 = vld [vmem:[#allocation79_spill] sm:$0xff] }
0x1cf5   :  { %10595 = vmatpush3.bf16.xpose.msra.mxu0 %v16639_v41  ;;  %10610 = vmatprep.mubr.msk.bf16.mxu0 %vm11686_vm0, %v16439_v38 }
0x1cf6   :  { %10596 = vmatprep.subr.bf16.mxu0 %v16439_v38 }
0x1cfb   :  { %10577 = vmatpush3.bf16.xpose.msra.mxu1 %v16640_v14 }
0x1cfc   :  { %10578 = vmatprep.subr.bf16.mxu1 %v16439_v38 }
0x1cfd   :  { %10597 = vmatpush3.bf16.xpose.msra.mxu0 %v16641_v21 }
0x1cfe   :  { %10598 = vmatprep.subr.bf16.mxu0 %v16439_v38 }
0x1d03   :  { %10579 = vmatpush3.bf16.xpose.msra.mxu1 %v16642_v63  ;;  %v16648_v63 = vld [vmem:[#allocation82_spill] sm:$0xff] }
0x1d04   :  { %10580 = vmatprep.subr.bf16.mxu1 %v16439_v38 }
0x1d05   :  { %10599 = vmatpush3.bf16.xpose.msra.mxu0 %v16643_v34  ;;  %v16649_v34 = vld [vmem:[#allocation83_spill] sm:$0xff] }
0x1d06   :  { %10600 = vmatprep.subr.bf16.mxu0 %v16439_v38 }
0x1d0b   :  { %10581 = vmatpush3.bf16.xpose.msra.mxu1 %v16644_v32  ;;  %v16650_v32 = vld [vmem:[#allocation86_spill] sm:$0xff] }
0x1d0c   :  { %10582 = vmatprep.subr.bf16.mxu1 %v16439_v38 }
0x1d0d   :  { %10601 = vmatpush3.bf16.xpose.msra.mxu0 %v16645_v51  ;;  %v16651_v51 = vld [vmem:[#allocation87_spill] sm:$0xff] }
0x1d0e   :  { %10602 = vmatprep.subr.bf16.mxu0 %v16439_v38 }
0x1d13   :  { %10583 = vmatpush3.bf16.xpose.msra.mxu1 %v16646_v11  ;;  %v16652_v11 = vld [vmem:[#allocation90_spill] sm:$0xff] }
0x1d14   :  { %10584 = vmatprep.subr.bf16.mxu1 %v16439_v38 }
0x1d15   :  { %10603 = vmatpush3.bf16.xpose.msra.mxu0 %v16647_v49  ;;  %v16653_v49 = vld [vmem:[#allocation91_spill] sm:$0xff] }
0x1d16   :  { %10604 = vmatprep.subr.bf16.mxu0 %v16439_v38 }
0x1d1b   :  { %10585 = vmatpush3.bf16.xpose.msra.mxu1 %v16648_v63  ;;  %v6071_v63 = vpop.permute.xlu0 %6070 }
0x1d1c   :  { %10586 = vmatprep.subr.bf16.mxu1 %v16439_v38 }
0x1d1d   :  { %10605 = vmatpush3.bf16.xpose.msra.mxu0 %v16649_v34 }
0x1d1e   :  { %10606 = vmatprep.subr.bf16.mxu0 %v16439_v38 }
0x1d23   :  { %10587 = vmatpush3.bf16.xpose.msra.mxu1 %v16650_v32  ;;  %v6121_v32 = vpop.permute.xlu1 %6120 }
0x1d24   :  { %10588 = vmatprep.subr.bf16.mxu1 %v16439_v38 }
0x1d25   :  { %10607 = vmatpush3.bf16.xpose.msra.mxu0 %v16651_v51  ;;  %v11551_v51 = vld [vmem:[%s16184_s1 + $0x38] sm:$0xff]  }
0x1d26   :  { %10608 = vmatprep.subr.bf16.mxu0 %v16439_v38 }
0x1d2b   :  { %10589 = vmatpush3.bf16.xpose.msra.mxu1 %v16652_v11 }
0x1d2c   :  { %10614 = vmatprep.subr.bf16.mxu1 %v16439_v38 }
0x1d2d   :  { %10609 = vmatpush3.bf16.xpose.msra.mxu0 %v16653_v49 }
0x1d2e   :  { %10634 = vmatprep.subr.bf16.mxu0 %v16439_v38 }
0x1d32   :  { %10591 = vmatmul.mubr.msk.bf16.vlgmr.msra.gmra.mxu1 %vm295_vm2, %v6071_v63  ;;  %v15079_v34 = vpop.f32.mrf.mxu1  ;;  %v11552_v63 = vld [vmem:[%s16184_s1 + $0x78] sm:$0xff]  }
0x1d33   :  { %10615 = vmatpush3.bf16.msra.mxu1 %v11551_v51  ;;  %10630 = vmatprep.mubr.msk.bf16.mxu1 %vm11686_vm0, %v16439_v38 }
0x1d34   :  { %10611 = vmatmul.mubr.msk.bf16.vlgmr.msra.gmra.mxu0 %vm295_vm2, %v6121_v32  ;;  %v10472_v11 = vpop.f32.mrf.mxu1  ;;  %v15087_v49 = vpop.f32.mrf.mxu0  ;;  %10616 = vmatprep.subr.bf16.mxu1 %v16439_v38  ;;  %v11553_v32 = vld [vmem:[%s16184_s1 + $0x30] sm:$0xff]  }
0x1d35   :  { %10635 = vmatpush3.bf16.msra.mxu0 %v11552_v63  ;;  %10650 = vmatprep.mubr.msk.bf16.mxu0 %vm11686_vm0, %v16439_v38  ;;  %v11554_v63 = vld [vmem:[%s16184_s1 + $0x70] sm:$0xff]  }
0x1d36   :  { %v5812_v21 = vpop.f32.mrf.mxu1  ;;  %v10492_v51 = vpop.f32.mrf.mxu0  ;;  %10636 = vmatprep.subr.bf16.mxu0 %v16439_v38 }
0x1d37   :  { %10617 = vmatpush3.bf16.msra.mxu1 %v11553_v32  ;;  %v11555_v21 = vld [vmem:[%s16184_s1 + $0x28] sm:$0xff]   ;;  %v11558_v51 = vld [vmem:[%s16184_s1 + $0x60] sm:$0xff]   ;;  %v11559_v32 = vld [vmem:[%s16184_s1 + $0x18] sm:$0xff]  }
0x1d38   :  { %v10473_v11 = vpop.f32.mrf.mxu1  ;;  %v5862_v14 = vpop.f32.mrf.mxu0  ;;  %10618 = vmatprep.subr.bf16.mxu1 %v16439_v38 }
0x1d39   :  { %10637 = vmatpush3.bf16.msra.mxu0 %v11554_v63  ;;  %v11556_v14 = vld [vmem:[%s16184_s1 + $0x68] sm:$0xff]   ;;  %v11560_v11 = vld [vmem:[%s16184_s1 + $0x58] sm:$0xff]   ;;  %v11561_v63 = vld [vmem:[%s16184_s1 + $0x10] sm:$0xff]  }
0x1d3a   :  { %v10493_v41 = vpop.f32.mrf.mxu0  ;;  %10638 = vmatprep.subr.bf16.mxu0 %v16439_v38 }
0x1d3b   :  { %10619 = vmatpush3.bf16.msra.mxu1 %v11555_v21  ;;  %v11557_v41 = vld [vmem:[%s16184_s1 + $0x20] sm:$0xff]   ;;  %v11562_v21 = vld [vmem:[%s16184_s1 + $0x50] sm:$0xff]  }
0x1d3c   :  { %10620 = vmatprep.subr.bf16.mxu1 %v16439_v38 }
0x1d3d   :  { %10639 = vmatpush3.bf16.msra.mxu0 %v11556_v14  ;;  %v11563_v14 = vld [vmem:[%s16184_s1 + $0x8] sm:$0xff]  }
0x1d3e   :  { %10640 = vmatprep.subr.bf16.mxu0 %v16439_v38 }
0x1d3f   :  { %10621 = vmatpush3.bf16.msra.mxu1 %v11557_v41  ;;  %v11564_v41 = vld [vmem:[%s16184_s1 + $0x48] sm:$0xff]  }
0x1d40   :  { %10622 = vmatprep.subr.bf16.mxu1 %v16439_v38 }
0x1d41   :  { %10641 = vmatpush3.bf16.msra.mxu0 %v11558_v51  ;;  %v11565_v51 = vld [vmem:[%s16184_s1] sm:$0xff]  }
0x1d42   :  { %10642 = vmatprep.subr.bf16.mxu0 %v16439_v38 }
0x1d43   :  { %10623 = vmatpush3.bf16.msra.mxu1 %v11559_v32  ;;  %v11566_v32 = vld [vmem:[%s16184_s1 + $0x40] sm:$0xff]  }
0x1d44   :  { %10624 = vmatprep.subr.bf16.mxu1 %v16439_v38 }
0x1d45   :  { %10643 = vmatpush3.bf16.msra.mxu0 %v11560_v11 }
0x1d46   :  { %10644 = vmatprep.subr.bf16.mxu0 %v16439_v38 }
0x1d47   :  { %10625 = vmatpush3.bf16.msra.mxu1 %v11561_v63 }
0x1d48   :  { %10626 = vmatprep.subr.bf16.mxu1 %v16439_v38 }
0x1d49   :  { %10645 = vmatpush3.bf16.msra.mxu0 %v11562_v21 }
0x1d4a   :  { %10646 = vmatprep.subr.bf16.mxu0 %v16439_v38 }
0x1d4b   :  { %10627 = vmatpush3.bf16.msra.mxu1 %v11563_v14 }
0x1d4c   :  { %10628 = vmatprep.subr.bf16.mxu1 %v16439_v38 }
0x1d4d   :  { %10647 = vmatpush3.bf16.msra.mxu0 %v11564_v41 }
0x1d4e   :  { %10648 = vmatprep.subr.bf16.mxu0 %v16439_v38 }
0x1d4f   :  { %10629 = vmatpush3.bf16.msra.mxu1 %v11565_v51 }
0x1d50   :  { %10654 = vmatprep.subr.bf16.mxu1 %v16439_v38 }
0x1d51   :  { %10649 = vmatpush3.bf16.msra.mxu0 %v11566_v32  ;;  %v6166_v32 = vadd.f32 %v15087_v49, %v16654_v39 }
0x1d52   :  { %10674 = vmatprep.subr.bf16.mxu0 %v16439_v38 }
0x1d72   :  { %v5909_v11 = vpop.f32.mrf.mxu1 }
0x1d73   :  { %v6167_v9 = vadd.f32 %v5909_v11, %v16654_v39 }
0x1d74   :  { %v10512_v63 = vpop.f32.mrf.mxu1  ;;  %v5959_v21 = vpop.f32.mrf.mxu0 }
0x1d75   :  { %v6181_v63 = vrot.slane %v6166_v32, 7 }
0x1d76   :  { %v5912_v14 = vpop.f32.mrf.mxu1  ;;  %v10532_v41 = vpop.f32.mrf.mxu0 }
0x1d77   :  { %v6168_v14 = vadd.f32 %v5959_v21, %v16654_v39  ;;  %v6183_v41 = vrot.slane %v6167_v9, 6 }
0x1d78   :  { %v10513_v1 = vpop.f32.mrf.mxu1  ;;  %v5962_v59 = vpop.f32.mrf.mxu0 }
0x1d7a   :  { %v10533_v17 = vpop.f32.mrf.mxu0 }
0x1db2   :  { %v6009_v54 = vpop.f32.mrf.mxu1 }
0x1db3   :  { %v6169_v59 = vadd.f32 %v6009_v54, %v16654_v39 }
0x1db4   :  { %v10552_v26 = vpop.f32.mrf.mxu1  ;;  %v6059_v51 = vpop.f32.mrf.mxu0 }
0x1db5   :  { %v6165_v26 = vadd.f32 %v15079_v34, %v16654_v39 }
0x1db6   :  { %v6012_v62 = vpop.f32.mrf.mxu1  ;;  %v10572_v57 = vpop.f32.mrf.mxu0 }
0x1db7   :  { %v6182_v62 = vsel %vm1389_vm4, %v6181_v63, %v6165_v26  ;;  %v6185_v57 = vrot.slane %v6168_v14, 5 }
0x1db8   :  { %v10553_v43 = vpop.f32.mrf.mxu1  ;;  %v6062_v0 = vpop.f32.mrf.mxu0 }
0x1db9   :  { %v6170_v0 = vadd.f32 %v6059_v51, %v16654_v39  ;;  %v6187_v43 = vrot.slane %v6169_v59, 4 }
0x1dba   :  { %v10573_v45 = vpop.f32.mrf.mxu0 }
0x1dbb   :  { %v6184_v45 = vsel %vm1392_vm5, %v6183_v41, %v6182_v62  ;;  %v6189_v1 = vrot.slane %v6170_v0, 3 }
0x1dbc   :  { %v6186_v17 = vsel %vm1395_vm6, %v6185_v57, %v6184_v45 }
0x1dbd   :  { %v6188_v11 = vsel %vm1398_vm7, %v6187_v43, %v6186_v17 }
0x1dbe   :  { %v6190_v51 = vsel %vm1401_vm8, %v6189_v1, %v6188_v11 }
0x1df2   :  { %v6109_v49 = vpop.f32.mrf.mxu1 }
0x1df3   :  { %v6171_v21 = vadd.f32 %v6109_v49, %v16654_v39 }
0x1df4   :  { %v10592_v54 = vpop.f32.mrf.mxu1  ;;  %v6159_v48 = vpop.f32.mrf.mxu0 }
0x1df5   :  { %v6191_v31 = vrot.slane %v6171_v21, 2  ;;  %v6172_v34 = vadd.f32 %v6159_v48, %v16654_v39 }
0x1df6   :  { %v6112_v63 = vpop.f32.mrf.mxu1  ;;  %v10612_v40 = vpop.f32.mrf.mxu0 }
0x1df7   :  { %v6193_v52 = vrot.slane %v6172_v34, 1  ;;  %v6192_v41 = vsel %vm1404_vm9, %v6191_v31, %v6190_v51 }
0x1df8   :  { %v10593_v62 = vpop.f32.mrf.mxu1  ;;  %v6162_v57 = vpop.f32.mrf.mxu0 }
0x1df9   :  { %v6194_v45 = vsel %vm1407_vm10, %v6193_v52, %v6192_v41 }
0x1dfa   :  { %6196 = vmax.xlane.f32.xlu0 %v6194_v45  ;;  %v10613_v43 = vpop.f32.mrf.mxu0 }
0x1e10   :  { %6841 = vrot.lane.b32.xlu0 %v14942_v42, %s11689_s26 }
0x1e83   :  { %v6197_v17 = vpop.xlane.xlu0 %6196 }
0x1e84   :  { %v6199_v49 = vrot.slane %v6197_v17, 1  ;;  %v6200_v54 = vrot.slane %v6197_v17, 2  ;;  %v6201_v48 = vrot.slane %v6197_v17, 3  ;;  %v6202_v63 = vrot.slane %v6197_v17, 4 }
0x1e85   :  { %v6203_v40 = vrot.slane %v6197_v17, 5  ;;  %v6204_v39 = vrot.slane %v6197_v17, 6  ;;  %v6205_v1 = vrot.slane %v6197_v17, 7  ;;  %v6214_v11 = vsub.f32 %v6165_v26, %v6197_v17 }
0x1e86   :  { %v6215_v36 = vsub.f32 %v6166_v32, %v6199_v49  ;;  %v6216_v31 = vsub.f32 %v6167_v9, %v6200_v54  ;;  %v6217_v51 = vsub.f32 %v6168_v14, %v6201_v48  ;;  %v6218_v62 = vsub.f32 %v6169_v59, %v6202_v63 }
0x1e87   :  { %v6219_v57 = vsub.f32 %v6170_v0, %v6203_v40  ;;  %v6220_v52 = vsub.f32 %v6171_v21, %v6204_v39  ;;  %v6222_v41 = vmul.f32 1.442695, %v6214_v11  ;;  %v6221_v10 = vsub.f32 %v6172_v34, %v6205_v1 }
0x1e88   :  { %v6224_v45 = vmul.f32 1.442695, %v6215_v36  ;;  %v6226_v43 = vmul.f32 1.442695, %v6216_v31  ;;  %v6228_v19 = vmul.f32 1.442695, %v6217_v51 }
0x1e89   :  { %11293 = vpow2.f32 %v6222_v41  ;;  %v6230_v58 = vmul.f32 1.442695, %v6218_v62  ;;  %v6232_v35 = vmul.f32 1.442695, %v6219_v57  ;;  %v6234_v37 = vmul.f32 1.442695, %v6220_v52 }
0x1e8a   :  { %11295 = vpow2.f32 %v6224_v45  ;;  %v6236_v47 = vmul.f32 1.442695, %v6221_v10 }
0x1e8b   :  { %11297 = vpow2.f32 %v6226_v43 }
0x1e8c   :  { %11299 = vpow2.f32 %v6228_v19 }
0x1e8d   :  { %11301 = vpow2.f32 %v6230_v58 }
0x1e8e   :  { %11303 = vpow2.f32 %v6232_v35 }
0x1e8f   :  { %11305 = vpow2.f32 %v6234_v37 }
0x1e90   :  { %11307 = vpow2.f32 %v6236_v47 }
0x1e96   :  { %v11294_v9 = vpop.eup %11293 }
0x1e97   :  { %v11296_v32 = vpop.eup %11295 }
0x1e98   :  { %v11298_v39 = vpop.eup %11297  ;;  %v6246_v14 = vrot.slane %v11296_v32, 7 }
0x1e99   :  { %v11300_v36 = vpop.eup %11299  ;;  %v6248_v59 = vrot.slane %v11298_v39, 6 }
0x1e9a   :  { %v11302_v26 = vpop.eup %11301  ;;  %v6247_v0 = vsel %vm1389_vm4, %v6246_v14, %v11294_v9  ;;  %v6250_v21 = vrot.slane %v11300_v36, 5 }
0x1e9b   :  { %v11304_v34 = vpop.eup %11303  ;;  %v6249_v17 = vsel %vm1392_vm5, %v6248_v59, %v6247_v0  ;;  %v6252_v49 = vrot.slane %v11302_v26, 4 }
0x1e9c   :  { %v11306_v19 = vpop.eup %11305  ;;  %v6251_v58 = vsel %vm1395_vm6, %v6250_v21, %v6249_v17  ;;  %v6254_v35 = vrot.slane %v11304_v34, 3 }
0x1e9d   :  { %v11308_v37 = vpop.eup %11307  ;;  %v6253_v47 = vsel %vm1398_vm7, %v6252_v49, %v6251_v58  ;;  %v6256_v10 = vrot.slane %v11306_v19, 2 }
0x1e9e   :  { %v6255_v54 = vsel %vm1401_vm8, %v6254_v35, %v6253_v47  ;;  %v6258_v48 = vrot.slane %v11308_v37, 1  ;;  %v11574_v47 = vld [vmem:[%s16184_s1 + $0xe0] sm:$0xff]  }
0x1e9f   :  { %v6257_v63 = vsel %vm1404_vm9, %v6256_v10, %v6255_v54  ;;  %v11575_v10 = vld [vmem:[%s16184_s1 + $0x98] sm:$0xff]  }
0x1ea0   :  { %v6259_v40 = vsel %vm1407_vm10, %v6258_v48, %v6257_v63  ;;  %v11576_v54 = vld [vmem:[%s16184_s1 + $0xd8] sm:$0xff]   ;;  %v11577_v48 = vld [vmem:[%s16184_s1 + $0x90] sm:$0xff]  }
0x1ea1   :  { %6261 = vadd.xlane.f32.xlu1 %v6259_v40  ;;  %v11578_v63 = vld [vmem:[%s16184_s1 + $0xd0] sm:$0xff]   ;;  %v11579_v40 = vld [vmem:[%s16184_s1 + $0x88] sm:$0xff]  }
0x1f2a   :  { %v6262_v1 = vpop.xlane.xlu1 %6261 }
0x1f2b   :  { %11309 = vrcp.f32 %v6262_v1  ;;  %v11580_v1 = vld [vmem:[%s16184_s1 + $0xc8] sm:$0xff]  }
0x1f38   :  { %v11310_v11 = vpop.eup %11309 }
0x1f39   :  { %v6280_v31 = vmul.f32 %v11310_v11, %v11294_v9  ;;  %v6265_v51 = vrot.slane %v11310_v11, 1  ;;  %v6266_v62 = vrot.slane %v11310_v11, 2  ;;  %v6267_v57 = vrot.slane %v11310_v11, 3 }
0x1f3a   :  { %v6268_v52 = vrot.slane %v11310_v11, 4  ;;  %v6269_v41 = vrot.slane %v11310_v11, 5  ;;  %v6270_v45 = vrot.slane %v11310_v11, 6  ;;  %v6271_v43 = vrot.slane %v11310_v11, 7  ;;  %v11581_v11 = vld [vmem:[%s16184_s1 + $0x80] sm:$0xff]  }
0x1f3b   :  { %v6288_v14 = vpack.c.bf16 %v6280_v31, %v6280_v31  ;;  %6624 = vst [vmem:[%s16185_s8 + $0x4] sm:$0x1] %v6280_v31  ;;  %v6281_v59 = vmul.f32 %v11296_v32, %v6265_v51  ;;  %v15181_v0 = vmul.f32 %v11298_v39, %v6266_v62  ;;  %v15183_v21 = vmul.f32 %v11300_v36, %v6267_v57  ;;  %v11567_v32 = vld [vmem:[%s16184_s1 + $0xb8] sm:$0xff]   ;;  %v11569_v36 = vld [vmem:[%s16184_s1 + $0xb0] sm:$0xff]   ;;  %v11582_v51 = vld [vmem:[%s16184_s1 + $0xc0] sm:$0xff]  }
0x1f3c   :  { %v15185_v17 = vmul.f32 %v11302_v26, %v6268_v52  ;;  %v15187_v9 = vmul.f32 %v11304_v34, %v6269_v41  ;;  %v15189_v49 = vmul.f32 %v11306_v19, %v6270_v45  ;;  %v15191_v58 = vmul.f32 %v11308_v37, %v6271_v43  ;;  %v11568_v39 = vld [vmem:[%s16184_s1 + $0xf8] sm:$0xff]   ;;  %v11570_v26 = vld [vmem:[%s16184_s1 + $0xf0] sm:$0xff]   ;;  %v11571_v34 = vld [vmem:[%s16184_s1 + $0xa8] sm:$0xff]  }
0x1f3d   :  { %10631 = vmatmul.mubr.bf16.vlgmr.msra.gmra.mxu1 %v6288_v14  ;;  %v6289_v35 = vpack.c.bf16 %v6281_v59, %v6281_v59  ;;  %6625 = vst [vmem:[%s16185_s8 + $0xc] sm:$0x1] %v6281_v59  ;;  %6626 = vst [vmem:[%s16185_s8 + $0x14] sm:$0x1] %v15181_v0  ;;  %v11572_v19 = vld [vmem:[%s16184_s1 + $0xe8] sm:$0xff]   ;;  %v11573_v37 = vld [vmem:[%s16184_s1 + $0xa0] sm:$0xff]   ;;  %v6290_v31 = vpack.c.bf16 %v15181_v0, %v15181_v0  ;;  %v6291_v62 = vpack.c.bf16 %v15183_v21, %v15183_v21 }
0x1f3e   :  { %6627 = vst [vmem:[%s16185_s8 + $0x1c] sm:$0x1] %v15183_v21  ;;  %10655 = vmatpush3.bf16.msra.mxu1 %v11567_v32  ;;  %10670 = vmatprep.mubr.msk.bf16.mxu1 %vm11686_vm0, %v16439_v38  ;;  %6628 = vst [vmem:[%s16185_s8 + $0x24] sm:$0x1] %v15185_v17  ;;  %v11583_v57 = vld [vmem:[%s16184_s1 + $0x138] sm:$0xff]   ;;  %v11585_v41 = vld [vmem:[%s16184_s1 + $0x130] sm:$0xff]  }
0x1f3f   :  { %6629 = vst [vmem:[%s16185_s8 + $0x2c] sm:$0x1] %v15187_v9  ;;  %6630 = vst [vmem:[%s16185_s8 + $0x34] sm:$0x1] %v15189_v49  ;;  %10651 = vmatmul.mubr.bf16.vlgmr.msra.gmra.mxu0 %v6289_v35  ;;  %10656 = vmatprep.subr.bf16.mxu1 %v16439_v38  ;;  %v11584_v52 = vld [vmem:[%s16184_s1 + $0x178] sm:$0xff]   ;;  %v11586_v45 = vld [vmem:[%s16184_s1 + $0x170] sm:$0xff]  }
0x1f40   :  { %6631 = vst [vmem:[%s16185_s8 + $0x3c] sm:$0x1] %v15191_v58  ;;  %10675 = vmatpush3.bf16.msra.mxu0 %v11568_v39  ;;  %10690 = vmatprep.mubr.msk.bf16.mxu0 %vm11686_vm0, %v16439_v38  ;;  %v11587_v43 = vld [vmem:[%s16184_s1 + $0x128] sm:$0xff]   ;;  %v11589_v59 = vld [vmem:[%s16184_s1 + $0x120] sm:$0xff]   ;;  %v11591_v21 = vld [vmem:[%s16184_s1 + $0x118] sm:$0xff]  }
0x1f41   :  { %10676 = vmatprep.subr.bf16.mxu0 %v16439_v38  ;;  %v11588_v14 = vld [vmem:[%s16184_s1 + $0x168] sm:$0xff]   ;;  %v11590_v0 = vld [vmem:[%s16184_s1 + $0x160] sm:$0xff]   ;;  %v11592_v35 = vld [vmem:[%s16184_s1 + $0x158] sm:$0xff]  }
0x1f42   :  { %10657 = vmatpush3.bf16.msra.mxu1 %v11569_v36  ;;  %v11593_v32 = vld [vmem:[%s16184_s1 + $0x110] sm:$0xff]   ;;  %v11595_v36 = vld [vmem:[%s16184_s1 + $0x108] sm:$0xff]  }
0x1f43   :  { %10658 = vmatprep.subr.bf16.mxu1 %v16439_v38  ;;  %v11594_v39 = vld [vmem:[%s16184_s1 + $0x150] sm:$0xff]  }
0x1f44   :  { %10677 = vmatpush3.bf16.msra.mxu0 %v11570_v26  ;;  %v11596_v26 = vld [vmem:[%s16184_s1 + $0x148] sm:$0xff]  }
0x1f45   :  { %10678 = vmatprep.subr.bf16.mxu0 %v16439_v38 }
0x1f46   :  { %10659 = vmatpush3.bf16.msra.mxu1 %v11571_v34  ;;  %v11597_v34 = vld [vmem:[%s16184_s1 + $0x100] sm:$0xff]  }
0x1f47   :  { %10660 = vmatprep.subr.bf16.mxu1 %v16439_v38 }
0x1f48   :  { %10679 = vmatpush3.bf16.msra.mxu0 %v11572_v19  ;;  %v6292_v19 = vpack.c.bf16 %v15185_v17, %v15185_v17  ;;  %v11600_v17 = vld [vmem:[%s16184_s1 + $0x1f8] sm:$0xff]  }
0x1f49   :  { %10680 = vmatprep.subr.bf16.mxu0 %v16439_v38 }
0x1f4a   :  { %10661 = vmatpush3.bf16.msra.mxu1 %v11573_v37  ;;  %v11598_v37 = vld [vmem:[%s16184_s1 + $0x140] sm:$0xff]  }
0x1f4b   :  { %10662 = vmatprep.subr.bf16.mxu1 %v16439_v38 }
0x1f4c   :  { %10681 = vmatpush3.bf16.msra.mxu0 %v11574_v47  ;;  %v6293_v47 = vpack.c.bf16 %v15187_v9, %v15187_v9  ;;  %v11601_v9 = vld [vmem:[%s16184_s1 + $0x1b0] sm:$0xff]  }
0x1f4d   :  { %10682 = vmatprep.subr.bf16.mxu0 %v16439_v38 }
0x1f4e   :  { %10663 = vmatpush3.bf16.msra.mxu1 %v11575_v10  ;;  %v11599_v10 = vld [vmem:[%s16184_s1 + $0x1b8] sm:$0xff]  }
0x1f4f   :  { %10664 = vmatprep.subr.bf16.mxu1 %v16439_v38 }
0x1f50   :  { %10683 = vmatpush3.bf16.msra.mxu0 %v11576_v54  ;;  %v11602_v54 = vld [vmem:[%s16184_s1 + $0x1f0] sm:$0xff]  }
0x1f51   :  { %10684 = vmatprep.subr.bf16.mxu0 %v16439_v38 }
0x1f52   :  { %10665 = vmatpush3.bf16.msra.mxu1 %v11577_v48  ;;  %v11603_v48 = vld [vmem:[%s16184_s1 + $0x1a8] sm:$0xff]  }
0x1f53   :  { %10666 = vmatprep.subr.bf16.mxu1 %v16439_v38 }
0x1f54   :  { %10685 = vmatpush3.bf16.msra.mxu0 %v11578_v63  ;;  %v11604_v63 = vld [vmem:[%s16184_s1 + $0x1e8] sm:$0xff]  }
0x1f55   :  { %10686 = vmatprep.subr.bf16.mxu0 %v16439_v38 }
0x1f56   :  { %10667 = vmatpush3.bf16.msra.mxu1 %v11579_v40  ;;  %v11605_v40 = vld [vmem:[%s16184_s1 + $0x1a0] sm:$0xff]  }
0x1f57   :  { %10668 = vmatprep.subr.bf16.mxu1 %v16439_v38 }
0x1f58   :  { %10687 = vmatpush3.bf16.msra.mxu0 %v11580_v1  ;;  %v11606_v1 = vld [vmem:[%s16184_s1 + $0x1e0] sm:$0xff]  }
0x1f59   :  { %10688 = vmatprep.subr.bf16.mxu0 %v16439_v38 }
0x1f5a   :  { %10669 = vmatpush3.bf16.msra.mxu1 %v11581_v11  ;;  %v11607_v11 = vld [vmem:[%s16184_s1 + $0x198] sm:$0xff]  }
0x1f5b   :  { %10694 = vmatprep.subr.bf16.mxu1 %v16439_v38 }
0x1f5c   :  { %10689 = vmatpush3.bf16.msra.mxu0 %v11582_v51  ;;  %v11609_v51 = vld [vmem:[%s16184_s1 + $0x190] sm:$0xff]  }
0x1f5d   :  { %10671 = vmatmul.mubr.bf16.vlgmr.msra.gmra.mxu1 %v6290_v31  ;;  %10714 = vmatprep.subr.bf16.mxu0 %v16439_v38  ;;  %v11608_v31 = vld [vmem:[%s16184_s1 + $0x1d8] sm:$0xff]  }
0x1f5e   :  { %10695 = vmatpush3.bf16.msra.mxu1 %v11583_v57  ;;  %10710 = vmatprep.mubr.msk.bf16.mxu1 %vm11686_vm0, %v16439_v38  ;;  %v11611_v57 = vld [vmem:[%s16184_s1 + $0x188] sm:$0xff]  }
0x1f5f   :  { %10691 = vmatmul.mubr.bf16.vlgmr.msra.gmra.mxu0 %v6291_v62  ;;  %10696 = vmatprep.subr.bf16.mxu1 %v16439_v38  ;;  %v11610_v62 = vld [vmem:[%s16184_s1 + $0x1d0] sm:$0xff]  }
0x1f60   :  { %10715 = vmatpush3.bf16.msra.mxu0 %v11584_v52  ;;  %10730 = vmatprep.mubr.msk.bf16.mxu0 %vm11686_vm0, %v16439_v38  ;;  %v11612_v52 = vld [vmem:[%s16184_s1 + $0x1c8] sm:$0xff]  }
0x1f61   :  { %10716 = vmatprep.subr.bf16.mxu0 %v16439_v38 }
0x1f62   :  { %10697 = vmatpush3.bf16.msra.mxu1 %v11585_v41  ;;  %v11613_v41 = vld [vmem:[%s16184_s1 + $0x180] sm:$0xff]  }
0x1f63   :  { %10698 = vmatprep.subr.bf16.mxu1 %v16439_v38 }
0x1f64   :  { %10717 = vmatpush3.bf16.msra.mxu0 %v11586_v45  ;;  %v6294_v45 = vpack.c.bf16 %v15189_v49, %v15189_v49  ;;  %v11616_v49 = vld [vmem:[%s16180_s5 + $0x8] sm:$0xff]  }
0x1f65   :  { %10718 = vmatprep.subr.bf16.mxu0 %v16439_v38 }
0x1f66   :  { %10699 = vmatpush3.bf16.msra.mxu1 %v11587_v43  ;;  %v11614_v43 = vld [vmem:[%s16184_s1 + $0x1c0] sm:$0xff]  }
0x1f67   :  { %10700 = vmatprep.subr.bf16.mxu1 %v16439_v38 }
0x1f68   :  { %10719 = vmatpush3.bf16.msra.mxu0 %v11588_v14  ;;  %v6295_v14 = vpack.c.bf16 %v15191_v58, %v15191_v58  ;;  %v11617_v58 = vld [vmem:[%s16177_s4] sm:$0xff]  }
0x1f69   :  { %10720 = vmatprep.subr.bf16.mxu0 %v16439_v38 }
0x1f6a   :  { %10701 = vmatpush3.bf16.msra.mxu1 %v11589_v59  ;;  %v11615_v59 = vld [vmem:[%s16177_s4 + $0x8] sm:$0xff]  }
0x1f6b   :  { %10702 = vmatprep.subr.bf16.mxu1 %v16439_v38 }
0x1f6c   :  { %10721 = vmatpush3.bf16.msra.mxu0 %v11590_v0  ;;  %v11618_v0 = vld [vmem:[%s16180_s5] sm:$0xff]  }
0x1f6d   :  { %10722 = vmatprep.subr.bf16.mxu0 %v16439_v38 }
0x1f6e   :  { %10703 = vmatpush3.bf16.msra.mxu1 %v11591_v21  ;;  %v6842_v21 = vpop.permute.xlu0 %6841 }
0x1f6f   :  { %10704 = vmatprep.subr.bf16.mxu1 %v16439_v38 }
0x1f70   :  { %10723 = vmatpush3.bf16.msra.mxu0 %v11592_v35 }
0x1f71   :  { %10724 = vmatprep.subr.bf16.mxu0 %v16439_v38 }
0x1f72   :  { %10705 = vmatpush3.bf16.msra.mxu1 %v11593_v32 }
0x1f73   :  { %10706 = vmatprep.subr.bf16.mxu1 %v16439_v38 }
0x1f74   :  { %10725 = vmatpush3.bf16.msra.mxu0 %v11594_v39 }
0x1f75   :  { %10726 = vmatprep.subr.bf16.mxu0 %v16439_v38 }
0x1f76   :  { %10707 = vmatpush3.bf16.msra.mxu1 %v11595_v36 }
0x1f77   :  { %10708 = vmatprep.subr.bf16.mxu1 %v16439_v38 }
0x1f78   :  { %10727 = vmatpush3.bf16.msra.mxu0 %v11596_v26 }
0x1f79   :  { %10728 = vmatprep.subr.bf16.mxu0 %v16439_v38 }
0x1f7a   :  { %10709 = vmatpush3.bf16.msra.mxu1 %v11597_v34 }
0x1f7b   :  { %10734 = vmatprep.subr.bf16.mxu1 %v16439_v38 }
0x1f7c   :  { %10729 = vmatpush3.bf16.msra.mxu0 %v11598_v37 }
0x1f7d   :  { %10711 = vmatmul.mubr.bf16.vlgmr.msra.gmra.mxu1 %v6292_v19  ;;  %10754 = vmatprep.subr.bf16.mxu0 %v16439_v38 }
0x1f7e   :  { %10735 = vmatpush3.bf16.msra.mxu1 %v11599_v10  ;;  %10750 = vmatprep.mubr.msk.bf16.mxu1 %vm11686_vm0, %v16439_v38 }
0x1f7f   :  { %10731 = vmatmul.mubr.bf16.vlgmr.msra.gmra.mxu0 %v6293_v47  ;;  %10736 = vmatprep.subr.bf16.mxu1 %v16439_v38 }
0x1f80   :  { %10755 = vmatpush3.bf16.msra.mxu0 %v11600_v17  ;;  %10770 = vmatprep.mubr.msk.bf16.mxu0 %vm11686_vm0, %v16439_v38 }
0x1f81   :  { %10756 = vmatprep.subr.bf16.mxu0 %v16439_v38 }
0x1f82   :  { %10737 = vmatpush3.bf16.msra.mxu1 %v11601_v9 }
0x1f83   :  { %10738 = vmatprep.subr.bf16.mxu1 %v16439_v38 }
0x1f84   :  { %10757 = vmatpush3.bf16.msra.mxu0 %v11602_v54 }
0x1f85   :  { %10758 = vmatprep.subr.bf16.mxu0 %v16439_v38 }
0x1f86   :  { %10739 = vmatpush3.bf16.msra.mxu1 %v11603_v48 }
0x1f87   :  { %10740 = vmatprep.subr.bf16.mxu1 %v16439_v38 }
0x1f88   :  { %10759 = vmatpush3.bf16.msra.mxu0 %v11604_v63 }
0x1f89   :  { %10760 = vmatprep.subr.bf16.mxu0 %v16439_v38 }
0x1f8a   :  { %10741 = vmatpush3.bf16.msra.mxu1 %v11605_v40 }
0x1f8b   :  { %10742 = vmatprep.subr.bf16.mxu1 %v16439_v38 }
0x1f8c   :  { %10761 = vmatpush3.bf16.msra.mxu0 %v11606_v1 }
0x1f8d   :  { %10762 = vmatprep.subr.bf16.mxu0 %v16439_v38 }
0x1f8e   :  { %10743 = vmatpush3.bf16.msra.mxu1 %v11607_v11 }
0x1f8f   :  { %10744 = vmatprep.subr.bf16.mxu1 %v16439_v38 }
0x1f90   :  { %10763 = vmatpush3.bf16.msra.mxu0 %v11608_v31 }
0x1f91   :  { %10764 = vmatprep.subr.bf16.mxu0 %v16439_v38 }
0x1f92   :  { %10745 = vmatpush3.bf16.msra.mxu1 %v11609_v51 }
0x1f93   :  { %10746 = vmatprep.subr.bf16.mxu1 %v16439_v38 }
0x1f94   :  { %10765 = vmatpush3.bf16.msra.mxu0 %v11610_v62 }
0x1f95   :  { %10766 = vmatprep.subr.bf16.mxu0 %v16439_v38 }
0x1f96   :  { %10747 = vmatpush3.bf16.msra.mxu1 %v11611_v57 }
0x1f97   :  { %10748 = vmatprep.subr.bf16.mxu1 %v16439_v38 }
0x1f98   :  { %10767 = vmatpush3.bf16.msra.mxu0 %v11612_v52 }
0x1f99   :  { %10768 = vmatprep.subr.bf16.mxu0 %v16439_v38 }
0x1f9a   :  { %10749 = vmatpush3.bf16.msra.mxu1 %v11613_v41 }
0x1f9b   :  { %10774 = vmatprep.subr.bf16.mxu1 %v16439_v38 }
0x1f9c   :  { %10769 = vmatpush3.bf16.msra.mxu0 %v11614_v43 }
0x1f9d   :  { %10751 = vmatmul.mubr.bf16.vlgmr.msra.gmra.mxu1 %v6294_v45  ;;  %10782 = vmatprep.subr.bf16.mxu0 %v16439_v38 }
0x1f9e   :  { %10775 = vmatpush3.bf16.msra.mxu1 %v11615_v59  ;;  %10778 = vmatprep.mubr.msk.bf16.mxu1 %vm11686_vm0, %v16439_v38 }
0x1f9f   :  { %10771 = vmatmul.mubr.bf16.vlgmr.msra.gmra.mxu0 %v6295_v14  ;;  %10776 = vmatprep.subr.bf16.mxu1 %v16439_v38 }
0x1fa0   :  { %10783 = vmatpush3.bf16.msra.mxu0 %v11616_v49  ;;  %10786 = vmatprep.mubr.msk.bf16.mxu0 %vm11686_vm0, %v16439_v38 }
0x1fa1   :  { %10784 = vmatprep.subr.bf16.mxu0 %v16439_v38 }
0x1fa2   :  { %10777 = vmatpush3.bf16.msra.mxu1 %v11617_v58 }
0x1fa3   :  { %10790 = vmatprep.subr.bf16.mxu1 %v16439_v38 }
0x1fa4   :  { %10785 = vmatpush3.bf16.msra.mxu0 %v11618_v0 }
0x1fa5   :  { %10810 = vmatprep.subr.bf16.mxu0 %v16439_v38 }
0x1fa7   :  { %10787 = vmatmul.mubr.msk.bf16.vlgmr.msra.gmra.mxu0 %vm295_vm2, %v6842_v21 }
0x1fa8   :  { %10811 = vmatpush3.bf16.xpose.msra.mxu0 %v16469_v29  ;;  %10826 = vmatprep.mubr.msk.bf16.mxu0 %vm11686_vm0, %v16439_v38 }
0x1fa9   :  { %10812 = vmatprep.subr.bf16.mxu0 %v16439_v38 }
0x1fb0   :  { %10813 = vmatpush3.bf16.xpose.msra.mxu0 %v16470_v6 }
0x1fb1   :  { %10814 = vmatprep.subr.bf16.mxu0 %v16439_v38 }
0x1fb8   :  { %10815 = vmatpush3.bf16.xpose.msra.mxu0 %v16471_v4 }
0x1fb9   :  { %10816 = vmatprep.subr.bf16.mxu0 %v16439_v38 }
0x1fc0   :  { %10817 = vmatpush3.bf16.xpose.msra.mxu0 %v16472_v55 }
0x1fc1   :  { %10818 = vmatprep.subr.bf16.mxu0 %v16439_v38 }
0x1fc8   :  { %10819 = vmatpush3.bf16.xpose.msra.mxu0 %v16473_v44 }
0x1fc9   :  { %10820 = vmatprep.subr.bf16.mxu0 %v16439_v38 }
0x1fd0   :  { %10821 = vmatpush3.bf16.xpose.msra.mxu0 %v16474_v61 }
0x1fd1   :  { %10822 = vmatprep.subr.bf16.mxu0 %v16439_v38 }
0x1fd8   :  { %10823 = vmatpush3.bf16.xpose.msra.mxu0 %v16475_v5 }
0x1fd9   :  { %10824 = vmatprep.subr.bf16.mxu0 %v16439_v38 }
0x1fe0   :  { %10825 = vmatpush3.bf16.xpose.msra.mxu0 %v16476_v46 }
0x1fe1   :  { %10850 = vmatprep.subr.bf16.mxu0 %v16439_v38 }
0x1ffd   :  { %v6330_v29 = vpop.f32.mrf.mxu1 }
0x1ffe   :  { %v6616_v55 = vpack.c.bf16 %v6330_v29, %v6330_v29 }
0x1fff   :  { %v10632_v6 = vpop.f32.mrf.mxu1  ;;  %v6370_v4 = vpop.f32.mrf.mxu0 }
0x2000   :  { %v6617_v35 = vpack.c.bf16 %v6370_v4, %v6370_v4  ;;  %v6640_v26 = vunpack.c.l.b16 %v6616_v55 }
0x2001   :  { %v6333_v44 = vpop.f32.mrf.mxu1  ;;  %v10652_v32 = vpop.f32.mrf.mxu0 }
0x2002   :  { %v6641_v39 = vunpack.c.l.b16 %v6617_v35 }
0x2003   :  { %v10633_v36 = vpop.f32.mrf.mxu1  ;;  %v6373_v61 = vpop.f32.mrf.mxu0 }
0x2004   :  { %v6648_v34 = vrot.slane %v6641_v39, 7 }
0x2005   :  { %v10653_v19 = vpop.f32.mrf.mxu0 }
0x2006   :  { %v6649_v5 = vsel %vm1389_vm4, %v6648_v34, %v6640_v26 }
0x201d   :  { %v6410_v37 = vpop.f32.mrf.mxu1 }
0x201e   :  { %v6618_v52 = vpack.c.bf16 %v6410_v37, %v6410_v37 }
0x201f   :  { %v10672_v47 = vpop.f32.mrf.mxu1  ;;  %v6450_v46 = vpop.f32.mrf.mxu0 }
0x2020   :  { %v6619_v41 = vpack.c.bf16 %v6450_v46, %v6450_v46  ;;  %v6642_v45 = vunpack.c.l.b16 %v6618_v52 }
0x2021   :  { %v6413_v10 = vpop.f32.mrf.mxu1  ;;  %v10692_v17 = vpop.f32.mrf.mxu0 }
0x2022   :  { %v6643_v14 = vunpack.c.l.b16 %v6619_v41  ;;  %v6650_v49 = vrot.slane %v6642_v45, 6 }
0x2023   :  { %v10673_v9 = vpop.f32.mrf.mxu1  ;;  %v6453_v54 = vpop.f32.mrf.mxu0 }
0x2024   :  { %v6652_v0 = vrot.slane %v6643_v14, 5  ;;  %v6651_v29 = vsel %vm1392_vm5, %v6650_v49, %v6649_v5 }
0x2025   :  { %v10693_v48 = vpop.f32.mrf.mxu0 }
0x2026   :  { %v6653_v35 = vsel %vm1395_vm6, %v6652_v0, %v6651_v29  ;;  %v6774_v29 = vld [vmem:[%s16186_s9] sm:$0x4] }
0x203d   :  { %v6490_v63 = vpop.f32.mrf.mxu1 }
0x203e   :  { %v6620_v43 = vpack.c.bf16 %v6490_v63, %v6490_v63 }
0x203f   :  { %v10712_v40 = vpop.f32.mrf.mxu1  ;;  %v6530_v1 = vpop.f32.mrf.mxu0 }
0x2040   :  { %v6621_v59 = vpack.c.bf16 %v6530_v1, %v6530_v1  ;;  %v6644_v58 = vunpack.c.l.b16 %v6620_v43  ;;  %v11619_v1 = vld [vmem:[%s16183_s7] ss:$0 sm:$0xff] }
0x2041   :  { %v6493_v11 = vpop.f32.mrf.mxu1  ;;  %v10732_v31 = vpop.f32.mrf.mxu0 }
0x2042   :  { %v6645_v21 = vunpack.c.l.b16 %v6621_v59  ;;  %v6654_v6 = vrot.slane %v6644_v58, 4 }
0x2043   :  { %v10713_v51 = vpop.f32.mrf.mxu1  ;;  %v6533_v62 = vpop.f32.mrf.mxu0 }
0x2044   :  { %v6656_v44 = vrot.slane %v6645_v21, 3  ;;  %v6655_v36 = vsel %vm1398_vm7, %v6654_v6, %v6653_v35 }
0x2045   :  { %v10733_v57 = vpop.f32.mrf.mxu0 }
0x2046   :  { %v6657_v46 = vsel %vm1401_vm8, %v6656_v44, %v6655_v36  ;;  %v6777_v36 = vld [vmem:[%s16186_s9 + $0x4] sm:$0x4] }
0x205d   :  { %v6570_v4 = vpop.f32.mrf.mxu1 }
0x205e   :  { %v6622_v55 = vpack.c.bf16 %v6570_v4, %v6570_v4 }
0x205f   :  { %v10752_v32 = vpop.f32.mrf.mxu1  ;;  %v6610_v39 = vpop.f32.mrf.mxu0 }
0x2060   :  { %v6646_v61 = vunpack.c.l.b16 %v6622_v55  ;;  %v6623_v26 = vpack.c.bf16 %v6610_v39, %v6610_v39 }
0x2061   :  { %v6573_v34 = vpop.f32.mrf.mxu1  ;;  %v10772_v19 = vpop.f32.mrf.mxu0 }
0x2062   :  { %v6658_v37 = vrot.slane %v6646_v61, 2  ;;  %v6647_v47 = vunpack.c.l.b16 %v6623_v26  ;;  %v6780_v61 = vld [vmem:[%s16186_s9 + $0x8] sm:$0x4]  ;;  %v6786_v26 = vld [vmem:[%s16186_s9 + $0x10] sm:$0x4] }
0x2063   :  { %v10753_v10 = vpop.f32.mrf.mxu1  ;;  %v6613_v5 = vpop.f32.mrf.mxu0 }
0x2064   :  { %v6659_v17 = vsel %vm1404_vm9, %v6658_v37, %v6657_v46  ;;  %v6660_v9 = vrot.slane %v6647_v47, 1  ;;  %v6783_v46 = vld [vmem:[%s16186_s9 + $0xc] sm:$0x4]  ;;  %v6789_v10 = vld [vmem:[%s16186_s9 + $0x14] sm:$0x4] }
0x2065   :  { %v10773_v54 = vpop.f32.mrf.mxu0 }
0x2066   :  { %v6661_v48 = vsel %vm1407_vm10, %v6660_v9, %v6659_v17 }
0x2067   :  { %v6662_v63 = vpack.c.b16 %v6661_v48, %v6661_v48  ;;  %v6880_v40 = vpop.f32.mrf.mxu0 }
0x2068   :  { %v15485_v11 = vadd.f32 %v11619_v1, %v6880_v40  ;;  %v6795_v1 = vld [vmem:[%s16186_s9 + $0x1c] sm:$0x4] }
0x2069   :  { %v6665_v31 = vsel %vm295_vm2, %v6662_v63, %v14942_v42  ;;  %10779 = vmatmul.mubr.msk.bf16.vlgmr.msra.gmra.mxu1 %vm295_vm2, %v6662_v63  ;;  %v10788_v51 = vpop.f32.mrf.mxu0 }
0x206a   :  { %v6673_v62 = vrot.slane %v6665_v31, %v16465_v50  ;;  %6894 = vrot.lane.b32.xlu1 %v15485_v11, %s11688_s25  ;;  %10791 = vmatpush3.bf16.xpose.msra.mxu1 %v16456_v15 }
0x206b   :  { %v6883_v57 = vpop.f32.mrf.mxu0  ;;  %10792 = vmatprep.subr.bf16.mxu1 %v16439_v38  ;;  %10806 = vmatprep.mubr.msk.bf16.mxu1 %vm11686_vm0, %v16439_v38 }
0x206c   :  { %v6674_v52 = vcombine.high %v6673_v62, %v6673_v62  ;;  %v6681_v41 = vrot.slane %v6673_v62, %v16465_v50 }
0x206d   :  { %v10789_v42 = vpop.f32.mrf.mxu0 }
0x206e   :  { %v6688_v45 = vrot.slane %v6674_v52, %v16465_v50  ;;  %v6689_v43 = vcombine.high %v6681_v41, %v6681_v41  ;;  %v6692_v14 = vunpack.i.h.s16 %v6681_v41  ;;  %v8153_v59 = vpack.i.b16 %v6681_v41, %v6681_v41 }
0x2070   :  { %v6690_v49 = vcombine.high %v6688_v45, %v6688_v45  ;;  %v6694_v58 = vunpack.i.h.s16 %v6688_v45  ;;  %v6696_v15 = vunpack.i.h.s16 %v6689_v43  ;;  %v6700_v0 = vpack.i.b16 %v6692_v14, %v6692_v14 }
0x2071   :  { %v8154_v6 = vpack.i.b16 %v6688_v45, %v6688_v45  ;;  %v8155_v4 = vpack.i.b16 %v6689_v43, %v6689_v43  ;;  %v6713_v55 = vrot.slane %v8153_v59, %v12844_v53 }
0x2072   :  { %v6698_v35 = vunpack.i.h.s16 %v6690_v49  ;;  %v6702_v44 = vpack.i.b16 %v6694_v58, %v6694_v58  ;;  %v6704_v32 = vpack.i.b16 %v6696_v15, %v6696_v15  ;;  %v8156_v39 = vpack.i.b16 %v6690_v49, %v6690_v49  ;;  %10793 = vmatpush3.bf16.xpose.msra.mxu1 %v16457_v22  ;;  %v6792_v22 = vld [vmem:[%s16186_s9 + $0x18] sm:$0x4] }
0x2073   :  { %v6720_v34 = vrot.slane %v6700_v0, %v12844_v53  ;;  %v6727_v19 = vrot.slane %v8154_v6, %v12844_v53  ;;  %v6741_v37 = vrot.slane %v8155_v4, %v12844_v53  ;;  %v6775_v47 = vsel %vm15500_vm1, %v6713_v55, %v6774_v29  ;;  %10794 = vmatprep.subr.bf16.mxu1 %v16439_v38 }
0x2074   :  { %v6706_v5 = vpack.i.b16 %v6698_v35, %v6698_v35  ;;  %v6734_v17 = vrot.slane %v6702_v44, %v12844_v53  ;;  %v6748_v9 = vrot.slane %v6704_v32, %v12844_v53  ;;  %v6755_v54 = vrot.slane %v8156_v39, %v12844_v53  ;;  %6776 = vst [vmem:[%s16186_s9] sm:$0x4] %v6775_v47 }
0x2075   :  { %v6778_v48 = vsel %vm15500_vm1, %v6720_v34, %v6777_v36  ;;  %v6781_v63 = vsel %vm15500_vm1, %v6727_v19, %v6780_v61  ;;  %v6787_v40 = vsel %vm15500_vm1, %v6741_v37, %v6786_v26 }
0x2076   :  { %v6762_v31 = vrot.slane %v6706_v5, %v12844_v53  ;;  %6779 = vst [vmem:[%s16186_s9 + $0x4] sm:$0x4] %v6778_v48  ;;  %6782 = vst [vmem:[%s16186_s9 + $0x8] sm:$0x4] %v6781_v63  ;;  %v6784_v51 = vsel %vm15500_vm1, %v6734_v17, %v6783_v46  ;;  %v6790_v62 = vsel %vm15500_vm1, %v6748_v9, %v6789_v10 }
0x2077   :  { %6788 = vst [vmem:[%s16186_s9 + $0x10] sm:$0x4] %v6787_v40  ;;  %v6793_v57 = vsel %vm15500_vm1, %v6755_v54, %v6792_v22  ;;  %6785 = vst [vmem:[%s16186_s9 + $0xc] sm:$0x4] %v6784_v51 }
0x2078   :  { %6791 = vst [vmem:[%s16186_s9 + $0x14] sm:$0x4] %v6790_v62  ;;  %6794 = vst [vmem:[%s16186_s9 + $0x18] sm:$0x4] %v6793_v57  ;;  %v6796_v52 = vsel %vm15500_vm1, %v6762_v31, %v6795_v1 }
0x2079   :  { %6797 = vst [vmem:[%s16186_s9 + $0x1c] sm:$0x4] %v6796_v52 }
0x207a   :  { %10795 = vmatpush3.bf16.xpose.msra.mxu1 %v16458_v24  ;;  %v11620_v24 = vld [vmem:[%s16182_s6] ss:$0 sm:$0xff] }
0x207b   :  { %10796 = vmatprep.subr.bf16.mxu1 %v16439_v38 }
0x2082   :  { %10797 = vmatpush3.bf16.xpose.msra.mxu1 %v16459_v30  ;;  %v16657_v30 = vld [vmem:[#allocation42_spill] sm:$0xff] }
0x2083   :  { %10798 = vmatprep.subr.bf16.mxu1 %v16439_v38 }
0x208a   :  { %10799 = vmatpush3.bf16.xpose.msra.mxu1 %v16460_v18  ;;  %v132_v18 = vadd.f32 %v11620_v24, %v16657_v30 }
0x208b   :  { %10800 = vmatprep.subr.bf16.mxu1 %v16439_v38 }
0x2092   :  { %10801 = vmatpush3.bf16.xpose.msra.mxu1 %v16461_v28 }
0x2093   :  { %10802 = vmatprep.subr.bf16.mxu1 %v16439_v38 }
0x209a   :  { %10803 = vmatpush3.bf16.xpose.msra.mxu1 %v16462_v12 }
0x209b   :  { %10804 = vmatprep.subr.bf16.mxu1 %v16439_v38 }
0x20a2   :  { %10805 = vmatpush3.bf16.xpose.msra.mxu1 %v16463_v33 }
0x20a3   :  { %10830 = vmatprep.subr.bf16.mxu1 %v16439_v38 }
0x20dc   :  { %v6895_v58 = vpop.permute.xlu1 %6894 }
0x2129   :  { %v6834_v41 = vpop.f32.mrf.mxu1 }
0x212a   :  { %v6840_v42 = vadd.f32 %v6834_v41, %v132_v18  ;;  %v16667_v18 = vld [vmem:[#allocation47_spill] sm:$0xff]  ;;  %v16668_v41 = vld [vmem:[#allocation48_spill] sm:$0xff] }
0x212b   :  { %v10780_v45 = vpop.f32.mrf.mxu1 }
0x212c   :  { %v6886_v28 = vadd.f32 %v15485_v11, %v6840_v42  ;;  %v16670_v45 = vld [vmem:[#allocation50_spill] sm:$0xff] }
0x212d   :  { %v6837_v43 = vpop.f32.mrf.mxu1 }
0x212e   :  { %v8159_v14 = vmul.f32 -1.442695, %v6886_v28  ;;  %v16671_v28 = vld [vmem:[#allocation51_spill] sm:$0xff]  ;;  %v16672_v43 = vld [vmem:[#allocation52_spill] sm:$0xff] }
0x212f   :  { %v10781_v12 = vpop.f32.mrf.mxu1 }
0x2130   :  { %11311 = vpow2.f32 %v8159_v14  ;;  %v16673_v14 = vld [vmem:[#allocation53_spill] sm:$0xff]  ;;  %v16674_v12 = vld [vmem:[#allocation54_spill] sm:$0xff] }
0x213d   :  { %v11312_v59 = vpop.eup %11311 }
0x213e   :  { %v6890_v49 = vadd.f32 1.0, %v11312_v59  ;;  %v16675_v59 = vld [vmem:[#allocation55_spill] sm:$0xff] }
0x2140   :  { %11313 = vrcp.f32 %v6890_v49  ;;  %v16676_v49 = vld [vmem:[#allocation56_spill] sm:$0xff] }
0x214d   :  { %v11314_v33 = vpop.eup %11313 }
0x214e   :  { %v6897_v15 = vmul.f32 %v11314_v33, %v6895_v58  ;;  %v6904_v6 = vsub.f32 1.0, %v11314_v33  ;;  %v6910_v4 = vmul.f32 %v11314_v33, %v14938_v13  ;;  %v16677_v33 = vld [vmem:[#allocation57_spill] sm:$0xff]  ;;  %v16678_v58 = vld [vmem:[#allocation58_spill] sm:$0xff] }
0x2150   :  { %6899 = vrot.lane.b32.xlu0 %v6897_v15, %s11688_s25  ;;  %v16679_v15 = vld [vmem:[#allocation59_spill] sm:$0xff] }
0x21c2   :  { %v6900_v0 = vpop.permute.xlu0 %6899 }
0x21c3   :  { %v6902_v21 = vadd.f32 %v6900_v0, %v6840_v42  ;;  %v16669_v42 = vld [vmem:[#allocation49_spill] sm:$0xff] }
0x21c5   :  { %11315 = vtanh.f32 %v6902_v21 }
0x21d2   :  { %v11316_v29 = vpop.eup %11315 }
0x21d3   :  { %6906 = vrot.lane.b32.xlu1 %v11316_v29, %s11689_s26  ;;  %v16680_v29 = vld [vmem:[#allocation62_spill] sm:$0xff] }
0x2245   :  { %v6907_v11 = vpop.permute.xlu1 %6906 }
0x2246   :  { %v6909_v55 = vmul.f32 %v6907_v11, %v6904_v6  ;;  %v16681_v6 = vld [vmem:[#allocation63_spill] sm:$0xff]  ;;  %v16682_v11 = vld [vmem:[#allocation66_spill] sm:$0xff] }
0x2248   :  { %v6911_v35 = vadd.f32 %v6910_v4, %v6909_v55  ;;  %v16683_v4 = vld [vmem:[#allocation67_spill] sm:$0xff]  ;;  %v16684_v55 = vld [vmem:[#allocation70_spill] sm:$0xff] }
0x224a   :  { %v15598_v44 = vpack.c.bf16 %v6911_v35, %v6911_v35  ;;  %v16685_v35 = vld [vmem:[#allocation71_spill] sm:$0xff] }
0x224c   :  { %v6920_v32 = vrot.slane %v15598_v44, %v16465_v50 }
0x224e   :  { %v6921_v39 = vcombine.high %v6920_v32, %v6920_v32  ;;  %v6928_v36 = vrot.slane %v6920_v32, %v16465_v50  ;;  %v16686_v32 = vld [vmem:[#allocation74_spill] sm:$0xff] }
0x2250   :  { %v6935_v61 = vrot.slane %v6921_v39, %v16465_v50  ;;  %v8160_v26 = vpack.i.b16 %v6928_v36, %v6928_v36  ;;  %v6939_v34 = vunpack.i.h.s16 %v6928_v36  ;;  %v6936_v19 = vcombine.high %v6928_v36, %v6928_v36  ;;  %v16687_v39 = vld [vmem:[#allocation75_spill] sm:$0xff]  ;;  %v16688_v36 = vld [vmem:[#allocation78_spill] sm:$0xff] }
0x2252   :  { %v6950_v37 = vrot.slane %v8160_v26, %v16479_v2  ;;  %v6996_v47 = vpack.i.b16 %v6939_v34, %v6939_v34  ;;  %v8163_v46 = vpack.i.b16 %v6935_v61, %v6935_v61  ;;  %v6941_v13 = vunpack.i.h.s16 %v6935_v61  ;;  %v16690_v26 = vld [vmem:[#allocation82_spill] sm:$0xff]  ;;  %v16691_v34 = vld [vmem:[#allocation83_spill] sm:$0xff] }
0x2253   :  { %v6943_v5 = vunpack.i.h.s16 %v6936_v19  ;;  %v6937_v17 = vcombine.high %v6935_v61, %v6935_v61  ;;  %v8166_v54 = vpack.i.b16 %v6936_v19, %v6936_v19  ;;  %v16689_v61 = vld [vmem:[#allocation79_spill] sm:$0xff]  ;;  %v16692_v19 = vld [vmem:[#allocation86_spill] sm:$0xff] }
0x2254   :  { %6951 = vrot.lane.b32.xlu0 %v6950_v37, %s11689_s26  ;;  %v7000_v10 = vrot.slane %v6996_v47, %v16479_v2  ;;  %v7096_v22 = vpack.i.b16 %v6941_v13, %v6941_v13  ;;  %v7050_v9 = vrot.slane %v8163_v46, %v16479_v2  ;;  %v16693_v37 = vld [vmem:[#allocation87_spill] sm:$0xff]  ;;  %v16694_v47 = vld [vmem:[#allocation90_spill] sm:$0xff] }
0x2255   :  { %v7196_v63 = vpack.i.b16 %v6943_v5, %v6943_v5  ;;  %v6945_v40 = vunpack.i.h.s16 %v6937_v17  ;;  %v7150_v1 = vrot.slane %v8166_v54, %v16479_v2  ;;  %v8169_v31 = vpack.i.b16 %v6937_v17, %v6937_v17  ;;  %v16695_v46 = vld [vmem:[#allocation91_spill] sm:$0xff]  ;;  %v11621_v5 = vld [vmem:[%s16184_s1 + $0x38] sm:$0xff]  }
0x2256   :  { %7001 = vrot.lane.b32.xlu1 %v7000_v10, %s11689_s26  ;;  %v7100_v48 = vrot.slane %v7096_v22, %v16479_v2  ;;  %v11622_v54 = vld [vmem:[%s16184_s1 + $0x78] sm:$0xff]  }
0x2257   :  { %v7200_v51 = vrot.slane %v7196_v63, %v16479_v2  ;;  %v7296_v62 = vpack.i.b16 %v6945_v40, %v6945_v40  ;;  %v7250_v57 = vrot.slane %v8169_v31, %v16479_v2  ;;  %v11623_v40 = vld [vmem:[%s16184_s1 + $0x30] sm:$0xff]  }
0x2258   :  { %7051 = vrot.lane.b32.xlu0 %v7050_v9, %s11689_s26 }
0x2259   :  { %v7300_v52 = vrot.slane %v7296_v62, %v16479_v2  ;;  %v16658_v2 = vld [vmem:[#allocation34_spill] sm:$0xff] }
0x225a   :  { %7101 = vrot.lane.b32.xlu1 %v7100_v48, %s11689_s26 }
0x225c   :  { %7151 = vrot.lane.b32.xlu0 %v7150_v1, %s11689_s26 }
0x225e   :  { %7201 = vrot.lane.b32.xlu1 %v7200_v51, %s11689_s26  ;;  %v11624_v51 = vld [vmem:[%s16184_s1 + $0x70] sm:$0xff]  }
0x2260   :  { %7251 = vrot.lane.b32.xlu0 %v7250_v57, %s11689_s26  ;;  %v11625_v57 = vld [vmem:[%s16184_s1 + $0x28] sm:$0xff]  }
0x2262   :  { %7301 = vrot.lane.b32.xlu1 %v7300_v52, %s11689_s26  ;;  %v11626_v52 = vld [vmem:[%s16184_s1 + $0x68] sm:$0xff]  }
0x22c6   :  { %v6952_v24 = vpop.permute.xlu0 %6951 }
0x22c7   :  { %10807 = vmatmul.mubr.msk.bf16.vlgmr.msra.gmra.mxu1 %vm295_vm2, %v6952_v24  ;;  %v11627_v24 = vld [vmem:[%s16184_s1 + $0x20] sm:$0xff]  }
0x22c8   :  { %10831 = vmatpush3.bf16.xpose.msra.mxu1 %v16480_v25  ;;  %v7002_v30 = vpop.permute.xlu1 %7001  ;;  %10846 = vmatprep.mubr.msk.bf16.mxu1 %vm11686_vm0, %v16439_v38  ;;  %v16659_v25 = vld [vmem:[#allocation35_spill] sm:$0xff] }
0x22c9   :  { %10827 = vmatmul.mubr.msk.bf16.vlgmr.msra.gmra.mxu0 %vm295_vm2, %v7002_v30  ;;  %10832 = vmatprep.subr.bf16.mxu1 %v16439_v38  ;;  %v11628_v30 = vld [vmem:[%s16184_s1 + $0x60] sm:$0xff]  }
0x22ca   :  { %10851 = vmatpush3.bf16.xpose.msra.mxu0 %v16481_v16  ;;  %10866 = vmatprep.mubr.msk.bf16.mxu0 %vm11686_vm0, %v16439_v38  ;;  %v16660_v16 = vld [vmem:[#allocation37_spill] sm:$0xff] }
0x22cb   :  { %10852 = vmatprep.subr.bf16.mxu0 %v16439_v38 }
0x22d0   :  { %10833 = vmatpush3.bf16.xpose.msra.mxu1 %v16482_v3  ;;  %v16661_v3 = vld [vmem:[#allocation39_spill] sm:$0xff] }
0x22d1   :  { %10834 = vmatprep.subr.bf16.mxu1 %v16439_v38 }
0x22d2   :  { %10853 = vmatpush3.bf16.xpose.msra.mxu0 %v16483_v8  ;;  %v16662_v8 = vld [vmem:[#allocation41_spill] sm:$0xff] }
0x22d3   :  { %10854 = vmatprep.subr.bf16.mxu0 %v16439_v38 }
0x22d8   :  { %10835 = vmatpush3.bf16.xpose.msra.mxu1 %v16484_v60  ;;  %v16663_v60 = vld [vmem:[#allocation43_spill] sm:$0xff] }
0x22d9   :  { %10836 = vmatprep.subr.bf16.mxu1 %v16439_v38 }
0x22da   :  { %10855 = vmatpush3.bf16.xpose.msra.mxu0 %v16485_v56  ;;  %v7052_v56 = vpop.permute.xlu0 %7051 }
0x22db   :  { %10856 = vmatprep.subr.bf16.mxu0 %v16439_v38 }
0x22de   :  { %v7152_v0 = vpop.permute.xlu0 %7151 }
0x22e0   :  { %10837 = vmatpush3.bf16.xpose.msra.mxu1 %v16486_v7  ;;  %v7102_v7 = vpop.permute.xlu1 %7101 }
0x22e1   :  { %10838 = vmatprep.subr.bf16.mxu1 %v16439_v38 }
0x22e2   :  { %10857 = vmatpush3.bf16.xpose.msra.mxu0 %v16487_v20  ;;  %v16664_v20 = vld [vmem:[#allocation44_spill] sm:$0xff]  ;;  %v7252_v13 = vpop.permute.xlu0 %7251 }
0x22e3   :  { %10858 = vmatprep.subr.bf16.mxu0 %v16439_v38 }
0x22e4   :  { %v7202_v21 = vpop.permute.xlu1 %7201 }
0x22e8   :  { %10839 = vmatpush3.bf16.xpose.msra.mxu1 %v16488_v23  ;;  %v16665_v23 = vld [vmem:[#allocation45_spill] sm:$0xff]  ;;  %v7302_v22 = vpop.permute.xlu1 %7301 }
0x22e9   :  { %10840 = vmatprep.subr.bf16.mxu1 %v16439_v38 }
0x22ea   :  { %10859 = vmatpush3.bf16.xpose.msra.mxu0 %v16489_v27  ;;  %v16666_v27 = vld [vmem:[#allocation46_spill] sm:$0xff] }
0x22eb   :  { %10860 = vmatprep.subr.bf16.mxu0 %v16439_v38 }
0x22f0   :  { %10841 = vmatpush3.bf16.xpose.msra.mxu1 %v16658_v2  ;;  %v11629_v2 = vld [vmem:[%s16184_s1 + $0x18] sm:$0xff]  }
0x22f1   :  { %10842 = vmatprep.subr.bf16.mxu1 %v16439_v38 }
0x22f2   :  { %10861 = vmatpush3.bf16.xpose.msra.mxu0 %v16659_v25  ;;  %v11630_v25 = vld [vmem:[%s16184_s1 + $0x58] sm:$0xff]  }
0x22f3   :  { %10862 = vmatprep.subr.bf16.mxu0 %v16439_v38 }
0x22f8   :  { %10843 = vmatpush3.bf16.xpose.msra.mxu1 %v16660_v16  ;;  %v11631_v16 = vld [vmem:[%s16184_s1 + $0x10] sm:$0xff]  }
0x22f9   :  { %10844 = vmatprep.subr.bf16.mxu1 %v16439_v38 }
0x22fa   :  { %10863 = vmatpush3.bf16.xpose.msra.mxu0 %v16661_v3  ;;  %v11632_v3 = vld [vmem:[%s16184_s1 + $0x50] sm:$0xff]  }
0x22fb   :  { %10864 = vmatprep.subr.bf16.mxu0 %v16439_v38 }
0x2300   :  { %10845 = vmatpush3.bf16.xpose.msra.mxu1 %v16662_v8  ;;  %v11633_v8 = vld [vmem:[%s16184_s1 + $0x8] sm:$0xff]  }
0x2301   :  { %10870 = vmatprep.subr.bf16.mxu1 %v16439_v38 }
0x2302   :  { %10865 = vmatpush3.bf16.xpose.msra.mxu0 %v16663_v60  ;;  %v11634_v60 = vld [vmem:[%s16184_s1 + $0x48] sm:$0xff]  }
0x2303   :  { %10890 = vmatprep.subr.bf16.mxu0 %v16439_v38 }
0x2307   :  { %10847 = vmatmul.mubr.msk.bf16.vlgmr.msra.gmra.mxu1 %vm295_vm2, %v7052_v56  ;;  %v11635_v56 = vld [vmem:[%s16184_s1] sm:$0xff]  }
0x2308   :  { %10871 = vmatpush3.bf16.xpose.msra.mxu1 %v16664_v20  ;;  %10886 = vmatprep.mubr.msk.bf16.mxu1 %vm11686_vm0, %v16439_v38 }
0x2309   :  { %10867 = vmatmul.mubr.msk.bf16.vlgmr.msra.gmra.mxu0 %vm295_vm2, %v7102_v7  ;;  %10872 = vmatprep.subr.bf16.mxu1 %v16439_v38  ;;  %v11636_v7 = vld [vmem:[%s16184_s1 + $0x40] sm:$0xff]  }
0x230a   :  { %10891 = vmatpush3.bf16.xpose.msra.mxu0 %v16665_v23  ;;  %10906 = vmatprep.mubr.msk.bf16.mxu0 %vm11686_vm0, %v16439_v38 }
0x230b   :  { %10892 = vmatprep.subr.bf16.mxu0 %v16439_v38 }
0x2310   :  { %10873 = vmatpush3.bf16.xpose.msra.mxu1 %v16666_v27 }
0x2311   :  { %10874 = vmatprep.subr.bf16.mxu1 %v16439_v38 }
0x2312   :  { %10893 = vmatpush3.bf16.xpose.msra.mxu0 %v16667_v18 }
0x2313   :  { %10894 = vmatprep.subr.bf16.mxu0 %v16439_v38 }
0x2318   :  { %10875 = vmatpush3.bf16.xpose.msra.mxu1 %v16668_v41 }
0x2319   :  { %10876 = vmatprep.subr.bf16.mxu1 %v16439_v38 }
0x231a   :  { %10895 = vmatpush3.bf16.xpose.msra.mxu0 %v16669_v42 }
0x231b   :  { %10896 = vmatprep.subr.bf16.mxu0 %v16439_v38 }
0x2320   :  { %10877 = vmatpush3.bf16.xpose.msra.mxu1 %v16670_v45 }
0x2321   :  { %10878 = vmatprep.subr.bf16.mxu1 %v16439_v38 }
0x2322   :  { %10897 = vmatpush3.bf16.xpose.msra.mxu0 %v16671_v28 }
0x2323   :  { %10898 = vmatprep.subr.bf16.mxu0 %v16439_v38 }
0x2328   :  { %10879 = vmatpush3.bf16.xpose.msra.mxu1 %v16672_v43 }
0x2329   :  { %10880 = vmatprep.subr.bf16.mxu1 %v16439_v38 }
0x232a   :  { %10899 = vmatpush3.bf16.xpose.msra.mxu0 %v16673_v14 }
0x232b   :  { %10900 = vmatprep.subr.bf16.mxu0 %v16439_v38 }
0x2330   :  { %10881 = vmatpush3.bf16.xpose.msra.mxu1 %v16674_v12 }
0x2331   :  { %10882 = vmatprep.subr.bf16.mxu1 %v16439_v38 }
0x2332   :  { %10901 = vmatpush3.bf16.xpose.msra.mxu0 %v16675_v59 }
0x2333   :  { %10902 = vmatprep.subr.bf16.mxu0 %v16439_v38 }
0x2338   :  { %10883 = vmatpush3.bf16.xpose.msra.mxu1 %v16676_v49 }
0x2339   :  { %10884 = vmatprep.subr.bf16.mxu1 %v16439_v38 }
0x233a   :  { %10903 = vmatpush3.bf16.xpose.msra.mxu0 %v16677_v33 }
0x233b   :  { %10904 = vmatprep.subr.bf16.mxu0 %v16439_v38 }
0x2340   :  { %10885 = vmatpush3.bf16.xpose.msra.mxu1 %v16678_v58 }
0x2341   :  { %10910 = vmatprep.subr.bf16.mxu1 %v16439_v38 }
0x2342   :  { %10905 = vmatpush3.bf16.xpose.msra.mxu0 %v16679_v15 }
0x2343   :  { %10930 = vmatprep.subr.bf16.mxu0 %v16439_v38 }
0x2347   :  { %10887 = vmatmul.mubr.msk.bf16.vlgmr.msra.gmra.mxu1 %vm295_vm2, %v7152_v0  ;;  %v16696_v0 = vld [vmem:[#allocation92_spill] sm:$0xff] }
0x2348   :  { %10911 = vmatpush3.bf16.xpose.msra.mxu1 %v16680_v29  ;;  %10926 = vmatprep.mubr.msk.bf16.mxu1 %vm11686_vm0, %v16439_v38 }
0x2349   :  { %10907 = vmatmul.mubr.msk.bf16.vlgmr.msra.gmra.mxu0 %vm295_vm2, %v7202_v21  ;;  %10912 = vmatprep.subr.bf16.mxu1 %v16439_v38 }
0x234a   :  { %10931 = vmatpush3.bf16.xpose.msra.mxu0 %v16681_v6  ;;  %10946 = vmatprep.mubr.msk.bf16.mxu0 %vm11686_vm0, %v16439_v38 }
0x234b   :  { %10932 = vmatprep.subr.bf16.mxu0 %v16439_v38 }
0x2350   :  { %10913 = vmatpush3.bf16.xpose.msra.mxu1 %v16682_v11 }
0x2351   :  { %10914 = vmatprep.subr.bf16.mxu1 %v16439_v38 }
0x2352   :  { %10933 = vmatpush3.bf16.xpose.msra.mxu0 %v16683_v4 }
0x2353   :  { %10934 = vmatprep.subr.bf16.mxu0 %v16439_v38 }
0x2358   :  { %10915 = vmatpush3.bf16.xpose.msra.mxu1 %v16684_v55 }
0x2359   :  { %10916 = vmatprep.subr.bf16.mxu1 %v16439_v38 }
0x235a   :  { %10935 = vmatpush3.bf16.xpose.msra.mxu0 %v16685_v35 }
0x235b   :  { %10936 = vmatprep.subr.bf16.mxu0 %v16439_v38 }
0x2360   :  { %10917 = vmatpush3.bf16.xpose.msra.mxu1 %v16686_v32 }
0x2361   :  { %10918 = vmatprep.subr.bf16.mxu1 %v16439_v38 }
0x2362   :  { %10937 = vmatpush3.bf16.xpose.msra.mxu0 %v16687_v39 }
0x2363   :  { %10938 = vmatprep.subr.bf16.mxu0 %v16439_v38 }
0x2368   :  { %10919 = vmatpush3.bf16.xpose.msra.mxu1 %v16688_v36 }
0x2369   :  { %10920 = vmatprep.subr.bf16.mxu1 %v16439_v38 }
0x236a   :  { %10939 = vmatpush3.bf16.xpose.msra.mxu0 %v16689_v61 }
0x236b   :  { %10940 = vmatprep.subr.bf16.mxu0 %v16439_v38 }
0x2370   :  { %10921 = vmatpush3.bf16.xpose.msra.mxu1 %v16690_v26 }
0x2371   :  { %10922 = vmatprep.subr.bf16.mxu1 %v16439_v38 }
0x2372   :  { %10941 = vmatpush3.bf16.xpose.msra.mxu0 %v16691_v34 }
0x2373   :  { %10942 = vmatprep.subr.bf16.mxu0 %v16439_v38 }
0x2378   :  { %10923 = vmatpush3.bf16.xpose.msra.mxu1 %v16692_v19 }
0x2379   :  { %10924 = vmatprep.subr.bf16.mxu1 %v16439_v38 }
0x237a   :  { %10943 = vmatpush3.bf16.xpose.msra.mxu0 %v16693_v37 }
0x237b   :  { %10944 = vmatprep.subr.bf16.mxu0 %v16439_v38 }
0x2380   :  { %10925 = vmatpush3.bf16.xpose.msra.mxu1 %v16694_v47 }
0x2381   :  { %10950 = vmatprep.subr.bf16.mxu1 %v16439_v38 }
0x2382   :  { %10945 = vmatpush3.bf16.xpose.msra.mxu0 %v16695_v46 }
0x2383   :  { %10970 = vmatprep.subr.bf16.mxu0 %v16439_v38 }
0x2387   :  { %10927 = vmatmul.mubr.msk.bf16.vlgmr.msra.gmra.mxu1 %vm295_vm2, %v7252_v13  ;;  %v15735_v10 = vpop.f32.mrf.mxu1 }
0x2388   :  { %10951 = vmatpush3.bf16.msra.mxu1 %v11621_v5  ;;  %10966 = vmatprep.mubr.msk.bf16.mxu1 %vm11686_vm0, %v16439_v38  ;;  %v7346_v35 = vadd.f32 %v15735_v10, %v16696_v0 }
0x2389   :  { %10947 = vmatmul.mubr.msk.bf16.vlgmr.msra.gmra.mxu0 %vm295_vm2, %v7302_v22  ;;  %v10808_v17 = vpop.f32.mrf.mxu1  ;;  %v15743_v9 = vpop.f32.mrf.mxu0  ;;  %10952 = vmatprep.subr.bf16.mxu1 %v16439_v38 }
0x238a   :  { %10971 = vmatpush3.bf16.msra.mxu0 %v11622_v54  ;;  %10986 = vmatprep.mubr.msk.bf16.mxu0 %vm11686_vm0, %v16439_v38  ;;  %v7347_v21 = vadd.f32 %v15743_v9, %v16696_v0 }
0x238b   :  { %v6993_v48 = vpop.f32.mrf.mxu1  ;;  %v10828_v63 = vpop.f32.mrf.mxu0  ;;  %10972 = vmatprep.subr.bf16.mxu0 %v16439_v38 }
0x238c   :  { %10953 = vmatpush3.bf16.msra.mxu1 %v11623_v40  ;;  %v7362_v6 = vrot.slane %v7347_v21, 7 }
0x238d   :  { %v10809_v1 = vpop.f32.mrf.mxu1  ;;  %v7043_v31 = vpop.f32.mrf.mxu0  ;;  %10954 = vmatprep.subr.bf16.mxu1 %v16439_v38 }
0x238e   :  { %10973 = vmatpush3.bf16.msra.mxu0 %v11624_v51  ;;  %v7363_v32 = vsel %vm1389_vm4, %v7362_v6, %v7346_v35 }
0x238f   :  { %v10829_v62 = vpop.f32.mrf.mxu0  ;;  %10974 = vmatprep.subr.bf16.mxu0 %v16439_v38 }
0x2390   :  { %10955 = vmatpush3.bf16.msra.mxu1 %v11625_v57 }
0x2391   :  { %10956 = vmatprep.subr.bf16.mxu1 %v16439_v38 }
0x2392   :  { %10975 = vmatpush3.bf16.msra.mxu0 %v11626_v52 }
0x2393   :  { %10976 = vmatprep.subr.bf16.mxu0 %v16439_v38 }
0x2394   :  { %10957 = vmatpush3.bf16.msra.mxu1 %v11627_v24 }
0x2395   :  { %10958 = vmatprep.subr.bf16.mxu1 %v16439_v38 }
0x2396   :  { %10977 = vmatpush3.bf16.msra.mxu0 %v11628_v30 }
0x2397   :  { %10978 = vmatprep.subr.bf16.mxu0 %v16439_v38 }
0x2398   :  { %10959 = vmatpush3.bf16.msra.mxu1 %v11629_v2 }
0x2399   :  { %10960 = vmatprep.subr.bf16.mxu1 %v16439_v38 }
0x239a   :  { %10979 = vmatpush3.bf16.msra.mxu0 %v11630_v25 }
0x239b   :  { %10980 = vmatprep.subr.bf16.mxu0 %v16439_v38 }
0x239c   :  { %10961 = vmatpush3.bf16.msra.mxu1 %v11631_v16 }
0x239d   :  { %10962 = vmatprep.subr.bf16.mxu1 %v16439_v38 }
0x239e   :  { %10981 = vmatpush3.bf16.msra.mxu0 %v11632_v3 }
0x239f   :  { %10982 = vmatprep.subr.bf16.mxu0 %v16439_v38 }
0x23a0   :  { %10963 = vmatpush3.bf16.msra.mxu1 %v11633_v8 }
0x23a1   :  { %10964 = vmatprep.subr.bf16.mxu1 %v16439_v38 }
0x23a2   :  { %10983 = vmatpush3.bf16.msra.mxu0 %v11634_v60 }
0x23a3   :  { %10984 = vmatprep.subr.bf16.mxu0 %v16439_v38 }
0x23a4   :  { %10965 = vmatpush3.bf16.msra.mxu1 %v11635_v56 }
0x23a5   :  { %10990 = vmatprep.subr.bf16.mxu1 %v16439_v38 }
0x23a6   :  { %10985 = vmatpush3.bf16.msra.mxu0 %v11636_v7 }
0x23a7   :  { %11010 = vmatprep.subr.bf16.mxu0 %v16439_v38 }
0x23c7   :  { %v7090_v20 = vpop.f32.mrf.mxu1 }
0x23c8   :  { %v7348_v29 = vadd.f32 %v7090_v20, %v16696_v0 }
0x23c9   :  { %v10848_v23 = vpop.f32.mrf.mxu1  ;;  %v7140_v27 = vpop.f32.mrf.mxu0 }
0x23ca   :  { %v7349_v11 = vadd.f32 %v7140_v27, %v16696_v0  ;;  %v7364_v4 = vrot.slane %v7348_v29, 6 }
0x23cb   :  { %v7093_v18 = vpop.f32.mrf.mxu1  ;;  %v10868_v41 = vpop.f32.mrf.mxu0 }
0x23cc   :  { %v7366_v39 = vrot.slane %v7349_v11, 5  ;;  %v7365_v61 = vsel %vm1392_vm5, %v7364_v4, %v7363_v32 }
0x23cd   :  { %v10849_v42 = vpop.f32.mrf.mxu1  ;;  %v7143_v45 = vpop.f32.mrf.mxu0 }
0x23ce   :  { %v7367_v34 = vsel %vm1395_vm6, %v7366_v39, %v7365_v61 }
0x23cf   :  { %v10869_v28 = vpop.f32.mrf.mxu0 }
0x2407   :  { %v7190_v43 = vpop.f32.mrf.mxu1 }
0x2408   :  { %v7350_v55 = vadd.f32 %v7190_v43, %v16696_v0 }
0x2409   :  { %v10888_v14 = vpop.f32.mrf.mxu1  ;;  %v7240_v12 = vpop.f32.mrf.mxu0 }
0x240a   :  { %v7351_v36 = vadd.f32 %v7240_v12, %v16696_v0  ;;  %v7368_v26 = vrot.slane %v7350_v55, 4 }
0x240b   :  { %v7193_v59 = vpop.f32.mrf.mxu1  ;;  %v10908_v49 = vpop.f32.mrf.mxu0 }
0x240c   :  { %v7370_v19 = vrot.slane %v7351_v36, 3  ;;  %v7369_v47 = vsel %vm1398_vm7, %v7368_v26, %v7367_v34 }
0x240d   :  { %v10889_v33 = vpop.f32.mrf.mxu1  ;;  %v7243_v58 = vpop.f32.mrf.mxu0 }
0x240e   :  { %v7371_v54 = vsel %vm1401_vm8, %v7370_v19, %v7369_v47 }
0x240f   :  { %v10909_v15 = vpop.f32.mrf.mxu0 }
0x2447   :  { %v7290_v37 = vpop.f32.mrf.mxu1 }
0x2448   :  { %v7352_v46 = vadd.f32 %v7290_v37, %v16696_v0 }
0x2449   :  { %v10928_v13 = vpop.f32.mrf.mxu1  ;;  %v7340_v22 = vpop.f32.mrf.mxu0 }
0x244a   :  { %v7372_v5 = vrot.slane %v7352_v46, 2  ;;  %v7353_v10 = vadd.f32 %v7340_v22, %v16696_v0 }
0x244b   :  { %v7293_v17 = vpop.f32.mrf.mxu1  ;;  %v10948_v9 = vpop.f32.mrf.mxu0 }
0x244c   :  { %v7374_v48 = vrot.slane %v7353_v10, 1  ;;  %v7373_v63 = vsel %vm1404_vm9, %v7372_v5, %v7371_v54 }
0x244d   :  { %v10929_v40 = vpop.f32.mrf.mxu1  ;;  %v7343_v1 = vpop.f32.mrf.mxu0 }
0x244e   :  { %v7375_v31 = vsel %vm1407_vm10, %v7374_v48, %v7373_v63 }
0x244f   :  { %7377 = vmax.xlane.f32.xlu0 %v7375_v31  ;;  %v10949_v51 = vpop.f32.mrf.mxu0 }
0x24d8   :  { %v7378_v62 = vpop.xlane.xlu0 %7377 }
0x24d9   :  { %v7380_v57 = vrot.slane %v7378_v62, 1  ;;  %v7381_v52 = vrot.slane %v7378_v62, 2  ;;  %v7382_v24 = vrot.slane %v7378_v62, 3  ;;  %v7383_v30 = vrot.slane %v7378_v62, 4 }
0x24da   :  { %v7384_v2 = vrot.slane %v7378_v62, 5  ;;  %v7385_v25 = vrot.slane %v7378_v62, 6  ;;  %v7386_v16 = vrot.slane %v7378_v62, 7  ;;  %v7395_v3 = vsub.f32 %v7346_v35, %v7378_v62 }
0x24db   :  { %v7396_v8 = vsub.f32 %v7347_v21, %v7380_v57  ;;  %v7397_v60 = vsub.f32 %v7348_v29, %v7381_v52  ;;  %v7398_v56 = vsub.f32 %v7349_v11, %v7382_v24  ;;  %v7399_v7 = vsub.f32 %v7350_v55, %v7383_v30 }
0x24dc   :  { %v7400_v20 = vsub.f32 %v7351_v36, %v7384_v2  ;;  %v7401_v23 = vsub.f32 %v7352_v46, %v7385_v25  ;;  %v7403_v27 = vmul.f32 1.442695, %v7395_v3  ;;  %v7402_v18 = vsub.f32 %v7353_v10, %v7386_v16  ;;  %v11637_v2 = vld [vmem:[%s16184_s1 + $0xb8] sm:$0xff]   ;;  %v11639_v16 = vld [vmem:[%s16184_s1 + $0xb0] sm:$0xff]  }
0x24dd   :  { %v7405_v41 = vmul.f32 1.442695, %v7396_v8  ;;  %v7407_v42 = vmul.f32 1.442695, %v7397_v60  ;;  %v7409_v45 = vmul.f32 1.442695, %v7398_v56 }
0x24de   :  { %11317 = vpow2.f32 %v7403_v27  ;;  %v7411_v28 = vmul.f32 1.442695, %v7399_v7  ;;  %v7413_v43 = vmul.f32 1.442695, %v7400_v20  ;;  %v7415_v14 = vmul.f32 1.442695, %v7401_v23 }
0x24df   :  { %11319 = vpow2.f32 %v7405_v41  ;;  %v7417_v12 = vmul.f32 1.442695, %v7402_v18  ;;  %v11638_v25 = vld [vmem:[%s16184_s1 + $0xf8] sm:$0xff]   ;;  %v11640_v3 = vld [vmem:[%s16184_s1 + $0xf0] sm:$0xff]   ;;  %v11641_v8 = vld [vmem:[%s16184_s1 + $0xa8] sm:$0xff]  }
0x24e0   :  { %11321 = vpow2.f32 %v7407_v42  ;;  %v11642_v60 = vld [vmem:[%s16184_s1 + $0xe8] sm:$0xff]   ;;  %v11643_v56 = vld [vmem:[%s16184_s1 + $0xa0] sm:$0xff]   ;;  %v11645_v20 = vld [vmem:[%s16184_s1 + $0x98] sm:$0xff]  }
0x24e1   :  { %11323 = vpow2.f32 %v7409_v45  ;;  %v11644_v7 = vld [vmem:[%s16184_s1 + $0xe0] sm:$0xff]   ;;  %v11646_v23 = vld [vmem:[%s16184_s1 + $0xd8] sm:$0xff]   ;;  %v11647_v27 = vld [vmem:[%s16184_s1 + $0x90] sm:$0xff]  }
0x24e2   :  { %11325 = vpow2.f32 %v7411_v28  ;;  %v11648_v18 = vld [vmem:[%s16184_s1 + $0xd0] sm:$0xff]   ;;  %v11649_v41 = vld [vmem:[%s16184_s1 + $0x88] sm:$0xff]   ;;  %v11651_v45 = vld [vmem:[%s16184_s1 + $0x80] sm:$0xff]  }
0x24e3   :  { %11327 = vpow2.f32 %v7413_v43  ;;  %v11650_v42 = vld [vmem:[%s16184_s1 + $0xc8] sm:$0xff]   ;;  %v11652_v43 = vld [vmem:[%s16184_s1 + $0xc0] sm:$0xff]  }
0x24e4   :  { %11329 = vpow2.f32 %v7415_v14 }
0x24e5   :  { %11331 = vpow2.f32 %v7417_v12  ;;  %v11653_v12 = vld [vmem:[%s16184_s1 + $0x138] sm:$0xff]  }
0x24eb   :  { %v11318_v59 = vpop.eup %11317 }
0x24ec   :  { %v11320_v49 = vpop.eup %11319 }
0x24ed   :  { %v11322_v33 = vpop.eup %11321  ;;  %v7427_v58 = vrot.slane %v11320_v49, 7 }
0x24ee   :  { %v11324_v15 = vpop.eup %11323  ;;  %v7429_v0 = vrot.slane %v11322_v33, 6 }
0x24ef   :  { %v11326_v21 = vpop.eup %11325  ;;  %v7428_v29 = vsel %vm1389_vm4, %v7427_v58, %v11318_v59  ;;  %v7431_v6 = vrot.slane %v11324_v15, 5  ;;  %v11657_v58 = vld [vmem:[%s16184_s1 + $0x128] sm:$0xff]  }
0x24f0   :  { %v11328_v11 = vpop.eup %11327  ;;  %v7430_v4 = vsel %vm1392_vm5, %v7429_v0, %v7428_v29  ;;  %v7433_v55 = vrot.slane %v11326_v21, 4  ;;  %v11659_v0 = vld [vmem:[%s16184_s1 + $0x120] sm:$0xff]   ;;  %v11661_v29 = vld [vmem:[%s16184_s1 + $0x118] sm:$0xff]  }
0x24f1   :  { %v11330_v35 = vpop.eup %11329  ;;  %v7432_v32 = vsel %vm1395_vm6, %v7431_v6, %v7430_v4  ;;  %v7435_v39 = vrot.slane %v11328_v11, 3  ;;  %v11662_v6 = vld [vmem:[%s16184_s1 + $0x158] sm:$0xff]   ;;  %v11664_v4 = vld [vmem:[%s16184_s1 + $0x150] sm:$0xff]  }
0x24f2   :  { %v11332_v36 = vpop.eup %11331  ;;  %v7434_v61 = vsel %vm1398_vm7, %v7433_v55, %v7432_v32  ;;  %v7437_v26 = vrot.slane %v11330_v35, 2  ;;  %v11665_v55 = vld [vmem:[%s16184_s1 + $0x108] sm:$0xff]   ;;  %v11667_v32 = vld [vmem:[%s16184_s1 + $0x100] sm:$0xff]  }
0x24f3   :  { %v7436_v34 = vsel %vm1401_vm8, %v7435_v39, %v7434_v61  ;;  %v7439_v19 = vrot.slane %v11332_v36, 1 }
0x24f4   :  { %v7438_v37 = vsel %vm1404_vm9, %v7437_v26, %v7436_v34  ;;  %v11669_v26 = vld [vmem:[%s16184_s1 + $0x1b8] sm:$0xff]  }
0x24f5   :  { %v7440_v47 = vsel %vm1407_vm10, %v7439_v19, %v7438_v37  ;;  %v11670_v34 = vld [vmem:[%s16184_s1 + $0x1f8] sm:$0xff]   ;;  %v11671_v19 = vld [vmem:[%s16184_s1 + $0x1b0] sm:$0xff]  }
0x24f6   :  { %7442 = vadd.xlane.f32.xlu1 %v7440_v47  ;;  %v11672_v37 = vld [vmem:[%s16184_s1 + $0x1f0] sm:$0xff]   ;;  %v11673_v47 = vld [vmem:[%s16184_s1 + $0x1a8] sm:$0xff]  }
0x257f   :  { %v7443_v46 = vpop.xlane.xlu1 %7442 }
0x2580   :  { %11333 = vrcp.f32 %v7443_v46  ;;  %v11674_v46 = vld [vmem:[%s16184_s1 + $0x1e8] sm:$0xff]  }
0x258d   :  { %v11334_v13 = vpop.eup %11333 }
0x258e   :  { %v7461_v22 = vmul.f32 %v11334_v13, %v11318_v59  ;;  %v7446_v5 = vrot.slane %v11334_v13, 1  ;;  %v7447_v10 = vrot.slane %v11334_v13, 2  ;;  %v7448_v17 = vrot.slane %v11334_v13, 3  ;;  %v11654_v59 = vld [vmem:[%s16184_s1 + $0x178] sm:$0xff]  }
0x258f   :  { %v7449_v9 = vrot.slane %v11334_v13, 4  ;;  %v7450_v54 = vrot.slane %v11334_v13, 5  ;;  %v7451_v48 = vrot.slane %v11334_v13, 6  ;;  %v7452_v63 = vrot.slane %v11334_v13, 7  ;;  %v11675_v13 = vld [vmem:[%s16184_s1 + $0x1a0] sm:$0xff]  }
0x2590   :  { %v7469_v40 = vpack.c.bf16 %v7461_v22, %v7461_v22  ;;  %7805 = vst [vmem:[%s16185_s8 + $0x5] sm:$0x1] %v7461_v22  ;;  %v7462_v1 = vmul.f32 %v11320_v49, %v7446_v5  ;;  %v15835_v31 = vmul.f32 %v11322_v33, %v7447_v10  ;;  %v15837_v51 = vmul.f32 %v11324_v15, %v7448_v17  ;;  %v11655_v49 = vld [vmem:[%s16184_s1 + $0x130] sm:$0xff]   ;;  %v11658_v15 = vld [vmem:[%s16184_s1 + $0x168] sm:$0xff]   ;;  %v11676_v22 = vld [vmem:[%s16184_s1 + $0x1e0] sm:$0xff]  }
0x2591   :  { %v15839_v62 = vmul.f32 %v11326_v21, %v7449_v9  ;;  %v15841_v57 = vmul.f32 %v11328_v11, %v7450_v54  ;;  %v15843_v52 = vmul.f32 %v11330_v35, %v7451_v48  ;;  %v15845_v24 = vmul.f32 %v11332_v36, %v7452_v63  ;;  %v11656_v33 = vld [vmem:[%s16184_s1 + $0x170] sm:$0xff]   ;;  %v11660_v21 = vld [vmem:[%s16184_s1 + $0x160] sm:$0xff]   ;;  %v11666_v35 = vld [vmem:[%s16184_s1 + $0x148] sm:$0xff]  }
0x2592   :  { %10967 = vmatmul.mubr.bf16.vlgmr.msra.gmra.mxu1 %v7469_v40  ;;  %v7470_v30 = vpack.c.bf16 %v7462_v1, %v7462_v1  ;;  %7806 = vst [vmem:[%s16185_s8 + $0xd] sm:$0x1] %v7462_v1  ;;  %7807 = vst [vmem:[%s16185_s8 + $0x15] sm:$0x1] %v15835_v31  ;;  %v7471_v28 = vpack.c.bf16 %v15835_v31, %v15835_v31  ;;  %v7472_v14 = vpack.c.bf16 %v15837_v51, %v15837_v51  ;;  %v11663_v11 = vld [vmem:[%s16184_s1 + $0x110] sm:$0xff]   ;;  %v11668_v36 = vld [vmem:[%s16184_s1 + $0x140] sm:$0xff]  }
0x2593   :  { %7808 = vst [vmem:[%s16185_s8 + $0x1d] sm:$0x1] %v15837_v51  ;;  %10991 = vmatpush3.bf16.msra.mxu1 %v11637_v2  ;;  %11006 = vmatprep.mubr.msk.bf16.mxu1 %vm11686_vm0, %v16439_v38  ;;  %7809 = vst [vmem:[%s16185_s8 + $0x25] sm:$0x1] %v15839_v62  ;;  %v7473_v39 = vpack.c.bf16 %v15839_v62, %v15839_v62  ;;  %v7474_v61 = vpack.c.bf16 %v15841_v57, %v15841_v57  ;;  %v11677_v5 = vld [vmem:[%s16184_s1 + $0x198] sm:$0xff]   ;;  %v11679_v17 = vld [vmem:[%s16184_s1 + $0x190] sm:$0xff]  }
0x2594   :  { %7810 = vst [vmem:[%s16185_s8 + $0x2d] sm:$0x1] %v15841_v57  ;;  %7811 = vst [vmem:[%s16185_s8 + $0x35] sm:$0x1] %v15843_v52  ;;  %10987 = vmatmul.mubr.bf16.vlgmr.msra.gmra.mxu0 %v7470_v30  ;;  %10992 = vmatprep.subr.bf16.mxu1 %v16439_v38  ;;  %v11678_v10 = vld [vmem:[%s16184_s1 + $0x1d8] sm:$0xff]   ;;  %v11680_v9 = vld [vmem:[%s16184_s1 + $0x1d0] sm:$0xff]   ;;  %v7475_v40 = vpack.c.bf16 %v15843_v52, %v15843_v52  ;;  %v7476_v31 = vpack.c.bf16 %v15845_v24, %v15845_v24 }
0x2595   :  { %7812 = vst [vmem:[%s16185_s8 + $0x3d] sm:$0x1] %v15845_v24  ;;  %11011 = vmatpush3.bf16.msra.mxu0 %v11638_v25  ;;  %11026 = vmatprep.mubr.msk.bf16.mxu0 %vm11686_vm0, %v16439_v38  ;;  %v11681_v54 = vld [vmem:[%s16184_s1 + $0x188] sm:$0xff]   ;;  %v11683_v63 = vld [vmem:[%s16184_s1 + $0x180] sm:$0xff]  }
0x2596   :  { %11012 = vmatprep.subr.bf16.mxu0 %v16439_v38  ;;  %v11682_v48 = vld [vmem:[%s16184_s1 + $0x1c8] sm:$0xff]   ;;  %v11684_v1 = vld [vmem:[%s16184_s1 + $0x1c0] sm:$0xff]  }
0x2597   :  { %10993 = vmatpush3.bf16.msra.mxu1 %v11639_v16 }
0x2598   :  { %10994 = vmatprep.subr.bf16.mxu1 %v16439_v38 }
0x2599   :  { %11013 = vmatpush3.bf16.msra.mxu0 %v11640_v3 }
0x259a   :  { %11014 = vmatprep.subr.bf16.mxu0 %v16439_v38 }
0x259b   :  { %10995 = vmatpush3.bf16.msra.mxu1 %v11641_v8 }
0x259c   :  { %10996 = vmatprep.subr.bf16.mxu1 %v16439_v38 }
0x259d   :  { %11015 = vmatpush3.bf16.msra.mxu0 %v11642_v60 }
0x259e   :  { %11016 = vmatprep.subr.bf16.mxu0 %v16439_v38 }
0x259f   :  { %10997 = vmatpush3.bf16.msra.mxu1 %v11643_v56 }
0x25a0   :  { %10998 = vmatprep.subr.bf16.mxu1 %v16439_v38 }
0x25a1   :  { %11017 = vmatpush3.bf16.msra.mxu0 %v11644_v7 }
0x25a2   :  { %11018 = vmatprep.subr.bf16.mxu0 %v16439_v38 }
0x25a3   :  { %10999 = vmatpush3.bf16.msra.mxu1 %v11645_v20 }
0x25a4   :  { %11000 = vmatprep.subr.bf16.mxu1 %v16439_v38 }
0x25a5   :  { %11019 = vmatpush3.bf16.msra.mxu0 %v11646_v23 }
0x25a6   :  { %11020 = vmatprep.subr.bf16.mxu0 %v16439_v38 }
0x25a7   :  { %11001 = vmatpush3.bf16.msra.mxu1 %v11647_v27 }
0x25a8   :  { %11002 = vmatprep.subr.bf16.mxu1 %v16439_v38 }
0x25a9   :  { %11021 = vmatpush3.bf16.msra.mxu0 %v11648_v18 }
0x25aa   :  { %11022 = vmatprep.subr.bf16.mxu0 %v16439_v38 }
0x25ab   :  { %11003 = vmatpush3.bf16.msra.mxu1 %v11649_v41 }
0x25ac   :  { %11004 = vmatprep.subr.bf16.mxu1 %v16439_v38 }
0x25ad   :  { %11023 = vmatpush3.bf16.msra.mxu0 %v11650_v42 }
0x25ae   :  { %11024 = vmatprep.subr.bf16.mxu0 %v16439_v38 }
0x25af   :  { %11005 = vmatpush3.bf16.msra.mxu1 %v11651_v45 }
0x25b0   :  { %11030 = vmatprep.subr.bf16.mxu1 %v16439_v38 }
0x25b1   :  { %11025 = vmatpush3.bf16.msra.mxu0 %v11652_v43 }
0x25b2   :  { %11007 = vmatmul.mubr.bf16.vlgmr.msra.gmra.mxu1 %v7471_v28  ;;  %11050 = vmatprep.subr.bf16.mxu0 %v16439_v38 }
0x25b3   :  { %11031 = vmatpush3.bf16.msra.mxu1 %v11653_v12  ;;  %11046 = vmatprep.mubr.msk.bf16.mxu1 %vm11686_vm0, %v16439_v38 }
0x25b4   :  { %11027 = vmatmul.mubr.bf16.vlgmr.msra.gmra.mxu0 %v7472_v14  ;;  %11032 = vmatprep.subr.bf16.mxu1 %v16439_v38 }
0x25b5   :  { %11051 = vmatpush3.bf16.msra.mxu0 %v11654_v59  ;;  %11066 = vmatprep.mubr.msk.bf16.mxu0 %vm11686_vm0, %v16439_v38 }
0x25b6   :  { %11052 = vmatprep.subr.bf16.mxu0 %v16439_v38 }
0x25b7   :  { %11033 = vmatpush3.bf16.msra.mxu1 %v11655_v49 }
0x25b8   :  { %11034 = vmatprep.subr.bf16.mxu1 %v16439_v38 }
0x25b9   :  { %11053 = vmatpush3.bf16.msra.mxu0 %v11656_v33 }
0x25ba   :  { %11054 = vmatprep.subr.bf16.mxu0 %v16439_v38 }
0x25bb   :  { %11035 = vmatpush3.bf16.msra.mxu1 %v11657_v58 }
0x25bc   :  { %11036 = vmatprep.subr.bf16.mxu1 %v16439_v38 }
0x25bd   :  { %11055 = vmatpush3.bf16.msra.mxu0 %v11658_v15 }
0x25be   :  { %11056 = vmatprep.subr.bf16.mxu0 %v16439_v38 }
0x25bf   :  { %11037 = vmatpush3.bf16.msra.mxu1 %v11659_v0 }
0x25c0   :  { %11038 = vmatprep.subr.bf16.mxu1 %v16439_v38 }
0x25c1   :  { %11057 = vmatpush3.bf16.msra.mxu0 %v11660_v21 }
0x25c2   :  { %11058 = vmatprep.subr.bf16.mxu0 %v16439_v38 }
0x25c3   :  { %11039 = vmatpush3.bf16.msra.mxu1 %v11661_v29 }
0x25c4   :  { %11040 = vmatprep.subr.bf16.mxu1 %v16439_v38 }
0x25c5   :  { %11059 = vmatpush3.bf16.msra.mxu0 %v11662_v6 }
0x25c6   :  { %11060 = vmatprep.subr.bf16.mxu0 %v16439_v38 }
0x25c7   :  { %11041 = vmatpush3.bf16.msra.mxu1 %v11663_v11 }
0x25c8   :  { %11042 = vmatprep.subr.bf16.mxu1 %v16439_v38 }
0x25c9   :  { %11061 = vmatpush3.bf16.msra.mxu0 %v11664_v4 }
0x25ca   :  { %11062 = vmatprep.subr.bf16.mxu0 %v16439_v38 }
0x25cb   :  { %11043 = vmatpush3.bf16.msra.mxu1 %v11665_v55 }
0x25cc   :  { %11044 = vmatprep.subr.bf16.mxu1 %v16439_v38 }
0x25cd   :  { %11063 = vmatpush3.bf16.msra.mxu0 %v11666_v35 }
0x25ce   :  { %11064 = vmatprep.subr.bf16.mxu0 %v16439_v38 }
0x25cf   :  { %11045 = vmatpush3.bf16.msra.mxu1 %v11667_v32 }
0x25d0   :  { %11070 = vmatprep.subr.bf16.mxu1 %v16439_v38 }
0x25d1   :  { %11065 = vmatpush3.bf16.msra.mxu0 %v11668_v36 }
0x25d2   :  { %11047 = vmatmul.mubr.bf16.vlgmr.msra.gmra.mxu1 %v7473_v39  ;;  %11090 = vmatprep.subr.bf16.mxu0 %v16439_v38 }
0x25d3   :  { %11071 = vmatpush3.bf16.msra.mxu1 %v11669_v26  ;;  %11086 = vmatprep.mubr.msk.bf16.mxu1 %vm11686_vm0, %v16439_v38 }
0x25d4   :  { %11067 = vmatmul.mubr.bf16.vlgmr.msra.gmra.mxu0 %v7474_v61  ;;  %11072 = vmatprep.subr.bf16.mxu1 %v16439_v38 }
0x25d5   :  { %11091 = vmatpush3.bf16.msra.mxu0 %v11670_v34  ;;  %11106 = vmatprep.mubr.msk.bf16.mxu0 %vm11686_vm0, %v16439_v38  ;;  %vm7952_vm0 = vsmask.f32 7946 }
0x25d6   :  { %11092 = vmatprep.subr.bf16.mxu0 %v16439_v38 }
0x25d7   :  { %11073 = vmatpush3.bf16.msra.mxu1 %v11671_v19 }
0x25d8   :  { %11074 = vmatprep.subr.bf16.mxu1 %v16439_v38 }
0x25d9   :  { %11093 = vmatpush3.bf16.msra.mxu0 %v11672_v37 }
0x25da   :  { %11094 = vmatprep.subr.bf16.mxu0 %v16439_v38 }
0x25db   :  { %11075 = vmatpush3.bf16.msra.mxu1 %v11673_v47 }
0x25dc   :  { %11076 = vmatprep.subr.bf16.mxu1 %v16439_v38 }
0x25dd   :  { %11095 = vmatpush3.bf16.msra.mxu0 %v11674_v46 }
0x25de   :  { %11096 = vmatprep.subr.bf16.mxu0 %v16439_v38 }
0x25df   :  { %11077 = vmatpush3.bf16.msra.mxu1 %v11675_v13 }
0x25e0   :  { %11078 = vmatprep.subr.bf16.mxu1 %v16439_v38 }
0x25e1   :  { %11097 = vmatpush3.bf16.msra.mxu0 %v11676_v22 }
0x25e2   :  { %11098 = vmatprep.subr.bf16.mxu0 %v16439_v38 }
0x25e3   :  { %11079 = vmatpush3.bf16.msra.mxu1 %v11677_v5 }
0x25e4   :  { %11080 = vmatprep.subr.bf16.mxu1 %v16439_v38 }
0x25e5   :  { %11099 = vmatpush3.bf16.msra.mxu0 %v11678_v10 }
0x25e6   :  { %11100 = vmatprep.subr.bf16.mxu0 %v16439_v38 }
0x25e7   :  { %11081 = vmatpush3.bf16.msra.mxu1 %v11679_v17 }
0x25e8   :  { %11082 = vmatprep.subr.bf16.mxu1 %v16439_v38 }
0x25e9   :  { %11101 = vmatpush3.bf16.msra.mxu0 %v11680_v9 }
0x25ea   :  { %11102 = vmatprep.subr.bf16.mxu0 %v16439_v38 }
0x25eb   :  { %11083 = vmatpush3.bf16.msra.mxu1 %v11681_v54 }
0x25ec   :  { %11084 = vmatprep.subr.bf16.mxu1 %v16439_v38 }
0x25ed   :  { %11103 = vmatpush3.bf16.msra.mxu0 %v11682_v48 }
0x25ee   :  { %11104 = vmatprep.subr.bf16.mxu0 %v16439_v38 }
0x25ef   :  { %11085 = vmatpush3.bf16.msra.mxu1 %v11683_v63 }
0x25f1   :  { %11105 = vmatpush3.bf16.msra.mxu0 %v11684_v1 }
0x25f2   :  { %11087 = vmatmul.mubr.bf16.vlgmr.msra.gmra.mxu1 %v7475_v40 }
0x25f4   :  { %11107 = vmatmul.mubr.bf16.vlgmr.msra.gmra.mxu0 %v7476_v31 }
0x2652   :  { %v7511_v51 = vpop.f32.mrf.mxu1 }
0x2653   :  { %v7797_v57 = vpack.c.bf16 %v7511_v51, %v7511_v51 }
0x2654   :  { %v10968_v38 = vpop.f32.mrf.mxu1  ;;  %v7551_v62 = vpop.f32.mrf.mxu0 }
0x2655   :  { %v7798_v30 = vpack.c.bf16 %v7551_v62, %v7551_v62  ;;  %v7821_v8 = vunpack.c.l.b16 %v7797_v57 }
0x2656   :  { %v7514_v2 = vpop.f32.mrf.mxu1  ;;  %v10988_v25 = vpop.f32.mrf.mxu0 }
0x2657   :  { %v7822_v16 = vunpack.c.l.b16 %v7798_v30 }
0x2658   :  { %v10969_v3 = vpop.f32.mrf.mxu1  ;;  %v7554_v52 = vpop.f32.mrf.mxu0 }
0x2659   :  { %v7829_v60 = vrot.slane %v7822_v16, 7 }
0x265a   :  { %v10989_v56 = vpop.f32.mrf.mxu0 }
0x265b   :  { %v7830_v7 = vsel %vm1389_vm4, %v7829_v60, %v7821_v8  ;;  %vm16101_vm4 = vmand %vm6771_vm14, %vm7952_vm0 }
0x2672   :  { %v7591_v20 = vpop.f32.mrf.mxu1 }
0x2673   :  { %v7799_v15 = vpack.c.bf16 %v7591_v20, %v7591_v20 }
0x2674   :  { %v11008_v23 = vpop.f32.mrf.mxu1  ;;  %v7631_v27 = vpop.f32.mrf.mxu0 }
0x2675   :  { %v7800_v0 = vpack.c.bf16 %v7631_v27, %v7631_v27  ;;  %v7823_v21 = vunpack.c.l.b16 %v7799_v15  ;;  %v7960_v15 = vld [vmem:[%s16186_s9 + $0x8] sm:$0x4] }
0x2676   :  { %v7594_v24 = vpop.f32.mrf.mxu1  ;;  %v11028_v18 = vpop.f32.mrf.mxu0 }
0x2677   :  { %v7824_v6 = vunpack.c.l.b16 %v7800_v0  ;;  %v7831_v4 = vrot.slane %v7823_v21, 6  ;;  %v7966_v0 = vld [vmem:[%s16186_s9 + $0x10] sm:$0x4] }
0x2678   :  { %v11009_v41 = vpop.f32.mrf.mxu1  ;;  %v7634_v42 = vpop.f32.mrf.mxu0 }
0x2679   :  { %v7833_v35 = vrot.slane %v7824_v6, 5  ;;  %v7832_v39 = vsel %vm1392_vm5, %v7831_v4, %v7830_v7  ;;  %v7954_v42 = vld [vmem:[%s16186_s9] sm:$0x4]  ;;  %v7963_v6 = vld [vmem:[%s16186_s9 + $0xc] sm:$0x4] }
0x267a   :  { %v11029_v45 = vpop.f32.mrf.mxu0  ;;  %v7969_v4 = vld [vmem:[%s16186_s9 + $0x14] sm:$0x4] }
0x267b   :  { %v7834_v34 = vsel %vm1395_vm6, %v7833_v35, %v7832_v39 }
0x2692   :  { %v7671_v28 = vpop.f32.mrf.mxu1 }
0x2693   :  { %v7801_v29 = vpack.c.bf16 %v7671_v28, %v7671_v28 }
0x2694   :  { %v11048_v43 = vpop.f32.mrf.mxu1  ;;  %v7711_v14 = vpop.f32.mrf.mxu0 }
0x2695   :  { %v7802_v11 = vpack.c.bf16 %v7711_v14, %v7711_v14  ;;  %v7825_v55 = vunpack.c.l.b16 %v7801_v29 }
0x2696   :  { %v7674_v12 = vpop.f32.mrf.mxu1  ;;  %v11068_v59 = vpop.f32.mrf.mxu0 }
0x2697   :  { %v7826_v32 = vunpack.c.l.b16 %v7802_v11  ;;  %v7835_v36 = vrot.slane %v7825_v55, 4  ;;  %v7972_v55 = vld [vmem:[%s16186_s9 + $0x18] sm:$0x4] }
0x2698   :  { %v11049_v49 = vpop.f32.mrf.mxu1  ;;  %v7714_v33 = vpop.f32.mrf.mxu0 }
0x2699   :  { %v7837_v19 = vrot.slane %v7826_v32, 3  ;;  %v7836_v46 = vsel %vm1398_vm7, %v7835_v36, %v7834_v34  ;;  %v7975_v36 = vld [vmem:[%s16186_s9 + $0x1c] sm:$0x4] }
0x269a   :  { %v11069_v58 = vpop.f32.mrf.mxu0 }
0x269b   :  { %v7838_v54 = vsel %vm1401_vm8, %v7837_v19, %v7836_v46  ;;  %v7957_v58 = vld [vmem:[%s16186_s9 + $0x4] sm:$0x4] }
0x26b2   :  { %v7751_v61 = vpop.f32.mrf.mxu1 }
0x26b3   :  { %v7803_v26 = vpack.c.bf16 %v7751_v61, %v7751_v61 }
0x26b4   :  { %v11088_v37 = vpop.f32.mrf.mxu1  ;;  %v7791_v47 = vpop.f32.mrf.mxu0 }
0x26b5   :  { %v7827_v13 = vunpack.c.l.b16 %v7803_v26  ;;  %v7804_v22 = vpack.c.bf16 %v7791_v47, %v7791_v47 }
0x26b6   :  { %v7754_v5 = vpop.f32.mrf.mxu1  ;;  %v11108_v10 = vpop.f32.mrf.mxu0 }
0x26b7   :  { %v7839_v17 = vrot.slane %v7827_v13, 2  ;;  %v7828_v9 = vunpack.c.l.b16 %v7804_v22 }
0x26b8   :  { %v11089_v48 = vpop.f32.mrf.mxu1  ;;  %v7794_v63 = vpop.f32.mrf.mxu0 }
0x26b9   :  { %v7840_v40 = vsel %vm1404_vm9, %v7839_v17, %v7838_v54  ;;  %v7841_v1 = vrot.slane %v7828_v9, 1 }
0x26ba   :  { %v11109_v31 = vpop.f32.mrf.mxu0 }
0x26bb   :  { %v7842_v51 = vsel %vm1407_vm10, %v7841_v1, %v7840_v40 }
0x26bc   :  { %v7843_v38 = vpack.c.b16 %v7842_v51, %v7842_v51 }
0x26be   :  { %v7846_v62 = vsel %vm295_vm2, %v7843_v38, %v15598_v44 }
0x26bf   :  { %v7854_v57 = vrot.slane %v7846_v62, %v16465_v50 }
0x26c1   :  { %v7855_v30 = vcombine.high %v7854_v57, %v7854_v57  ;;  %v7862_v2 = vrot.slane %v7854_v57, %v16465_v50 }
0x26c3   :  { %v7869_v25 = vrot.slane %v7855_v30, %v16465_v50  ;;  %v7870_v16 = vcombine.high %v7862_v2, %v7862_v2  ;;  %v7873_v3 = vunpack.i.h.s16 %v7862_v2  ;;  %v8172_v52 = vpack.i.b16 %v7862_v2, %v7862_v2 }
0x26c5   :  { %v7871_v8 = vcombine.high %v7869_v25, %v7869_v25  ;;  %v7875_v60 = vunpack.i.h.s16 %v7869_v25  ;;  %v7877_v56 = vunpack.i.h.s16 %v7870_v16  ;;  %v7881_v7 = vpack.i.b16 %v7873_v3, %v7873_v3 }
0x26c6   :  { %v8173_v44 = vpack.i.b16 %v7869_v25, %v7869_v25  ;;  %v8174_v23 = vpack.i.b16 %v7870_v16, %v7870_v16  ;;  %v7894_v27 = vrot.slane %v8172_v52, %v12844_v53 }
0x26c7   :  { %v7879_v24 = vunpack.i.h.s16 %v7871_v8  ;;  %v7883_v18 = vpack.i.b16 %v7875_v60, %v7875_v60  ;;  %v7885_v41 = vpack.i.b16 %v7877_v56, %v7877_v56  ;;  %v8175_v50 = vpack.i.b16 %v7871_v8, %v7871_v8 }
0x26c8   :  { %v7901_v45 = vrot.slane %v7881_v7, %v12844_v53  ;;  %v7908_v28 = vrot.slane %v8173_v44, %v12844_v53  ;;  %v7922_v43 = vrot.slane %v8174_v23, %v12844_v53  ;;  %v7955_v14 = vsel %vm16101_vm4, %v7894_v27, %v7954_v42 }
0x26c9   :  { %v7887_v12 = vpack.i.b16 %v7879_v24, %v7879_v24  ;;  %v7915_v59 = vrot.slane %v7883_v18, %v12844_v53  ;;  %v7929_v49 = vrot.slane %v7885_v41, %v12844_v53  ;;  %v7936_v33 = vrot.slane %v8175_v50, %v12844_v53  ;;  %7956 = vst [vmem:[%s16186_s9] sm:$0x4] %v7955_v14 }
0x26ca   :  { %v7958_v21 = vsel %vm16101_vm4, %v7901_v45, %v7957_v58  ;;  %v7961_v29 = vsel %vm16101_vm4, %v7908_v28, %v7960_v15  ;;  %v7967_v11 = vsel %vm16101_vm4, %v7922_v43, %v7966_v0 }
0x26cb   :  { %v7943_v35 = vrot.slane %v7887_v12, %v12844_v53  ;;  %7959 = vst [vmem:[%s16186_s9 + $0x4] sm:$0x4] %v7958_v21  ;;  %7962 = vst [vmem:[%s16186_s9 + $0x8] sm:$0x4] %v7961_v29  ;;  %v7964_v32 = vsel %vm16101_vm4, %v7915_v59, %v7963_v6  ;;  %v7970_v39 = vsel %vm16101_vm4, %v7929_v49, %v7969_v4 }
0x26cc   :  { %7968 = vst [vmem:[%s16186_s9 + $0x10] sm:$0x4] %v7967_v11  ;;  %v7973_v53 = vsel %vm16101_vm4, %v7936_v33, %v7972_v55  ;;  %7965 = vst [vmem:[%s16186_s9 + $0xc] sm:$0x4] %v7964_v32 }
0x26cd   :  { %7971 = vst [vmem:[%s16186_s9 + $0x14] sm:$0x4] %v7970_v39  ;;  %7974 = vst [vmem:[%s16186_s9 + $0x18] sm:$0x4] %v7973_v53  ;;  %v7976_v61 = vsel %vm16101_vm4, %v7943_v35, %v7975_v36 }
0x26ce   :  { %7977 = vst [vmem:[%s16186_s9 + $0x1c] sm:$0x4] %v7976_v61 }

</bundles_post_ra>
